<compile_context>
chip_gen: v7x
topology: tpu7x:2x2x1
jax: 0.10.0
libtpu: 0.0.40
codegen_flags: <defaults>
</compile_context>

<pallas_src>
import jax
import jax.numpy as jnp
from jax.experimental import pallas as pl
from jax.experimental.pallas import tpu as pltpu

# ---- small, TPU-friendly config (scaled-down stand-in for 768-dim Longformer) ----
BATCH = 2
SEQ = 128
HIDDEN = 128
NUM_HEADS = 4
HEAD_DIM = HIDDEN // NUM_HEADS
INTERMEDIATE = 256
NUM_LAYERS = 2
VOCAB = 1000
TYPE_VOCAB = 2
MAX_POS = 512
NUM_CLASSES = 9
CLS_PAD = 128        # classifier output padded to lane width; sliced back to NUM_CLASSES
LN_EPS = 1e-12


def _softmax_dtype():
    # bf16 VPU/EUP exist on v6e/v7x -> roughly halves the (S,S) softmax VALU/EUP cost there.
    # v5e (and anything unrecognized) keeps the f32 path.
    try:
        kind = jax.devices()[0].device_kind.lower()
    except Exception:
        return jnp.float32
    return jnp.bfloat16 if ("v6" in kind or "v7" in kind) else jnp.float32


SOFTMAX_DTYPE = _softmax_dtype()


def _layernorm(x, g, b, eps=LN_EPS):
    mu = jnp.mean(x, axis=-1, keepdims=True)
    var = jnp.mean((x - mu) ** 2, axis=-1, keepdims=True)
    return (x - mu) * jax.lax.rsqrt(var + eps) * g + b


# ---------------------------------------------------------------------------
# One encoder layer, computed for the first `q_rows` query rows.
# K/V always use all SEQ rows of x; everything after the QKV projection runs at M=q_rows,
# so the last layer (which only feeds the CLS classifier) passes q_rows=1.
# All values live in VMEM / vregs; matmul weights are bf16, accumulation is f32.
# ---------------------------------------------------------------------------
def _layer_core(x, add_mask, wqkv, bqkv, wo, bo, ln1_g, ln1_b,
                w_ff1, b_ff1, w_ff2, b_ff2, ln2_g, ln2_b,
                *, q_rows, score_dtype):
    # fused QKV projection (1/sqrt(head_dim) already folded into the Q columns of wqkv)
    qkv = jnp.dot(x.astype(jnp.bfloat16), wqkv,
                  preferred_element_type=jnp.float32) + bqkv          # (S, 3H) f32

    # transpose K once per layer (one (S,H) XLU transpose) instead of 4 per-head ones
    k_t = qkv[:, HIDDEN:2 * HIDDEN].T.astype(jnp.bfloat16)            # (H, S)
    v_all = qkv[:, 2 * HIDDEN:].astype(jnp.bfloat16)                  # (S, H)
    q_all = qkv[:q_rows, :HIDDEN].astype(jnp.bfloat16)                # (q, H)

    # hoist the additive-mask broadcast out of the unrolled head loop (no per-head bcast)
    mask_b = jnp.broadcast_to(add_mask.astype(score_dtype), (q_rows, SEQ))

    ctx_heads = []
    for h in range(NUM_HEADS):                                        # static unrolled heads
        lo = h * HEAD_DIM
        s = jnp.dot(q_all[:, lo:lo + HEAD_DIM], k_t[lo:lo + HEAD_DIM, :],
                    preferred_element_type=jnp.float32)               # (q, S) f32 from MXU
        s = s.astype(score_dtype) + mask_b
        # max-subtraction keeps fully-masked rows finite (uniform probs, not 0/0 -> inf)
        p = jnp.exp(s - jnp.max(s, axis=-1, keepdims=True))
        inv = pl.reciprocal(jnp.sum(p.astype(jnp.float32), axis=-1, keepdims=True),
                            approx=True)                              # EUP slot, f32 denom
        pv = jnp.dot(p.astype(jnp.bfloat16), v_all[:, lo:lo + HEAD_DIM],
                     preferred_element_type=jnp.float32)              # (q, d) f32
        ctx_heads.append(pv * inv)      # normalize after P·V: (q,d) multiply, not (q,S)
    ctx = jnp.concatenate(ctx_heads, axis=-1)                         # (q, H) lane-dense

    attn = jnp.dot(ctx.astype(jnp.bfloat16), wo,
                   preferred_element_type=jnp.float32) + bo
    x1 = _layernorm(attn + x[:q_rows, :], ln1_g, ln1_b)

    ff = jax.nn.gelu(jnp.dot(x1.astype(jnp.bfloat16), w_ff1,
                             preferred_element_type=jnp.float32) + b_ff1)
    ff2 = jnp.dot(ff.astype(jnp.bfloat16), w_ff2,
                  preferred_element_type=jnp.float32) + b_ff2
    return _layernorm(ff2 + x1, ln2_g, ln2_b)


# ---------------------------------------------------------------------------
# The single fused kernel: grid = (B, L), x resident in a VMEM scratch across L.
#   l == 0         : embedding LayerNorm into the scratch
#   l <  L-1       : full layer, scratch -> scratch
#   l == L-1       : CLS-row-only layer + pre_classifier/ReLU/classifier -> logits out
# ---------------------------------------------------------------------------
def _encoder_cls_kernel(
        emb_ref, mask_ref, emb_g_ref, emb_b_ref,
        wqkv_ref, bqkv_ref, wo_ref, bo_ref, ln1_g_ref, ln1_b_ref,
        wff1_ref, bff1_ref, wff2_ref, bff2_ref, ln2_g_ref, ln2_b_ref,
        wpre_ref, bpre_ref, wcls_ref, bcls_ref,
        logits_ref, x_sc):
    l = pl.program_id(1)
    n_layers = pl.num_programs(1)

    @pl.when(l == 0)
    def _():
        # embedding LayerNorm folded into the first fused-layer grid step
        x_sc[...] = _layernorm(emb_ref[0], emb_g_ref[...], emb_b_ref[...])

    add_mask = mask_ref[0]                                            # (1, S) additive, f32
    layer_w = (wqkv_ref[0], bqkv_ref[0], wo_ref[0], bo_ref[0],
               ln1_g_ref[0], ln1_b_ref[0], wff1_ref[0], bff1_ref[0],
               wff2_ref[0], bff2_ref[0], ln2_g_ref[0], ln2_b_ref[0])

    @pl.when(l < n_layers - 1)
    def _():
        x_sc[...] = _layer_core(x_sc[...], add_mask, *layer_w,
                                q_rows=SEQ, score_dtype=SOFTMAX_DTYPE)

    @pl.when(l == n_layers - 1)
    def _():
        cls = _layer_core(x_sc[...], add_mask, *layer_w,
                          q_rows=1, score_dtype=jnp.float32)          # (1, H) CLS row only
        h = jnp.dot(cls.astype(jnp.bfloat16), wpre_ref[...],
                    preferred_element_type=jnp.float32) + bpre_ref[...]
        h = jnp.maximum(h, 0.0)                                       # ReLU
        # Dropout(p=0.3) is an identity at inference time.
        logits = jnp.dot(h.astype(jnp.bfloat16), wcls_ref[...],
                         preferred_element_type=jnp.float32) + bcls_ref[...]
        logits_ref[0] = logits.astype(logits_ref.dtype)               # (1, CLS_PAD)


# ---------------------------------------------------------------------------
# BlockSpecs
# ---------------------------------------------------------------------------
def _per_layer_spec(block_shape):
    nd = len(block_shape)
    return pl.BlockSpec(block_shape, lambda b, l, _nd=nd: (l,) + (0,) * (_nd - 1))


def _const_spec(shape):
    nd = len(shape)
    return pl.BlockSpec(shape, lambda b, l, _nd=nd: (0,) * _nd)


def _encoder_in_specs():
    return [
        pl.BlockSpec((1, SEQ, HIDDEN), lambda b, l: (b, 0, 0)),       # embeddings (pre-LN)
        pl.BlockSpec((1, 1, SEQ), lambda b, l: (b, 0, 0)),            # additive mask
        _const_spec((1, HIDDEN)), _const_spec((1, HIDDEN)),           # embedding LN g/b
        _per_layer_spec((1, HIDDEN, 3 * HIDDEN)),                     # wqkv (stacked over L)
        _per_layer_spec((1, 1, 3 * HIDDEN)),                          # bqkv
        _per_layer_spec((1, HIDDEN, HIDDEN)),                         # wo
        _per_layer_spec((1, 1, HIDDEN)),                              # bo
        _per_layer_spec((1, 1, HIDDEN)), _per_layer_spec((1, 1, HIDDEN)),   # ln1 g/b
        _per_layer_spec((1, HIDDEN, INTERMEDIATE)),                   # w_ff1
        _per_layer_spec((1, 1, INTERMEDIATE)),                        # b_ff1
        _per_layer_spec((1, INTERMEDIATE, HIDDEN)),                   # w_ff2
        _per_layer_spec((1, 1, HIDDEN)),                              # b_ff2
        _per_layer_spec((1, 1, HIDDEN)), _per_layer_spec((1, 1, HIDDEN)),   # ln2 g/b
        _const_spec((HIDDEN, HIDDEN)), _const_spec((1, HIDDEN)),      # pre_classifier w/b
        _const_spec((HIDDEN, CLS_PAD)), _const_spec((1, CLS_PAD)),    # classifier w/b (padded)
    ]


# ---------------------------------------------------------------------------
# Parameters (deterministic synthetic init).
# Per-layer weights are stacked along a leading L axis; MXU weights in bf16,
# biases / LN params / embeddings in f32.
# ---------------------------------------------------------------------------
def init_params(seed=0):
    key = jax.random.PRNGKey(seed)
    ks = iter(jax.random.split(key, 8 * NUM_LAYERS + 8))

    def w(shape, scale=0.02):
        return (scale * jax.random.normal(next(ks), shape)).astype(jnp.float32)

    q_scale = 1.0 / (HEAD_DIM ** 0.5)

    per_layer = {k: [] for k in (
        "wqkv", "bqkv", "wo", "bo", "ln1_g", "ln1_b",
        "w_ff1", "b_ff1", "w_ff2", "b_ff2", "ln2_g", "ln2_b")}
    for _ in range(NUM_LAYERS):
        wq, wk, wv = w((HIDDEN, HIDDEN)), w((HIDDEN, HIDDEN)), w((HIDDEN, HIDDEN))
        # fold 1/sqrt(head_dim) into the Q projection -> no (S,S) scale multiply in-kernel
        per_layer["wqkv"].append(
            jnp.concatenate([wq * q_scale, wk, wv], axis=1).astype(jnp.bfloat16))
        per_layer["bqkv"].append(jnp.zeros((1, 3 * HIDDEN), jnp.float32))
        per_layer["wo"].append(w((HIDDEN, HIDDEN)).astype(jnp.bfloat16))
        per_layer["bo"].append(jnp.zeros((1, HIDDEN), jnp.float32))
        per_layer["ln1_g"].append(jnp.ones((1, HIDDEN), jnp.float32))
        per_layer["ln1_b"].append(jnp.zeros((1, HIDDEN), jnp.float32))
        per_layer["w_ff1"].append(w((HIDDEN, INTERMEDIATE)).astype(jnp.bfloat16))
        per_layer["b_ff1"].append(jnp.zeros((1, INTERMEDIATE), jnp.float32))
        per_layer["w_ff2"].append(w((INTERMEDIATE, HIDDEN)).astype(jnp.bfloat16))
        per_layer["b_ff2"].append(jnp.zeros((1, HIDDEN), jnp.float32))
        per_layer["ln2_g"].append(jnp.ones((1, HIDDEN), jnp.float32))
        per_layer["ln2_b"].append(jnp.zeros((1, HIDDEN), jnp.float32))

    p = {k: jnp.stack(v, axis=0) for k, v in per_layer.items()}       # (L, ...) stacks

    p.update({
        "word_emb": w((VOCAB, HIDDEN)),
        "pos_emb": w((MAX_POS, HIDDEN)),
        "type_emb": w((TYPE_VOCAB, HIDDEN)),
        "emb_ln_g": jnp.ones((1, HIDDEN), jnp.float32),
        "emb_ln_b": jnp.zeros((1, HIDDEN), jnp.float32),
        "w_pre": w((HIDDEN, HIDDEN)).astype(jnp.bfloat16),
        "b_pre": jnp.zeros((1, HIDDEN), jnp.float32),
        "b_cls_pad": jnp.zeros((1, CLS_PAD), jnp.float32),
    })
    w_cls = w((HIDDEN, NUM_CLASSES))
    p["w_cls_pad"] = jnp.pad(
        w_cls, ((0, 0), (0, CLS_PAD - NUM_CLASSES))).astype(jnp.bfloat16)
    return p


# ---------------------------------------------------------------------------
# Forward pass: embedding gathers in plain JAX, everything else in ONE pallas_call.
# ---------------------------------------------------------------------------
def longformer_class_forward(params, input_ids, attention_mask, token_type_ids):
    b, s = input_ids.shape

    # embeddings (table gathers are plain-JAX glue; the LN runs inside the kernel at l==0)
    emb = (params["word_emb"][input_ids]
           + params["pos_emb"][:s][None, :, :]
           + params["type_emb"][token_type_ids])                      # (B, S, H) f32
    # additive attention mask: 0 where attended, -1e9 where padded
    add_mask = ((1.0 - attention_mask.astype(jnp.float32)) * -1e9).reshape(b, 1, s)

    logits_pad = pl.pallas_call(
        _encoder_cls_kernel,
        out_shape=jax.ShapeDtypeStruct((b, 1, CLS_PAD), jnp.float32),
        grid=(b, NUM_LAYERS),
        in_specs=_encoder_in_specs(),
        out_specs=pl.BlockSpec((1, 1, CLS_PAD), lambda bb, ll: (bb, 0, 0)),
        scratch_shapes=[pltpu.VMEM((SEQ, HIDDEN), jnp.float32)],      # layer-resident x
        compiler_params=pltpu.CompilerParams(
            dimension_semantics=("parallel", "arbitrary")),
    )(emb, add_mask, params["emb_ln_g"], params["emb_ln_b"],
      params["wqkv"], params["bqkv"], params["wo"], params["bo"],
      params["ln1_g"], params["ln1_b"], params["w_ff1"], params["b_ff1"],
      params["w_ff2"], params["b_ff2"], params["ln2_g"], params["ln2_b"],
      params["w_pre"], params["b_pre"], params["w_cls_pad"], params["b_cls_pad"])

    return logits_pad[:, 0, :NUM_CLASSES]                             # (B, 9)


if __name__ == "__main__":
    params = init_params(seed=0)

    key = jax.random.PRNGKey(0)
    k_ids, _ = jax.random.split(key)
    input_ids = jax.random.randint(k_ids, (BATCH, SEQ), 0, VOCAB, dtype=jnp.int32)
    # last quarter of every sequence is padding
    attention_mask = jnp.concatenate(
        [jnp.ones((BATCH, 3 * SEQ // 4), jnp.int32),
         jnp.zeros((BATCH, SEQ // 4), jnp.int32)], axis=1)
    token_type_ids = jnp.zeros((BATCH, SEQ), jnp.int32)

    forward = jax.jit(longformer_class_forward)
    logits = jax.block_until_ready(
        forward(params, input_ids, attention_mask, token_type_ids))
    assert logits.shape == (BATCH, NUM_CLASSES)
    assert bool(jnp.all(jnp.isfinite(logits)))
    print("KERNEL_OK")
</pallas_src>

<mosaic_0001>
module attributes {stable_mosaic.version = 11 : i64} {
  func.func @_encoder_cls_kernel(%arg0: i32, %arg1: i32, %arg2: memref<1x128x128xf32, #tpu.memory_space<vmem>>, %arg3: memref<1x1x128xf32, #tpu.memory_space<vmem>>, %arg4: memref<1x128xf32, #tpu.memory_space<vmem>>, %arg5: memref<1x128xf32, #tpu.memory_space<vmem>>, %arg6: memref<1x128x384xbf16, #tpu.memory_space<vmem>>, %arg7: memref<1x1x384xf32, #tpu.memory_space<vmem>>, %arg8: memref<1x128x128xbf16, #tpu.memory_space<vmem>>, %arg9: memref<1x1x128xf32, #tpu.memory_space<vmem>>, %arg10: memref<1x1x128xf32, #tpu.memory_space<vmem>>, %arg11: memref<1x1x128xf32, #tpu.memory_space<vmem>>, %arg12: memref<1x128x256xbf16, #tpu.memory_space<vmem>>, %arg13: memref<1x1x256xf32, #tpu.memory_space<vmem>>, %arg14: memref<1x256x128xbf16, #tpu.memory_space<vmem>>, %arg15: memref<1x1x128xf32, #tpu.memory_space<vmem>>, %arg16: memref<1x1x128xf32, #tpu.memory_space<vmem>>, %arg17: memref<1x1x128xf32, #tpu.memory_space<vmem>>, %arg18: memref<128x128xbf16, #tpu.memory_space<vmem>>, %arg19: memref<1x128xf32, #tpu.memory_space<vmem>>, %arg20: memref<128x128xbf16, #tpu.memory_space<vmem>>, %arg21: memref<1x128xf32, #tpu.memory_space<vmem>>, %arg22: memref<1x1x128xf32, #tpu.memory_space<vmem>>, %arg23: memref<128x128xf32, #tpu.memory_space<vmem>>) attributes {dimension_semantics = [#tpu.dimension_semantics<parallel>, #tpu.dimension_semantics<arbitrary>], iteration_bounds = array<i64: 2, 2>, scalar_prefetch = 0 : i64, scratch_operands = 1 : i64, tpu.core_type = #tpu.core_type<tc>, window_params = [{transform_indices = @transform_0, window_bounds = array<i64: 1, 128, 128>}, {transform_indices = @transform_1, window_bounds = array<i64: 1, 1, 128>}, {pipeline_mode = #tpu.pipeline_mode<synchronous>, transform_indices = @transform_2, window_bounds = array<i64: 1, 128>}, {pipeline_mode = #tpu.pipeline_mode<synchronous>, transform_indices = @transform_3, window_bounds = array<i64: 1, 128>}, {transform_indices = @transform_4, window_bounds = array<i64: 1, 128, 384>}, {transform_indices = @transform_5, window_bounds = array<i64: 1, 1, 384>}, {transform_indices = @transform_6, window_bounds = array<i64: 1, 128, 128>}, {transform_indices = @transform_7, window_bounds = array<i64: 1, 1, 128>}, {transform_indices = @transform_8, window_bounds = array<i64: 1, 1, 128>}, {transform_indices = @transform_9, window_bounds = array<i64: 1, 1, 128>}, {transform_indices = @transform_10, window_bounds = array<i64: 1, 128, 256>}, {transform_indices = @transform_11, window_bounds = array<i64: 1, 1, 256>}, {transform_indices = @transform_12, window_bounds = array<i64: 1, 256, 128>}, {transform_indices = @transform_13, window_bounds = array<i64: 1, 1, 128>}, {transform_indices = @transform_14, window_bounds = array<i64: 1, 1, 128>}, {transform_indices = @transform_15, window_bounds = array<i64: 1, 1, 128>}, {pipeline_mode = #tpu.pipeline_mode<synchronous>, transform_indices = @transform_16, window_bounds = array<i64: 128, 128>}, {pipeline_mode = #tpu.pipeline_mode<synchronous>, transform_indices = @transform_17, window_bounds = array<i64: 1, 128>}, {pipeline_mode = #tpu.pipeline_mode<synchronous>, transform_indices = @transform_18, window_bounds = array<i64: 128, 128>}, {pipeline_mode = #tpu.pipeline_mode<synchronous>, transform_indices = @transform_19, window_bounds = array<i64: 1, 128>}, {transform_indices = @transform_20, window_bounds = array<i64: 1, 1, 128>}]} {
    %c0_i32 = arith.constant 0 : i32
    %0 = arith.cmpi eq, %arg1, %c0_i32 : i32
    %1 = arith.extui %0 : i1 to i32
    %c0_i32_0 = arith.constant 0 : i32
    %2 = arith.cmpi ne, %1, %c0_i32_0 : i32
    scf.if %2 {
      %c0_42 = arith.constant 0 : index
      %c0_43 = arith.constant 0 : index
      %c0_44 = arith.constant 0 : index
      %35 = vector.load %arg2[%c0_42, %c0_43, %c0_44] : memref<1x128x128xf32, #tpu.memory_space<vmem>>, vector<1x128x128xf32>
      %36 = vector.shape_cast %35 : vector<1x128x128xf32> to vector<128x128xf32>
      %c0_45 = arith.constant 0 : index
      %c0_46 = arith.constant 0 : index
      %37 = vector.load %arg4[%c0_45, %c0_46] : memref<1x128xf32, #tpu.memory_space<vmem>>, vector<1x128xf32>
      %c0_47 = arith.constant 0 : index
      %c0_48 = arith.constant 0 : index
      %38 = vector.load %arg5[%c0_47, %c0_48] : memref<1x128xf32, #tpu.memory_space<vmem>>, vector<1x128xf32>
      %cst = arith.constant dense<0.000000e+00> : vector<128xf32>
      %39 = vector.multi_reduction <add>, %36, %cst [1] : vector<128x128xf32> to vector<128xf32>
      %40 = vector.shape_cast %39 : vector<128xf32> to vector<128x1xf32>
      %cst_49 = arith.constant 1.280000e+02 : f32
      %41 = vector.broadcast %cst_49 : f32 to vector<128x1xf32>
      %42 = arith.divf %40, %41 : vector<128x1xf32>
      %43 = vector.broadcast %42 : vector<128x1xf32> to vector<128x128xf32>
      %44 = arith.subf %36, %43 : vector<128x128xf32>
      %45 = arith.mulf %44, %44 : vector<128x128xf32>
      %cst_50 = arith.constant dense<0.000000e+00> : vector<128xf32>
      %46 = vector.multi_reduction <add>, %45, %cst_50 [1] : vector<128x128xf32> to vector<128xf32>
      %47 = vector.shape_cast %46 : vector<128xf32> to vector<128x1xf32>
      %cst_51 = arith.constant 1.280000e+02 : f32
      %48 = vector.broadcast %cst_51 : f32 to vector<128x1xf32>
      %49 = arith.divf %47, %48 : vector<128x1xf32>
      %50 = vector.broadcast %42 : vector<128x1xf32> to vector<128x128xf32>
      %51 = arith.subf %36, %50 : vector<128x128xf32>
      %cst_52 = arith.constant 9.99999996E-13 : f32
      %52 = vector.broadcast %cst_52 : f32 to vector<128x1xf32>
      %53 = arith.addf %49, %52 : vector<128x1xf32>
      %54 = math.rsqrt %53 : vector<128x1xf32>
      %55 = vector.broadcast %54 : vector<128x1xf32> to vector<128x128xf32>
      %56 = arith.mulf %51, %55 : vector<128x128xf32>
      %57 = vector.broadcast %37 : vector<1x128xf32> to vector<128x128xf32>
      %58 = arith.mulf %56, %57 : vector<128x128xf32>
      %59 = vector.broadcast %38 : vector<1x128xf32> to vector<128x128xf32>
      %60 = arith.addf %58, %59 : vector<128x128xf32>
      %c0_53 = arith.constant 0 : index
      %c0_54 = arith.constant 0 : index
      %61 = vector.load %arg23[%c0_53, %c0_54] : memref<128x128xf32, #tpu.memory_space<vmem>>, vector<128x128xf32>
      tpu.vector_store %arg23[%c0_53, %c0_54], %60 {strides = array<i32>} : memref<128x128xf32, #tpu.memory_space<vmem>>, vector<128x128xf32>,
    } else {
    }
    %c0 = arith.constant 0 : index
    %c0_1 = arith.constant 0 : index
    %c0_2 = arith.constant 0 : index
    %3 = vector.load %arg3[%c0, %c0_1, %c0_2] : memref<1x1x128xf32, #tpu.memory_space<vmem>>, vector<1x1x128xf32>
    %4 = vector.shape_cast %3 : vector<1x1x128xf32> to vector<1x128xf32>
    %c0_3 = arith.constant 0 : index
    %c0_4 = arith.constant 0 : index
    %c0_5 = arith.constant 0 : index
    %5 = vector.load %arg6[%c0_3, %c0_4, %c0_5] : memref<1x128x384xbf16, #tpu.memory_space<vmem>>, vector<1x128x384xbf16>
    %6 = vector.shape_cast %5 : vector<1x128x384xbf16> to vector<128x384xbf16>
    %c0_6 = arith.constant 0 : index
    %c0_7 = arith.constant 0 : index
    %c0_8 = arith.constant 0 : index
    %7 = vector.load %arg7[%c0_6, %c0_7, %c0_8] : memref<1x1x384xf32, #tpu.memory_space<vmem>>, vector<1x1x384xf32>
    %8 = vector.shape_cast %7 : vector<1x1x384xf32> to vector<1x384xf32>
    %c0_9 = arith.constant 0 : index
    %c0_10 = arith.constant 0 : index
    %c0_11 = arith.constant 0 : index
    %9 = vector.load %arg8[%c0_9, %c0_10, %c0_11] : memref<1x128x128xbf16, #tpu.memory_space<vmem>>, vector<1x128x128xbf16>
    %10 = vector.shape_cast %9 : vector<1x128x128xbf16> to vector<128x128xbf16>
    %c0_12 = arith.constant 0 : index
    %c0_13 = arith.constant 0 : index
    %c0_14 = arith.constant 0 : index
    %11 = vector.load %arg9[%c0_12, %c0_13, %c0_14] : memref<1x1x128xf32, #tpu.memory_space<vmem>>, vector<1x1x128xf32>
    %12 = vector.shape_cast %11 : vector<1x1x128xf32> to vector<1x128xf32>
    %c0_15 = arith.constant 0 : index
    %c0_16 = arith.constant 0 : index
    %c0_17 = arith.constant 0 : index
    %13 = vector.load %arg10[%c0_15, %c0_16, %c0_17] : memref<1x1x128xf32, #tpu.memory_space<vmem>>, vector<1x1x128xf32>
    %14 = vector.shape_cast %13 : vector<1x1x128xf32> to vector<1x128xf32>
    %c0_18 = arith.constant 0 : index
    %c0_19 = arith.constant 0 : index
    %c0_20 = arith.constant 0 : index
    %15 = vector.load %arg11[%c0_18, %c0_19, %c0_20] : memref<1x1x128xf32, #tpu.memory_space<vmem>>, vector<1x1x128xf32>
    %16 = vector.shape_cast %15 : vector<1x1x128xf32> to vector<1x128xf32>
    %c0_21 = arith.constant 0 : index
    %c0_22 = arith.constant 0 : index
    %c0_23 = arith.constant 0 : index
    %17 = vector.load %arg12[%c0_21, %c0_22, %c0_23] : memref<1x128x256xbf16, #tpu.memory_space<vmem>>, vector<1x128x256xbf16>
    %18 = vector.shape_cast %17 : vector<1x128x256xbf16> to vector<128x256xbf16>
    %c0_24 = arith.constant 0 : index
    %c0_25 = arith.constant 0 : index
    %c0_26 = arith.constant 0 : index
    %19 = vector.load %arg13[%c0_24, %c0_25, %c0_26] : memref<1x1x256xf32, #tpu.memory_space<vmem>>, vector<1x1x256xf32>
    %20 = vector.shape_cast %19 : vector<1x1x256xf32> to vector<1x256xf32>
    %c0_27 = arith.constant 0 : index
    %c0_28 = arith.constant 0 : index
    %c0_29 = arith.constant 0 : index
    %21 = vector.load %arg14[%c0_27, %c0_28, %c0_29] : memref<1x256x128xbf16, #tpu.memory_space<vmem>>, vector<1x256x128xbf16>
    %22 = vector.shape_cast %21 : vector<1x256x128xbf16> to vector<256x128xbf16>
    %c0_30 = arith.constant 0 : index
    %c0_31 = arith.constant 0 : index
    %c0_32 = arith.constant 0 : index
    %23 = vector.load %arg15[%c0_30, %c0_31, %c0_32] : memref<1x1x128xf32, #tpu.memory_space<vmem>>, vector<1x1x128xf32>
    %24 = vector.shape_cast %23 : vector<1x1x128xf32> to vector<1x128xf32>
    %c0_33 = arith.constant 0 : index
    %c0_34 = arith.constant 0 : index
    %c0_35 = arith.constant 0 : index
    %25 = vector.load %arg16[%c0_33, %c0_34, %c0_35] : memref<1x1x128xf32, #tpu.memory_space<vmem>>, vector<1x1x128xf32>
    %26 = vector.shape_cast %25 : vector<1x1x128xf32> to vector<1x128xf32>
    %c0_36 = arith.constant 0 : index
    %c0_37 = arith.constant 0 : index
    %c0_38 = arith.constant 0 : index
    %27 = vector.load %arg17[%c0_36, %c0_37, %c0_38] : memref<1x1x128xf32, #tpu.memory_space<vmem>>, vector<1x1x128xf32>
    %28 = vector.shape_cast %27 : vector<1x1x128xf32> to vector<1x128xf32>
    %c1_i32 = arith.constant 1 : i32
    %29 = arith.cmpi slt, %arg1, %c1_i32 : i32
    %30 = arith.extui %29 : i1 to i32
    %c0_i32_39 = arith.constant 0 : i32
    %31 = arith.cmpi ne, %30, %c0_i32_39 : i32
    scf.if %31 {
      %c0_42 = arith.constant 0 : index
      %c0_43 = arith.constant 0 : index
      %35 = vector.load %arg23[%c0_42, %c0_43] : memref<128x128xf32, #tpu.memory_space<vmem>>, vector<128x128xf32>
      %36 = arith.truncf %35 : vector<128x128xf32> to vector<128x128xbf16>
      %cst = arith.constant dense<0.000000e+00> : vector<128x384xf32>
      %37 = tpu.matmul %36, %6, %cst {dimension_numbers = #tpu.dot_dimension_numbers<[1], [0], [0], [1], [0, 0, 1, 1], [], []>} : vector<128x128xbf16>, vector<128x384xbf16>, vector<128x384xf32> -> vector<128x384xf32>
      %38 = vector.broadcast %8 : vector<1x384xf32> to vector<128x384xf32>
      %39 = arith.addf %37, %38 : vector<128x384xf32>
      %40 = vector.extract_strided_slice %39 {offsets = [0, 128], sizes = [128, 128], strides = [1, 1]} : vector<128x384xf32> to vector<128x128xf32>
      %41 = tpu.transpose %40, [1, 0] : vector<128x128xf32> -> vector<128x128xf32>
      %42 = arith.truncf %41 : vector<128x128xf32> to vector<128x128xbf16>
      %43 = vector.extract_strided_slice %39 {offsets = [0, 256], sizes = [128, 128], strides = [1, 1]} : vector<128x384xf32> to vector<128x128xf32>
      %44 = arith.truncf %43 : vector<128x128xf32> to vector<128x128xbf16>
      %45 = vector.extract_strided_slice %39 {offsets = [0, 0], sizes = [128, 128], strides = [1, 1]} : vector<128x384xf32> to vector<128x128xf32>
      %46 = arith.truncf %45 : vector<128x128xf32> to vector<128x128xbf16>
      %47 = vector.shape_cast %4 : vector<1x128xf32> to vector<1x128xf32>
      %48 = vector.broadcast %47 : vector<1x128xf32> to vector<128x128xf32>
      %49 = vector.extract_strided_slice %46 {offsets = [0, 0], sizes = [128, 32], strides = [1, 1]} : vector<128x128xbf16> to vector<128x32xbf16>
      %50 = vector.extract_strided_slice %42 {offsets = [0, 0], sizes = [32, 128], strides = [1, 1]} : vector<128x128xbf16> to vector<32x128xbf16>
      %cst_44 = arith.constant dense<0.000000e+00> : vector<128x128xf32>
      %51 = tpu.matmul %49, %50, %cst_44 {dimension_numbers = #tpu.dot_dimension_numbers<[1], [0], [0], [1], [0, 0, 1, 1], [], []>} : vector<128x32xbf16>, vector<32x128xbf16>, vector<128x128xf32> -> vector<128x128xf32>
      %52 = arith.addf %51, %48 : vector<128x128xf32>
      %cst_45 = arith.constant dense<0xFF800000> : vector<128xf32>
      %53 = vector.multi_reduction <maximumf>, %52, %cst_45 [1] : vector<128x128xf32> to vector<128xf32>
      %54 = vector.shape_cast %53 : vector<128xf32> to vector<128x1xf32>
      %55 = vector.broadcast %54 : vector<128x1xf32> to vector<128x128xf32>
      %56 = arith.subf %52, %55 : vector<128x128xf32>
      %57 = math.exp %56 : vector<128x128xf32>
      %cst_46 = arith.constant dense<0.000000e+00> : vector<128xf32>
      %58 = vector.multi_reduction <add>, %57, %cst_46 [1] : vector<128x128xf32> to vector<128xf32>
      %59 = vector.shape_cast %58 : vector<128xf32> to vector<128x1xf32>
      %60 = tpu.reciprocal %59 {approx = true} : vector<128x1xf32> -> vector<128x1xf32>
      %61 = arith.truncf %57 : vector<128x128xf32> to vector<128x128xbf16>
      %62 = vector.extract_strided_slice %44 {offsets = [0, 0], sizes = [128, 32], strides = [1, 1]} : vector<128x128xbf16> to vector<128x32xbf16>
      %cst_47 = arith.constant dense<0.000000e+00> : vector<128x32xf32>
      %63 = tpu.matmul %61, %62, %cst_47 {dimension_numbers = #tpu.dot_dimension_numbers<[1], [0], [0], [1], [0, 0, 1, 1], [], []>} : vector<128x128xbf16>, vector<128x32xbf16>, vector<128x32xf32> -> vector<128x32xf32>
      %64 = vector.broadcast %60 : vector<128x1xf32> to vector<128x32xf32>
      %65 = arith.mulf %63, %64 : vector<128x32xf32>
      %66 = vector.extract_strided_slice %46 {offsets = [0, 32], sizes = [128, 32], strides = [1, 1]} : vector<128x128xbf16> to vector<128x32xbf16>
      %67 = vector.extract_strided_slice %42 {offsets = [32, 0], sizes = [32, 128], strides = [1, 1]} : vector<128x128xbf16> to vector<32x128xbf16>
      %cst_48 = arith.constant dense<0.000000e+00> : vector<128x128xf32>
      %68 = tpu.matmul %66, %67, %cst_48 {dimension_numbers = #tpu.dot_dimension_numbers<[1], [0], [0], [1], [0, 0, 1, 1], [], []>} : vector<128x32xbf16>, vector<32x128xbf16>, vector<128x128xf32> -> vector<128x128xf32>
      %69 = arith.addf %68, %48 : vector<128x128xf32>
      %cst_49 = arith.constant dense<0xFF800000> : vector<128xf32>
      %70 = vector.multi_reduction <maximumf>, %69, %cst_49 [1] : vector<128x128xf32> to vector<128xf32>
      %71 = vector.shape_cast %70 : vector<128xf32> to vector<128x1xf32>
      %72 = vector.broadcast %71 : vector<128x1xf32> to vector<128x128xf32>
      %73 = arith.subf %69, %72 : vector<128x128xf32>
      %74 = math.exp %73 : vector<128x128xf32>
      %cst_50 = arith.constant dense<0.000000e+00> : vector<128xf32>
      %75 = vector.multi_reduction <add>, %74, %cst_50 [1] : vector<128x128xf32> to vector<128xf32>
      %76 = vector.shape_cast %75 : vector<128xf32> to vector<128x1xf32>
      %77 = tpu.reciprocal %76 {approx = true} : vector<128x1xf32> -> vector<128x1xf32>
      %78 = arith.truncf %74 : vector<128x128xf32> to vector<128x128xbf16>
      %79 = vector.extract_strided_slice %44 {offsets = [0, 32], sizes = [128, 32], strides = [1, 1]} : vector<128x128xbf16> to vector<128x32xbf16>
      %cst_51 = arith.constant dense<0.000000e+00> : vector<128x32xf32>
      %80 = tpu.matmul %78, %79, %cst_51 {dimension_numbers = #tpu.dot_dimension_numbers<[1], [0], [0], [1], [0, 0, 1, 1], [], []>} : vector<128x128xbf16>, vector<128x32xbf16>, vector<128x32xf32> -> vector<128x32xf32>
      %81 = vector.broadcast %77 : vector<128x1xf32> to vector<128x32xf32>
      %82 = arith.mulf %80, %81 : vector<128x32xf32>
      %83 = vector.extract_strided_slice %46 {offsets = [0, 64], sizes = [128, 32], strides = [1, 1]} : vector<128x128xbf16> to vector<128x32xbf16>
      %84 = vector.extract_strided_slice %42 {offsets = [64, 0], sizes = [32, 128], strides = [1, 1]} : vector<128x128xbf16> to vector<32x128xbf16>
      %cst_52 = arith.constant dense<0.000000e+00> : vector<128x128xf32>
      %85 = tpu.matmul %83, %84, %cst_52 {dimension_numbers = #tpu.dot_dimension_numbers<[1], [0], [0], [1], [0, 0, 1, 1], [], []>} : vector<128x32xbf16>, vector<32x128xbf16>, vector<128x128xf32> -> vector<128x128xf32>
      %86 = arith.addf %85, %48 : vector<128x128xf32>
      %cst_53 = arith.constant dense<0xFF800000> : vector<128xf32>
      %87 = vector.multi_reduction <maximumf>, %86, %cst_53 [1] : vector<128x128xf32> to vector<128xf32>
      %88 = vector.shape_cast %87 : vector<128xf32> to vector<128x1xf32>
      %89 = vector.broadcast %88 : vector<128x1xf32> to vector<128x128xf32>
      %90 = arith.subf %86, %89 : vector<128x128xf32>
      %91 = math.exp %90 : vector<128x128xf32>
      %cst_54 = arith.constant dense<0.000000e+00> : vector<128xf32>
      %92 = vector.multi_reduction <add>, %91, %cst_54 [1] : vector<128x128xf32> to vector<128xf32>
      %93 = vector.shape_cast %92 : vector<128xf32> to vector<128x1xf32>
      %94 = tpu.reciprocal %93 {approx = true} : vector<128x1xf32> -> vector<128x1xf32>
      %95 = arith.truncf %91 : vector<128x128xf32> to vector<128x128xbf16>
      %96 = vector.extract_strided_slice %44 {offsets = [0, 64], sizes = [128, 32], strides = [1, 1]} : vector<128x128xbf16> to vector<128x32xbf16>
      %cst_55 = arith.constant dense<0.000000e+00> : vector<128x32xf32>
      %97 = tpu.matmul %95, %96, %cst_55 {dimension_numbers = #tpu.dot_dimension_numbers<[1], [0], [0], [1], [0, 0, 1, 1], [], []>} : vector<128x128xbf16>, vector<128x32xbf16>, vector<128x32xf32> -> vector<128x32xf32>
      %98 = vector.broadcast %94 : vector<128x1xf32> to vector<128x32xf32>
      %99 = arith.mulf %97, %98 : vector<128x32xf32>
      %100 = vector.extract_strided_slice %46 {offsets = [0, 96], sizes = [128, 32], strides = [1, 1]} : vector<128x128xbf16> to vector<128x32xbf16>
      %101 = vector.extract_strided_slice %42 {offsets = [96, 0], sizes = [32, 128], strides = [1, 1]} : vector<128x128xbf16> to vector<32x128xbf16>
      %cst_56 = arith.constant dense<0.000000e+00> : vector<128x128xf32>
      %102 = tpu.matmul %100, %101, %cst_56 {dimension_numbers = #tpu.dot_dimension_numbers<[1], [0], [0], [1], [0, 0, 1, 1], [], []>} : vector<128x32xbf16>, vector<32x128xbf16>, vector<128x128xf32> -> vector<128x128xf32>
      %103 = arith.addf %102, %48 : vector<128x128xf32>
      %cst_57 = arith.constant dense<0xFF800000> : vector<128xf32>
      %104 = vector.multi_reduction <maximumf>, %103, %cst_57 [1] : vector<128x128xf32> to vector<128xf32>
      %105 = vector.shape_cast %104 : vector<128xf32> to vector<128x1xf32>
      %106 = vector.broadcast %105 : vector<128x1xf32> to vector<128x128xf32>
      %107 = arith.subf %103, %106 : vector<128x128xf32>
      %108 = math.exp %107 : vector<128x128xf32>
      %cst_58 = arith.constant dense<0.000000e+00> : vector<128xf32>
      %109 = vector.multi_reduction <add>, %108, %cst_58 [1] : vector<128x128xf32> to vector<128xf32>
      %110 = vector.shape_cast %109 : vector<128xf32> to vector<128x1xf32>
      %111 = tpu.reciprocal %110 {approx = true} : vector<128x1xf32> -> vector<128x1xf32>
      %112 = arith.truncf %108 : vector<128x128xf32> to vector<128x128xbf16>
      %113 = vector.extract_strided_slice %44 {offsets = [0, 96], sizes = [128, 32], strides = [1, 1]} : vector<128x128xbf16> to vector<128x32xbf16>
      %cst_59 = arith.constant dense<0.000000e+00> : vector<128x32xf32>
      %114 = tpu.matmul %112, %113, %cst_59 {dimension_numbers = #tpu.dot_dimension_numbers<[1], [0], [0], [1], [0, 0, 1, 1], [], []>} : vector<128x128xbf16>, vector<128x32xbf16>, vector<128x32xf32> -> vector<128x32xf32>
      %115 = vector.broadcast %111 : vector<128x1xf32> to vector<128x32xf32>
      %116 = arith.mulf %114, %115 : vector<128x32xf32>
      %117 = tpu.concatenate %65, %82, %99, %116 in 1 : vector<128x32xf32>, vector<128x32xf32>, vector<128x32xf32>, vector<128x32xf32> -> vector<128x128xf32>
      %118 = arith.truncf %117 : vector<128x128xf32> to vector<128x128xbf16>
      %cst_60 = arith.constant dense<0.000000e+00> : vector<128x128xf32>
      %119 = tpu.matmul %118, %10, %cst_60 {dimension_numbers = #tpu.dot_dimension_numbers<[1], [0], [0], [1], [0, 0, 1, 1], [], []>} : vector<128x128xbf16>, vector<128x128xbf16>, vector<128x128xf32> -> vector<128x128xf32>
      %120 = vector.broadcast %12 : vector<1x128xf32> to vector<128x128xf32>
      %121 = arith.addf %119, %120 : vector<128x128xf32>
      %122 = arith.addf %121, %35 : vector<128x128xf32>
      %cst_61 = arith.constant dense<0.000000e+00> : vector<128xf32>
      %123 = vector.multi_reduction <add>, %122, %cst_61 [1] : vector<128x128xf32> to vector<128xf32>
      %124 = vector.shape_cast %123 : vector<128xf32> to vector<128x1xf32>
      %cst_62 = arith.constant 1.280000e+02 : f32
      %125 = vector.broadcast %cst_62 : f32 to vector<128x1xf32>
      %126 = arith.divf %124, %125 : vector<128x1xf32>
      %127 = vector.broadcast %126 : vector<128x1xf32> to vector<128x128xf32>
      %128 = arith.subf %122, %127 : vector<128x128xf32>
      %129 = arith.mulf %128, %128 : vector<128x128xf32>
      %cst_63 = arith.constant dense<0.000000e+00> : vector<128xf32>
      %130 = vector.multi_reduction <add>, %129, %cst_63 [1] : vector<128x128xf32> to vector<128xf32>
      %131 = vector.shape_cast %130 : vector<128xf32> to vector<128x1xf32>
      %cst_64 = arith.constant 1.280000e+02 : f32
      %132 = vector.broadcast %cst_64 : f32 to vector<128x1xf32>
      %133 = arith.divf %131, %132 : vector<128x1xf32>
      %134 = vector.broadcast %126 : vector<128x1xf32> to vector<128x128xf32>
      %135 = arith.subf %122, %134 : vector<128x128xf32>
      %cst_65 = arith.constant 9.99999996E-13 : f32
      %136 = vector.broadcast %cst_65 : f32 to vector<128x1xf32>
      %137 = arith.addf %133, %136 : vector<128x1xf32>
      %138 = math.rsqrt %137 : vector<128x1xf32>
      %139 = vector.broadcast %138 : vector<128x1xf32> to vector<128x128xf32>
      %140 = arith.mulf %135, %139 : vector<128x128xf32>
      %141 = vector.broadcast %14 : vector<1x128xf32> to vector<128x128xf32>
      %142 = arith.mulf %140, %141 : vector<128x128xf32>
      %143 = vector.broadcast %16 : vector<1x128xf32> to vector<128x128xf32>
      %144 = arith.addf %142, %143 : vector<128x128xf32>
      %145 = arith.truncf %144 : vector<128x128xf32> to vector<128x128xbf16>
      %cst_66 = arith.constant dense<0.000000e+00> : vector<128x256xf32>
      %146 = tpu.matmul %145, %18, %cst_66 {dimension_numbers = #tpu.dot_dimension_numbers<[1], [0], [0], [1], [0, 0, 1, 1], [], []>} : vector<128x128xbf16>, vector<128x256xbf16>, vector<128x256xf32> -> vector<128x256xf32>
      %147 = vector.broadcast %20 : vector<1x256xf32> to vector<128x256xf32>
      %148 = arith.addf %146, %147 : vector<128x256xf32>
      %149 = arith.mulf %148, %148 : vector<128x256xf32>
      %150 = arith.mulf %148, %149 : vector<128x256xf32>
      %cst_67 = arith.constant 4.471500e-02 : f32
      %151 = vector.broadcast %cst_67 : f32 to vector<128x256xf32>
      %152 = arith.mulf %151, %150 : vector<128x256xf32>
      %153 = arith.addf %148, %152 : vector<128x256xf32>
      %cst_68 = arith.constant 0.797884583 : f32
      %154 = vector.broadcast %cst_68 : f32 to vector<128x256xf32>
      %155 = arith.mulf %154, %153 : vector<128x256xf32>
      %156 = math.tanh %155 : vector<128x256xf32>
      %cst_69 = arith.constant 1.000000e+00 : f32
      %157 = vector.broadcast %cst_69 : f32 to vector<128x256xf32>
      %158 = arith.addf %157, %156 : vector<128x256xf32>
      %cst_70 = arith.constant 5.000000e-01 : f32
      %159 = vector.broadcast %cst_70 : f32 to vector<128x256xf32>
      %160 = arith.mulf %159, %158 : vector<128x256xf32>
      %161 = arith.mulf %148, %160 : vector<128x256xf32>
      %162 = arith.truncf %161 : vector<128x256xf32> to vector<128x256xbf16>
      %cst_71 = arith.constant dense<0.000000e+00> : vector<128x128xf32>
      %163 = tpu.matmul %162, %22, %cst_71 {dimension_numbers = #tpu.dot_dimension_numbers<[1], [0], [0], [1], [0, 0, 1, 1], [], []>} : vector<128x256xbf16>, vector<256x128xbf16>, vector<128x128xf32> -> vector<128x128xf32>
      %164 = vector.broadcast %24 : vector<1x128xf32> to vector<128x128xf32>
      %165 = arith.addf %163, %164 : vector<128x128xf32>
      %166 = arith.addf %165, %144 : vector<128x128xf32>
      %cst_72 = arith.constant dense<0.000000e+00> : vector<128xf32>
      %167 = vector.multi_reduction <add>, %166, %cst_72 [1] : vector<128x128xf32> to vector<128xf32>
      %168 = vector.shape_cast %167 : vector<128xf32> to vector<128x1xf32>
      %cst_73 = arith.constant 1.280000e+02 : f32
      %169 = vector.broadcast %cst_73 : f32 to vector<128x1xf32>
      %170 = arith.divf %168, %169 : vector<128x1xf32>
      %171 = vector.broadcast %170 : vector<128x1xf32> to vector<128x128xf32>
      %172 = arith.subf %166, %171 : vector<128x128xf32>
      %173 = arith.mulf %172, %172 : vector<128x128xf32>
      %cst_74 = arith.constant dense<0.000000e+00> : vector<128xf32>
      %174 = vector.multi_reduction <add>, %173, %cst_74 [1] : vector<128x128xf32> to vector<128xf32>
      %175 = vector.shape_cast %174 : vector<128xf32> to vector<128x1xf32>
      %cst_75 = arith.constant 1.280000e+02 : f32
      %176 = vector.broadcast %cst_75 : f32 to vector<128x1xf32>
      %177 = arith.divf %175, %176 : vector<128x1xf32>
      %178 = vector.broadcast %170 : vector<128x1xf32> to vector<128x128xf32>
      %179 = arith.subf %166, %178 : vector<128x128xf32>
      %cst_76 = arith.constant 9.99999996E-13 : f32
      %180 = vector.broadcast %cst_76 : f32 to vector<128x1xf32>
      %181 = arith.addf %177, %180 : vector<128x1xf32>
      %182 = math.rsqrt %181 : vector<128x1xf32>
      %183 = vector.broadcast %182 : vector<128x1xf32> to vector<128x128xf32>
      %184 = arith.mulf %179, %183 : vector<128x128xf32>
      %185 = vector.broadcast %26 : vector<1x128xf32> to vector<128x128xf32>
      %186 = arith.mulf %184, %185 : vector<128x128xf32>
      %187 = vector.broadcast %28 : vector<1x128xf32> to vector<128x128xf32>
      %188 = arith.addf %186, %187 : vector<128x128xf32>
      %c0_77 = arith.constant 0 : index
      %c0_78 = arith.constant 0 : index
      %189 = vector.load %arg23[%c0_77, %c0_78] : memref<128x128xf32, #tpu.memory_space<vmem>>, vector<128x128xf32>
      tpu.vector_store %arg23[%c0_77, %c0_78], %188 {strides = array<i32>} : memref<128x128xf32, #tpu.memory_space<vmem>>, vector<128x128xf32>,
    } else {
    }
    %c1_i32_40 = arith.constant 1 : i32
    %32 = arith.cmpi eq, %arg1, %c1_i32_40 : i32
    %33 = arith.extui %32 : i1 to i32
    %c0_i32_41 = arith.constant 0 : i32
    %34 = arith.cmpi ne, %33, %c0_i32_41 : i32
    scf.if %34 {
      %c0_42 = arith.constant 0 : index
      %c0_43 = arith.constant 0 : index
      %35 = vector.load %arg23[%c0_42, %c0_43] : memref<128x128xf32, #tpu.memory_space<vmem>>, vector<128x128xf32>
      %36 = arith.truncf %35 : vector<128x128xf32> to vector<128x128xbf16>
      %cst = arith.constant dense<0.000000e+00> : vector<128x384xf32>
      %37 = tpu.matmul %36, %6, %cst {dimension_numbers = #tpu.dot_dimension_numbers<[1], [0], [0], [1], [0, 0, 1, 1], [], []>} : vector<128x128xbf16>, vector<128x384xbf16>, vector<128x384xf32> -> vector<128x384xf32>
      %38 = vector.broadcast %8 : vector<1x384xf32> to vector<128x384xf32>
      %39 = arith.addf %37, %38 : vector<128x384xf32>
      %40 = vector.extract_strided_slice %39 {offsets = [0, 128], sizes = [128, 128], strides = [1, 1]} : vector<128x384xf32> to vector<128x128xf32>
      %41 = tpu.transpose %40, [1, 0] : vector<128x128xf32> -> vector<128x128xf32>
      %42 = arith.truncf %41 : vector<128x128xf32> to vector<128x128xbf16>
      %43 = vector.extract_strided_slice %39 {offsets = [0, 256], sizes = [128, 128], strides = [1, 1]} : vector<128x384xf32> to vector<128x128xf32>
      %44 = arith.truncf %43 : vector<128x128xf32> to vector<128x128xbf16>
      %45 = vector.extract_strided_slice %39 {offsets = [0, 0], sizes = [1, 128], strides = [1, 1]} : vector<128x384xf32> to vector<1x128xf32>
      %46 = arith.truncf %45 : vector<1x128xf32> to vector<1x128xbf16>
      %47 = vector.extract_strided_slice %46 {offsets = [0, 0], sizes = [1, 32], strides = [1, 1]} : vector<1x128xbf16> to vector<1x32xbf16>
      %48 = vector.extract_strided_slice %42 {offsets = [0, 0], sizes = [32, 128], strides = [1, 1]} : vector<128x128xbf16> to vector<32x128xbf16>
      %cst_44 = arith.constant dense<0.000000e+00> : vector<1x128xf32>
      %49 = tpu.matmul %47, %48, %cst_44 {dimension_numbers = #tpu.dot_dimension_numbers<[1], [0], [0], [1], [0, 0, 1, 1], [], []>} : vector<1x32xbf16>, vector<32x128xbf16>, vector<1x128xf32> -> vector<1x128xf32>
      %50 = arith.addf %49, %4 : vector<1x128xf32>
      %cst_45 = arith.constant dense<0xFF800000> : vector<1xf32>
      %51 = vector.multi_reduction <maximumf>, %50, %cst_45 [1] : vector<1x128xf32> to vector<1xf32>
      %52 = vector.shape_cast %51 : vector<1xf32> to vector<1x1xf32>
      %53 = vector.broadcast %52 : vector<1x1xf32> to vector<1x128xf32>
      %54 = arith.subf %50, %53 : vector<1x128xf32>
      %55 = math.exp %54 : vector<1x128xf32>
      %cst_46 = arith.constant dense<0.000000e+00> : vector<1xf32>
      %56 = vector.multi_reduction <add>, %55, %cst_46 [1] : vector<1x128xf32> to vector<1xf32>
      %57 = vector.shape_cast %56 : vector<1xf32> to vector<1x1xf32>
      %58 = tpu.reciprocal %57 {approx = true} : vector<1x1xf32> -> vector<1x1xf32>
      %59 = arith.truncf %55 : vector<1x128xf32> to vector<1x128xbf16>
      %60 = vector.extract_strided_slice %44 {offsets = [0, 0], sizes = [128, 32], strides = [1, 1]} : vector<128x128xbf16> to vector<128x32xbf16>
      %cst_47 = arith.constant dense<0.000000e+00> : vector<1x32xf32>
      %61 = tpu.matmul %59, %60, %cst_47 {dimension_numbers = #tpu.dot_dimension_numbers<[1], [0], [0], [1], [0, 0, 1, 1], [], []>} : vector<1x128xbf16>, vector<128x32xbf16>, vector<1x32xf32> -> vector<1x32xf32>
      %62 = vector.broadcast %58 : vector<1x1xf32> to vector<1x32xf32>
      %63 = arith.mulf %61, %62 : vector<1x32xf32>
      %64 = vector.extract_strided_slice %46 {offsets = [0, 32], sizes = [1, 32], strides = [1, 1]} : vector<1x128xbf16> to vector<1x32xbf16>
      %65 = vector.extract_strided_slice %42 {offsets = [32, 0], sizes = [32, 128], strides = [1, 1]} : vector<128x128xbf16> to vector<32x128xbf16>
      %cst_48 = arith.constant dense<0.000000e+00> : vector<1x128xf32>
      %66 = tpu.matmul %64, %65, %cst_48 {dimension_numbers = #tpu.dot_dimension_numbers<[1], [0], [0], [1], [0, 0, 1, 1], [], []>} : vector<1x32xbf16>, vector<32x128xbf16>, vector<1x128xf32> -> vector<1x128xf32>
      %67 = arith.addf %66, %4 : vector<1x128xf32>
      %cst_49 = arith.constant dense<0xFF800000> : vector<1xf32>
      %68 = vector.multi_reduction <maximumf>, %67, %cst_49 [1] : vector<1x128xf32> to vector<1xf32>
      %69 = vector.shape_cast %68 : vector<1xf32> to vector<1x1xf32>
      %70 = vector.broadcast %69 : vector<1x1xf32> to vector<1x128xf32>
      %71 = arith.subf %67, %70 : vector<1x128xf32>
      %72 = math.exp %71 : vector<1x128xf32>
      %cst_50 = arith.constant dense<0.000000e+00> : vector<1xf32>
      %73 = vector.multi_reduction <add>, %72, %cst_50 [1] : vector<1x128xf32> to vector<1xf32>
      %74 = vector.shape_cast %73 : vector<1xf32> to vector<1x1xf32>
      %75 = tpu.reciprocal %74 {approx = true} : vector<1x1xf32> -> vector<1x1xf32>
      %76 = arith.truncf %72 : vector<1x128xf32> to vector<1x128xbf16>
      %77 = vector.extract_strided_slice %44 {offsets = [0, 32], sizes = [128, 32], strides = [1, 1]} : vector<128x128xbf16> to vector<128x32xbf16>
      %cst_51 = arith.constant dense<0.000000e+00> : vector<1x32xf32>
      %78 = tpu.matmul %76, %77, %cst_51 {dimension_numbers = #tpu.dot_dimension_numbers<[1], [0], [0], [1], [0, 0, 1, 1], [], []>} : vector<1x128xbf16>, vector<128x32xbf16>, vector<1x32xf32> -> vector<1x32xf32>
      %79 = vector.broadcast %75 : vector<1x1xf32> to vector<1x32xf32>
      %80 = arith.mulf %78, %79 : vector<1x32xf32>
      %81 = vector.extract_strided_slice %46 {offsets = [0, 64], sizes = [1, 32], strides = [1, 1]} : vector<1x128xbf16> to vector<1x32xbf16>
      %82 = vector.extract_strided_slice %42 {offsets = [64, 0], sizes = [32, 128], strides = [1, 1]} : vector<128x128xbf16> to vector<32x128xbf16>
      %cst_52 = arith.constant dense<0.000000e+00> : vector<1x128xf32>
      %83 = tpu.matmul %81, %82, %cst_52 {dimension_numbers = #tpu.dot_dimension_numbers<[1], [0], [0], [1], [0, 0, 1, 1], [], []>} : vector<1x32xbf16>, vector<32x128xbf16>, vector<1x128xf32> -> vector<1x128xf32>
      %84 = arith.addf %83, %4 : vector<1x128xf32>
      %cst_53 = arith.constant dense<0xFF800000> : vector<1xf32>
      %85 = vector.multi_reduction <maximumf>, %84, %cst_53 [1] : vector<1x128xf32> to vector<1xf32>
      %86 = vector.shape_cast %85 : vector<1xf32> to vector<1x1xf32>
      %87 = vector.broadcast %86 : vector<1x1xf32> to vector<1x128xf32>
      %88 = arith.subf %84, %87 : vector<1x128xf32>
      %89 = math.exp %88 : vector<1x128xf32>
      %cst_54 = arith.constant dense<0.000000e+00> : vector<1xf32>
      %90 = vector.multi_reduction <add>, %89, %cst_54 [1] : vector<1x128xf32> to vector<1xf32>
      %91 = vector.shape_cast %90 : vector<1xf32> to vector<1x1xf32>
      %92 = tpu.reciprocal %91 {approx = true} : vector<1x1xf32> -> vector<1x1xf32>
      %93 = arith.truncf %89 : vector<1x128xf32> to vector<1x128xbf16>
      %94 = vector.extract_strided_slice %44 {offsets = [0, 64], sizes = [128, 32], strides = [1, 1]} : vector<128x128xbf16> to vector<128x32xbf16>
      %cst_55 = arith.constant dense<0.000000e+00> : vector<1x32xf32>
      %95 = tpu.matmul %93, %94, %cst_55 {dimension_numbers = #tpu.dot_dimension_numbers<[1], [0], [0], [1], [0, 0, 1, 1], [], []>} : vector<1x128xbf16>, vector<128x32xbf16>, vector<1x32xf32> -> vector<1x32xf32>
      %96 = vector.broadcast %92 : vector<1x1xf32> to vector<1x32xf32>
      %97 = arith.mulf %95, %96 : vector<1x32xf32>
      %98 = vector.extract_strided_slice %46 {offsets = [0, 96], sizes = [1, 32], strides = [1, 1]} : vector<1x128xbf16> to vector<1x32xbf16>
      %99 = vector.extract_strided_slice %42 {offsets = [96, 0], sizes = [32, 128], strides = [1, 1]} : vector<128x128xbf16> to vector<32x128xbf16>
      %cst_56 = arith.constant dense<0.000000e+00> : vector<1x128xf32>
      %100 = tpu.matmul %98, %99, %cst_56 {dimension_numbers = #tpu.dot_dimension_numbers<[1], [0], [0], [1], [0, 0, 1, 1], [], []>} : vector<1x32xbf16>, vector<32x128xbf16>, vector<1x128xf32> -> vector<1x128xf32>
      %101 = arith.addf %100, %4 : vector<1x128xf32>
      %cst_57 = arith.constant dense<0xFF800000> : vector<1xf32>
      %102 = vector.multi_reduction <maximumf>, %101, %cst_57 [1] : vector<1x128xf32> to vector<1xf32>
      %103 = vector.shape_cast %102 : vector<1xf32> to vector<1x1xf32>
      %104 = vector.broadcast %103 : vector<1x1xf32> to vector<1x128xf32>
      %105 = arith.subf %101, %104 : vector<1x128xf32>
      %106 = math.exp %105 : vector<1x128xf32>
      %cst_58 = arith.constant dense<0.000000e+00> : vector<1xf32>
      %107 = vector.multi_reduction <add>, %106, %cst_58 [1] : vector<1x128xf32> to vector<1xf32>
      %108 = vector.shape_cast %107 : vector<1xf32> to vector<1x1xf32>
      %109 = tpu.reciprocal %108 {approx = true} : vector<1x1xf32> -> vector<1x1xf32>
      %110 = arith.truncf %106 : vector<1x128xf32> to vector<1x128xbf16>
      %111 = vector.extract_strided_slice %44 {offsets = [0, 96], sizes = [128, 32], strides = [1, 1]} : vector<128x128xbf16> to vector<128x32xbf16>
      %cst_59 = arith.constant dense<0.000000e+00> : vector<1x32xf32>
      %112 = tpu.matmul %110, %111, %cst_59 {dimension_numbers = #tpu.dot_dimension_numbers<[1], [0], [0], [1], [0, 0, 1, 1], [], []>} : vector<1x128xbf16>, vector<128x32xbf16>, vector<1x32xf32> -> vector<1x32xf32>
      %113 = vector.broadcast %109 : vector<1x1xf32> to vector<1x32xf32>
      %114 = arith.mulf %112, %113 : vector<1x32xf32>
      %115 = tpu.concatenate %63, %80, %97, %114 in 1 : vector<1x32xf32>, vector<1x32xf32>, vector<1x32xf32>, vector<1x32xf32> -> vector<1x128xf32>
      %116 = arith.truncf %115 : vector<1x128xf32> to vector<1x128xbf16>
      %cst_60 = arith.constant dense<0.000000e+00> : vector<1x128xf32>
      %117 = tpu.matmul %116, %10, %cst_60 {dimension_numbers = #tpu.dot_dimension_numbers<[1], [0], [0], [1], [0, 0, 1, 1], [], []>} : vector<1x128xbf16>, vector<128x128xbf16>, vector<1x128xf32> -> vector<1x128xf32>
      %118 = arith.addf %117, %12 : vector<1x128xf32>
      %119 = vector.extract_strided_slice %35 {offsets = [0, 0], sizes = [1, 128], strides = [1, 1]} : vector<128x128xf32> to vector<1x128xf32>
      %120 = arith.addf %118, %119 : vector<1x128xf32>
      %cst_61 = arith.constant dense<0.000000e+00> : vector<1xf32>
      %121 = vector.multi_reduction <add>, %120, %cst_61 [1] : vector<1x128xf32> to vector<1xf32>
      %122 = vector.shape_cast %121 : vector<1xf32> to vector<1x1xf32>
      %cst_62 = arith.constant 1.280000e+02 : f32
      %123 = vector.broadcast %cst_62 : f32 to vector<1x1xf32>
      %124 = arith.divf %122, %123 : vector<1x1xf32>
      %125 = vector.broadcast %124 : vector<1x1xf32> to vector<1x128xf32>
      %126 = arith.subf %120, %125 : vector<1x128xf32>
      %127 = arith.mulf %126, %126 : vector<1x128xf32>
      %cst_63 = arith.constant dense<0.000000e+00> : vector<1xf32>
      %128 = vector.multi_reduction <add>, %127, %cst_63 [1] : vector<1x128xf32> to vector<1xf32>
      %129 = vector.shape_cast %128 : vector<1xf32> to vector<1x1xf32>
      %cst_64 = arith.constant 1.280000e+02 : f32
      %130 = vector.broadcast %cst_64 : f32 to vector<1x1xf32>
      %131 = arith.divf %129, %130 : vector<1x1xf32>
      %132 = vector.broadcast %124 : vector<1x1xf32> to vector<1x128xf32>
      %133 = arith.subf %120, %132 : vector<1x128xf32>
      %cst_65 = arith.constant 9.99999996E-13 : f32
      %134 = vector.broadcast %cst_65 : f32 to vector<1x1xf32>
      %135 = arith.addf %131, %134 : vector<1x1xf32>
      %136 = math.rsqrt %135 : vector<1x1xf32>
      %137 = vector.broadcast %136 : vector<1x1xf32> to vector<1x128xf32>
      %138 = arith.mulf %133, %137 : vector<1x128xf32>
      %139 = arith.mulf %138, %14 : vector<1x128xf32>
      %140 = arith.addf %139, %16 : vector<1x128xf32>
      %141 = arith.truncf %140 : vector<1x128xf32> to vector<1x128xbf16>
      %cst_66 = arith.constant dense<0.000000e+00> : vector<1x256xf32>
      %142 = tpu.matmul %141, %18, %cst_66 {dimension_numbers = #tpu.dot_dimension_numbers<[1], [0], [0], [1], [0, 0, 1, 1], [], []>} : vector<1x128xbf16>, vector<128x256xbf16>, vector<1x256xf32> -> vector<1x256xf32>
      %143 = arith.addf %142, %20 : vector<1x256xf32>
      %144 = arith.mulf %143, %143 : vector<1x256xf32>
      %145 = arith.mulf %143, %144 : vector<1x256xf32>
      %cst_67 = arith.constant 4.471500e-02 : f32
      %146 = vector.broadcast %cst_67 : f32 to vector<1x256xf32>
      %147 = arith.mulf %146, %145 : vector<1x256xf32>
      %148 = arith.addf %143, %147 : vector<1x256xf32>
      %cst_68 = arith.constant 0.797884583 : f32
      %149 = vector.broadcast %cst_68 : f32 to vector<1x256xf32>
      %150 = arith.mulf %149, %148 : vector<1x256xf32>
      %151 = math.tanh %150 : vector<1x256xf32>
      %cst_69 = arith.constant 1.000000e+00 : f32
      %152 = vector.broadcast %cst_69 : f32 to vector<1x256xf32>
      %153 = arith.addf %152, %151 : vector<1x256xf32>
      %cst_70 = arith.constant 5.000000e-01 : f32
      %154 = vector.broadcast %cst_70 : f32 to vector<1x256xf32>
      %155 = arith.mulf %154, %153 : vector<1x256xf32>
      %156 = arith.mulf %143, %155 : vector<1x256xf32>
      %157 = arith.truncf %156 : vector<1x256xf32> to vector<1x256xbf16>
      %cst_71 = arith.constant dense<0.000000e+00> : vector<1x128xf32>
      %158 = tpu.matmul %157, %22, %cst_71 {dimension_numbers = #tpu.dot_dimension_numbers<[1], [0], [0], [1], [0, 0, 1, 1], [], []>} : vector<1x256xbf16>, vector<256x128xbf16>, vector<1x128xf32> -> vector<1x128xf32>
      %159 = arith.addf %158, %24 : vector<1x128xf32>
      %160 = arith.addf %159, %140 : vector<1x128xf32>
      %cst_72 = arith.constant dense<0.000000e+00> : vector<1xf32>
      %161 = vector.multi_reduction <add>, %160, %cst_72 [1] : vector<1x128xf32> to vector<1xf32>
      %162 = vector.shape_cast %161 : vector<1xf32> to vector<1x1xf32>
      %cst_73 = arith.constant 1.280000e+02 : f32
      %163 = vector.broadcast %cst_73 : f32 to vector<1x1xf32>
      %164 = arith.divf %162, %163 : vector<1x1xf32>
      %165 = vector.broadcast %164 : vector<1x1xf32> to vector<1x128xf32>
      %166 = arith.subf %160, %165 : vector<1x128xf32>
      %167 = arith.mulf %166, %166 : vector<1x128xf32>
      %cst_74 = arith.constant dense<0.000000e+00> : vector<1xf32>
      %168 = vector.multi_reduction <add>, %167, %cst_74 [1] : vector<1x128xf32> to vector<1xf32>
      %169 = vector.shape_cast %168 : vector<1xf32> to vector<1x1xf32>
      %cst_75 = arith.constant 1.280000e+02 : f32
      %170 = vector.broadcast %cst_75 : f32 to vector<1x1xf32>
      %171 = arith.divf %169, %170 : vector<1x1xf32>
      %172 = vector.broadcast %164 : vector<1x1xf32> to vector<1x128xf32>
      %173 = arith.subf %160, %172 : vector<1x128xf32>
      %cst_76 = arith.constant 9.99999996E-13 : f32
      %174 = vector.broadcast %cst_76 : f32 to vector<1x1xf32>
      %175 = arith.addf %171, %174 : vector<1x1xf32>
      %176 = math.rsqrt %175 : vector<1x1xf32>
      %177 = vector.broadcast %176 : vector<1x1xf32> to vector<1x128xf32>
      %178 = arith.mulf %173, %177 : vector<1x128xf32>
      %179 = arith.mulf %178, %26 : vector<1x128xf32>
      %180 = arith.addf %179, %28 : vector<1x128xf32>
      %181 = arith.truncf %180 : vector<1x128xf32> to vector<1x128xbf16>
      %c0_77 = arith.constant 0 : index
      %c0_78 = arith.constant 0 : index
      %182 = vector.load %arg18[%c0_77, %c0_78] : memref<128x128xbf16, #tpu.memory_space<vmem>>, vector<128x128xbf16>
      %cst_79 = arith.constant dense<0.000000e+00> : vector<1x128xf32>
      %183 = tpu.matmul %181, %182, %cst_79 {dimension_numbers = #tpu.dot_dimension_numbers<[1], [0], [0], [1], [0, 0, 1, 1], [], []>} : vector<1x128xbf16>, vector<128x128xbf16>, vector<1x128xf32> -> vector<1x128xf32>
      %c0_80 = arith.constant 0 : index
      %c0_81 = arith.constant 0 : index
      %184 = vector.load %arg19[%c0_80, %c0_81] : memref<1x128xf32, #tpu.memory_space<vmem>>, vector<1x128xf32>
      %185 = arith.addf %183, %184 : vector<1x128xf32>
      %cst_82 = arith.constant 0.000000e+00 : f32
      %186 = vector.broadcast %cst_82 : f32 to vector<1x128xf32>
      %187 = arith.maximumf %185, %186 : vector<1x128xf32>
      %188 = arith.truncf %187 : vector<1x128xf32> to vector<1x128xbf16>
      %c0_83 = arith.constant 0 : index
      %c0_84 = arith.constant 0 : index
      %189 = vector.load %arg20[%c0_83, %c0_84] : memref<128x128xbf16, #tpu.memory_space<vmem>>, vector<128x128xbf16>
      %cst_85 = arith.constant dense<0.000000e+00> : vector<1x128xf32>
      %190 = tpu.matmul %188, %189, %cst_85 {dimension_numbers = #tpu.dot_dimension_numbers<[1], [0], [0], [1], [0, 0, 1, 1], [], []>} : vector<1x128xbf16>, vector<128x128xbf16>, vector<1x128xf32> -> vector<1x128xf32>
      %c0_86 = arith.constant 0 : index
      %c0_87 = arith.constant 0 : index
      %191 = vector.load %arg21[%c0_86, %c0_87] : memref<1x128xf32, #tpu.memory_space<vmem>>, vector<1x128xf32>
      %192 = arith.addf %190, %191 : vector<1x128xf32>
      %c0_88 = arith.constant 0 : index
      %c0_89 = arith.constant 0 : index
      %c0_90 = arith.constant 0 : index
      %193 = vector.load %arg22[%c0_88, %c0_89, %c0_90] : memref<1x1x128xf32, #tpu.memory_space<vmem>>, vector<1x1x128xf32>
      %194 = vector.shape_cast %193 : vector<1x1x128xf32> to vector<1x128xf32>
      %195 = vector.shape_cast %192 : vector<1x128xf32> to vector<1x1x128xf32>
      tpu.vector_store %arg22[%c0_88, %c0_89, %c0_90], %195 {strides = array<i32>} : memref<1x1x128xf32, #tpu.memory_space<vmem>>, vector<1x1x128xf32>,
    } else {
    }
    return
  }
  func.func @transform_0(%arg0: i32, %arg1: i32) -> (i32, i32, i32) {
    %c0_i32 = arith.constant 0 : i32
    %c0_i32_0 = arith.constant 0 : i32
    %c0_i32_1 = arith.constant 0 : i32
    return %arg0, %c0_i32, %c0_i32_0 : i32, i32, i32
  }
  func.func @transform_1(%arg0: i32, %arg1: i32) -> (i32, i32, i32) {
    %c0_i32 = arith.constant 0 : i32
    %c0_i32_0 = arith.constant 0 : i32
    %c0_i32_1 = arith.constant 0 : i32
    return %arg0, %c0_i32, %c0_i32_0 : i32, i32, i32
  }
  func.func @transform_2(%arg0: i32, %arg1: i32) -> (i32, i32) {
    %c0_i32 = arith.constant 0 : i32
    %c0_i32_0 = arith.constant 0 : i32
    %c0_i32_1 = arith.constant 0 : i32
    return %c0_i32, %c0_i32_0 : i32, i32
  }
  func.func @transform_3(%arg0: i32, %arg1: i32) -> (i32, i32) {
    %c0_i32 = arith.constant 0 : i32
    %c0_i32_0 = arith.constant 0 : i32
    %c0_i32_1 = arith.constant 0 : i32
    return %c0_i32, %c0_i32_0 : i32, i32
  }
  func.func @transform_4(%arg0: i32, %arg1: i32) -> (i32, i32, i32) {
    %c0_i32 = arith.constant 0 : i32
    %c0_i32_0 = arith.constant 0 : i32
    %c0_i32_1 = arith.constant 0 : i32
    return %arg1, %c0_i32, %c0_i32_0 : i32, i32, i32
  }
  func.func @transform_5(%arg0: i32, %arg1: i32) -> (i32, i32, i32) {
    %c0_i32 = arith.constant 0 : i32
    %c0_i32_0 = arith.constant 0 : i32
    %c0_i32_1 = arith.constant 0 : i32
    return %arg1, %c0_i32, %c0_i32_0 : i32, i32, i32
  }
  func.func @transform_6(%arg0: i32, %arg1: i32) -> (i32, i32, i32) {
    %c0_i32 = arith.constant 0 : i32
    %c0_i32_0 = arith.constant 0 : i32
    %c0_i32_1 = arith.constant 0 : i32
    return %arg1, %c0_i32, %c0_i32_0 : i32, i32, i32
  }
  func.func @transform_7(%arg0: i32, %arg1: i32) -> (i32, i32, i32) {
    %c0_i32 = arith.constant 0 : i32
    %c0_i32_0 = arith.constant 0 : i32
    %c0_i32_1 = arith.constant 0 : i32
    return %arg1, %c0_i32, %c0_i32_0 : i32, i32, i32
  }
  func.func @transform_8(%arg0: i32, %arg1: i32) -> (i32, i32, i32) {
    %c0_i32 = arith.constant 0 : i32
    %c0_i32_0 = arith.constant 0 : i32
    %c0_i32_1 = arith.constant 0 : i32
    return %arg1, %c0_i32, %c0_i32_0 : i32, i32, i32
  }
  func.func @transform_9(%arg0: i32, %arg1: i32) -> (i32, i32, i32) {
    %c0_i32 = arith.constant 0 : i32
    %c0_i32_0 = arith.constant 0 : i32
    %c0_i32_1 = arith.constant 0 : i32
    return %arg1, %c0_i32, %c0_i32_0 : i32, i32, i32
  }
  func.func @transform_10(%arg0: i32, %arg1: i32) -> (i32, i32, i32) {
    %c0_i32 = arith.constant 0 : i32
    %c0_i32_0 = arith.constant 0 : i32
    %c0_i32_1 = arith.constant 0 : i32
    return %arg1, %c0_i32, %c0_i32_0 : i32, i32, i32
  }
  func.func @transform_11(%arg0: i32, %arg1: i32) -> (i32, i32, i32) {
    %c0_i32 = arith.constant 0 : i32
    %c0_i32_0 = arith.constant 0 : i32
    %c0_i32_1 = arith.constant 0 : i32
    return %arg1, %c0_i32, %c0_i32_0 : i32, i32, i32
  }
  func.func @transform_12(%arg0: i32, %arg1: i32) -> (i32, i32, i32) {
    %c0_i32 = arith.constant 0 : i32
    %c0_i32_0 = arith.constant 0 : i32
    %c0_i32_1 = arith.constant 0 : i32
    return %arg1, %c0_i32, %c0_i32_0 : i32, i32, i32
  }
  func.func @transform_13(%arg0: i32, %arg1: i32) -> (i32, i32, i32) {
    %c0_i32 = arith.constant 0 : i32
    %c0_i32_0 = arith.constant 0 : i32
    %c0_i32_1 = arith.constant 0 : i32
    return %arg1, %c0_i32, %c0_i32_0 : i32, i32, i32
  }
  func.func @transform_14(%arg0: i32, %arg1: i32) -> (i32, i32, i32) {
    %c0_i32 = arith.constant 0 : i32
    %c0_i32_0 = arith.constant 0 : i32
    %c0_i32_1 = arith.constant 0 : i32
    return %arg1, %c0_i32, %c0_i32_0 : i32, i32, i32
  }
  func.func @transform_15(%arg0: i32, %arg1: i32) -> (i32, i32, i32) {
    %c0_i32 = arith.constant 0 : i32
    %c0_i32_0 = arith.constant 0 : i32
    %c0_i32_1 = arith.constant 0 : i32
    return %arg1, %c0_i32, %c0_i32_0 : i32, i32, i32
  }
  func.func @transform_16(%arg0: i32, %arg1: i32) -> (i32, i32) {
    %c0_i32 = arith.constant 0 : i32
    %c0_i32_0 = arith.constant 0 : i32
    %c0_i32_1 = arith.constant 0 : i32
    return %c0_i32, %c0_i32_0 : i32, i32
  }
  func.func @transform_17(%arg0: i32, %arg1: i32) -> (i32, i32) {
    %c0_i32 = arith.constant 0 : i32
    %c0_i32_0 = arith.constant 0 : i32
    %c0_i32_1 = arith.constant 0 : i32
    return %c0_i32, %c0_i32_0 : i32, i32
  }
  func.func @transform_18(%arg0: i32, %arg1: i32) -> (i32, i32) {
    %c0_i32 = arith.constant 0 : i32
    %c0_i32_0 = arith.constant 0 : i32
    %c0_i32_1 = arith.constant 0 : i32
    return %c0_i32, %c0_i32_0 : i32, i32
  }
  func.func @transform_19(%arg0: i32, %arg1: i32) -> (i32, i32) {
    %c0_i32 = arith.constant 0 : i32
    %c0_i32_0 = arith.constant 0 : i32
    %c0_i32_1 = arith.constant 0 : i32
    return %c0_i32, %c0_i32_0 : i32, i32
  }
  func.func @transform_20(%arg0: i32, %arg1: i32) -> (i32, i32, i32) {
    %c0_i32 = arith.constant 0 : i32
    %c0_i32_0 = arith.constant 0 : i32
    %c0_i32_1 = arith.constant 0 : i32
    return %arg0, %c0_i32, %c0_i32_0 : i32, i32, i32
  }
}

</mosaic_0001>

<bundles_post_ra>
// kernel: longformer_class_forward.1
= control target key start
LH: loop header
LB: loop body
LE: loop exit
PB: predicated region body
PF: predicated region fallthrough
CT: control target
= control target key end

     0   :  { %s11619_s0 = inlined_call_operand.vmem [shape: f32[2,128,128], index: 0, kind: input, shape index: {}]   ;;  %s11620_s1 = inlined_call_operand.vmem [shape: f32[2,1,128], index: 1, kind: input, shape index: {}]   ;;  %s11621_s2 = inlined_call_operand.vmem [shape: f32[1,128], index: 2, kind: input, shape index: {}]   ;;  %s11622_s3 = inlined_call_operand.vmem [shape: f32[1,128], index: 3, kind: input, shape index: {}]   ;;  %s11623_s4 = inlined_call_operand.vmem [shape: bf16[2,128,384], index: 4, kind: input, shape index: {}]   ;;  %s11624_s5 = inlined_call_operand.vmem [shape: f32[2,1,384], index: 5, kind: input, shape index: {}]   ;;  %s11625_s6 = inlined_call_operand.vmem [shape: bf16[2,128,128], index: 6, kind: input, shape index: {}]   ;;  %s11626_s7 = inlined_call_operand.vmem [shape: f32[2,1,128], index: 7, kind: input, shape index: {}]   ;;  %s11627_s8 = inlined_call_operand.vmem [shape: f32[2,1,128], index: 8, kind: input, shape index: {}]   ;;  %s11628_s9 = inlined_call_operand.vmem [shape: f32[2,1,128], index: 9, kind: input, shape index: {}]   ;;  %s11629_s10 = inlined_call_operand.vmem [shape: bf16[2,128,256], index: 10, kind: input, shape index: {}]   ;;  %s11630_s11 = inlined_call_operand.vmem [shape: f32[2,1,256], index: 11, kind: input, shape index: {}]   ;;  %s11631_s12 = inlined_call_operand.vmem [shape: bf16[2,256,128], index: 12, kind: input, shape index: {}]   ;;  %s11632_s13 = inlined_call_operand.vmem [shape: f32[2,1,128], index: 13, kind: input, shape index: {}]   ;;  %s11633_s14 = inlined_call_operand.vmem [shape: f32[2,1,128], index: 14, kind: input, shape index: {}]   ;;  %s11634_s15 = inlined_call_operand.vmem [shape: f32[2,1,128], index: 15, kind: input, shape index: {}]   ;;  %s11635_s16 = inlined_call_operand.vmem [shape: bf16[128,128], index: 16, kind: input, shape index: {}]   ;;  %s11636_s17 = inlined_call_operand.vmem [shape: f32[1,128], index: 17, kind: input, shape index: {}]   ;;  %s11637_s18 = inlined_call_operand.vmem [shape: bf16[128,128], index: 18, kind: input, shape index: {}]   ;;  %s11638_s19 = inlined_call_operand.vmem [shape: f32[1,128], index: 19, kind: input, shape index: {}]   ;;  %s11639_s20 = inlined_call_operand.hbm [shape: f32[2,1,128], index: 20, kind: output, shape index: {}]  }
   0x1   :  { %11790 = sst [smem:[#allocation165_spill]] %s11619_s0 }
   0x2   :  { %11791 = sst [smem:[#allocation166_spill]] %s11620_s1 }
   0x3   :  { %11792 = sst [smem:[#allocation167_spill]] %s11621_s2 }
   0x4   :  { %11793 = sst [smem:[#allocation168_spill]] %s11622_s3 }
   0x5   :  { %11794 = sst [smem:[#allocation169_spill]] %s11623_s4 }
   0x6   :  { %11795 = sst [smem:[#allocation170_spill]] %s11624_s5 }
   0x7   :  { %11796 = sst [smem:[#allocation171_spill]] %s11625_s6 }
   0x8   :  { %11797 = sst [smem:[#allocation172_spill]] %s11629_s10 }
   0x9   :  { %11798 = sst [smem:[#allocation173_spill]] %s11635_s16 }
   0xa   :  { %11799 = sst [smem:[#allocation174_spill]] %s11636_s17 }
   0xb   :  { %11800 = sst [smem:[#allocation175_spill]] %s11637_s18 }
   0xc   :  { %11801 = sst [smem:[#allocation176_spill]] %s11638_s19 }
   0xd   :  { %11802 = sst [smem:[#allocation177_spill]] %s11639_s20 }
   0xe   :  { %25 = vsyncpa [#allocation4], 0 }
   0xf   :  { %27 = vsyncpa [#allocation4 + $0x1], 0  ;;  %s8507_s1 = smov 0   ;;  %s8509_s22 = smov 0  }
  0x10   :  { %s8511_s23 = smov 0   ;;  %s8513_s24 = smov 0  }
  0x11   :  { %s8515_s2 = smov 0   ;;  %s8517_s25 = smov 0  }
  0x12   :  { %s8519_s3 = smov 0   ;;  %s8521_s26 = smov 0  }
  0x13 LB: > { %11803 = sst [smem:[#allocation6_spill]] %s8361_s1  ;;  %s6623_s27 = sadd.s32 4294967295, %s8389_s26   ;;  %s8389_s26 = sphi %s8521_s26, %s33_s26   ;;  %s8385_s3 = sphi %s8519_s3, %s12248_s3   ;;  %s8381_s25 = sphi %s8517_s25, %s12247_s25   ;;  %s8377_s2 = sphi %s8515_s2, %s12246_s2   ;;  %s8373_s24 = sphi %s8513_s24, %s12245_s24   ;;  %s8369_s23 = sphi %s8511_s23, %s12244_s23   ;;  %s8365_s22 = sphi %s8509_s22, %s12250_s22   ;;  %s8361_s1 = sphi %s8507_s1, %s12249_s1  }
  0x14   : > { %11804 = sst [smem:[#allocation7_spill]] %s8369_s23  ;;  %s6624_s28 = sadd.s32 4294967294, %s8389_s26  }
  0x15   : > { %11805 = sst [smem:[#allocation8_spill]] %s8373_s24  ;;  %s42_s4 = sadd.s32 1, %s8381_s25 }
  0x16   : > { %11806 = sst [smem:[#allocation9_spill]] %s8377_s2  ;;  %p43_p0 = scmp.ge.s32.totalorder %s42_s4, 2 }
  0x17   : > { %11807 = sst [smem:[#allocation10_spill]] %s8381_s25  ;;  %s45_s29 = sadd.s32 1, %s8385_s3 }
  0x18   : > { %11808 = sst [smem:[#allocation11_spill]] %s8385_s3  ;;  %p552_p1 = scmp.ne.s32.totalorder %s8369_s23, %s8365_s22 }
  0x19   : > { %11809 = sst [smem:[#allocation12_spill]] %s8389_s26  ;;  %p553_p2 = scmp.eq.s32.totalorder %s6623_s27, 3 }
  0x1a   : > { %s12252_s4 = smov (%p43_p0, %s42_s4), 0  ;;  %s12254_s29 = smov (!%p43_p0, %s45_s29), %s8385_s3 }
  0x1b   : > { %11810 = sst [smem:[#allocation13_spill]] %s12252_s4  ;;  %p8556_p3 = por %p553_p2, %p552_p1 }
  0x1c   : > { %p558_p4 = scmp.ne.s32.totalorder %s8365_s22, %s8361_s1  ;;  %p47_p5 = scmp.ge.s32.totalorder %s12254_s29, 2 }
  0x1d   : > { %s11811_s30 = scalar_select %p8556_p3, 1, 0 }
  0x1e   : > { %p559_p6 = scmp.eq.s32.totalorder %s6624_s28, 3  ;;  %p6627_p7 = scmp.ge.s32.totalorder %s8389_s26, 1 }
  0x1f   : > { %11812 = sst [smem:[#allocation14_spill]] %s11811_s30  ;;  %p691_p8 = scmp.lt.s32.totalorder %s8389_s26, 5 }
  0x20   : > { %s12256_s29 = smov (%p47_p5, %s12254_s29), 0  ;;  %p8566_p9 = por %p559_p6, %p558_p4 }
  0x21   : > { %11813 = sst [smem:[#allocation15_spill]] %s12256_s29  ;;  %p692_p10 = pnand %p6627_p7, %p691_p8 }
  0x22   : > { %s11814_s0 = scalar_select %p8566_p9, 1, 0 }
  0x23   : > { %s539_s21 = ssub.s32 %s8385_s3, %s12256_s29  ;;  %s542_s27 = sadd.s32 1, %s8369_s23 }
  0x24   : > { %11815 = sst [smem:[#allocation16_spill]] %s11814_s0  ;;  %p540_p11 = scmp.eq.s32.totalorder %s539_s21, 0 }
  0x25   : > { %695 = sbr.rel (%p692_p10) target bundleno = 6458 (0x193a), region = 100 }
  0x26   : > { %s8574_s4 = scalar_select %p540_p11, %s8369_s23, %s542_s27  }
  0x28   : > { %11816 = sst [smem:[#allocation17_spill]] %s8574_s4 }
  0x2c   : > { %p797_p12 = scmp.lt.s32.totalorder %s8377_s2, 1  ;;  %p805_p13 = scmp.lt.s32.totalorder %s8373_s24, 1 }
  0x2d   : > { %s11819_s1 = sld [smem:[#allocation165_spill]]  ;;  %s11821_s18 = sld [smem:[#allocation169_spill]] }
  0x2e   : > { %s8580_s25 = scalar_select %p797_p12, %s8377_s2, 1 }
  0x2f   : > { %s8583_s0 = scalar_select %p805_p13, %s8373_s24, 1 }
  0x30   : > { %11817 = sst [smem:[#allocation18_spill]] %s8580_s25  ;;  %s6826_s21 = sshll.u32 %s8580_s25, 7 }
  0x31   : > { %s7619_s20 = smul.u32 192, %s8583_s0  ;;  %s6827_s2 = sshll.u32 %s8583_s0, 6 }
  0x32   : > { %s7620_s30 = smul.u32 3, %s8583_s0  ;;  %s11822_s6 = sld [smem:[#allocation171_spill]] }
  0x33   : > { %s8593_s26 = scalar_lea.vmem %s11819_s1, %s6826_s21  ;;  %s8601_s16 = scalar_lea.vmem %s11821_s18, %s7619_s20 }
  0x34   : > { %11820 = sst [smem:[#allocation19_spill]] %s8593_s26  ;;  %s11823_s5 = sld [smem:[#allocation170_spill]] }
  0x35   : > { %s6828_s24 = sshll.u32 %s8583_s0, 7  ;;  %s11824_s10 = sld [smem:[#allocation172_spill]] }
  0x36   : > { %s8640_s25 = scalar_lea.vmem %s11631_s12, %s6828_s24  ;;  %s844_s19 = scalar_lea.vmem %s11632_s13, %s8583_s0 }
  0x37   : > { %s11826_s4 = sld [smem:[#allocation8_spill]] }
  0x38   : > { %s8606_s28 = scalar_lea.vmem %s11822_s6, %s6827_s2  ;;  %s6635_s2 = sshll.u32 %s8583_s0, 1 }
  0x39   : > { %s8635_s21 = scalar_lea.vmem %s11630_s11, %s6635_s2  ;;  %s847_s6 = scalar_lea.vmem %s11633_s14, %s8583_s0 }
  0x3a   : > { %s8611_s1 = scalar_lea.vmem %s11823_s5, %s7620_s30  ;;  %s11825_s30 = sand.u32 1, %s8365_s22  }
  0x3b   : > { %s8630_s23 = scalar_lea.vmem %s11824_s10, %s6828_s24  ;;  %s850_s10 = scalar_lea.vmem %s11634_s15, %s8583_s0 }
  0x3c   : > { %s8656_s2 = scalar_lea.vmem [#allocation3], %s11825_s30 }
  0x3d   : > { %p6638_p0 = scmp.ne.s32.totalorder %s11826_s4, 0 }
  0x3e   : > { %s11827_s3 = sld [smem:[#allocation19_spill]] (!%p6638_p0)  ;;  %s11829_s26 = sld [smem:[#allocation168_spill]] (!%p6638_p0) }
  0x3f   : > { %855 = sbr.rel (%p6638_p0) target bundleno = 413 (0x19d), region = 104  ;;  %s11828_s20 = sld [smem:[#allocation167_spill]] (!%p6638_p0) }
  0x44   : > { %v856_v0 = vld [vmem:[%s11827_s3] sm:$0xff] (!%p6638_p0)  ;;  %v858_v1 = vld [vmem:[%s11827_s3 + $0x10] sm:$0xff] (!%p6638_p0)  ;;  %v857_v2 = vld [vmem:[%s11827_s3 + $0x8] sm:$0xff] (!%p6638_p0) }
  0x45   : > { %874 = vadd.xlane.f32.xlu0 (!%p6638_p0), %v856_v0  ;;  %878 = vadd.xlane.f32.xlu1 (!%p6638_p0), %v858_v1  ;;  %v859_v3 = vld [vmem:[%s11827_s3 + $0x18] sm:$0xff] (!%p6638_p0)  ;;  %v860_v4 = vld [vmem:[%s11827_s3 + $0x20] sm:$0xff] (!%p6638_p0)  ;;  %v861_v5 = vld [vmem:[%s11827_s3 + $0x28] sm:$0xff] (!%p6638_p0) }
  0x46   : > { %v862_v6 = vld [vmem:[%s11827_s3 + $0x30] sm:$0xff]  ;;  %v863_v7 = vld [vmem:[%s11827_s3 + $0x38] sm:$0xff]  ;;  %v864_v8 = vld [vmem:[%s11827_s3 + $0x40] sm:$0xff] }
  0x47   : > { %v865_v9 = vld [vmem:[%s11827_s3 + $0x48] sm:$0xff]  ;;  %v866_v10 = vld [vmem:[%s11827_s3 + $0x50] sm:$0xff]  ;;  %v8671_v11 = vld [vmem:[%s11827_s3 + $0x58] sm:$0xff] }
  0x48   : > { %v8675_v12 = vld [vmem:[%s11827_s3 + $0x60] sm:$0xff]  ;;  %v8678_v13 = vld [vmem:[%s11827_s3 + $0x68] sm:$0xff]  ;;  %v8683_v14 = vld [vmem:[%s11827_s3 + $0x70] sm:$0xff] }
  0x49   : > { %876 = vadd.xlane.f32.xlu0 %v857_v2  ;;  %880 = vadd.xlane.f32.xlu1 %v859_v3  ;;  %v8686_v15 = vld [vmem:[%s11827_s3 + $0x78] sm:$0xff] }
  0x4d   : > { %882 = vadd.xlane.f32.xlu0 %v860_v4  ;;  %884 = vadd.xlane.f32.xlu1 %v861_v5 }
  0x51   : > { %886 = vadd.xlane.f32.xlu0 %v862_v6  ;;  %888 = vadd.xlane.f32.xlu1 %v863_v7 }
  0x55   : > { %890 = vadd.xlane.f32.xlu0 %v864_v8  ;;  %892 = vadd.xlane.f32.xlu1 %v865_v9 }
  0x59   : > { %894 = vadd.xlane.f32.xlu0 %v866_v10  ;;  %896 = vadd.xlane.f32.xlu1 %v8671_v11 }
  0x5d   : > { %898 = vadd.xlane.f32.xlu0 %v8675_v12  ;;  %900 = vadd.xlane.f32.xlu1 %v8678_v13 }
  0x61   : > { %902 = vadd.xlane.f32.xlu0 %v8683_v14  ;;  %904 = vadd.xlane.f32.xlu1 %v8686_v15 }
  0xd2   : > { %v875_v16 = vpop.xlane.xlu0 %874  ;;  %v879_v17 = vpop.xlane.xlu1 %878 }
  0xd3   : > { %v907_v18 = vmul.f32 0.0078125, %v875_v16  ;;  %v909_v19 = vmul.f32 0.0078125, %v879_v17 }
  0xd5   : > { %v8690_v20 = vsub.f32 %v856_v0, %v907_v18  ;;  %v8692_v21 = vsub.f32 %v858_v1, %v909_v19 }
  0xd6   : > { %v877_v22 = vpop.xlane.xlu0 %876  ;;  %v881_v23 = vpop.xlane.xlu1 %880 }
  0xd7   : > { %v908_v24 = vmul.f32 0.0078125, %v877_v22  ;;  %v939_v25 = vmul.f32 %v8690_v20, %v8690_v20  ;;  %v910_v26 = vmul.f32 0.0078125, %v881_v23  ;;  %v941_v29 = vmul.f32 %v8692_v21, %v8692_v21 }
  0xd9   : > { %v8696_v27 = vsub.f32 %v857_v2, %v908_v24  ;;  %955 = vadd.xlane.f32.xlu0 %v939_v25  ;;  %v8698_v28 = vsub.f32 %v859_v3, %v910_v26 }
  0xda   : > { %v883_v30 = vpop.xlane.xlu0 %882  ;;  %v885_v31 = vpop.xlane.xlu1 %884 }
  0xdb   : > { %v911_v32 = vmul.f32 0.0078125, %v883_v30  ;;  %v940_v33 = vmul.f32 %v8696_v27, %v8696_v27  ;;  %v912_v34 = vmul.f32 0.0078125, %v885_v31  ;;  %v942_v37 = vmul.f32 %v8698_v28, %v8698_v28 }
  0xdd   : > { %v8704_v35 = vsub.f32 %v860_v4, %v911_v32  ;;  %959 = vadd.xlane.f32.xlu0 %v941_v29  ;;  %957 = vadd.xlane.f32.xlu1 %v940_v33  ;;  %v8706_v36 = vsub.f32 %v861_v5, %v912_v34 }
  0xde   : > { %v887_v38 = vpop.xlane.xlu0 %886  ;;  %v889_v39 = vpop.xlane.xlu1 %888 }
  0xdf   : > { %v913_v40 = vmul.f32 0.0078125, %v887_v38  ;;  %v943_v41 = vmul.f32 %v8704_v35, %v8704_v35  ;;  %v914_v42 = vmul.f32 0.0078125, %v889_v39  ;;  %v944_v45 = vmul.f32 %v8706_v36, %v8706_v36 }
  0xe1   : > { %v8712_v43 = vsub.f32 %v862_v6, %v913_v40  ;;  %961 = vadd.xlane.f32.xlu1 %v942_v37  ;;  %963 = vadd.xlane.f32.xlu0 %v943_v41  ;;  %v8714_v44 = vsub.f32 %v863_v7, %v914_v42  ;;  %v8762_v42 = vld [vmem:[%s11828_s20] ss:$0 sm:$0xff] }
  0xe2   : > { %v891_v46 = vpop.xlane.xlu0 %890  ;;  %v893_v47 = vpop.xlane.xlu1 %892 }
  0xe3   : > { %v915_v48 = vmul.f32 0.0078125, %v891_v46  ;;  %v945_v49 = vmul.f32 %v8712_v43, %v8712_v43  ;;  %v916_v50 = vmul.f32 0.0078125, %v893_v47  ;;  %v946_v53 = vmul.f32 %v8714_v44, %v8714_v44 }
  0xe5   : > { %v8720_v51 = vsub.f32 %v864_v8, %v915_v48  ;;  %965 = vadd.xlane.f32.xlu1 %v944_v45  ;;  %967 = vadd.xlane.f32.xlu0 %v945_v49  ;;  %v8722_v52 = vsub.f32 %v865_v9, %v916_v50  ;;  %v8768_v50 = vld [vmem:[%s11829_s26] ss:$0 sm:$0xff] }
  0xe6   : > { %v895_v54 = vpop.xlane.xlu0 %894  ;;  %v897_v55 = vpop.xlane.xlu1 %896 }
  0xe7   : > { %v917_v56 = vmul.f32 0.0078125, %v895_v54  ;;  %v947_v57 = vmul.f32 %v8720_v51, %v8720_v51  ;;  %v918_v58 = vmul.f32 0.0078125, %v897_v55  ;;  %v948_v61 = vmul.f32 %v8722_v52, %v8722_v52 }
  0xe9   : > { %v8728_v59 = vsub.f32 %v866_v10, %v917_v56  ;;  %969 = vadd.xlane.f32.xlu1 %v946_v53  ;;  %971 = vadd.xlane.f32.xlu0 %v947_v57  ;;  %v8731_v60 = vsub.f32 %v8671_v11, %v918_v58 }
  0xea   : > { %v899_v62 = vpop.xlane.xlu0 %898  ;;  %v901_v63 = vpop.xlane.xlu1 %900 }
  0xeb   : > { %v919_v0 = vmul.f32 0.0078125, %v899_v62  ;;  %v949_v1 = vmul.f32 %v8728_v59, %v8728_v59  ;;  %v920_v2 = vmul.f32 0.0078125, %v901_v63  ;;  %v950_v5 = vmul.f32 %v8731_v60, %v8731_v60 }
  0xed   : > { %v8738_v3 = vsub.f32 %v8675_v12, %v919_v0  ;;  %973 = vadd.xlane.f32.xlu1 %v948_v61  ;;  %975 = vadd.xlane.f32.xlu0 %v949_v1  ;;  %v8741_v4 = vsub.f32 %v8678_v13, %v920_v2 }
  0xee   : > { %v903_v6 = vpop.xlane.xlu0 %902  ;;  %v905_v7 = vpop.xlane.xlu1 %904 }
  0xef   : > { %v921_v8 = vmul.f32 0.0078125, %v903_v6  ;;  %v951_v9 = vmul.f32 %v8738_v3, %v8738_v3  ;;  %v922_v10 = vmul.f32 0.0078125, %v905_v7  ;;  %v952_v13 = vmul.f32 %v8741_v4, %v8741_v4 }
  0xf1   : > { %v8748_v11 = vsub.f32 %v8683_v14, %v921_v8  ;;  %977 = vadd.xlane.f32.xlu1 %v950_v5  ;;  %979 = vadd.xlane.f32.xlu0 %v951_v9  ;;  %v8751_v12 = vsub.f32 %v8686_v15, %v922_v10 }
  0xf3   : > { %v953_v16 = vmul.f32 %v8748_v11, %v8748_v11  ;;  %v954_v17 = vmul.f32 %v8751_v12, %v8751_v12 }
  0xf5   : > { %981 = vadd.xlane.f32.xlu1 %v952_v13  ;;  %983 = vadd.xlane.f32.xlu0 %v953_v16 }
  0xf9   : > { %985 = vadd.xlane.f32.xlu1 %v954_v17 }
 0x166   : > { %v956_v18 = vpop.xlane.xlu0 %955 }
 0x167   : > { %v987_v14 = vmul.f32 0.0078125, %v956_v18 }
 0x169   : > { %v1003_v19 = vadd.f32 1e-12, %v987_v14 }
 0x16a   : > { %v958_v22 = vpop.xlane.xlu1 %957  ;;  %v960_v23 = vpop.xlane.xlu0 %959 }
 0x16b   : > { %7702 = vrsqrt.f32 %v1003_v19  ;;  %v988_v15 = vmul.f32 0.0078125, %v958_v22  ;;  %v989_v24 = vmul.f32 0.0078125, %v960_v23 }
 0x16d   : > { %v1004_v25 = vadd.f32 1e-12, %v988_v15  ;;  %v1005_v26 = vadd.f32 1e-12, %v989_v24 }
 0x16e   : > { %v962_v29 = vpop.xlane.xlu1 %961  ;;  %v964_v30 = vpop.xlane.xlu0 %963 }
 0x16f   : > { %7704 = vrsqrt.f32 %v1004_v25  ;;  %v990_v31 = vmul.f32 0.0078125, %v962_v29  ;;  %v991_v32 = vmul.f32 0.0078125, %v964_v30 }
 0x170   : > { %7706 = vrsqrt.f32 %v1005_v26 }
 0x171   : > { %v1006_v33 = vadd.f32 1e-12, %v990_v31  ;;  %v1007_v34 = vadd.f32 1e-12, %v991_v32 }
 0x172   : > { %v966_v37 = vpop.xlane.xlu1 %965  ;;  %v968_v38 = vpop.xlane.xlu0 %967 }
 0x173   : > { %7708 = vrsqrt.f32 %v1006_v33  ;;  %v992_v39 = vmul.f32 0.0078125, %v966_v37  ;;  %v993_v40 = vmul.f32 0.0078125, %v968_v38 }
 0x174   : > { %7710 = vrsqrt.f32 %v1007_v34 }
 0x175   : > { %v7703_v41 = vpop.eup %7702  ;;  %v1008_v45 = vadd.f32 1e-12, %v992_v39  ;;  %v1009_v46 = vadd.f32 1e-12, %v993_v40 }
 0x176   : > { %v1035_v47 = vmul.f32 %v7703_v41, %v8690_v20  ;;  %v970_v48 = vpop.xlane.xlu1 %969  ;;  %v972_v49 = vpop.xlane.xlu0 %971 }
 0x177   : > { %7712 = vrsqrt.f32 %v1008_v45  ;;  %v994_v53 = vmul.f32 0.0078125, %v970_v48  ;;  %v995_v54 = vmul.f32 0.0078125, %v972_v49 }
 0x178   : > { %v1057_v55 = vmul.f32 %v8762_v42, %v1035_v47  ;;  %7714 = vrsqrt.f32 %v1009_v46 }
 0x179   : > { %v7705_v56 = vpop.eup %7704  ;;  %v1010_v57 = vadd.f32 1e-12, %v994_v53  ;;  %v1011_v58 = vadd.f32 1e-12, %v995_v54 }
 0x17a   : > { %v7707_v61 = vpop.eup %7706  ;;  %v1079_v62 = vadd.f32 %v8768_v50, %v1057_v55  ;;  %v1036_v20 = vmul.f32 %v7705_v56, %v8696_v27  ;;  %v974_v63 = vpop.xlane.xlu1 %973 }
 0x17b   : > { %v976_v0 = vpop.xlane.xlu0 %975  ;;  %v1037_v1 = vmul.f32 %v7707_v61, %v8692_v21  ;;  %7716 = vrsqrt.f32 %v1010_v57  ;;  %v996_v2 = vmul.f32 0.0078125, %v974_v63 }
 0x17c   : > { %v997_v5 = vmul.f32 0.0078125, %v976_v0  ;;  %1095 = vst [vmem:[#allocation2] sm:$0xff] %v1079_v62  ;;  %v1058_v6 = vmul.f32 %v8762_v42, %v1036_v20  ;;  %7718 = vrsqrt.f32 %v1011_v58 }
 0x17d   : > { %v7709_v7 = vpop.eup %7708  ;;  %v1059_v8 = vmul.f32 %v8762_v42, %v1037_v1  ;;  %v1012_v9 = vadd.f32 1e-12, %v996_v2 }
 0x17e   : > { %v1013_v10 = vadd.f32 1e-12, %v997_v5  ;;  %v7711_v13 = vpop.eup %7710  ;;  %v1080_v16 = vadd.f32 %v8768_v50, %v1058_v6  ;;  %v1038_v27 = vmul.f32 %v7709_v7, %v8698_v28  ;;  %v978_v17 = vpop.xlane.xlu1 %977 }
 0x17f   : > { %v980_v18 = vpop.xlane.xlu0 %979  ;;  %v1081_v21 = vadd.f32 %v8768_v50, %v1059_v8  ;;  %v1039_v14 = vmul.f32 %v7711_v13, %v8704_v35  ;;  %7720 = vrsqrt.f32 %v1012_v9  ;;  %v998_v19 = vmul.f32 0.0078125, %v978_v17 }
 0x180   : > { %1096 = vst [vmem:[#allocation2 + $0x8] sm:$0xff] %v1080_v16  ;;  %v1060_v22 = vmul.f32 %v8762_v42, %v1038_v27  ;;  %7722 = vrsqrt.f32 %v1013_v10  ;;  %v999_v23 = vmul.f32 0.0078125, %v980_v18 }
 0x181   : > { %v7713_v15 = vpop.eup %7712  ;;  %1097 = vst [vmem:[#allocation2 + $0x10] sm:$0xff] %v1081_v21  ;;  %v1061_v24 = vmul.f32 %v8762_v42, %v1039_v14  ;;  %v1014_v25 = vadd.f32 1e-12, %v998_v19 }
 0x182   : > { %v7715_v26 = vpop.eup %7714  ;;  %v1082_v28 = vadd.f32 %v8768_v50, %v1060_v22  ;;  %v1040_v29 = vmul.f32 %v7713_v15, %v8706_v36  ;;  %v1015_v30 = vadd.f32 1e-12, %v999_v23  ;;  %v982_v31 = vpop.xlane.xlu1 %981 }
 0x183   : > { %v984_v35 = vpop.xlane.xlu0 %983  ;;  %v1083_v32 = vadd.f32 %v8768_v50, %v1061_v24  ;;  %v1041_v33 = vmul.f32 %v7715_v26, %v8712_v43  ;;  %7724 = vrsqrt.f32 %v1014_v25  ;;  %v1000_v34 = vmul.f32 0.0078125, %v982_v31 }
 0x184   : > { %1098 = vst [vmem:[#allocation2 + $0x18] sm:$0xff] %v1082_v28  ;;  %v1062_v37 = vmul.f32 %v8762_v42, %v1040_v29  ;;  %7726 = vrsqrt.f32 %v1015_v30  ;;  %v1001_v38 = vmul.f32 0.0078125, %v984_v35 }
 0x185   : > { %v7717_v39 = vpop.eup %7716  ;;  %1099 = vst [vmem:[#allocation2 + $0x20] sm:$0xff] %v1083_v32  ;;  %v1063_v40 = vmul.f32 %v8762_v42, %v1041_v33  ;;  %v1016_v41 = vadd.f32 1e-12, %v1000_v34 }
 0x186   : > { %v7719_v36 = vpop.eup %7718  ;;  %v1084_v45 = vadd.f32 %v8768_v50, %v1062_v37  ;;  %v1042_v46 = vmul.f32 %v7717_v39, %v8714_v44  ;;  %v1017_v47 = vadd.f32 1e-12, %v1001_v38  ;;  %v986_v48 = vpop.xlane.xlu1 %985 }
 0x187   : > { %v1085_v43 = vadd.f32 %v8768_v50, %v1063_v40  ;;  %v1043_v49 = vmul.f32 %v7719_v36, %v8720_v51  ;;  %7728 = vrsqrt.f32 %v1016_v41  ;;  %v1002_v53 = vmul.f32 0.0078125, %v986_v48 }
 0x188   : > { %1100 = vst [vmem:[#allocation2 + $0x28] sm:$0xff] %v1084_v45  ;;  %v1064_v54 = vmul.f32 %v8762_v42, %v1042_v46  ;;  %7730 = vrsqrt.f32 %v1017_v47 }
 0x189   : > { %v7721_v55 = vpop.eup %7720  ;;  %1101 = vst [vmem:[#allocation2 + $0x30] sm:$0xff] %v1085_v43  ;;  %v1065_v56 = vmul.f32 %v8762_v42, %v1043_v49  ;;  %v1018_v57 = vadd.f32 1e-12, %v1002_v53 }
 0x18a   : > { %v7723_v58 = vpop.eup %7722  ;;  %v1086_v44 = vadd.f32 %v8768_v50, %v1064_v54  ;;  %v1044_v61 = vmul.f32 %v7721_v55, %v8722_v52 }
 0x18b   : > { %v1087_v62 = vadd.f32 %v8768_v50, %v1065_v56  ;;  %v1045_v51 = vmul.f32 %v7723_v58, %v8728_v59  ;;  %7732 = vrsqrt.f32 %v1018_v57 }
 0x18c   : > { %1102 = vst [vmem:[#allocation2 + $0x38] sm:$0xff] %v1086_v44  ;;  %v1066_v20 = vmul.f32 %v8762_v42, %v1044_v61 }
 0x18d   : > { %v7725_v63 = vpop.eup %7724  ;;  %1103 = vst [vmem:[#allocation2 + $0x40] sm:$0xff] %v1087_v62  ;;  %v1067_v0 = vmul.f32 %v8762_v42, %v1045_v51 }
 0x18e   : > { %v7727_v1 = vpop.eup %7726  ;;  %v1088_v2 = vadd.f32 %v8768_v50, %v1066_v20  ;;  %v1046_v5 = vmul.f32 %v7725_v63, %v8731_v60 }
 0x18f   : > { %v1089_v6 = vadd.f32 %v8768_v50, %v1067_v0  ;;  %v1047_v52 = vmul.f32 %v7727_v1, %v8738_v3 }
 0x190   : > { %1104 = vst [vmem:[#allocation2 + $0x48] sm:$0xff] %v1088_v2  ;;  %v1068_v59 = vmul.f32 %v8762_v42, %v1046_v5 }
 0x191   : > { %v7729_v7 = vpop.eup %7728  ;;  %1105 = vst [vmem:[#allocation2 + $0x50] sm:$0xff] %v1089_v6  ;;  %v1069_v8 = vmul.f32 %v8762_v42, %v1047_v52 }
 0x192   : > { %v7731_v9 = vpop.eup %7730  ;;  %v1090_v10 = vadd.f32 %v8768_v50, %v1068_v59  ;;  %v1048_v13 = vmul.f32 %v7729_v7, %v8741_v4 }
 0x193   : > { %v1091_v16 = vadd.f32 %v8768_v50, %v1069_v8  ;;  %v1049_v60 = vmul.f32 %v7731_v9, %v8748_v11 }
 0x194   : > { %1106 = vst [vmem:[#allocation2 + $0x58] sm:$0xff] %v1090_v10  ;;  %v1070_v27 = vmul.f32 %v8762_v42, %v1048_v13 }
 0x195   : > { %v7733_v3 = vpop.eup %7732  ;;  %1107 = vst [vmem:[#allocation2 + $0x60] sm:$0xff] %v1091_v16  ;;  %v1071_v17 = vmul.f32 %v8762_v42, %v1049_v60 }
 0x196   : > { %v1092_v18 = vadd.f32 %v8768_v50, %v1070_v27  ;;  %v1050_v21 = vmul.f32 %v7733_v3, %v8751_v12 }
 0x197   : > { %v1093_v14 = vadd.f32 %v8768_v50, %v1071_v17 }
 0x198   : > { %1108 = vst [vmem:[#allocation2 + $0x68] sm:$0xff] %v1092_v18  ;;  %v1072_v4 = vmul.f32 %v8762_v42, %v1050_v21 }
 0x199   : > { %1109 = vst [vmem:[#allocation2 + $0x70] sm:$0xff] %v1093_v14 }
 0x19a   : > { %v1094_v19 = vadd.f32 %v8768_v50, %v1072_v4 }
 0x19c   : > { %1110 = vst [vmem:[#allocation2 + $0x78] sm:$0xff] %v1094_v19 }
 0x19d PF: > { %s11830_s30 = sld [smem:[#allocation166_spill]]  ;;  %v8825_v12 = vld [vmem:[%s8601_s16] sm:$0xff]  ;;  %v8828_v42 = vld [vmem:[%s8601_s16 + $0x8] sm:$0xf]  ;;  %v8831_v50 = vld [vmem:[%s8601_s16 + $0xc] sm:$0xff]  ;;  %s11883_s5 = scalar_lea.vmem %s11626_s7, %s8583_s0 }
 0x19e   : > { %s11831_s4 = sld [smem:[#allocation18_spill]]  ;;  %11834 = vst [vmem:[#allocation21_spill] sm:$0xff] %v8825_v12  ;;  %11835 = vst [vmem:[#allocation22_spill] sm:$0xff] %v8828_v42  ;;  %v8834_v22 = vld [vmem:[%s8601_s16 + $0x14] sm:$0xf]  ;;  %v8837_v23 = vld [vmem:[%s8601_s16 + $0x18] sm:$0xff]  ;;  %s11885_s24 = scalar_lea.vmem %s11627_s8, %s8583_s0 }
 0x19f   : > { %11836 = vst [vmem:[#allocation23_spill] sm:$0xff] %v8831_v50  ;;  %11837 = vst [vmem:[#allocation24_spill] sm:$0xff] %v8834_v22  ;;  %v8840_v15 = vld [vmem:[%s8601_s16 + $0x20] sm:$0xf]  ;;  %v8843_v24 = vld [vmem:[%s8601_s16 + $0x24] sm:$0xff]  ;;  %s11887_s18 = scalar_lea.vmem %s11628_s9, %s8583_s0 }
 0x1a0   : > { %11838 = vst [vmem:[#allocation25_spill] sm:$0xff] %v8837_v23  ;;  %11839 = vst [vmem:[#allocation26_spill] sm:$0xff] %v8840_v15  ;;  %v8846_v25 = vld [vmem:[%s8601_s16 + $0x2c] sm:$0xf]  ;;  %v8849_v26 = vld [vmem:[%s8601_s16 + $0x30] sm:$0xff] }
 0x1a1   : > { %11840 = vst [vmem:[#allocation27_spill] sm:$0xff] %v8843_v24  ;;  %11841 = vst [vmem:[#allocation28_spill] sm:$0xff] %v8846_v25  ;;  %v8852_v28 = vld [vmem:[%s8601_s16 + $0x38] sm:$0xf]  ;;  %v8855_v29 = vld [vmem:[%s8601_s16 + $0x3c] sm:$0xff] }
 0x1a2   : > { %11842 = vst [vmem:[#allocation29_spill] sm:$0xff] %v8849_v26  ;;  %11843 = vst [vmem:[#allocation30_spill] sm:$0xff] %v8852_v28  ;;  %v8858_v30 = vld [vmem:[%s8601_s16 + $0x44] sm:$0xf]  ;;  %v8861_v31 = vld [vmem:[%s8601_s16 + $0x48] sm:$0xff] }
 0x1a3   : > { %11844 = vst [vmem:[#allocation31_spill] sm:$0xff] %v8855_v29  ;;  %11845 = vst [vmem:[#allocation32_spill] sm:$0xff] %v8858_v30  ;;  %v8864_v35 = vld [vmem:[%s8601_s16 + $0x50] sm:$0xf]  ;;  %v8867_v32 = vld [vmem:[%s8601_s16 + $0x54] sm:$0xff] }
 0x1a4   : > { %s11832_s3 = scalar_lea.vmem %s11830_s30, %s11831_s4  ;;  %11846 = vst [vmem:[#allocation33_spill] sm:$0xff] %v8861_v31  ;;  %11847 = vst [vmem:[#allocation34_spill] sm:$0xff] %v8864_v35  ;;  %v8870_v33 = vld [vmem:[%s8601_s16 + $0x5c] sm:$0xf]  ;;  %v8873_v34 = vld [vmem:[%s8601_s16 + $0x60] sm:$0xff] }
 0x1a5   : > { %v8822_v11 = vld [vmem:[%s11832_s3] sm:$0x1]  ;;  %11848 = vst [vmem:[#allocation35_spill] sm:$0xff] %v8867_v32  ;;  %11849 = vst [vmem:[#allocation36_spill] sm:$0xff] %v8870_v33  ;;  %v8876_v37 = vld [vmem:[%s8601_s16 + $0x68] sm:$0xf] }
 0x1a6   : > { %11833 = vst [vmem:[#allocation20_spill] sm:$0xff] %v8822_v11  ;;  %11850 = vst [vmem:[#allocation37_spill] sm:$0xff] %v8873_v34  ;;  %v8879_v38 = vld [vmem:[%s8601_s16 + $0x6c] sm:$0xff]  ;;  %v8882_v39 = vld [vmem:[%s8601_s16 + $0x74] sm:$0xf] }
 0x1a7   : > { %11851 = vst [vmem:[#allocation38_spill] sm:$0xff] %v8876_v37  ;;  %11852 = vst [vmem:[#allocation39_spill] sm:$0xff] %v8879_v38  ;;  %v8885_v40 = vld [vmem:[%s8601_s16 + $0x78] sm:$0xff]  ;;  %v8888_v41 = vld [vmem:[%s8601_s16 + $0x80] sm:$0xf] }
 0x1a8   : > { %11853 = vst [vmem:[#allocation40_spill] sm:$0xff] %v8882_v39  ;;  %11854 = vst [vmem:[#allocation41_spill] sm:$0xff] %v8885_v40  ;;  %v8891_v36 = vld [vmem:[%s8601_s16 + $0x84] sm:$0xff]  ;;  %v8894_v45 = vld [vmem:[%s8601_s16 + $0x8c] sm:$0xf] }
 0x1a9   : > { %11855 = vst [vmem:[#allocation42_spill] sm:$0xff] %v8888_v41  ;;  %11856 = vst [vmem:[#allocation43_spill] sm:$0xff] %v8891_v36  ;;  %v8897_v46 = vld [vmem:[%s8601_s16 + $0x90] sm:$0xff]  ;;  %v8900_v47 = vld [vmem:[%s8601_s16 + $0x98] sm:$0xf] }
 0x1aa   : > { %11857 = vst [vmem:[#allocation44_spill] sm:$0xff] %v8894_v45  ;;  %11858 = vst [vmem:[#allocation45_spill] sm:$0xff] %v8897_v46  ;;  %v8903_v48 = vld [vmem:[%s8601_s16 + $0x9c] sm:$0xff]  ;;  %v8906_v43 = vld [vmem:[%s8601_s16 + $0xa4] sm:$0xf] }
 0x1ab   : > { %11859 = vst [vmem:[#allocation46_spill] sm:$0xff] %v8900_v47  ;;  %11860 = vst [vmem:[#allocation47_spill] sm:$0xff] %v8903_v48  ;;  %v8909_v49 = vld [vmem:[%s8601_s16 + $0xa8] sm:$0xff]  ;;  %v8912_v53 = vld [vmem:[%s8601_s16 + $0xb0] sm:$0xf] }
 0x1ac   : > { %11861 = vst [vmem:[#allocation48_spill] sm:$0xff] %v8906_v43  ;;  %11862 = vst [vmem:[#allocation49_spill] sm:$0xff] %v8909_v49  ;;  %v8915_v54 = vld [vmem:[%s8601_s16 + $0xb4] sm:$0xff]  ;;  %v8918_v55 = vld [vmem:[%s8601_s16 + $0xbc] sm:$0xf] }
 0x1ad   : > { %11863 = vst [vmem:[#allocation50_spill] sm:$0xff] %v8912_v53  ;;  %11864 = vst [vmem:[#allocation51_spill] sm:$0xff] %v8915_v54  ;;  %v8921_v56 = vld [vmem:[%s8611_s1] sm:$0x7]  ;;  %v8927_v58 = vld [vmem:[%s8606_s28 + $0x4] sm:$0xf] }
 0x1ae   : > { %11865 = vst [vmem:[#allocation52_spill] sm:$0xff] %v8918_v55  ;;  %11866 = vst [vmem:[#allocation53_spill] sm:$0xff] %v8921_v56  ;;  %v8924_v57 = vld [vmem:[%s8606_s28] sm:$0xf]  ;;  %v8930_v44 = vld [vmem:[%s8606_s28 + $0x8] sm:$0xf] }
 0x1af   : > { %11867 = vst [vmem:[#allocation54_spill] sm:$0xff] %v8924_v57  ;;  %11868 = vst [vmem:[#allocation55_spill] sm:$0xff] %v8927_v58  ;;  %v8933_v61 = vld [vmem:[%s8606_s28 + $0xc] sm:$0xf]  ;;  %v8936_v62 = vld [vmem:[%s8606_s28 + $0x10] sm:$0xf] }
 0x1b0   : > { %11869 = vst [vmem:[#allocation56_spill] sm:$0xff] %v8930_v44  ;;  %11870 = vst [vmem:[#allocation57_spill] sm:$0xff] %v8933_v61  ;;  %v8939_v51 = vld [vmem:[%s8606_s28 + $0x14] sm:$0xf]  ;;  %v8942_v20 = vld [vmem:[%s8606_s28 + $0x18] sm:$0xf] }
 0x1b1   : > { %11871 = vst [vmem:[#allocation58_spill] sm:$0xff] %v8936_v62  ;;  %11872 = vst [vmem:[#allocation59_spill] sm:$0xff] %v8939_v51  ;;  %v8945_v63 = vld [vmem:[%s8606_s28 + $0x1c] sm:$0xf]  ;;  %v8948_v0 = vld [vmem:[%s8606_s28 + $0x20] sm:$0xf] }
 0x1b2   : > { %11873 = vst [vmem:[#allocation60_spill] sm:$0xff] %v8942_v20  ;;  %11874 = vst [vmem:[#allocation61_spill] sm:$0xff] %v8945_v63  ;;  %v8951_v1 = vld [vmem:[%s8606_s28 + $0x24] sm:$0xf]  ;;  %v8954_v2 = vld [vmem:[%s8606_s28 + $0x28] sm:$0xf] }
 0x1b3   : > { %11875 = vst [vmem:[#allocation62_spill] sm:$0xff] %v8948_v0  ;;  %11876 = vst [vmem:[#allocation63_spill] sm:$0xff] %v8951_v1  ;;  %v8957_v5 = vld [vmem:[%s8606_s28 + $0x2c] sm:$0xf]  ;;  %v8960_v6 = vld [vmem:[%s8606_s28 + $0x30] sm:$0xf] }
 0x1b4   : > { %11877 = vst [vmem:[#allocation64_spill] sm:$0xff] %v8954_v2  ;;  %11878 = vst [vmem:[#allocation65_spill] sm:$0xff] %v8957_v5  ;;  %v8963_v52 = vld [vmem:[%s8606_s28 + $0x34] sm:$0xf]  ;;  %v8966_v59 = vld [vmem:[%s8606_s28 + $0x38] sm:$0xf] }
 0x1b5   : > { %11879 = vst [vmem:[#allocation66_spill] sm:$0xff] %v8960_v6  ;;  %11880 = vst [vmem:[#allocation67_spill] sm:$0xff] %v8963_v52  ;;  %v8969_v7 = vld [vmem:[%s8606_s28 + $0x3c] sm:$0xf]  ;;  %v8976_v8 = vld [vmem:[%s11883_s5] sm:$0x1] }
 0x1b6   : > { %11881 = vst [vmem:[#allocation68_spill] sm:$0xff] %v8966_v59  ;;  %11882 = vst [vmem:[#allocation69_spill] sm:$0xff] %v8969_v7  ;;  %v8983_v9 = vld [vmem:[%s11885_s24] sm:$0x1]  ;;  %v8996_v16 = vld [vmem:[%s8630_s23 + $0x8] sm:$0xff] }
 0x1b7   : > { %11884 = vst [vmem:[#allocation70_spill] sm:$0xff] %v8976_v8  ;;  %11886 = vst [vmem:[#allocation71_spill] sm:$0xff] %v8983_v9  ;;  %v8990_v10 = vld [vmem:[%s11887_s18] sm:$0x1]  ;;  %v8999_v60 = vld [vmem:[%s8630_s23 + $0x10] sm:$0xff] }
 0x1b8   : > { %11888 = vst [vmem:[#allocation72_spill] sm:$0xff] %v8990_v10  ;;  %v8993_v13 = vld [vmem:[%s8630_s23] sm:$0xff]  ;;  %11890 = vst [vmem:[#allocation74_spill] sm:$0xff] %v8996_v16  ;;  %v9002_v27 = vld [vmem:[%s8630_s23 + $0x18] sm:$0xff] }
 0x1b9   : > { %11889 = vst [vmem:[#allocation73_spill] sm:$0xff] %v8993_v13  ;;  %11891 = vst [vmem:[#allocation75_spill] sm:$0xff] %v8999_v60  ;;  %v9005_v3 = vld [vmem:[%s8630_s23 + $0x20] sm:$0xff]  ;;  %v9008_v17 = vld [vmem:[%s8630_s23 + $0x28] sm:$0xff] }
 0x1ba   : > { %11892 = vst [vmem:[#allocation76_spill] sm:$0xff] %v9002_v27  ;;  %11893 = vst [vmem:[#allocation77_spill] sm:$0xff] %v9005_v3  ;;  %v9011_v18 = vld [vmem:[%s8630_s23 + $0x30] sm:$0xff]  ;;  %v9014_v21 = vld [vmem:[%s8630_s23 + $0x38] sm:$0xff] }
 0x1bb   : > { %11894 = vst [vmem:[#allocation78_spill] sm:$0xff] %v9008_v17  ;;  %11895 = vst [vmem:[#allocation79_spill] sm:$0xff] %v9011_v18  ;;  %v9017_v14 = vld [vmem:[%s8630_s23 + $0x40] sm:$0xff]  ;;  %v9020_v4 = vld [vmem:[%s8630_s23 + $0x48] sm:$0xff] }
 0x1bc   : > { %11896 = vst [vmem:[#allocation80_spill] sm:$0xff] %v9014_v21  ;;  %11897 = vst [vmem:[#allocation81_spill] sm:$0xff] %v9017_v14  ;;  %v9023_v19 = vld [vmem:[%s8630_s23 + $0x50] sm:$0xff]  ;;  %v9026_v10 = vld [vmem:[%s8630_s23 + $0x58] sm:$0xff] }
 0x1bd   : > { %11898 = vst [vmem:[#allocation82_spill] sm:$0xff] %v9020_v4  ;;  %11899 = vst [vmem:[#allocation83_spill] sm:$0xff] %v9023_v19  ;;  %v9029_v9 = vld [vmem:[%s8630_s23 + $0x60] sm:$0xff]  ;;  %v9032_v18 = vld [vmem:[%s8630_s23 + $0x68] sm:$0xff] }
 0x1be   : > { %11900 = vst [vmem:[#allocation84_spill] sm:$0xff] %v9026_v10  ;;  %11901 = vst [vmem:[#allocation85_spill] sm:$0xff] %v9029_v9  ;;  %v9035_v21 = vld [vmem:[%s8630_s23 + $0x70] sm:$0xff]  ;;  %v9038_v14 = vld [vmem:[%s8630_s23 + $0x78] sm:$0xff] }
 0x1bf   : > { %11902 = vst [vmem:[#allocation86_spill] sm:$0xff] %v9032_v18  ;;  %11903 = vst [vmem:[#allocation87_spill] sm:$0xff] %v9035_v21  ;;  %v9041_v4 = vld [vmem:[%s8635_s21] sm:$0x3]  ;;  %v9047_v10 = vld [vmem:[%s8640_s25 + $0x4] sm:$0xf] }
 0x1c0   : > { %11904 = vst [vmem:[#allocation88_spill] sm:$0xff] %v9038_v14  ;;  %11905 = vst [vmem:[#allocation89_spill] sm:$0xff] %v9041_v4  ;;  %v9044_v19 = vld [vmem:[%s8640_s25] sm:$0xf]  ;;  %v9050_v9 = vld [vmem:[%s8640_s25 + $0x8] sm:$0xf] }
 0x1c1   : > { %11906 = vst [vmem:[#allocation90_spill] sm:$0xff] %v9044_v19  ;;  %11907 = vst [vmem:[#allocation91_spill] sm:$0xff] %v9047_v10  ;;  %v9053_v18 = vld [vmem:[%s8640_s25 + $0xc] sm:$0xf]  ;;  %v9056_v21 = vld [vmem:[%s8640_s25 + $0x10] sm:$0xf] }
 0x1c2   : > { %11908 = vst [vmem:[#allocation92_spill] sm:$0xff] %v9050_v9  ;;  %11909 = vst [vmem:[#allocation93_spill] sm:$0xff] %v9053_v18  ;;  %v9059_v14 = vld [vmem:[%s8640_s25 + $0x14] sm:$0xf]  ;;  %v9062_v4 = vld [vmem:[%s8640_s25 + $0x18] sm:$0xf] }
 0x1c3   : > { %11910 = vst [vmem:[#allocation94_spill] sm:$0xff] %v9056_v21  ;;  %11911 = vst [vmem:[#allocation95_spill] sm:$0xff] %v9059_v14  ;;  %v9065_v19 = vld [vmem:[%s8640_s25 + $0x1c] sm:$0xf]  ;;  %v9068_v10 = vld [vmem:[%s8640_s25 + $0x20] sm:$0xf] }
 0x1c4   : > { %11912 = vst [vmem:[#allocation96_spill] sm:$0xff] %v9062_v4  ;;  %11913 = vst [vmem:[#allocation97_spill] sm:$0xff] %v9065_v19  ;;  %v9071_v9 = vld [vmem:[%s8640_s25 + $0x24] sm:$0xf]  ;;  %v9074_v18 = vld [vmem:[%s8640_s25 + $0x28] sm:$0xf] }
 0x1c5   : > { %11914 = vst [vmem:[#allocation98_spill] sm:$0xff] %v9068_v10  ;;  %11915 = vst [vmem:[#allocation99_spill] sm:$0xff] %v9071_v9  ;;  %v9077_v21 = vld [vmem:[%s8640_s25 + $0x2c] sm:$0xf]  ;;  %v9080_v14 = vld [vmem:[%s8640_s25 + $0x30] sm:$0xf] }
 0x1c6   : > { %11916 = vst [vmem:[#allocation100_spill] sm:$0xff] %v9074_v18  ;;  %11917 = vst [vmem:[#allocation101_spill] sm:$0xff] %v9077_v21  ;;  %v9083_v4 = vld [vmem:[%s8640_s25 + $0x34] sm:$0xf]  ;;  %v9086_v19 = vld [vmem:[%s8640_s25 + $0x38] sm:$0xf] }
 0x1c7   : > { %11918 = vst [vmem:[#allocation102_spill] sm:$0xff] %v9080_v14  ;;  %11919 = vst [vmem:[#allocation103_spill] sm:$0xff] %v9083_v4  ;;  %v9089_v10 = vld [vmem:[%s8640_s25 + $0x3c] sm:$0xf]  ;;  %v9092_v9 = vld [vmem:[%s8640_s25 + $0x40] sm:$0xf] }
 0x1c8   : > { %11920 = vst [vmem:[#allocation104_spill] sm:$0xff] %v9086_v19  ;;  %11921 = vst [vmem:[#allocation105_spill] sm:$0xff] %v9089_v10  ;;  %v9095_v18 = vld [vmem:[%s8640_s25 + $0x44] sm:$0xf]  ;;  %v9098_v21 = vld [vmem:[%s8640_s25 + $0x48] sm:$0xf] }
 0x1c9   : > { %11922 = vst [vmem:[#allocation106_spill] sm:$0xff] %v9092_v9  ;;  %11923 = vst [vmem:[#allocation107_spill] sm:$0xff] %v9095_v18  ;;  %v9101_v14 = vld [vmem:[%s8640_s25 + $0x4c] sm:$0xf]  ;;  %v9104_v3 = vld [vmem:[%s8640_s25 + $0x50] sm:$0xf] }
 0x1ca   : > { %11924 = vst [vmem:[#allocation108_spill] sm:$0xff] %v9098_v21  ;;  %11925 = vst [vmem:[#allocation109_spill] sm:$0xff] %v9101_v14  ;;  %v9107_v4 = vld [vmem:[%s8640_s25 + $0x54] sm:$0xf]  ;;  %v9110_v19 = vld [vmem:[%s8640_s25 + $0x58] sm:$0xf] }
 0x1cb   : > { %11926 = vst [vmem:[#allocation110_spill] sm:$0xff] %v9104_v3  ;;  %11927 = vst [vmem:[#allocation111_spill] sm:$0xff] %v9107_v4  ;;  %v9113_v17 = vld [vmem:[%s8640_s25 + $0x5c] sm:$0xf]  ;;  %v9116_v10 = vld [vmem:[%s8640_s25 + $0x60] sm:$0xf] }
 0x1cc   : > { %11928 = vst [vmem:[#allocation112_spill] sm:$0xff] %v9110_v19  ;;  %11929 = vst [vmem:[#allocation113_spill] sm:$0xff] %v9113_v17  ;;  %v9119_v9 = vld [vmem:[%s8640_s25 + $0x64] sm:$0xf]  ;;  %v9122_v60 = vld [vmem:[%s8640_s25 + $0x68] sm:$0xf] }
 0x1cd   : > { %11930 = vst [vmem:[#allocation114_spill] sm:$0xff] %v9116_v10  ;;  %11931 = vst [vmem:[#allocation115_spill] sm:$0xff] %v9119_v9  ;;  %v9125_v18 = vld [vmem:[%s8640_s25 + $0x6c] sm:$0xf]  ;;  %v9128_v21 = vld [vmem:[%s8640_s25 + $0x70] sm:$0xf] }
 0x1ce   : > { %11932 = vst [vmem:[#allocation116_spill] sm:$0xff] %v9122_v60  ;;  %11933 = vst [vmem:[#allocation117_spill] sm:$0xff] %v9125_v18  ;;  %v9131_v27 = vld [vmem:[%s8640_s25 + $0x74] sm:$0xf]  ;;  %v9134_v14 = vld [vmem:[%s8640_s25 + $0x78] sm:$0xf] }
 0x1cf   : > { %11934 = vst [vmem:[#allocation118_spill] sm:$0xff] %v9128_v21  ;;  %11935 = vst [vmem:[#allocation119_spill] sm:$0xff] %v9131_v27  ;;  %v9137_v3 = vld [vmem:[%s8640_s25 + $0x7c] sm:$0xf]  ;;  %v9144_v19 = vld [vmem:[%s844_s19] sm:$0x1] }
 0x1d0   : > { %11936 = vst [vmem:[#allocation120_spill] sm:$0xff] %v9134_v14  ;;  %11937 = vst [vmem:[#allocation121_spill] sm:$0xff] %v9137_v3  ;;  %v9151_v60 = vld [vmem:[%s847_s6] sm:$0x1]  ;;  %s11941_s25 = sld [smem:[#allocation8_spill]] }
 0x1d1   : > { %11938 = vst [vmem:[#allocation122_spill] sm:$0xff] %v9144_v19  ;;  %11939 = vst [vmem:[#allocation123_spill] sm:$0xff] %v9151_v60  ;;  %v9158_v21 = vld [vmem:[%s850_s10] sm:$0x1] }
 0x1d2   : > { %11940 = vst [vmem:[#allocation124_spill] sm:$0xff] %v9158_v21 }
 0x1d6   : > { %p6641_p1 = scmp.ge.s32.totalorder %s11941_s25, 1 }
 0x1d8   : > { %1219 = sbr.rel (%p6641_p1) target bundleno = 3142 (0xc46), region = 108 }
 0x1df   : > { %v6643_v14 = vcombine.high %v8825_v12, %v8831_v50  ;;  %v6642_v19 = vcombine.low %v8825_v12, %v8831_v50  ;;  %v6646_v3 = vcombine.high %v8837_v23, %v8843_v24  ;;  %v1220_v27 = vld [vmem:[#allocation2] sm:$0xff]  ;;  %v1221_v60 = vld [vmem:[#allocation2 + $0x8] sm:$0xff]  ;;  %v6645_v18 = vcombine.low %v8837_v23, %v8843_v24  ;;  %s8392_s10 = smov 96   ;;  %s8393_s0 = smov 64  }
 0x1e0   : > { %v6649_v21 = vcombine.high %v8849_v26, %v8855_v29  ;;  %v1236_v10 = vpack.c.bf16 %v1221_v60, %v1220_v27  ;;  %v11697_v9 = vmov 0   ;;  %v6644_v12 = vcombine.low %v8828_v42, %v8834_v22  ;;  %s8394_s19 = smov 32  }
 0x1e1   : > { %1388 = vmatprep.subr.bf16.mxu0 %v6643_v14  ;;  %1420 = vmatprep.mubr.bf16.mxu0 %v11697_v9  ;;  %v6647_v50 = vcombine.low %v8840_v15, %v8846_v25  ;;  %v6648_v14 = vcombine.low %v8849_v26, %v8855_v29  ;;  %v6650_v60 = vcombine.low %v8852_v28, %v8858_v30  ;;  %vm1660_vm0 = vcmask 261120  }
 0x1e2   : > { %1389 = vmatpush1.bf16.msra.mxu0 %v6642_v19  ;;  %7159 = vmatprep.mubr.bf16.mxu1 %v1236_v10  ;;  %v6651_v27 = vcombine.low %v8861_v31, %v8867_v32  ;;  %v6658_v19 = vcombine.high %v8885_v40, %v8891_v36  ;;  %vm3485_vm1 = vcmask 523264   ;;  %vm3502_vm2 = vcmask 785408  }
 0x1e3   : > { %1390 = vmatprep.subr.bf16.mxu0 %v6646_v3  ;;  %v6652_v3 = vcombine.high %v8861_v31, %v8867_v32  ;;  %7143 = vmatprep.subr.bf16.mxu1 %v6644_v12 }
 0x1e4   : > { %7144 = vmatpush3.bf16.msra.mxu1 %v6644_v12  ;;  %v6654_v12 = vcombine.low %v8873_v34, %v8879_v38 }
 0x1e5   : > { %7145 = vmatprep.subr.bf16.mxu1 %v6647_v50 }
 0x1e6   : > { %1391 = vmatpush1.bf16.msra.mxu0 %v6645_v18  ;;  %v6655_v18 = vcombine.high %v8873_v34, %v8879_v38 }
 0x1e7   : > { %1392 = vmatprep.subr.bf16.mxu0 %v6649_v21  ;;  %v6653_v21 = vcombine.low %v8864_v35, %v8870_v33 }
 0x1e8   : > { %7146 = vmatpush3.bf16.msra.mxu1 %v6647_v50  ;;  %v6657_v50 = vcombine.low %v8885_v40, %v8891_v36 }
 0x1e9   : > { %7147 = vmatprep.subr.bf16.mxu1 %v6650_v60 }
 0x1ea   : > { %1393 = vmatpush1.bf16.msra.mxu0 %v6648_v14  ;;  %v6656_v14 = vcombine.low %v8876_v37, %v8882_v39 }
 0x1eb   : > { %1394 = vmatprep.subr.bf16.mxu0 %v6652_v3  ;;  %v6661_v3 = vcombine.high %v8897_v46, %v8903_v48 }
 0x1ec   : > { %7148 = vmatpush3.bf16.msra.mxu1 %v6650_v60  ;;  %v6660_v60 = vcombine.low %v8897_v46, %v8903_v48 }
 0x1ed   : > { %7149 = vmatprep.subr.bf16.mxu1 %v6653_v21 }
 0x1ee   : > { %1395 = vmatpush1.bf16.msra.mxu0 %v6651_v27  ;;  %v6659_v27 = vcombine.low %v8888_v41, %v8894_v45  ;;  %v1235_v41 = vld [vmem:[#allocation2 + $0x78] sm:$0xff] }
 0x1ef   : > { %1396 = vmatprep.subr.bf16.mxu0 %v6655_v18  ;;  %v6664_v18 = vcombine.high %v8909_v49, %v8915_v54 }
 0x1f0   : > { %7150 = vmatpush3.bf16.msra.mxu1 %v6653_v21  ;;  %v6663_v21 = vcombine.low %v8909_v49, %v8915_v54 }
 0x1f1   : > { %7151 = vmatprep.subr.bf16.mxu1 %v6656_v14 }
 0x1f2   : > { %1397 = vmatpush1.bf16.msra.mxu0 %v6654_v12  ;;  %v6662_v12 = vcombine.low %v8900_v47, %v8906_v43  ;;  %v1225_v47 = vld [vmem:[#allocation2 + $0x28] sm:$0xff] }
 0x1f3   : > { %1398 = vmatprep.subr.bf16.mxu0 %v6658_v19  ;;  %v6665_v19 = vcombine.low %v8912_v53, %v8918_v55  ;;  %v1230_v55 = vld [vmem:[#allocation2 + $0x50] sm:$0xff] }
 0x1f4   : > { %7152 = vmatpush3.bf16.msra.mxu1 %v6656_v14  ;;  %v1222_v14 = vld [vmem:[#allocation2 + $0x10] sm:$0xff] }
 0x1f5   : > { %7153 = vmatprep.subr.bf16.mxu1 %v6659_v27 }
 0x1f6   : > { %1399 = vmatpush1.bf16.msra.mxu0 %v6657_v50  ;;  %v1223_v50 = vld [vmem:[#allocation2 + $0x18] sm:$0xff] }
 0x1f7   : > { %1400 = vmatprep.subr.bf16.mxu0 %v6661_v3  ;;  %v1224_v3 = vld [vmem:[#allocation2 + $0x20] sm:$0xff] }
 0x1f8   : > { %7154 = vmatpush3.bf16.msra.mxu1 %v6659_v27  ;;  %v1238_v43 = vpack.c.bf16 %v1225_v47, %v1224_v3  ;;  %v1226_v27 = vld [vmem:[#allocation2 + $0x30] sm:$0xff]  ;;  %v1233_v47 = vld [vmem:[#allocation2 + $0x68] sm:$0xff] }
 0x1f9   : > { %7155 = vmatprep.subr.bf16.mxu1 %v6662_v12 }
 0x1fa   : > { %1401 = vmatpush1.bf16.msra.mxu0 %v6660_v60  ;;  %v1237_v60 = vpack.c.bf16 %v1223_v50, %v1222_v14  ;;  %v1232_v14 = vld [vmem:[#allocation2 + $0x60] sm:$0xff] }
 0x1fb   : > { %1402 = vmatprep.subr.bf16.mxu0 %v6664_v18  ;;  %v1227_v18 = vld [vmem:[#allocation2 + $0x38] sm:$0xff]  ;;  %v1242_v3 = vpack.c.bf16 %v1233_v47, %v1232_v14 }
 0x1fc   : > { %7156 = vmatpush3.bf16.msra.mxu1 %v6662_v12  ;;  %v1229_v12 = vld [vmem:[#allocation2 + $0x48] sm:$0xff] }
 0x1fd   : > { %7157 = vmatprep.subr.bf16.mxu1 %v6665_v19 }
 0x1fe   : > { %1403 = vmatpush1.bf16.msra.mxu0 %v6663_v21  ;;  %v1228_v21 = vld [vmem:[#allocation2 + $0x40] sm:$0xff] }
 0x1ff   : > { %v1240_v53 = vpack.c.bf16 %v1229_v12, %v1228_v21 }
 0x200   : > { %7158 = vmatpush3.bf16.msra.mxu1 %v6665_v19  ;;  %v1231_v19 = vld [vmem:[#allocation2 + $0x58] sm:$0xff] }
 0x201   : > { %1421 = vmatmul.mubr.bf16.vlgmr.msra.gmra.mrb[0].mxu0 %v1236_v10  ;;  %v1239_v10 = vpack.c.bf16 %v1227_v18, %v1226_v27  ;;  %v1241_v50 = vpack.c.bf16 %v1231_v19, %v1230_v55 }
 0x202   : > { %1430 = vmatprep.mubr.bf16.mxu0 %v11697_v9 }
 0x203   : > { %7160 = vmatmul.mubr.bf16.vlgmr.msra.gmra.mrb[0].mxu1 %v1237_v60 }
 0x204   : > { %7163 = vmatprep.mubr.bf16.mxu1 %v1238_v43 }
 0x209   : > { %1431 = vmatmul.mubr.bf16.gmra.mrb[4].mxu0 %v1237_v60  ;;  %v1234_v60 = vld [vmem:[#allocation2 + $0x70] sm:$0xff] }
 0x20a   : > { %1440 = vmatprep.mubr.bf16.mxu0 %v11697_v9  ;;  %v1243_v27 = vpack.c.bf16 %v1235_v41, %v1234_v60 }
 0x20b   : > { %7164 = vmatmul.mubr.bf16.gmra.mrb[4].mxu1 %v1239_v10 }
 0x20c   : > { %7167 = vmatprep.mubr.bf16.mxu1 %v1240_v53 }
 0x211   : > { %1441 = vmatmul.mubr.bf16.gmra.mrb[8].mxu0 %v1238_v43  ;;  %v1245_v43 = vlaneseq }
 0x212   : > { %1450 = vmatprep.mubr.bf16.mxu0 %v11697_v9 }
 0x213   : > { %7168 = vmatmul.mubr.bf16.gmra.mrb[8].mxu1 %v1241_v50  ;;  %v9217_v55 = vshrl.u32 %v1245_v43, 7 }
 0x214   : > { %7171 = vmatprep.mubr.bf16.mxu1 %v1242_v3 }
 0x215   : > { %11942 = vst [vmem:[#allocation125_spill] sm:$0xff] %v9217_v55  ;;  %v11696_v18 = vsub.s32 1, %v9217_v55  ;;  %v9221_v21 = vsub.s32 0, %v9217_v55 }
 0x217   : > { %11943 = vst [vmem:[#allocation126_spill] sm:$0xff] %v9221_v21  ;;  %v9226_v41 = vrot.slane %v8921_v56, %v11696_v18 }
 0x219   : > { %1451 = vmatmul.mubr.bf16.gmra.mrb[12].mxu0 %v1239_v10 }
 0x21a   : > { %1460 = vmatprep.mubr.bf16.mxu0 %v11697_v9 }
 0x21b   : > { %7172 = vmatmul.mubr.bf16.gmra.mrb[12].mxu1 %v1243_v27 }
 0x221   : > { %1461 = vmatmul.mubr.bf16.gmra.mrb[16].mxu0 %v1240_v53  ;;  %v9230_v53 = vrot.slane %v8921_v56, %v9221_v21 }
 0x222   : > { %1470 = vmatprep.mubr.bf16.mxu0 %v11697_v9 }
 0x229   : > { %1471 = vmatmul.mubr.bf16.gmra.mrb[20].mxu0 %v1241_v50 }
 0x22a   : > { %1480 = vmatprep.mubr.bf16.mxu0 %v11697_v9 }
 0x231   : > { %1481 = vmatmul.mubr.bf16.gmra.mrb[24].mxu0 %v1242_v3 }
 0x232   : > { %1490 = vmatprep.mubr.bf16.mxu0 %v11697_v9 }
 0x239   : > { %1491 = vmatmul.mubr.bf16.gmra.mrb[28].mxu0 %v1243_v27 }
 0x2d4   : > { %v1422_v12 = vpop.f32.mrb[0].mxu0 }
 0x2d5   : > { %v1424_v10 = vpop.f32.mrb[1].mxu0  ;;  %v1423_v47 = vadd.f32 %v1422_v12, %v9230_v53 }
 0x2d6   : > { %v1426_v19 = vpop.f32.mrb[2].mxu0  ;;  %v1425_v14 = vadd.f32 %v1424_v10, %v9226_v41 }
 0x2d7   : > { %v1427_v50 = vadd.f32 %v1426_v19, %v9230_v53  ;;  %v1428_v3 = vpop.f32.mrb[3].mxu0 }
 0x2d8   : > { %1598 = vxpose.xlu0.b32.start [1/16] %v1425_v14, 128  ;;  %v1429_v27 = vadd.f32 %v1428_v3, %v9226_v41 }
 0x2d9   : > { %v9235_v60 = vpack.c.bf16 %v1427_v50, %v1423_v47 }
 0x2db   : > { %2039 = vrot.lane.b32.xlu1 %v9235_v60, %s8392_s10  ;;  %7179 = vmatprep.mubr.msk.bf16.mxu1 %vm1660_vm0, %v9235_v60 }
 0x2dc   : > { %v1432_v43 = vpop.f32.mrb[4].mxu0  ;;  %1599 = vxpose.xlu0.b32.cont [2/16] %v1429_v27, 128 }
 0x2dd   : > { %v1434_v10 = vpop.f32.mrb[5].mxu0  ;;  %v1433_v14 = vadd.f32 %v1432_v43, %v9230_v53 }
 0x2de   : > { %v1435_v12 = vadd.f32 %v1434_v10, %v9226_v41  ;;  %v1436_v19 = vpop.f32.mrb[6].mxu0 }
 0x2df   : > { %v1437_v47 = vadd.f32 %v1436_v19, %v9230_v53  ;;  %v1438_v50 = vpop.f32.mrb[7].mxu0 }
 0x2e0   : > { %1600 = vxpose.xlu0.b32.cont [3/16] %v1435_v12, 128  ;;  %v1439_v18 = vadd.f32 %v1438_v50, %v9226_v41 }
 0x2e1   : > { %v9245_v3 = vpack.c.bf16 %v1437_v47, %v1433_v14 }
 0x2e3   : > { %2041 = vrot.lane.b32.xlu1 %v9245_v3, %s8392_s10 }
 0x2e4   : > { %v1442_v9 = vpop.f32.mrb[8].mxu0  ;;  %1601 = vxpose.xlu0.b32.cont [4/16] %v1439_v18, 128 }
 0x2e5   : > { %v1444_v27 = vpop.f32.mrb[9].mxu0  ;;  %v1443_v37 = vadd.f32 %v1442_v9, %v9230_v53 }
 0x2e6   : > { %v1445_v45 = vadd.f32 %v1444_v27, %v9226_v41  ;;  %v1446_v10 = vpop.f32.mrb[10].mxu0 }
 0x2e7   : > { %v1447_v43 = vadd.f32 %v1446_v10, %v9230_v53  ;;  %v1448_v19 = vpop.f32.mrb[11].mxu0 }
 0x2e8   : > { %1602 = vxpose.xlu0.b32.cont [5/16] %v1445_v45, 128  ;;  %v1449_v14 = vadd.f32 %v1448_v19, %v9226_v41 }
 0x2e9   : > { %v9253_v12 = vpack.c.bf16 %v1447_v43, %v1443_v37 }
 0x2eb   : > { %2043 = vrot.lane.b32.xlu1 %v9253_v12, %s8392_s10 }
 0x2ec   : > { %v1452_v47 = vpop.f32.mrb[12].mxu0  ;;  %1603 = vxpose.xlu0.b32.cont [6/16] %v1449_v14, 128 }
 0x2ed   : > { %v1454_v18 = vpop.f32.mrb[13].mxu0  ;;  %v1453_v39 = vadd.f32 %v1452_v47, %v9230_v53 }
 0x2ee   : > { %v1455_v50 = vadd.f32 %v1454_v18, %v9226_v41  ;;  %v1456_v27 = vpop.f32.mrb[14].mxu0 }
 0x2ef   : > { %v1457_v9 = vadd.f32 %v1456_v27, %v9230_v53  ;;  %v1458_v10 = vpop.f32.mrb[15].mxu0 }
 0x2f0   : > { %1604 = vxpose.xlu0.b32.cont [7/16] %v1455_v50, 128  ;;  %v1459_v37 = vadd.f32 %v1458_v10, %v9226_v41 }
 0x2f1   : > { %v9261_v45 = vpack.c.bf16 %v1457_v9, %v1453_v39 }
 0x2f3   : > { %2045 = vrot.lane.b32.xlu1 %v9261_v45, %s8392_s10 }
 0x2f4   : > { %v1462_v43 = vpop.f32.mrb[16].mxu0  ;;  %1605 = vxpose.xlu0.b32.cont [8/16] %v1459_v37, 128 }
 0x2f5   : > { %v1464_v19 = vpop.f32.mrb[17].mxu0  ;;  %v1463_v35 = vadd.f32 %v1462_v43, %v9230_v53 }
 0x2f6   : > { %v1465_v14 = vadd.f32 %v1464_v19, %v9226_v41  ;;  %v1466_v18 = vpop.f32.mrb[18].mxu0 }
 0x2f7   : > { %v1467_v47 = vadd.f32 %v1466_v18, %v9230_v53  ;;  %v1468_v27 = vpop.f32.mrb[19].mxu0 }
 0x2f8   : > { %1606 = vxpose.xlu0.b32.cont [9/16] %v1465_v14, 128  ;;  %v1469_v39 = vadd.f32 %v1468_v27, %v9226_v41 }
 0x2f9   : > { %v9269_v50 = vpack.c.bf16 %v1467_v47, %v1463_v35 }
 0x2fb   : > { %2047 = vrot.lane.b32.xlu1 %v9269_v50, %s8392_s10 }
 0x2fc   : > { %v1472_v9 = vpop.f32.mrb[20].mxu0  ;;  %1607 = vxpose.xlu0.b32.cont [10/16] %v1469_v39, 128 }
 0x2fd   : > { %v1474_v10 = vpop.f32.mrb[21].mxu0  ;;  %v1473_v33 = vadd.f32 %v1472_v9, %v9230_v53 }
 0x2fe   : > { %v1475_v37 = vadd.f32 %v1474_v10, %v9226_v41  ;;  %v1476_v19 = vpop.f32.mrb[22].mxu0 }
 0x2ff   : > { %v1477_v43 = vadd.f32 %v1476_v19, %v9230_v53  ;;  %v1478_v18 = vpop.f32.mrb[23].mxu0 }
 0x300   : > { %1608 = vxpose.xlu0.b32.cont [11/16] %v1475_v37, 128  ;;  %v1479_v35 = vadd.f32 %v1478_v18, %v9226_v41 }
 0x301   : > { %v9277_v14 = vpack.c.bf16 %v1477_v43, %v1473_v33 }
 0x303   : > { %2049 = vrot.lane.b32.xlu1 %v9277_v14, %s8392_s10 }
 0x304   : > { %v1482_v47 = vpop.f32.mrb[24].mxu0  ;;  %1609 = vxpose.xlu0.b32.cont [12/16] %v1479_v35, 128 }
 0x305   : > { %v1484_v27 = vpop.f32.mrb[25].mxu0  ;;  %v1483_v28 = vadd.f32 %v1482_v47, %v9230_v53 }
 0x306   : > { %v1485_v39 = vadd.f32 %v1484_v27, %v9226_v41  ;;  %v1486_v10 = vpop.f32.mrb[26].mxu0 }
 0x307   : > { %v1487_v9 = vadd.f32 %v1486_v10, %v9230_v53  ;;  %v1488_v19 = vpop.f32.mrb[27].mxu0 }
 0x308   : > { %1610 = vxpose.xlu0.b32.cont [13/16] %v1485_v39, 128  ;;  %v1489_v33 = vadd.f32 %v1488_v19, %v9226_v41 }
 0x309   : > { %v9285_v37 = vpack.c.bf16 %v1487_v9, %v1483_v28 }
 0x30b   : > { %2051 = vrot.lane.b32.xlu1 %v9285_v37, %s8392_s10 }
 0x30c   : > { %v1492_v43 = vpop.f32.mrb[28].mxu0  ;;  %1611 = vxpose.xlu0.b32.cont [14/16] %v1489_v33, 128 }
 0x30d   : > { %v1494_v18 = vpop.f32.mrb[29].mxu0  ;;  %v1493_v30 = vadd.f32 %v1492_v43, %v9230_v53 }
 0x30e   : > { %v1495_v35 = vadd.f32 %v1494_v18, %v9226_v41  ;;  %v1496_v27 = vpop.f32.mrb[30].mxu0 }
 0x30f   : > { %v1497_v47 = vadd.f32 %v1496_v27, %v9230_v53  ;;  %v1498_v10 = vpop.f32.mrb[31].mxu0 }
 0x310   : > { %1612 = vxpose.xlu0.b32.cont [15/16] %v1495_v35, 128  ;;  %v1499_v28 = vadd.f32 %v1498_v10, %v9226_v41  ;;  %v7161_v41 = vpop.f32.mrb[0].mxu1 }
 0x311   : > { %v9293_v39 = vpack.c.bf16 %v1497_v47, %v1493_v30  ;;  %v1255_v30 = vsub.s32 2, %v9217_v55  ;;  %v1535_v53 = vpop.f32.mrb[1].mxu1 }
 0x312   : > { %v7162_v19 = vpop.f32.mrb[2].mxu1 }
 0x313   : > { %2053 = vrot.lane.b32.xlu1 %v9293_v39, %s8392_s10  ;;  %v1256_v9 = vrot.slane %v8921_v56, %v1255_v30  ;;  %v1538_v33 = vpop.f32.mrb[3].mxu1 }
 0x314   : > { %1613 = vxpose.xlu0.b32.end [16/16] %v1499_v28, 128  ;;  %v7165_v35 = vpop.f32.mrb[4].mxu1 }
 0x315   : > { %v1536_v43 = vadd.f32 %v1535_v53, %v1256_v9  ;;  %v1539_v18 = vadd.f32 %v1538_v33, %v1256_v9  ;;  %v1551_v27 = vpop.f32.mrb[5].mxu1  ;;  %v1547_v56 = vadd.f32 %v7162_v19, %v1256_v9  ;;  %v1560_v49 = vadd.f32 %v7165_v35, %v1256_v9 }
 0x316   : > { %v1552_v28 = vadd.f32 %v1551_v27, %v1256_v9 }
 0x317   : > { %2457 = vrot.lane.b32.xlu1 %v9235_v60, %s8393_s0  ;;  %v9326_v47 = vpack.c.bf16 %v1539_v18, %v1536_v43  ;;  %v1544_v18 = vadd.f32 %v7161_v41, %v1256_v9 }
 0x319   : > { %7195 = vmatprep.subr.bf16.mxu0 %v9326_v47  ;;  %v1639_v42 = vpack.c.bf16 %v1547_v56, %v1544_v18 }
 0x31a   : > { %7196 = vmatpush3.bf16.msra.mxu0 %v9326_v47 }
 0x31b   : > { %2459 = vrot.lane.b32.xlu1 %v9245_v3, %s8393_s0  ;;  %7197 = vmatprep.subr.bf16.mxu0 %v1639_v42 }
 0x31e   : > { %7198 = vmatpush3.bf16.msra.mxu0 %v1639_v42 }
 0x31f   : > { %2461 = vrot.lane.b32.xlu1 %v9253_v12, %s8393_s0 }
 0x323   : > { %2463 = vrot.lane.b32.xlu1 %v9261_v45, %s8393_s0 }
 0x327   : > { %2465 = vrot.lane.b32.xlu1 %v9269_v50, %s8393_s0 }
 0x32b   : > { %2467 = vrot.lane.b32.xlu1 %v9277_v14, %s8393_s0 }
 0x32f   : > { %2469 = vrot.lane.b32.xlu1 %v9285_v37, %s8393_s0 }
 0x333   : > { %2471 = vrot.lane.b32.xlu1 %v9293_v39, %s8393_s0 }
 0x337   : > { %2869 = vrot.lane.b32.xlu1 %v9245_v3, %s8394_s19 }
 0x33b   : > { %2871 = vrot.lane.b32.xlu1 %v9253_v12, %s8394_s19 }
 0x33d   : > { %2867 = vrot.lane.b32.xlu0 %v9235_v60, %s8394_s19  ;;  %v7166_v60 = vpop.f32.mrb[6].mxu1 }
 0x33e   : > { %v1554_v10 = vpop.f32.mrb[7].mxu1  ;;  %v1563_v54 = vadd.f32 %v7166_v60, %v1256_v9 }
 0x33f   : > { %2873 = vrot.lane.b32.xlu1 %v9261_v45, %s8394_s19  ;;  %v1555_v15 = vadd.f32 %v1554_v10, %v1256_v9  ;;  %v7169_v25 = vpop.f32.mrb[8].mxu1 }
 0x340   : > { %v1567_v30 = vpop.f32.mrb[9].mxu1  ;;  %v1576_v46 = vadd.f32 %v7169_v25, %v1256_v9  ;;  %v1641_v19 = vpack.c.bf16 %v1563_v54, %v1560_v49 }
 0x341   : > { %2320 = vrot.lane.b32.xlu0 %v9326_v47, %s8392_s10  ;;  %v9334_v53 = vpack.c.bf16 %v1555_v15, %v1552_v28  ;;  %v7170_v33 = vpop.f32.mrb[10].mxu1  ;;  %v1568_v27 = vadd.f32 %v1567_v30, %v1256_v9 }
 0x342   : > { %v1570_v43 = vpop.f32.mrb[11].mxu1  ;;  %v1579_v15 = vadd.f32 %v7170_v33, %v1256_v9 }
 0x343   : > { %2875 = vrot.lane.b32.xlu1 %v9269_v50, %s8394_s19  ;;  %v1571_v10 = vadd.f32 %v1570_v43, %v1256_v9  ;;  %v7173_v28 = vpop.f32.mrb[12].mxu1  ;;  %7199 = vmatprep.subr.bf16.mxu0 %v9334_v53 }
 0x344   : > { %v1583_v41 = vpop.f32.mrb[13].mxu1  ;;  %v9346_v30 = vpack.c.bf16 %v1579_v15, %v1576_v46  ;;  %v1592_v35 = vadd.f32 %v7173_v28, %v1256_v9  ;;  %7200 = vmatpush3.bf16.msra.mxu0 %v9334_v53 }
 0x345   : > { %2324 = vrot.lane.b32.xlu0 %v9334_v53, %s8392_s10  ;;  %v9340_v22 = vpack.c.bf16 %v1571_v10, %v1568_v27  ;;  %v7174_v43 = vpop.f32.mrb[14].mxu1  ;;  %v1584_v25 = vadd.f32 %v1583_v41, %v1256_v9  ;;  %7201 = vmatprep.subr.bf16.mxu0 %v1641_v19 }
 0x346   : > { %v1586_v56 = vpop.f32.mrb[15].mxu1  ;;  %v1595_v60 = vadd.f32 %v7174_v43, %v1256_v9 }
 0x347   : > { %2877 = vrot.lane.b32.xlu1 %v9277_v14, %s8394_s19  ;;  %v1587_v33 = vadd.f32 %v1586_v56, %v1256_v9 }
 0x348   : > { %v9352_v18 = vpack.c.bf16 %v1595_v60, %v1592_v35  ;;  %7202 = vmatpush3.bf16.msra.mxu0 %v1641_v19 }
 0x349   : > { %2328 = vrot.lane.b32.xlu0 %v9340_v22, %s8392_s10  ;;  %v9354_v27 = vpack.c.bf16 %v1587_v33, %v1584_v25  ;;  %7203 = vmatprep.subr.bf16.mxu0 %v9340_v22 }
 0x34b   : > { %2879 = vrot.lane.b32.xlu1 %v9285_v37, %s8394_s19 }
 0x34c   : > { %7204 = vmatpush3.bf16.msra.mxu0 %v9340_v22 }
 0x34d   : > { %2330 = vrot.lane.b32.xlu0 %v9346_v30, %s8392_s10  ;;  %7205 = vmatprep.subr.bf16.mxu0 %v9346_v30  ;;  %v2040_v41 = vpop.permute.xlu1 %2039 }
 0x34f   : > { %2881 = vrot.lane.b32.xlu1 %v9293_v39, %s8394_s19 }
 0x350   : > { %7206 = vmatpush3.bf16.msra.mxu0 %v9346_v30 }
 0x351   : > { %2334 = vrot.lane.b32.xlu0 %v9352_v18, %s8392_s10  ;;  %7207 = vmatprep.subr.bf16.mxu0 %v9354_v27 }
 0x353   : > { %2322 = vrot.lane.b32.xlu1 %v1639_v42, %s8392_s10 }
 0x354   : > { %7208 = vmatpush3.bf16.msra.mxu0 %v9354_v27 }
 0x355   : > { %2732 = vrot.lane.b32.xlu0 %v1639_v42, %s8393_s0  ;;  %7209 = vmatprep.subr.bf16.mxu0 %v9352_v18  ;;  %v2042_v35 = vpop.permute.xlu1 %2041 }
 0x357   : > { %2326 = vrot.lane.b32.xlu1 %v1641_v19, %s8392_s10 }
 0x358   : > { %v1614_v46 = vpop.trf.xlu0  ;;  %7210 = vmatpush3.bf16.msra.mxu0 %v9352_v18 }
 0x359   : > { %2736 = vrot.lane.b32.xlu0 %v1641_v19, %s8393_s0 }
 0x35b   : > { %2332 = vrot.lane.b32.xlu1 %v9354_v27, %s8392_s10 }
 0x35c   : > { %v1615_v49 = vpop.trf.xlu0 }
 0x35d   : > { %v1630_v54 = vpack.c.bf16 %v1615_v49, %v1614_v46  ;;  %2740 = vrot.lane.b32.xlu0 %v9346_v30, %s8393_s0 }
 0x35f   : > { %7175 = vmatprep.subr.bf16.mxu1 %v1630_v54  ;;  %2730 = vrot.lane.b32.xlu1 %v9326_v47, %s8393_s0 }
 0x360   : > { %7176 = vmatpush3.bf16.msra.mxu1 %v1630_v54  ;;  %v1616_v9 = vpop.trf.xlu0 }
 0x361   : > { %2744 = vrot.lane.b32.xlu0 %v9352_v18, %s8393_s0 }
 0x363   : > { %2734 = vrot.lane.b32.xlu1 %v9334_v53, %s8393_s0 }
 0x364   : > { %v1617_v10 = vpop.trf.xlu0 }
 0x365   : > { %v1631_v15 = vpack.c.bf16 %v1617_v10, %v1616_v9  ;;  %3142 = vrot.lane.b32.xlu0 %v1639_v42, %s8394_s19 }
 0x367   : > { %7177 = vmatprep.subr.bf16.mxu1 %v1631_v15  ;;  %2738 = vrot.lane.b32.xlu1 %v9340_v22, %s8393_s0 }
 0x368   : > { %7178 = vmatpush3.bf16.msra.mxu1 %v1631_v15  ;;  %v1618_v28 = vpop.trf.xlu0 }
 0x369   : > { %3146 = vrot.lane.b32.xlu0 %v1641_v19, %s8394_s19 }
 0x36b   : > { %7180 = vmatmul.mubr.msk.bf16.vlgmr.msra.gmra.mrb[16].mxu1 %vm1660_vm0, %v9245_v3  ;;  %2742 = vrot.lane.b32.xlu1 %v9354_v27, %s8393_s0  ;;  %v2044_v3 = vpop.permute.xlu1 %2043 }
 0x36c   : > { %7183 = vmatprep.mubr.msk.bf16.mxu1 %vm1660_vm0, %v9253_v12  ;;  %v1619_v43 = vpop.trf.xlu0 }
 0x36d   : > { %v1632_v56 = vpack.c.bf16 %v1619_v43, %v1618_v28  ;;  %3148 = vrot.lane.b32.xlu0 %v9340_v22, %s8394_s19 }
 0x36f   : > { %7227 = vmatprep.subr.bf16.mxu1 %v1632_v56  ;;  %3140 = vrot.lane.b32.xlu1 %v9326_v47, %s8394_s19  ;;  %v2046_v47 = vpop.permute.xlu1 %2045 }
 0x370   : > { %7228 = vmatpush3.bf16.msra.mxu1 %v1632_v56  ;;  %v1620_v42 = vpop.trf.xlu0 }
 0x371   : > { %3150 = vrot.lane.b32.xlu0 %v9346_v30, %s8394_s19 }
 0x373   : > { %7184 = vmatmul.mubr.msk.bf16.gmra.mrb[20].mxu1 %vm1660_vm0, %v9261_v45  ;;  %3144 = vrot.lane.b32.xlu1 %v9334_v53, %s8394_s19  ;;  %v2048_v22 = vpop.permute.xlu1 %2047 }
 0x374   : > { %7187 = vmatprep.mubr.msk.bf16.mxu1 %vm1660_vm0, %v9269_v50  ;;  %v1621_v12 = vpop.trf.xlu0 }
 0x375   : > { %v1633_v19 = vpack.c.bf16 %v1621_v12, %v1620_v42 }
 0x377   : > { %7229 = vmatprep.subr.bf16.mxu1 %v1633_v19  ;;  %v2050_v60 = vpop.permute.xlu1 %2049 }
 0x378   : > { %7230 = vmatpush3.bf16.msra.mxu1 %v1633_v19  ;;  %v1622_v25 = vpop.trf.xlu0 }
 0x37b   : > { %7188 = vmatmul.mubr.msk.bf16.gmra.mrb[24].mxu1 %vm1660_vm0, %v9277_v14 }
 0x37c   : > { %7191 = vmatprep.mubr.msk.bf16.mxu1 %vm1660_vm0, %v9285_v37  ;;  %v1623_v45 = vpop.trf.xlu0 }
 0x37d   : > { %v1634_v53 = vpack.c.bf16 %v1623_v45, %v1622_v25  ;;  %v2052_v33 = vpop.permute.xlu1 %2051 }
 0x37f   : > { %7279 = vmatprep.subr.bf16.mxu1 %v1634_v53 }
 0x380   : > { %v1624_v50 = vpop.trf.xlu0 }
 0x383   : > { %7192 = vmatmul.mubr.msk.bf16.gmra.mrb[28].mxu1 %vm1660_vm0, %v9293_v39 }
 0x384   : > { %7231 = vmatprep.mubr.msk.bf16.mxu1 %vm1660_vm0, %v2040_v41  ;;  %v1625_v30 = vpop.trf.xlu0 }
 0x385   : > { %v2054_v46 = vpop.permute.xlu1 %2053  ;;  %v1635_v54 = vpack.c.bf16 %v1625_v30, %v1624_v50 }
 0x388   : > { %v1626_v49 = vpop.trf.xlu0 }
 0x389   : > { %v2458_v37 = vpop.permute.xlu1 %2457 }
 0x38b   : > { %7232 = vmatmul.mubr.msk.bf16.vlgmr.msra.gmra.mrb[32].mxu1 %vm1660_vm0, %v2042_v35 }
 0x38c   : > { %7235 = vmatprep.mubr.msk.bf16.mxu1 %vm1660_vm0, %v2044_v3  ;;  %v1627_v14 = vpop.trf.xlu0  ;;  %7280 = vmatpush3.bf16.msra.mxu1 %v1634_v53 }
 0x38d   : > { %v1636_v9 = vpack.c.bf16 %v1627_v14, %v1626_v49  ;;  %7281 = vmatprep.subr.bf16.mxu1 %v1635_v54  ;;  %v2460_v10 = vpop.permute.xlu1 %2459 }
 0x390   : > { %7282 = vmatpush3.bf16.msra.mxu1 %v1635_v54  ;;  %v1628_v28 = vpop.trf.xlu0 }
 0x391   : > { %7331 = vmatprep.subr.bf16.mxu1 %v1636_v9  ;;  %v2462_v39 = vpop.permute.xlu1 %2461 }
 0x393   : > { %7236 = vmatmul.mubr.msk.bf16.gmra.mrb[36].mxu1 %vm1660_vm0, %v2046_v47 }
 0x394   : > { %7239 = vmatprep.mubr.msk.bf16.mxu1 %vm1660_vm0, %v2048_v22  ;;  %v1629_v43 = vpop.trf.xlu0 }
 0x395   : > { %v2464_v15 = vpop.permute.xlu1 %2463  ;;  %v1637_v56 = vpack.c.bf16 %v1629_v43, %v1628_v28 }
 0x399   : > { %v2466_v41 = vpop.permute.xlu1 %2465 }
 0x39b   : > { %7240 = vmatmul.mubr.msk.bf16.gmra.mrb[40].mxu1 %vm1660_vm0, %v2050_v60 }
 0x39c   : > { %7243 = vmatprep.mubr.msk.bf16.mxu1 %vm1660_vm0, %v2052_v33  ;;  %v9437_v33 = vrot.slane %v8822_v11, %v9221_v21 }
 0x39d   : > { %v2468_v35 = vpop.permute.xlu1 %2467 }
 0x3a1   : > { %v2470_v42 = vpop.permute.xlu1 %2469 }
 0x3a3   : > { %7244 = vmatmul.mubr.msk.bf16.gmra.mrb[44].mxu1 %vm1660_vm0, %v2054_v46 }
 0x3a4   : > { %7283 = vmatprep.mubr.msk.bf16.mxu1 %vm1660_vm0, %v2458_v37 }
 0x3a5   : > { %v2472_v12 = vpop.permute.xlu1 %2471 }
 0x3a9   : > { %v2870_v47 = vpop.permute.xlu1 %2869 }
 0x3ab   : > { %7284 = vmatmul.mubr.msk.bf16.vlgmr.msra.gmra.mrb[48].mxu1 %vm1660_vm0, %v2460_v10 }
 0x3ac   : > { %7287 = vmatprep.mubr.msk.bf16.mxu1 %vm1660_vm0, %v2462_v39  ;;  %7332 = vmatpush3.bf16.msra.mxu1 %v1636_v9 }
 0x3ad   : > { %7333 = vmatprep.subr.bf16.mxu1 %v1637_v56  ;;  %v2872_v25 = vpop.permute.xlu1 %2871 }
 0x3af   : > { %v2868_v3 = vpop.permute.xlu0 %2867 }
 0x3b0   : > { %7334 = vmatpush3.bf16.msra.mxu1 %v1637_v56 }
 0x3b1   : > { %v2874_v22 = vpop.permute.xlu1 %2873 }
 0x3b3   : > { %7288 = vmatmul.mubr.msk.bf16.gmra.mrb[52].mxu1 %vm1660_vm0, %v2464_v15  ;;  %v9421_v19 = vpop.permute.xlu0 %2320 }
 0x3b4   : > { %7291 = vmatprep.mubr.msk.bf16.mxu1 %vm1660_vm0, %v2466_v41  ;;  %7247 = vmatprep.subr.bf16.mxu0 %v9421_v19 }
 0x3b5   : > { %v2876_v45 = vpop.permute.xlu1 %2875 }
 0x3b9   : > { %v2878_v53 = vpop.permute.xlu1 %2877 }
 0x3bb   : > { %7292 = vmatmul.mubr.msk.bf16.gmra.mrb[56].mxu1 %vm1660_vm0, %v2468_v35 }
 0x3bc   : > { %7295 = vmatprep.mubr.msk.bf16.mxu1 %vm1660_vm0, %v2470_v42 }
 0x3bd   : > { %v2880_v60 = vpop.permute.xlu1 %2879 }
 0x3c1   : > { %v2882_v50 = vpop.permute.xlu1 %2881 }
 0x3c3   : > { %7296 = vmatmul.mubr.msk.bf16.gmra.mrb[60].mxu1 %vm1660_vm0, %v2472_v12 }
 0x3c4   : > { %7335 = vmatprep.mubr.msk.bf16.mxu1 %vm1660_vm0, %v2868_v3 }
 0x3c5   : > { %v9616_v62 = vpop.permute.xlu1 %2322 }
 0x3cb   : > { %7336 = vmatmul.mubr.msk.bf16.vlgmr.msra.gmra.mrb[64].mxu1 %vm1660_vm0, %v2870_v47 }
 0x3cc   : > { %7339 = vmatprep.mubr.msk.bf16.mxu1 %vm1660_vm0, %v2872_v25 }
 0x3d3   : > { %7340 = vmatmul.mubr.msk.bf16.gmra.mrb[68].mxu1 %vm1660_vm0, %v2874_v22 }
 0x3d4   : > { %7343 = vmatprep.mubr.msk.bf16.mxu1 %vm1660_vm0, %v2876_v45 }
 0x3db   : > { %7344 = vmatmul.mubr.msk.bf16.gmra.mrb[72].mxu1 %vm1660_vm0, %v2878_v53 }
 0x3dc   : > { %7347 = vmatprep.mubr.msk.bf16.mxu1 %vm1660_vm0, %v2880_v60 }
 0x3e3   : > { %7348 = vmatmul.mubr.msk.bf16.gmra.mrb[76].mxu1 %vm1660_vm0, %v2882_v50 }
 0x43e   : > { %v7181_v30 = vpop.f32.mrb[16].mxu1 }
 0x43f   : > { %v9440_v46 = vadd.f32 %v7181_v30, %v9437_v33  ;;  %v1719_v49 = vpop.f32.mrb[17].mxu1 }
 0x440   : > { %v7182_v54 = vpop.f32.mrb[18].mxu1  ;;  %v9447_v9 = vadd.f32 %v1719_v49, %v9437_v33 }
 0x441   : > { %1786 = vmax.xlane.f32.xlu1 %v9440_v46  ;;  %v1722_v14 = vpop.f32.mrb[19].mxu1  ;;  %v9452_v39 = vadd.f32 %v7182_v54, %v9437_v33 }
 0x442   : > { %v9444_v37 = vadd.f32 %v1722_v14, %v9437_v33 }
 0x444   : > { %1784 = vmax.xlane.f32.xlu0 %v9444_v37 }
 0x445   : > { %1782 = vmax.xlane.f32.xlu1 %v9447_v9 }
 0x446   : > { %v7185_v10 = vpop.f32.mrb[20].mxu1 }
 0x447   : > { %v9455_v15 = vadd.f32 %v7185_v10, %v9437_v33  ;;  %v1735_v28 = vpop.f32.mrb[21].mxu1 }
 0x448   : > { %v7186_v41 = vpop.f32.mrb[22].mxu1  ;;  %v9460_v56 = vadd.f32 %v1735_v28, %v9437_v33 }
 0x449   : > { %v1738_v43 = vpop.f32.mrb[23].mxu1  ;;  %1794 = vmax.xlane.f32.xlu0 %v9455_v15  ;;  %1788 = vmax.xlane.f32.xlu1 %v9452_v39  ;;  %v9463_v35 = vadd.f32 %v7186_v41, %v9437_v33 }
 0x44a   : > { %v9468_v3 = vadd.f32 %v1738_v43, %v9437_v33 }
 0x44d   : > { %1790 = vmax.xlane.f32.xlu0 %v9460_v56  ;;  %1796 = vmax.xlane.f32.xlu1 %v9463_v35 }
 0x44e   : > { %v7189_v42 = vpop.f32.mrb[24].mxu1 }
 0x44f   : > { %v9471_v12 = vadd.f32 %v7189_v42, %v9437_v33  ;;  %v1751_v47 = vpop.f32.mrb[25].mxu1 }
 0x450   : > { %v7190_v25 = vpop.f32.mrb[26].mxu1  ;;  %v9476_v45 = vadd.f32 %v1751_v47, %v9437_v33 }
 0x451   : > { %v1754_v22 = vpop.f32.mrb[27].mxu1  ;;  %1802 = vmax.xlane.f32.xlu0 %v9471_v12  ;;  %1792 = vmax.xlane.f32.xlu1 %v9468_v3  ;;  %v9479_v53 = vadd.f32 %v7190_v25, %v9437_v33 }
 0x452   : > { %v9484_v50 = vadd.f32 %v1754_v22, %v9437_v33 }
 0x455   : > { %1798 = vmax.xlane.f32.xlu0 %v9476_v45  ;;  %1804 = vmax.xlane.f32.xlu1 %v9479_v53 }
 0x456   : > { %v7193_v60 = vpop.f32.mrb[28].mxu1 }
 0x457   : > { %v9487_v30 = vadd.f32 %v7193_v60, %v9437_v33  ;;  %v1767_v49 = vpop.f32.mrb[29].mxu1 }
 0x458   : > { %v7194_v54 = vpop.f32.mrb[30].mxu1  ;;  %v9492_v10 = vadd.f32 %v1767_v49, %v9437_v33 }
 0x459   : > { %v1770_v14 = vpop.f32.mrb[31].mxu1  ;;  %1810 = vmax.xlane.f32.xlu0 %v9487_v30  ;;  %1800 = vmax.xlane.f32.xlu1 %v9484_v50  ;;  %v9495_v28 = vadd.f32 %v7194_v54, %v9437_v33 }
 0x45a   : > { %v9500_v43 = vadd.f32 %v1770_v14, %v9437_v33 }
 0x45d   : > { %1806 = vmax.xlane.f32.xlu0 %v9492_v10  ;;  %1812 = vmax.xlane.f32.xlu1 %v9495_v28 }
 0x45e   : > { %v7233_v41 = vpop.f32.mrb[32].mxu1 }
 0x45f   : > { %v2113_v42 = vpop.f32.mrb[33].mxu1  ;;  %v9508_v60 = vadd.f32 %v7233_v41, %v9437_v33 }
 0x460   : > { %v9503_v47 = vadd.f32 %v2113_v42, %v9437_v33  ;;  %v7234_v25 = vpop.f32.mrb[34].mxu1 }
 0x461   : > { %v2116_v22 = vpop.f32.mrb[35].mxu1  ;;  %1808 = vmax.xlane.f32.xlu1 %v9500_v43  ;;  %v9512_v54 = vadd.f32 %v7234_v25, %v9437_v33 }
 0x462   : > { %2176 = vmax.xlane.f32.xlu0 %v9503_v47  ;;  %v9520_v40 = vadd.f32 %v2116_v22, %v9437_v33 }
 0x465   : > { %2180 = vmax.xlane.f32.xlu1 %v9508_v60 }
 0x466   : > { %v7237_v49 = vpop.f32.mrb[36].mxu1 }
 0x467   : > { %v2129_v14 = vpop.f32.mrb[37].mxu1  ;;  %v9524_v36 = vadd.f32 %v7237_v49, %v9437_v33 }
 0x468   : > { %v9515_v11 = vadd.f32 %v2129_v14, %v9437_v33  ;;  %v7238_v42 = vpop.f32.mrb[38].mxu1 }
 0x469   : > { %v2132_v48 = vpop.f32.mrb[39].mxu1  ;;  %2182 = vmax.xlane.f32.xlu1 %v9512_v54  ;;  %v9532_v31 = vadd.f32 %v7238_v42, %v9437_v33 }
 0x46a   : > { %2184 = vmax.xlane.f32.xlu0 %v9515_v11  ;;  %v9536_v32 = vadd.f32 %v2132_v48, %v9437_v33 }
 0x46d   : > { %2178 = vmax.xlane.f32.xlu1 %v9520_v40 }
 0x46e   : > { %v7241_v41 = vpop.f32.mrb[40].mxu1 }
 0x46f   : > { %v2145_v25 = vpop.f32.mrb[41].mxu1  ;;  %v9543_v23 = vadd.f32 %v7241_v41, %v9437_v33 }
 0x470   : > { %v9527_v34 = vadd.f32 %v2145_v25, %v9437_v33  ;;  %v7242_v14 = vpop.f32.mrb[42].mxu1 }
 0x471   : > { %v2148_v38 = vpop.f32.mrb[43].mxu1  ;;  %2188 = vmax.xlane.f32.xlu1 %v9524_v36  ;;  %v9551_v24 = vadd.f32 %v7242_v14, %v9437_v33 }
 0x472   : > { %2192 = vmax.xlane.f32.xlu0 %v9527_v34  ;;  %v9559_v4 = vadd.f32 %v2148_v38, %v9437_v33 }
 0x475   : > { %2190 = vmax.xlane.f32.xlu1 %v9532_v31 }
 0x476   : > { %v7245_v22 = vpop.f32.mrb[44].mxu1 }
 0x477   : > { %v2161_v49 = vpop.f32.mrb[45].mxu1  ;;  %v9567_v13 = vadd.f32 %v7245_v22, %v9437_v33 }
 0x478   : > { %v7246_v26 = vpop.f32.mrb[46].mxu1  ;;  %v9575_v21 = vadd.f32 %v2161_v49, %v9437_v33 }
 0x479   : > { %v9539_v25 = vadd.f32 %v7246_v26, %v9437_v33  ;;  %v2164_v29 = vpop.f32.mrb[47].mxu1  ;;  %2186 = vmax.xlane.f32.xlu1 %v9536_v32  ;;  %11947 = vst [vmem:[#allocation130_spill] sm:$0xff] %v9567_v13 }
 0x47a   : > { %v9547_v42 = vadd.f32 %v2164_v29, %v9437_v33  ;;  %11949 = vst [vmem:[#allocation132_spill] sm:$0xff] %v9575_v21 }
 0x47b   : > { %2206 = vmax.xlane.f32.xlu0 %v9539_v25 }
 0x47c   : > { %11944 = vst [vmem:[#allocation127_spill] sm:$0xff] %v9547_v42 }
 0x47d   : > { %2196 = vmax.xlane.f32.xlu1 %v9543_v23 }
 0x47e   : > { %v7285_v48 = vpop.f32.mrb[48].mxu1 }
 0x47f   : > { %v2531_v55 = vpop.f32.mrb[49].mxu1  ;;  %2202 = vmax.xlane.f32.xlu0 %v9547_v42  ;;  %v9585_v7 = vadd.f32 %v7285_v48, %v9437_v33 }
 0x480   : > { %v7286_v26 = vpop.f32.mrb[50].mxu1 }
 0x481   : > { %v9555_v17 = vadd.f32 %v7286_v26, %v9437_v33  ;;  %v2534_v41 = vpop.f32.mrb[51].mxu1  ;;  %2198 = vmax.xlane.f32.xlu1 %v9551_v24  ;;  %11951 = vst [vmem:[#allocation134_spill] sm:$0xff] %v9585_v7 }
 0x482   : > { %v9563_v29 = vadd.f32 %v2534_v41, %v9437_v33  ;;  %v9578_v41 = vpop.permute.xlu0 %2324 }
 0x483   : > { %11945 = vst [vmem:[#allocation128_spill] sm:$0xff] %v9555_v17  ;;  %2600 = vmax.xlane.f32.xlu0 %v9555_v17 }
 0x484   : > { %11946 = vst [vmem:[#allocation129_spill] sm:$0xff] %v9563_v29 }
 0x485   : > { %2194 = vmax.xlane.f32.xlu1 %v9559_v4 }
 0x486   : > { %v7289_v14 = vpop.f32.mrb[52].mxu1  ;;  %v9592_v2 = vpop.permute.xlu0 %2328 }
 0x487   : > { %v2547_v16 = vpop.f32.mrb[53].mxu1  ;;  %2596 = vmax.xlane.f32.xlu0 %v9563_v29  ;;  %v9603_v0 = vadd.f32 %v7289_v14, %v9437_v33 }
 0x488   : > { %v7290_v26 = vpop.f32.mrb[54].mxu1 }
 0x489   : > { %v9571_v8 = vadd.f32 %v7290_v26, %v9437_v33  ;;  %v2550_v38 = vpop.f32.mrb[55].mxu1  ;;  %2204 = vmax.xlane.f32.xlu1 %v9567_v13  ;;  %11955 = vst [vmem:[#allocation138_spill] sm:$0xff] %v9603_v0 }
 0x48a   : > { %v9581_v22 = vadd.f32 %v2550_v38, %v9437_v33  ;;  %v9595_v38 = vadd.f32 %v2531_v55, %v9437_v33  ;;  %v9606_v20 = vpop.permute.xlu0 %2330 }
 0x48b   : > { %11948 = vst [vmem:[#allocation131_spill] sm:$0xff] %v9571_v8  ;;  %2608 = vmax.xlane.f32.xlu0 %v9571_v8 }
 0x48c   : > { %11950 = vst [vmem:[#allocation133_spill] sm:$0xff] %v9581_v22  ;;  %11953 = vst [vmem:[#allocation136_spill] sm:$0xff] %v9595_v38 }
 0x48d   : > { %2200 = vmax.xlane.f32.xlu1 %v9575_v21 }
 0x48e   : > { %v7293_v59 = vpop.f32.mrb[56].mxu1  ;;  %v9622_v44 = vpop.permute.xlu0 %2334 }
 0x48f   : > { %v2563_v26 = vpop.f32.mrb[57].mxu1  ;;  %2604 = vmax.xlane.f32.xlu0 %v9581_v22 }
 0x490   : > { %v7294_v6 = vpop.f32.mrb[58].mxu1 }
 0x491   : > { %v9589_v49 = vadd.f32 %v7294_v6, %v9437_v33  ;;  %v2566_v52 = vpop.f32.mrb[59].mxu1  ;;  %2598 = vmax.xlane.f32.xlu1 %v9585_v7 }
 0x492   : > { %v9599_v48 = vadd.f32 %v2566_v52, %v9437_v33  ;;  %v9613_v52 = vadd.f32 %v2547_v16, %v9437_v33 }
 0x493   : > { %11952 = vst [vmem:[#allocation135_spill] sm:$0xff] %v9589_v49  ;;  %2616 = vmax.xlane.f32.xlu0 %v9589_v49 }
 0x494   : > { %11954 = vst [vmem:[#allocation137_spill] sm:$0xff] %v9599_v48  ;;  %11957 = vst [vmem:[#allocation140_spill] sm:$0xff] %v9613_v52 }
 0x495   : > { %2594 = vmax.xlane.f32.xlu1 %v9595_v38 }
 0x496   : > { %v7297_v5 = vpop.f32.mrb[60].mxu1 }
 0x497   : > { %v2579_v6 = vpop.f32.mrb[61].mxu1  ;;  %2612 = vmax.xlane.f32.xlu0 %v9599_v48  ;;  %v9638_v48 = vpop.permute.xlu0 %2732 }
 0x498   : > { %v7298_v1 = vpop.f32.mrb[62].mxu1 }
 0x499   : > { %v9609_v55 = vadd.f32 %v7298_v1, %v9437_v33  ;;  %v2582_v63 = vpop.f32.mrb[63].mxu1  ;;  %2606 = vmax.xlane.f32.xlu1 %v9603_v0  ;;  %v9625_v1 = vadd.f32 %v7293_v59, %v9437_v33 }
 0x49a   : > { %v9619_v14 = vadd.f32 %v2582_v63, %v9437_v33  ;;  %v9632_v63 = vpop.permute.xlu1 %2326 }
 0x49b   : > { %11956 = vst [vmem:[#allocation139_spill] sm:$0xff] %v9609_v55  ;;  %2624 = vmax.xlane.f32.xlu0 %v9609_v55  ;;  %11959 = vst [vmem:[#allocation142_spill] sm:$0xff] %v9625_v1  ;;  %v9635_v55 = vadd.f32 %v2563_v26, %v9437_v33 }
 0x49c   : > { %11958 = vst [vmem:[#allocation141_spill] sm:$0xff] %v9619_v14 }
 0x49d   : > { %2602 = vmax.xlane.f32.xlu1 %v9613_v52  ;;  %11961 = vst [vmem:[#allocation144_spill] sm:$0xff] %v9635_v55 }
 0x49e   : > { %v7337_v51 = vpop.f32.mrb[64].mxu1 }
 0x49f   : > { %v2941_v61 = vpop.f32.mrb[65].mxu1  ;;  %2620 = vmax.xlane.f32.xlu0 %v9619_v14 }
 0x4a0   : > { %v7338_v16 = vpop.f32.mrb[66].mxu1 }
 0x4a1   : > { %v9629_v57 = vadd.f32 %v7338_v16, %v9437_v33  ;;  %v2944_v58 = vpop.f32.mrb[67].mxu1  ;;  %2614 = vmax.xlane.f32.xlu1 %v9625_v1  ;;  %v9645_v16 = vadd.f32 %v7297_v5, %v9437_v33  ;;  %v9648_v1 = vpop.permute.xlu1 %2332 }
 0x4a2   : > { %v9641_v59 = vadd.f32 %v2944_v58, %v9437_v33  ;;  %v9654_v58 = vpop.permute.xlu0 %2736 }
 0x4a3   : > { %11960 = vst [vmem:[#allocation143_spill] sm:$0xff] %v9629_v57  ;;  %3010 = vmax.xlane.f32.xlu0 %v9629_v57  ;;  %11963 = vst [vmem:[#allocation146_spill] sm:$0xff] %v9645_v16 }
 0x4a4   : > { %11962 = vst [vmem:[#allocation145_spill] sm:$0xff] %v9641_v59  ;;  %11965 = vst [vmem:[#allocation148_spill] sm:$0xff] %v9654_v58 }
 0x4a5   : > { %2610 = vmax.xlane.f32.xlu1 %v9635_v55  ;;  %v9657_v55 = vadd.f32 %v2579_v6, %v9437_v33  ;;  %v9661_v5 = vpop.permute.xlu1 %2730  ;;  %v9676_v6 = vadd.f32 %v2941_v61, %v9437_v33 }
 0x4a6   : > { %v7341_v14 = vpop.f32.mrb[68].mxu1 }
 0x4a7   : > { %v2957_v52 = vpop.f32.mrb[69].mxu1  ;;  %3006 = vmax.xlane.f32.xlu0 %v9641_v59  ;;  %11966 = vst [vmem:[#allocation149_spill] sm:$0xff] %v9657_v55  ;;  %11969 = vst [vmem:[#allocation152_spill] sm:$0xff] %v9676_v6  ;;  %v9686_v8 = vadd.f32 %v7341_v14, %v9437_v33 }
 0x4a8   : > { %v9651_v26 = vadd.f32 %v2957_v52, %v9437_v33  ;;  %v7342_v57 = vpop.f32.mrb[70].mxu1  ;;  %v9666_v52 = vadd.f32 %v7337_v51, %v9437_v33 }
 0x4a9   : > { %v2960_v49 = vpop.f32.mrb[71].mxu1  ;;  %2622 = vmax.xlane.f32.xlu1 %v9645_v16  ;;  %v9670_v16 = vpop.permute.xlu0 %2740  ;;  %11971 = vst [vmem:[#allocation154_spill] sm:$0xff] %v9686_v8 }
 0x4aa   : > { %11964 = vst [vmem:[#allocation147_spill] sm:$0xff] %v9651_v26  ;;  %11967 = vst [vmem:[#allocation150_spill] sm:$0xff] %v9666_v52  ;;  %v9704_v14 = vadd.f32 %v2960_v49, %v9437_v33 }
 0x4ab   : > { %3012 = vmax.xlane.f32.xlu0 %v9651_v26  ;;  %11968 = vst [vmem:[#allocation151_spill] sm:$0xff] %v9670_v16  ;;  %v9678_v26 = vpop.permute.xlu1 %2734 }
 0x4ac   : > { %11975 = vst [vmem:[#allocation158_spill] sm:$0xff] %v9704_v14 }
 0x4ad   : > { %2618 = vmax.xlane.f32.xlu1 %v9657_v55  ;;  %v9683_v51 = vpop.permute.xlu0 %2744 }
 0x4ae   : > { %v9663_v59 = vpop.f32.mrb[72].mxu1  ;;  %11970 = vst [vmem:[#allocation153_spill] sm:$0xff] %v9683_v51 }
 0x4af   : > { %v2973_v0 = vpop.f32.mrb[73].mxu1  ;;  %v9695_v61 = vpop.permute.xlu1 %2738 }
 0x4b0   : > { %v9668_v22 = vpop.f32.mrb[74].mxu1  ;;  %11972 = vst [vmem:[#allocation155_spill] sm:$0xff] %v9695_v61 }
 0x4b1   : > { %v9672_v38 = vpop.f32.mrb[75].mxu1  ;;  %3008 = vmax.xlane.f32.xlu1 %v9666_v52  ;;  %v9698_v52 = vadd.f32 %v7342_v57, %v9437_v33 }
 0x4b3   : > { %11973 = vst [vmem:[#allocation156_spill] sm:$0xff] %v9698_v52  ;;  %v9706_v51 = vpop.permute.xlu1 %2742 }
 0x4b4   : > { %11976 = vst [vmem:[#allocation159_spill] sm:$0xff] %v9706_v51 }
 0x4b5   : > { %3004 = vmax.xlane.f32.xlu1 %v9676_v6  ;;  %v9700_v6 = vpop.permute.xlu0 %3142 }
 0x4b6   : > { %v9681_v55 = vpop.f32.mrb[76].mxu1  ;;  %11974 = vst [vmem:[#allocation157_spill] sm:$0xff] %v9700_v6 }
 0x4b7   : > { %v9688_v7 = vpop.f32.mrb[77].mxu1 }
 0x4b8   : > { %v9690_v16 = vpop.f32.mrb[78].mxu1 }
 0x4b9   : > { %v9692_v29 = vpop.f32.mrb[79].mxu1  ;;  %3016 = vmax.xlane.f32.xlu1 %v9686_v8  ;;  %v9708_v21 = vpop.permute.xlu0 %3146 }
 0x4ba   : > { %11977 = vst [vmem:[#allocation160_spill] sm:$0xff] %v9708_v21  ;;  %v9713_v8 = vpop.permute.xlu1 %3140 }
 0x4bb   : > { %11978 = vst [vmem:[#allocation161_spill] sm:$0xff] %v9713_v8 }
 0x4bd   : > { %3018 = vmax.xlane.f32.xlu1 %v9698_v52  ;;  %v9715_v57 = vpop.permute.xlu0 %3148 }
 0x4be   : > { %11979 = vst [vmem:[#allocation162_spill] sm:$0xff] %v9715_v57  ;;  %v9717_v61 = vpop.permute.xlu1 %3144 }
 0x4bf   : > { %11980 = vst [vmem:[#allocation163_spill] sm:$0xff] %v9717_v61 }
 0x4c1   : > { %3154 = vrot.lane.b32.xlu0 %v9352_v18, %s8394_s19  ;;  %3014 = vmax.xlane.f32.xlu1 %v9704_v14  ;;  %v9719_v6 = vpop.permute.xlu0 %3150 }
 0x4c2   : > { %11981 = vst [vmem:[#allocation164_spill] sm:$0xff] %v9719_v6 }
 0x4ce   : > { %v1787_v52 = vpop.xlane.xlu1 %1786 }
 0x4cf   : > { %v1816_v18 = vsub.f32 %v9440_v46, %v1787_v52 }
 0x4d1   : > { %v1785_v49 = vpop.xlane.xlu0 %1784  ;;  %v1834_v61 = vmul.f32 1.442695, %v1816_v18 }
 0x4d2   : > { %v1815_v17 = vsub.f32 %v9444_v37, %v1785_v49  ;;  %3152 = vrot.lane.b32.xlu1 %v9354_v27, %s8394_s19  ;;  %v1783_v21 = vpop.xlane.xlu1 %1782 }
 0x4d3   : > { %v1814_v14 = vsub.f32 %v9447_v9, %v1783_v21  ;;  %v9730_v21 = vadd.f32 %v2973_v0, %v9437_v33 }
 0x4d4   : > { %v1832_v51 = vmul.f32 1.442695, %v1815_v17 }
 0x4d5   : > { %v1830_v8 = vmul.f32 1.442695, %v1814_v14  ;;  %v9754_v14 = vadd.f32 %v9668_v22, %v9437_v33  ;;  %v9763_v22 = vadd.f32 %v9688_v7, %v9437_v33 }
 0x4d6   : > { %7854 = vpow2.f32 %v1832_v51  ;;  %v1795_v57 = vpop.xlane.xlu0 %1794  ;;  %v1789_v13 = vpop.xlane.xlu1 %1788 }
 0x4d7   : > { %7856 = vpow2.f32 %v1830_v8  ;;  %v1817_v6 = vsub.f32 %v9452_v39, %v1789_v13  ;;  %v1820_v17 = vsub.f32 %v9455_v15, %v1795_v57 }
 0x4d8   : > { %7858 = vpow2.f32 %v1834_v61 }
 0x4d9   : > { %v1836_v58 = vmul.f32 1.442695, %v1817_v6  ;;  %v1842_v0 = vmul.f32 1.442695, %v1820_v17 }
 0x4da   : > { %v1791_v42 = vpop.xlane.xlu0 %1790  ;;  %v1797_v37 = vpop.xlane.xlu1 %1796 }
 0x4db   : > { %v1818_v27 = vsub.f32 %v9460_v56, %v1791_v42  ;;  %v1821_v49 = vsub.f32 %v9463_v35, %v1797_v37  ;;  %7860 = vpow2.f32 %v1836_v58  ;;  %v9741_v35 = vadd.f32 %v9663_v59, %v9437_v33 }
 0x4dd   : > { %v1838_v46 = vmul.f32 1.442695, %v1818_v27  ;;  %v1844_v8 = vmul.f32 1.442695, %v1821_v49 }
 0x4de   : > { %v1803_v9 = vpop.xlane.xlu0 %1802  ;;  %v1793_v52 = vpop.xlane.xlu1 %1792 }
 0x4df   : > { %v1819_v13 = vsub.f32 %v9468_v3, %v1793_v52  ;;  %7862 = vpow2.f32 %v1838_v46  ;;  %v1824_v57 = vsub.f32 %v9471_v12, %v1803_v9 }
 0x4e0   : > { %v9734_v39 = vpop.eup %7854  ;;  %3020 = vmax.xlane.f32.xlu0 %v9730_v21  ;;  %7864 = vpow2.f32 %v1844_v8 }
 0x4e1   : > { %v9737_v6 = vpop.eup %7856  ;;  %v1840_v56 = vmul.f32 1.442695, %v1819_v13  ;;  %v1850_v46 = vmul.f32 1.442695, %v1824_v57 }
 0x4e2   : > { %v1799_v15 = vpop.xlane.xlu0 %1798  ;;  %v1805_v42 = vpop.xlane.xlu1 %1804  ;;  %v1910_v58 = vpack.c.bf16 %v9734_v39, %v9737_v6 }
 0x4e3   : > { %v1822_v3 = vsub.f32 %v9476_v45, %v1799_v15  ;;  %v1825_v51 = vsub.f32 %v9479_v53, %v1805_v42  ;;  %7866 = vpow2.f32 %v1840_v56  ;;  %v9748_v61 = vpop.eup %7858 }
 0x4e4   : > { %3024 = vmax.xlane.f32.xlu0 %v9741_v35  ;;  %7211 = vmatprep.mubr.bf16.mxu0 %v1910_v58  ;;  %7868 = vpow2.f32 %v1842_v0 }
 0x4e5   : > { %v9750_v59 = vpop.eup %7860  ;;  %v1846_v18 = vmul.f32 1.442695, %v1822_v3  ;;  %v1852_v27 = vmul.f32 1.442695, %v1825_v51 }
 0x4e6   : > { %v1811_v37 = vpop.xlane.xlu0 %1810  ;;  %v1801_v45 = vpop.xlane.xlu1 %1800  ;;  %v1911_v49 = vpack.c.bf16 %v9750_v59, %v9748_v61 }
 0x4e7   : > { %v1823_v53 = vsub.f32 %v9484_v50, %v1801_v45  ;;  %7870 = vpow2.f32 %v1846_v18  ;;  %v1828_v56 = vsub.f32 %v9487_v30, %v1811_v37  ;;  %v9798_v18 = vadd.f32 %v9672_v38, %v9437_v33 }
 0x4e8   : > { %3026 = vmax.xlane.f32.xlu0 %v9754_v14  ;;  %7212 = vmatmul.mubr.bf16.vlgmr.msra.gmra.mrb[32].mxu0 %v1911_v49  ;;  %7872 = vpow2.f32 %v1852_v27 }
 0x4e9   : > { %v1848_v17 = vmul.f32 1.442695, %v1823_v53  ;;  %7248 = vmatpush3.bf16.msra.mxu0 %v9421_v19  ;;  %v9768_v52 = vpop.eup %7862  ;;  %v9778_v19 = vadd.f32 %v9692_v29, %v9437_v33  ;;  %v1858_v51 = vmul.f32 1.442695, %v1828_v56 }
 0x4ea   : > { %v1807_v12 = vpop.xlane.xlu0 %1806  ;;  %v1813_v9 = vpop.xlane.xlu1 %1812  ;;  %7249 = vmatprep.subr.bf16.mxu0 %v9616_v62 }
 0x4eb   : > { %v1826_v50 = vsub.f32 %v9492_v10, %v1807_v12  ;;  %7874 = vpow2.f32 %v1848_v17  ;;  %v1829_v8 = vsub.f32 %v9495_v28, %v1813_v9  ;;  %v9772_v7 = vpop.eup %7864 }
 0x4ec   : > { %3028 = vmax.xlane.f32.xlu0 %v9763_v22  ;;  %7876 = vpow2.f32 %v1850_v46 }
 0x4ed   : > { %v9774_v13 = vpop.eup %7866  ;;  %v1854_v0 = vmul.f32 1.442695, %v1826_v50  ;;  %7250 = vmatpush3.bf16.msra.mxu0 %v9616_v62  ;;  %v1860_v58 = vmul.f32 1.442695, %v1829_v8  ;;  %v9790_v62 = vadd.f32 %v9681_v55, %v9437_v33 }
 0x4ee   : > { %v1809_v10 = vpop.xlane.xlu1 %1808  ;;  %7251 = vmatprep.subr.bf16.mxu0 %v9578_v41  ;;  %v1912_v15 = vpack.c.bf16 %v9774_v13, %v9768_v52  ;;  %v7869_v42 = vpop.eup %7868 }
 0x4ef   : > { %v1827_v28 = vsub.f32 %v9500_v43, %v1809_v10  ;;  %v2177_v3 = vpop.xlane.xlu0 %2176  ;;  %v1913_v30 = vpack.c.bf16 %v9772_v7, %v7869_v42  ;;  %7878 = vpow2.f32 %v1854_v0 }
 0x4f0   : > { %3030 = vmax.xlane.f32.xlu0 %v9778_v19  ;;  %7215 = vmatprep.mubr.bf16.mxu0 %v1912_v15  ;;  %v2208_v37 = vsub.f32 %v9503_v47, %v2177_v3 }
 0x4f1   : > { %v1856_v29 = vmul.f32 1.442695, %v1827_v28  ;;  %7252 = vmatpush3.bf16.msra.mxu0 %v9578_v41  ;;  %v9794_v57 = vpop.eup %7870 }
 0x4f2   : > { %v2181_v43 = vpop.xlane.xlu1 %2180  ;;  %7216 = vmatmul.mubr.bf16.gmra.mrb[36].mxu0 %v1913_v30  ;;  %7253 = vmatprep.subr.bf16.mxu0 %v9632_v63  ;;  %v9802_v55 = vpop.eup %7872  ;;  %v2224_v49 = vmul.f32 1.442695, %v2208_v37 }
 0x4f3   : > { %7880 = vpow2.f32 %v1856_v29  ;;  %v2210_v41 = vsub.f32 %v9508_v60, %v2181_v43  ;;  %v9817_v60 = vadd.f32 %v9690_v16, %v9437_v33 }
 0x4f4   : > { %7882 = vpow2.f32 %v1860_v58  ;;  %3032 = vmax.xlane.f32.xlu0 %v9790_v62 }
 0x4f5   : > { %v9805_v45 = vpop.eup %7874  ;;  %7884 = vpow2.f32 %v1858_v51  ;;  %7254 = vmatpush3.bf16.msra.mxu0 %v9632_v63  ;;  %v2228_v63 = vmul.f32 1.442695, %v2210_v41 }
 0x4f6   : > { %3022 = vmax.xlane.f32.xlu1 %v9798_v18  ;;  %v2183_v27 = vpop.xlane.xlu1 %2182  ;;  %7255 = vmatprep.subr.bf16.mxu0 %v9592_v2  ;;  %v1914_v47 = vpack.c.bf16 %v9805_v45, %v9794_v57  ;;  %v9813_v53 = vpop.eup %7876  ;;  %7886 = vpow2.f32 %v2224_v49 }
 0x4f7   : > { %v2211_v38 = vsub.f32 %v9512_v54, %v2183_v27  ;;  %v1915_v17 = vpack.c.bf16 %v9802_v55, %v9813_v53  ;;  %7888 = vpow2.f32 %v2228_v63 }
 0x4f8   : > { %1866 = vadd.xlane.f32.xlu0 %v9748_v61  ;;  %7219 = vmatprep.mubr.bf16.mxu0 %v1914_v47 }
 0x4f9   : > { %v2230_v46 = vmul.f32 1.442695, %v2211_v38  ;;  %7256 = vmatpush3.bf16.msra.mxu0 %v9592_v2  ;;  %v9826_v16 = vpop.eup %7878  ;;  %v2185_v2 = vpop.xlane.xlu0 %2184 }
 0x4fa   : > { %3034 = vmax.xlane.f32.xlu1 %v9817_v60  ;;  %v2179_v54 = vpop.xlane.xlu1 %2178  ;;  %7220 = vmatmul.mubr.bf16.gmra.mrb[40].mxu0 %v1915_v17  ;;  %v2212_v56 = vsub.f32 %v9515_v11, %v2185_v2  ;;  %v11983_v2 = vld [vmem:[#allocation148_spill] sm:$0xff] }
 0x4fb   : > { %7257 = vmatprep.subr.bf16.mxu0 %v9606_v20  ;;  %v2209_v33 = vsub.f32 %v9520_v40, %v2179_v54  ;;  %7890 = vpow2.f32 %v2230_v46 }
 0x4fc   : > { %1862 = vadd.xlane.f32.xlu0 %v9737_v6  ;;  %v2232_v28 = vmul.f32 1.442695, %v2212_v56 }
 0x4fd   : > { %v9829_v61 = vpop.eup %7880  ;;  %v2226_v12 = vmul.f32 1.442695, %v2209_v33  ;;  %7258 = vmatpush3.bf16.msra.mxu0 %v9606_v20  ;;  %v11982_v33 = vld [vmem:[#allocation127_spill] sm:$0xff] }
 0x4fe   : > { %v9831_v9 = vpop.eup %7882  ;;  %1868 = vadd.xlane.f32.xlu1 %v9750_v59  ;;  %v2189_v50 = vpop.xlane.xlu1 %2188  ;;  %v1916_v40 = vpack.c.bf16 %v9829_v61, %v9826_v16  ;;  %7259 = vmatprep.subr.bf16.mxu0 %v9648_v1 }
 0x4ff   : > { %7892 = vpow2.f32 %v2226_v12  ;;  %v2214_v6 = vsub.f32 %v9524_v36, %v2189_v50  ;;  %v9839_v8 = vpop.eup %7884  ;;  %v2193_v10 = vpop.xlane.xlu0 %2192  ;;  %v11984_v50 = vld [vmem:[#allocation130_spill] sm:$0xff] }
 0x500   : > { %1874 = vadd.xlane.f32.xlu0 %v7869_v42  ;;  %7223 = vmatprep.mubr.bf16.mxu0 %v1916_v40  ;;  %v1917_v20 = vpack.c.bf16 %v9831_v9, %v9839_v8  ;;  %v7887_v11 = vpop.eup %7886  ;;  %v2216_v51 = vsub.f32 %v9527_v34, %v2193_v10  ;;  %v11986_v10 = vld [vmem:[#allocation155_spill] sm:$0xff] }
 0x501   : > { %v2236_v0 = vmul.f32 1.442695, %v2214_v6  ;;  %7260 = vmatpush3.bf16.msra.mxu0 %v9648_v1  ;;  %v7889_v42 = vpop.eup %7888 }
 0x502   : > { %1864 = vadd.xlane.f32.xlu1 %v9734_v39  ;;  %v2191_v59 = vpop.xlane.xlu1 %2190  ;;  %7224 = vmatmul.mubr.bf16.gmra.mrb[44].mxu0 %v1917_v20  ;;  %v2240_v27 = vmul.f32 1.442695, %v2216_v51 }
 0x503   : > { %7261 = vmatprep.subr.bf16.mxu0 %v9622_v44  ;;  %v2215_v36 = vsub.f32 %v9532_v31, %v2191_v59  ;;  %7894 = vpow2.f32 %v2236_v0  ;;  %v11985_v59 = vld [vmem:[#allocation128_spill] sm:$0xff] }
 0x504   : > { %1870 = vadd.xlane.f32.xlu0 %v9768_v52  ;;  %7896 = vpow2.f32 %v2232_v28  ;;  %v11987_v28 = vld [vmem:[#allocation132_spill] sm:$0xff] }
 0x505   : > { %v2238_v15 = vmul.f32 1.442695, %v2215_v36  ;;  %7262 = vmatpush3.bf16.msra.mxu0 %v9622_v44  ;;  %v7891_v58 = vpop.eup %7890 }
 0x506   : > { %1876 = vadd.xlane.f32.xlu1 %v9772_v7  ;;  %v2187_v1 = vpop.xlane.xlu1 %2186  ;;  %7299 = vmatprep.subr.bf16.mxu0 %v9661_v5  ;;  %v2305_v7 = vpack.c.bf16 %v7891_v58, %v7889_v42 }
 0x507   : > { %v2213_v39 = vsub.f32 %v9536_v32, %v2187_v1  ;;  %7898 = vpow2.f32 %v2238_v15 }
 0x508   : > { %v2207_v29 = vpop.xlane.xlu0 %2206  ;;  %2260 = vadd.xlane.f32.xlu0 %v7889_v42 }
 0x509   : > { %v7893_v31 = vpop.eup %7892  ;;  %v2234_v52 = vmul.f32 1.442695, %v2213_v39  ;;  %v2223_v34 = vsub.f32 %v9539_v25, %v2207_v29  ;;  %v11988_v29 = vld [vmem:[#allocation129_spill] sm:$0xff] }
 0x50a   : > { %1872 = vadd.xlane.f32.xlu1 %v9774_v13  ;;  %v2197_v3 = vpop.xlane.xlu1 %2196  ;;  %v2304_v30 = vpack.c.bf16 %v7893_v31, %v7887_v11 }
 0x50b   : > { %7900 = vpow2.f32 %v2234_v52  ;;  %v2218_v44 = vsub.f32 %v9543_v23, %v2197_v3  ;;  %v2254_v54 = vmul.f32 1.442695, %v2223_v34  ;;  %v11989_v3 = vld [vmem:[#allocation151_spill] sm:$0xff] }
 0x50c   : > { %v2203_v43 = vpop.xlane.xlu0 %2202  ;;  %2256 = vadd.xlane.f32.xlu0 %v7887_v11  ;;  %7263 = vmatprep.mubr.bf16.mxu0 %v2304_v30  ;;  %v11990_v30 = vld [vmem:[#allocation134_spill] sm:$0xff] }
 0x50d   : > { %v2244_v32 = vmul.f32 1.442695, %v2218_v44  ;;  %7264 = vmatmul.mubr.bf16.vlgmr.msra.gmra.mrb[48].mxu0 %v2305_v7  ;;  %v7895_v41 = vpop.eup %7894  ;;  %v2221_v12 = vsub.f32 %v11982_v33, %v2203_v43 }
 0x50e   : > { %7300 = vmatpush3.bf16.msra.mxu0 %v9661_v5  ;;  %2262 = vadd.xlane.f32.xlu1 %v7891_v58  ;;  %v2199_v37 = vpop.xlane.xlu1 %2198  ;;  %v7897_v49 = vpop.eup %7896 }
 0x50f   : > { %7902 = vpow2.f32 %v2244_v32  ;;  %7301 = vmatprep.subr.bf16.mxu0 %v9638_v48  ;;  %v2219_v13 = vsub.f32 %v9551_v24, %v2199_v37  ;;  %v2250_v20 = vmul.f32 1.442695, %v2221_v12  ;;  %v11991_v37 = vld [vmem:[#allocation131_spill] sm:$0xff]  ;;  %v11995_v12 = vld [vmem:[#allocation153_spill] sm:$0xff] }
 0x510   : > { %v2601_v23 = vpop.xlane.xlu0 %2600  ;;  %2268 = vadd.xlane.f32.xlu0 %v7895_v41 }
 0x511   : > { %v2246_v38 = vmul.f32 1.442695, %v2219_v13  ;;  %v7899_v63 = vpop.eup %7898  ;;  %v2629_v36 = vsub.f32 %v11985_v59, %v2601_v23  ;;  %v11992_v23 = vld [vmem:[#allocation159_spill] sm:$0xff] }
 0x512   : > { %7302 = vmatpush3.bf16.msra.mxu0 %v9638_v48  ;;  %2258 = vadd.xlane.f32.xlu1 %v7893_v31  ;;  %v2195_v47 = vpop.xlane.xlu1 %2194 }
 0x513   : > { %7904 = vpow2.f32 %v2246_v38  ;;  %7303 = vmatprep.subr.bf16.mxu0 %v9678_v26  ;;  %v2217_v5 = vsub.f32 %v9559_v4, %v2195_v47  ;;  %v2307_v4 = vpack.c.bf16 %v7899_v63, %v7895_v41  ;;  %v2648_v58 = vmul.f32 1.442695, %v2629_v36  ;;  %v11993_v38 = vld [vmem:[#allocation136_spill] sm:$0xff]  ;;  %v11998_v36 = vld [vmem:[#allocation161_spill] sm:$0xff] }
 0x514   : > { %7906 = vpow2.f32 %v2240_v27  ;;  %v2597_v17 = vpop.xlane.xlu0 %2596  ;;  %2264 = vadd.xlane.f32.xlu0 %v7897_v49 }
 0x515   : > { %v7901_v24 = vpop.eup %7900  ;;  %v2242_v46 = vmul.f32 1.442695, %v2217_v5  ;;  %v2627_v31 = vsub.f32 %v11988_v29, %v2597_v17 }
 0x516   : > { %7304 = vmatpush3.bf16.msra.mxu0 %v9678_v26  ;;  %2270 = vadd.xlane.f32.xlu1 %v7899_v63  ;;  %v2205_v25 = vpop.xlane.xlu1 %2204  ;;  %v2306_v48 = vpack.c.bf16 %v7901_v24, %v7897_v49 }
 0x517   : > { %7908 = vpow2.f32 %v2242_v46  ;;  %7305 = vmatprep.subr.bf16.mxu0 %v11983_v2  ;;  %v2222_v40 = vsub.f32 %v11984_v50, %v2205_v25  ;;  %v2644_v32 = vmul.f32 1.442695, %v2627_v31  ;;  %v11994_v46 = vld [vmem:[#allocation133_spill] sm:$0xff]  ;;  %v11996_v25 = vld [vmem:[#allocation138_spill] sm:$0xff] }
 0x518   : > { %v2609_v6 = vpop.xlane.xlu0 %2608  ;;  %7267 = vmatprep.mubr.bf16.mxu0 %v2306_v48  ;;  %7910 = vpow2.f32 %v2254_v54 }
 0x519   : > { %v7903_v56 = vpop.eup %7902  ;;  %v2252_v0 = vmul.f32 1.442695, %v2222_v40  ;;  %7268 = vmatmul.mubr.bf16.gmra.mrb[52].mxu0 %v2307_v4  ;;  %v2633_v41 = vsub.f32 %v11991_v37, %v2609_v6 }
 0x51a   : > { %7306 = vmatpush3.bf16.msra.mxu0 %v11983_v2  ;;  %2266 = vadd.xlane.f32.xlu1 %v7901_v24  ;;  %v2201_v26 = vpop.xlane.xlu1 %2200 }
 0x51b   : > { %7912 = vpow2.f32 %v2252_v0  ;;  %7307 = vmatprep.subr.bf16.mxu0 %v11986_v10  ;;  %2276 = vadd.xlane.f32.xlu0 %v7903_v56  ;;  %v2220_v11 = vsub.f32 %v11987_v28, %v2201_v26  ;;  %v2656_v24 = vmul.f32 1.442695, %v2633_v41  ;;  %v11999_v26 = vld [vmem:[#allocation140_spill] sm:$0xff] }
 0x51c   : > { %v2605_v15 = vpop.xlane.xlu0 %2604  ;;  %7914 = vpow2.f32 %v2250_v20 }
 0x51d   : > { %v7905_v1 = vpop.eup %7904  ;;  %v2248_v42 = vmul.f32 1.442695, %v2220_v11  ;;  %v2631_v54 = vsub.f32 %v11994_v46, %v2605_v15  ;;  %v12005_v46 = vld [vmem:[#allocation157_spill] sm:$0xff] }
 0x51e   : > { %v7907_v39 = vpop.eup %7906  ;;  %7308 = vmatpush3.bf16.msra.mxu0 %v11986_v10  ;;  %2278 = vadd.xlane.f32.xlu1 %v7905_v1  ;;  %v2599_v52 = vpop.xlane.xlu1 %2598  ;;  %v2309_v47 = vpack.c.bf16 %v7905_v1, %v7903_v56  ;;  %v11997_v56 = vld [vmem:[#allocation135_spill] sm:$0xff] }
 0x51f   : > { %7916 = vpow2.f32 %v2248_v42  ;;  %7309 = vmatprep.subr.bf16.mxu0 %v11989_v3  ;;  %2272 = vadd.xlane.f32.xlu0 %v7907_v39  ;;  %v2628_v44 = vsub.f32 %v11990_v30, %v2599_v52  ;;  %v2652_v6 = vmul.f32 1.442695, %v2631_v54  ;;  %v12001_v52 = vld [vmem:[#allocation142_spill] sm:$0xff] }
 0x520   : > { %v2617_v7 = vpop.xlane.xlu0 %2616  ;;  %7918 = vpow2.f32 %v2648_v58  ;;  %v12006_v54 = vld [vmem:[#allocation146_spill] sm:$0xff] }
 0x521   : > { %v7909_v51 = vpop.eup %7908  ;;  %v2646_v43 = vmul.f32 1.442695, %v2628_v44  ;;  %v2637_v0 = vsub.f32 %v11997_v56, %v2617_v7 }
 0x522   : > { %7310 = vmatpush3.bf16.msra.mxu0 %v11989_v3  ;;  %2274 = vadd.xlane.f32.xlu1 %v7909_v51  ;;  %v2595_v13 = vpop.xlane.xlu1 %2594  ;;  %v2308_v27 = vpack.c.bf16 %v7909_v51, %v7907_v39  ;;  %v7911_v49 = vpop.eup %7910  ;;  %v12000_v39 = vld [vmem:[#allocation137_spill] sm:$0xff] }
 0x523   : > { %7920 = vpow2.f32 %v2646_v43  ;;  %7311 = vmatprep.subr.bf16.mxu0 %v11992_v23  ;;  %v2626_v34 = vsub.f32 %v11993_v38, %v2595_v13  ;;  %v2664_v42 = vmul.f32 1.442695, %v2637_v0  ;;  %v12002_v43 = vld [vmem:[#allocation139_spill] sm:$0xff]  ;;  %v12003_v13 = vld [vmem:[#allocation144_spill] sm:$0xff] }
 0x524   : > { %v2613_v5 = vpop.xlane.xlu0 %2612  ;;  %7271 = vmatprep.mubr.bf16.mxu0 %v2308_v27  ;;  %7922 = vpow2.f32 %v2644_v32  ;;  %v12008_v0 = vld [vmem:[#allocation163_spill] sm:$0xff] }
 0x525   : > { %v7913_v63 = vpop.eup %7912  ;;  %v2642_v17 = vmul.f32 1.442695, %v2626_v34  ;;  %7272 = vmatmul.mubr.bf16.gmra.mrb[56].mxu0 %v2309_v47  ;;  %v2635_v58 = vsub.f32 %v12000_v39, %v2613_v5  ;;  %v12011_v39 = vld [vmem:[#allocation160_spill] sm:$0xff] }
 0x526   : > { %7312 = vmatpush3.bf16.msra.mxu0 %v11992_v23  ;;  %2286 = vadd.xlane.f32.xlu1 %v7911_v49  ;;  %v2607_v33 = vpop.xlane.xlu1 %2606  ;;  %v7915_v2 = vpop.eup %7914  ;;  %v2311_v28 = vpack.c.bf16 %v7911_v49, %v7913_v63 }
 0x527   : > { %7924 = vpow2.f32 %v2642_v17  ;;  %7313 = vmatprep.subr.bf16.mxu0 %v11995_v12  ;;  %2284 = vadd.xlane.f32.xlu0 %v7913_v63  ;;  %v2632_v48 = vsub.f32 %v11996_v25, %v2607_v33  ;;  %v2660_v51 = vmul.f32 1.442695, %v2635_v58  ;;  %v12004_v63 = vld [vmem:[#allocation141_spill] sm:$0xff]  ;;  %v12012_v58 = vld [vmem:[#allocation150_spill] sm:$0xff] }
 0x528   : > { %v2625_v4 = vpop.xlane.xlu0 %2624  ;;  %7926 = vpow2.f32 %v2656_v24 }
 0x529   : > { %v7917_v50 = vpop.eup %7916  ;;  %v2654_v40 = vmul.f32 1.442695, %v2632_v48  ;;  %v2641_v32 = vsub.f32 %v12002_v43, %v2625_v4  ;;  %v12014_v43 = vld [vmem:[#allocation152_spill] sm:$0xff] }
 0x52a   : > { %7314 = vmatpush3.bf16.msra.mxu0 %v11995_v12  ;;  %2282 = vadd.xlane.f32.xlu1 %v7915_v2  ;;  %v2603_v20 = vpop.xlane.xlu1 %2602  ;;  %v2310_v59 = vpack.c.bf16 %v7915_v2, %v7917_v50  ;;  %v7919_v11 = vpop.eup %7918 }
 0x52b   : > { %7928 = vpow2.f32 %v2654_v40  ;;  %7351 = vmatprep.subr.bf16.mxu0 %v11998_v36  ;;  %2280 = vadd.xlane.f32.xlu0 %v7917_v50  ;;  %v2630_v10 = vsub.f32 %v11999_v26, %v2603_v20  ;;  %v2672_v5 = vmul.f32 1.442695, %v2641_v32  ;;  %v12007_v50 = vld [vmem:[#allocation143_spill] sm:$0xff]  ;;  %v12009_v20 = vld [vmem:[#allocation149_spill] sm:$0xff] }
 0x52c   : > { %7275 = vmatprep.mubr.bf16.mxu0 %v2310_v59  ;;  %7930 = vpow2.f32 %v2652_v6  ;;  %v2621_v31 = vpop.xlane.xlu0 %2620 }
 0x52d   : > { %v7921_v15 = vpop.eup %7920  ;;  %v2650_v1 = vmul.f32 1.442695, %v2630_v10  ;;  %7276 = vmatmul.mubr.bf16.gmra.mrb[60].mxu0 %v2311_v28  ;;  %v2639_v17 = vsub.f32 %v12004_v63, %v2621_v31  ;;  %v12017_v63 = vld [vmem:[#allocation147_spill] sm:$0xff] }
 0x52e   : > { %2680 = vadd.xlane.f32.xlu1 %v7919_v11  ;;  %v2615_v29 = vpop.xlane.xlu1 %2614  ;;  %v7923_v30 = vpop.eup %7922  ;;  %v2723_v23 = vpack.c.bf16 %v7919_v11, %v7921_v15 }
 0x52f   : > { %7932 = vpow2.f32 %v2650_v1  ;;  %2678 = vadd.xlane.f32.xlu0 %v7921_v15  ;;  %v2636_v3 = vsub.f32 %v12001_v52, %v2615_v29  ;;  %v2668_v2 = vmul.f32 1.442695, %v2639_v17  ;;  %v12010_v15 = vld [vmem:[#allocation145_spill] sm:$0xff] }
 0x530   : > { %7934 = vpow2.f32 %v2664_v42  ;;  %v3011_v47 = vpop.xlane.xlu0 %3010 }
 0x531   : > { %v7925_v44 = vpop.eup %7924  ;;  %v2662_v7 = vmul.f32 1.442695, %v2636_v3  ;;  %v3039_v40 = vsub.f32 %v12007_v50, %v3011_v47  ;;  %v12016_v47 = vld [vmem:[#allocation154_spill] sm:$0xff] }
 0x532   : > { %2676 = vadd.xlane.f32.xlu1 %v7923_v30  ;;  %v2611_v37 = vpop.xlane.xlu1 %2610  ;;  %v2722_v41 = vpack.c.bf16 %v7923_v30, %v7925_v44  ;;  %v7927_v38 = vpop.eup %7926 }
 0x533   : > { %7936 = vpow2.f32 %v2662_v7  ;;  %2674 = vadd.xlane.f32.xlu0 %v7925_v44  ;;  %v2634_v27 = vsub.f32 %v12003_v13, %v2611_v37  ;;  %v3058_v11 = vmul.f32 1.442695, %v3039_v40 }
 0x534   : > { %7315 = vmatprep.mubr.bf16.mxu0 %v2722_v41  ;;  %7938 = vpow2.f32 %v2660_v51  ;;  %v3007_v56 = vpop.xlane.xlu0 %3006  ;;  %v12013_v51 = vld [vmem:[#allocation162_spill] sm:$0xff] }
 0x535   : > { %v7929_v34 = vpop.eup %7928  ;;  %v2658_v49 = vmul.f32 1.442695, %v2634_v27  ;;  %7316 = vmatmul.mubr.bf16.vlgmr.msra.gmra.mrb[64].mxu0 %v2723_v23  ;;  %v3037_v1 = vsub.f32 %v12010_v15, %v3007_v56  ;;  %v12019_v56 = vld [vmem:[#allocation158_spill] sm:$0xff] }
 0x536   : > { %7352 = vmatpush3.bf16.msra.mxu0 %v11998_v36  ;;  %2688 = vadd.xlane.f32.xlu1 %v7927_v38  ;;  %v2623_v24 = vpop.xlane.xlu1 %2622  ;;  %v7931_v12 = vpop.eup %7930  ;;  %v2725_v36 = vpack.c.bf16 %v7927_v38, %v7929_v34 }
 0x537   : > { %7940 = vpow2.f32 %v2658_v49  ;;  %7353 = vmatprep.subr.bf16.mxu0 %v12005_v46  ;;  %2686 = vadd.xlane.f32.xlu0 %v7929_v34  ;;  %v2640_v33 = vsub.f32 %v12006_v54, %v2623_v24  ;;  %v3054_v30 = vmul.f32 1.442695, %v3037_v1  ;;  %v12015_v34 = vld [vmem:[#allocation164_spill] sm:$0xff] }
 0x538   : > { %7942 = vpow2.f32 %v2672_v5  ;;  %v3013_v27 = vpop.xlane.xlu0 %3012 }
 0x539   : > { %v7933_v25 = vpop.eup %7932  ;;  %v2670_v48 = vmul.f32 1.442695, %v2640_v33  ;;  %v3040_v17 = vsub.f32 %v12017_v63, %v3013_v27 }
 0x53a   : > { %7354 = vmatpush3.bf16.msra.mxu0 %v12005_v46  ;;  %2684 = vadd.xlane.f32.xlu1 %v7931_v12  ;;  %v2619_v4 = vpop.xlane.xlu1 %2618  ;;  %v2724_v6 = vpack.c.bf16 %v7931_v12, %v7933_v25  ;;  %v7935_v26 = vpop.eup %7934  ;;  %v12018_v12 = vld [vmem:[#allocation156_spill] sm:$0xff] }
 0x53b   : > { %7944 = vpow2.f32 %v2670_v48  ;;  %7355 = vmatprep.subr.bf16.mxu0 %v12008_v0  ;;  %2682 = vadd.xlane.f32.xlu0 %v7933_v25  ;;  %v2638_v59 = vsub.f32 %v12009_v20, %v2619_v4  ;;  %v3060_v50 = vmul.f32 1.442695, %v3040_v17 }
 0x53c   : > { %7319 = vmatprep.mubr.bf16.mxu0 %v2724_v6  ;;  %7946 = vpow2.f32 %v2668_v2 }
 0x53d   : > { %v7937_v10 = vpop.eup %7936  ;;  %v2666_v28 = vmul.f32 1.442695, %v2638_v59  ;;  %7320 = vmatmul.mubr.bf16.gmra.mrb[68].mxu0 %v2725_v36 }
 0x53e   : > { %7356 = vmatpush3.bf16.msra.mxu0 %v12008_v0  ;;  %2696 = vadd.xlane.f32.xlu1 %v7935_v26  ;;  %v3009_v42 = vpop.xlane.xlu1 %3008  ;;  %v7939_v31 = vpop.eup %7938  ;;  %v2727_v37 = vpack.c.bf16 %v7935_v26, %v7937_v10 }
 0x53f   : > { %7948 = vpow2.f32 %v2666_v28  ;;  %7357 = vmatprep.subr.bf16.mxu0 %v12011_v39  ;;  %2694 = vadd.xlane.f32.xlu0 %v7937_v10  ;;  %v3038_v29 = vsub.f32 %v12012_v58, %v3009_v42  ;;  %v3155_v28 = vpop.permute.xlu0 %3154 }
 0x540   : > { %7950 = vpow2.f32 %v3058_v11 }
 0x541   : > { %v7941_v52 = vpop.eup %7940  ;;  %v3056_v3 = vmul.f32 1.442695, %v3038_v29 }
 0x542   : > { %7358 = vmatpush3.bf16.msra.mxu0 %v12011_v39  ;;  %2692 = vadd.xlane.f32.xlu1 %v7939_v31  ;;  %v3005_v44 = vpop.xlane.xlu1 %3004  ;;  %v2726_v7 = vpack.c.bf16 %v7939_v31, %v7941_v52  ;;  %v7943_v41 = vpop.eup %7942 }
 0x543   : > { %7952 = vpow2.f32 %v3056_v3  ;;  %7359 = vmatprep.subr.bf16.mxu0 %v12013_v51  ;;  %2690 = vadd.xlane.f32.xlu0 %v7941_v52  ;;  %v3036_v32 = vsub.f32 %v12014_v43, %v3005_v44 }
 0x544   : > { %7323 = vmatprep.mubr.bf16.mxu0 %v2726_v7  ;;  %7954 = vpow2.f32 %v3054_v30 }
 0x545   : > { %v7945_v13 = vpop.eup %7944  ;;  %v3052_v23 = vmul.f32 1.442695, %v3036_v32  ;;  %7324 = vmatmul.mubr.bf16.gmra.mrb[72].mxu0 %v2727_v37 }
 0x546   : > { %7360 = vmatpush3.bf16.msra.mxu0 %v12013_v51  ;;  %2704 = vadd.xlane.f32.xlu1 %v7943_v41  ;;  %v3017_v38 = vpop.xlane.xlu1 %3016  ;;  %v7947_v5 = vpop.eup %7946  ;;  %v2729_v48 = vpack.c.bf16 %v7943_v41, %v7945_v13 }
 0x547   : > { %7956 = vpow2.f32 %v3052_v23  ;;  %7361 = vmatprep.subr.bf16.mxu0 %v12015_v34  ;;  %2702 = vadd.xlane.f32.xlu0 %v7945_v13  ;;  %v3042_v49 = vsub.f32 %v12016_v47, %v3017_v38 }
 0x549   : > { %v7949_v24 = vpop.eup %7948  ;;  %v3064_v46 = vmul.f32 1.442695, %v3042_v49 }
 0x54a   : > { %7362 = vmatpush3.bf16.msra.mxu0 %v12015_v34  ;;  %2700 = vadd.xlane.f32.xlu1 %v7947_v5  ;;  %v3019_v54 = vpop.xlane.xlu1 %3018  ;;  %v2728_v33 = vpack.c.bf16 %v7947_v5, %v7949_v24  ;;  %v7951_v2 = vpop.eup %7950 }
 0x54b   : > { %7958 = vpow2.f32 %v3064_v46  ;;  %2698 = vadd.xlane.f32.xlu0 %v7949_v24  ;;  %v3043_v25 = vsub.f32 %v12018_v12, %v3019_v54 }
 0x54c   : > { %7327 = vmatprep.mubr.bf16.mxu0 %v2728_v33 }
 0x54d   : > { %v7953_v40 = vpop.eup %7952  ;;  %v3066_v4 = vmul.f32 1.442695, %v3043_v25  ;;  %7328 = vmatmul.mubr.bf16.gmra.mrb[76].mxu0 %v2729_v48 }
 0x54e   : > { %3090 = vadd.xlane.f32.xlu1 %v7951_v2  ;;  %v3015_v6 = vpop.xlane.xlu1 %3014  ;;  %v7955_v20 = vpop.eup %7954  ;;  %v3133_v1 = vpack.c.bf16 %v7951_v2, %v7953_v40 }
 0x54f   : > { %7960 = vpow2.f32 %v3066_v4  ;;  %3088 = vadd.xlane.f32.xlu0 %v7953_v40  ;;  %v3041_v0 = vsub.f32 %v12019_v56, %v3015_v6 }
 0x550   : > { %7962 = vpow2.f32 %v3060_v50 }
 0x551   : > { %v7957_v59 = vpop.eup %7956  ;;  %v3062_v36 = vmul.f32 1.442695, %v3041_v0 }
 0x552   : > { %3086 = vadd.xlane.f32.xlu1 %v7955_v20  ;;  %v3153_v26 = vpop.permute.xlu1 %3152  ;;  %v3132_v10 = vpack.c.bf16 %v7955_v20, %v7957_v59  ;;  %v12020_v20 = vmov 0  }
 0x553   : > { %7964 = vpow2.f32 %v3062_v36  ;;  %3084 = vadd.xlane.f32.xlu0 %v7957_v59  ;;  %7363 = vmatprep.subr.bf16.mxu0 %v3153_v26 }
 0x554   : > { %7364 = vmatpush3.bf16.msra.mxu0 %v3153_v26  ;;  %7367 = vmatprep.mubr.bf16.mxu0 %v3132_v10 }
 0x555   : > { %v7959_v11 = vpop.eup %7958  ;;  %7365 = vmatprep.subr.bf16.mxu0 %v3155_v28 }
 0x557   : > { %3096 = vadd.xlane.f32.xlu0 %v7959_v11 }
 0x558   : > { %7366 = vmatpush3.bf16.msra.mxu0 %v3155_v28 }
 0x559   : > { %v7961_v15 = vpop.eup %7960 }
 0x55a   : > { %v7963_v42 = vpop.eup %7962  ;;  %3098 = vadd.xlane.f32.xlu1 %v7961_v15  ;;  %v3135_v29 = vpack.c.bf16 %v7961_v15, %v7959_v11 }
 0x55b   : > { %3092 = vadd.xlane.f32.xlu0 %v7963_v42  ;;  %7368 = vmatmul.mubr.bf16.vlgmr.msra.gmra.mrb[80].mxu0 %v3133_v1 }
 0x55d   : > { %v7965_v39 = vpop.eup %7964 }
 0x55e   : > { %3094 = vadd.xlane.f32.xlu1 %v7965_v39  ;;  %v3134_v58 = vpack.c.bf16 %v7965_v39, %v7963_v42 }
 0x560   : > { %7371 = vmatprep.mubr.bf16.mxu0 %v3134_v58 }
 0x563   : > { %7372 = vmatmul.mubr.bf16.gmra.mrb[84].mxu0 %v3135_v29 }
 0x56d   : > { %v3021_v31 = vpop.xlane.xlu0 %3020 }
 0x56e   : > { %v3044_v52 = vsub.f32 %v9730_v21, %v3021_v31 }
 0x570   : > { %v3068_v7 = vmul.f32 1.442695, %v3044_v52 }
 0x571   : > { %v3025_v3 = vpop.xlane.xlu0 %3024 }
 0x572   : > { %v3046_v30 = vsub.f32 %v9741_v35, %v3025_v3 }
 0x574   : > { %v3072_v44 = vmul.f32 1.442695, %v3046_v30 }
 0x575   : > { %v3027_v51 = vpop.xlane.xlu0 %3026 }
 0x576   : > { %7966 = vpow2.f32 %v3072_v44  ;;  %v3047_v43 = vsub.f32 %v9754_v14, %v3027_v51 }
 0x577   : > { %7968 = vpow2.f32 %v3068_v7 }
 0x578   : > { %v3074_v32 = vmul.f32 1.442695, %v3047_v43 }
 0x579   : > { %v3029_v37 = vpop.xlane.xlu0 %3028 }
 0x57a   : > { %7970 = vpow2.f32 %v3074_v32  ;;  %v3048_v21 = vsub.f32 %v9763_v22, %v3029_v37 }
 0x57c   : > { %v3076_v63 = vmul.f32 1.442695, %v3048_v21 }
 0x57d   : > { %v3031_v41 = vpop.xlane.xlu0 %3030 }
 0x57e   : > { %v3049_v13 = vsub.f32 %v9778_v19, %v3031_v41 }
 0x580   : > { %v7967_v27 = vpop.eup %7966  ;;  %v3078_v34 = vmul.f32 1.442695, %v3049_v13 }
 0x581   : > { %v3033_v23 = vpop.xlane.xlu0 %3032  ;;  %3104 = vadd.xlane.f32.xlu0 %v7967_v27  ;;  %v7969_v38 = vpop.eup %7968 }
 0x582   : > { %v3050_v35 = vsub.f32 %v9790_v62, %v3033_v23 }
 0x583   : > { %v3023_v47 = vpop.xlane.xlu1 %3022 }
 0x584   : > { %v7971_v49 = vpop.eup %7970  ;;  %v3080_v5 = vmul.f32 1.442695, %v3050_v35  ;;  %v3045_v14 = vsub.f32 %v9798_v18, %v3023_v47 }
 0x585   : > { %3100 = vadd.xlane.f32.xlu0 %v7969_v38  ;;  %3106 = vadd.xlane.f32.xlu1 %v7971_v49  ;;  %v9921_v22 = vpop.xlane.xlu0 %1866  ;;  %v3137_v2 = vpack.c.bf16 %v7971_v49, %v7967_v27 }
 0x586   : > { %7972 = vpow2.f32 %v3080_v5  ;;  %v3070_v17 = vmul.f32 1.442695, %v3045_v14 }
 0x587   : > { %7974 = vpow2.f32 %v3078_v34  ;;  %v3035_v19 = vpop.xlane.xlu1 %3034 }
 0x588   : > { %7976 = vpow2.f32 %v3070_v17  ;;  %v3051_v24 = vsub.f32 %v9817_v60, %v3035_v19 }
 0x589   : > { %7978 = vpow2.f32 %v3076_v63  ;;  %v9923_v54 = vpop.xlane.xlu0 %1862 }
 0x58a   : > { %v3082_v62 = vmul.f32 1.442695, %v3051_v24 }
 0x58b   : > { %v9925_v33 = vpop.xlane.xlu1 %1868 }
 0x58c   : > { %7980 = vpow2.f32 %v3082_v62 }
 0x58d   : > { %v9927_v40 = vpop.xlane.xlu0 %1874 }
 0x58f   : > { %v9929_v4 = vpop.xlane.xlu1 %1864 }
 0x590   : > { %v7973_v46 = vpop.eup %7972 }
 0x591   : > { %v7975_v18 = vpop.eup %7974  ;;  %3112 = vadd.xlane.f32.xlu0 %v7973_v46  ;;  %v9932_v6 = vpop.xlane.xlu0 %1870 }
 0x592   : > { %v7977_v12 = vpop.eup %7976 }
 0x593   : > { %3102 = vadd.xlane.f32.xlu1 %v7977_v12  ;;  %v3136_v25 = vpack.c.bf16 %v7977_v12, %v7969_v38  ;;  %v7979_v48 = vpop.eup %7978  ;;  %v9934_v56 = vpop.xlane.xlu1 %1876 }
 0x594   : > { %v3138_v60 = vpack.c.bf16 %v7975_v18, %v7979_v48 }
 0x595   : > { %3108 = vadd.xlane.f32.xlu0 %v7979_v48  ;;  %7375 = vmatprep.mubr.bf16.mxu0 %v3136_v25  ;;  %v2261_v59 = vpop.xlane.xlu0 %2260 }
 0x596   : > { %v7981_v50 = vpop.eup %7980  ;;  %7376 = vmatmul.mubr.bf16.gmra.mrb[88].mxu0 %v3137_v2  ;;  %7982 = vrcp.f32 %v2261_v59 }
 0x597   : > { %7379 = vmatprep.mubr.bf16.mxu0 %v3138_v60  ;;  %3114 = vadd.xlane.f32.xlu1 %v7981_v50  ;;  %v3139_v0 = vpack.c.bf16 %v7981_v50, %v7973_v46  ;;  %v9940_v36 = vpop.xlane.xlu1 %1872 }
 0x599   : > { %1878 = vadd.xlane.f32.xlu0 %v9794_v57  ;;  %v2257_v57 = vpop.xlane.xlu0 %2256 }
 0x59a   : > { %7984 = vrcp.f32 %v2257_v57 }
 0x59b   : > { %3110 = vadd.xlane.f32.xlu1 %v7975_v18  ;;  %v2263_v26 = vpop.xlane.xlu1 %2262 }
 0x59c   : > { %7986 = vrcp.f32 %v2263_v26 }
 0x59d   : > { %1882 = vadd.xlane.f32.xlu0 %v9813_v53  ;;  %v2269_v10 = vpop.xlane.xlu0 %2268 }
 0x59e   : > { %7380 = vmatmul.mubr.bf16.gmra.mrb[92].mxu0 %v3139_v0 }
 0x59f   : > { %1880 = vadd.xlane.f32.xlu1 %v9805_v45  ;;  %4046 = vmatprep.mubr.bf16.mxu0 %v12020_v20  ;;  %v2259_v28 = vpop.xlane.xlu1 %2258  ;;  %v12030_v20 = vld [vmem:[#allocation54_spill] sm:$0xff] }
 0x5a0   : > { %7988 = vrcp.f32 %v2259_v28  ;;  %v7983_v14 = vpop.eup %7982 }
 0x5a1   : > { %1884 = vadd.xlane.f32.xlu0 %v9802_v55  ;;  %v2265_v11 = vpop.xlane.xlu0 %2264  ;;  %7990 = vrcp.f32 %v2269_v10 }
 0x5a2   : > { %7992 = vrcp.f32 %v2265_v11 }
 0x5a3   : > { %v2271_v15 = vpop.xlane.xlu1 %2270 }
 0x5a4   : > { %v7985_v19 = vpop.eup %7984  ;;  %7994 = vrcp.f32 %v2271_v15 }
 0x5a5   : > { %1886 = vadd.xlane.f32.xlu0 %v9826_v16 }
 0x5a6   : > { %v7987_v62 = vpop.eup %7986 }
 0x5a7   : > { %v2267_v53 = vpop.xlane.xlu1 %2266 }
 0x5a8   : > { %v9943_v1 = vpop.xlane.xlu0 %2276  ;;  %7996 = vrcp.f32 %v2267_v53 }
 0x5a9   : > { %7998 = vrcp.f32 %v9943_v1 }
 0x5aa   : > { %v7989_v18 = vpop.eup %7988 }
 0x5ab   : > { %v2279_v16 = vpop.xlane.xlu1 %2278  ;;  %v7991_v10 = vpop.eup %7990 }
 0x5ac   : > { %v9949_v39 = vpop.xlane.xlu0 %2272  ;;  %v7993_v15 = vpop.eup %7992  ;;  %8000 = vrcp.f32 %v2279_v16 }
 0x5ad   : > { %8002 = vrcp.f32 %v9949_v39 }
 0x5af   : > { %v9957_v31 = vpop.xlane.xlu1 %2274 }
 0x5b0   : > { %8004 = vrcp.f32 %v9957_v31 }
 0x5b3   : > { %v9969_v51 = vpop.xlane.xlu1 %2286 }
 0x5b4   : > { %v9955_v29 = vpop.xlane.xlu0 %2284  ;;  %8006 = vrcp.f32 %v9969_v51 }
 0x5b5   : > { %8008 = vrcp.f32 %v9955_v29 }
 0x5b7   : > { %v9981_v27 = vpop.xlane.xlu1 %2282 }
 0x5b8   : > { %v9963_v30 = vpop.xlane.xlu0 %2280  ;;  %8010 = vrcp.f32 %v9981_v27 }
 0x5b9   : > { %8012 = vrcp.f32 %v9963_v30 }
 0x5bb   : > { %v9945_v42 = vpop.f32.mrb[32].mxu0  ;;  %v9989_v38 = vpop.xlane.xlu1 %2680 }
 0x5bc   : > { %v9947_v45 = vpop.f32.mrb[33].mxu0  ;;  %v9971_v43 = vpop.xlane.xlu0 %2678  ;;  %8014 = vrcp.f32 %v9989_v38 }
 0x5bd   : > { %12021 = vst [vmem:[#allocation127_spill] sm:$0xff] %v9947_v45  ;;  %v9951_v55 = vpop.f32.mrb[34].mxu0  ;;  %8016 = vrcp.f32 %v9971_v43 }
 0x5be   : > { %12022 = vst [vmem:[#allocation148_spill] sm:$0xff] %v9951_v55  ;;  %v9953_v58 = vpop.f32.mrb[35].mxu0 }
 0x5bf   : > { %12023 = vst [vmem:[#allocation130_spill] sm:$0xff] %v9953_v58  ;;  %v9997_v5 = vpop.xlane.xlu1 %2676 }
 0x5c0   : > { %v9983_v23 = vpop.xlane.xlu0 %2674  ;;  %8018 = vrcp.f32 %v9997_v5 }
 0x5c1   : > { %8020 = vrcp.f32 %v9983_v23 }
 0x5c3   : > { %v10001_v2 = vpop.xlane.xlu1 %2688 }
 0x5c4   : > { %v9995_v49 = vpop.xlane.xlu0 %2686  ;;  %8022 = vrcp.f32 %v10001_v2 }
 0x5c5   : > { %v9959_v52 = vpop.f32.mrb[36].mxu0  ;;  %8024 = vrcp.f32 %v9995_v49 }
 0x5c6   : > { %v9961_v3 = vpop.f32.mrb[37].mxu0 }
 0x5c7   : > { %12024 = vst [vmem:[#allocation128_spill] sm:$0xff] %v9961_v3  ;;  %v9965_v44 = vpop.f32.mrb[38].mxu0  ;;  %v10007_v26 = vpop.xlane.xlu1 %2684  ;;  %v12042_v3 = vld [vmem:[#allocation66_spill] sm:$0xff] }
 0x5c8   : > { %v9967_v7 = vpop.f32.mrb[39].mxu0  ;;  %v9999_v63 = vpop.xlane.xlu0 %2682 }
 0x5c9   : > { %12025 = vst [vmem:[#allocation155_spill] sm:$0xff] %v9967_v7  ;;  %v12041_v7 = vld [vmem:[#allocation67_spill] sm:$0xff] }
 0x5cc   : > { %v10003_v59 = vpop.xlane.xlu0 %2694 }
 0x5cd   : > { %v9973_v32 = vpop.f32.mrb[40].mxu0 }
 0x5ce   : > { %v9975_v37 = vpop.f32.mrb[41].mxu0 }
 0x5cf   : > { %v9977_v41 = vpop.f32.mrb[42].mxu0 }
 0x5d0   : > { %v9979_v13 = vpop.f32.mrb[43].mxu0  ;;  %v10009_v28 = vpop.xlane.xlu0 %2690 }
 0x5d5   : > { %v9985_v21 = vpop.f32.mrb[44].mxu0 }
 0x5d6   : > { %12026 = vst [vmem:[#allocation132_spill] sm:$0xff] %v9985_v21  ;;  %v9987_v35 = vpop.f32.mrb[45].mxu0  ;;  %v6704_v21 = vcombine.low %v12042_v3, %v12041_v7 }
 0x5d7   : > { %v9991_v34 = vpop.f32.mrb[46].mxu0 }
 0x5d8   : > { %12027 = vst [vmem:[#allocation129_spill] sm:$0xff] %v9991_v34  ;;  %v9993_v47 = vpop.f32.mrb[47].mxu0 }
 0x5d9   : > { %12028 = vst [vmem:[#allocation151_spill] sm:$0xff] %v9993_v47 }
 0x5e0   : > { %v7265_v17 = vpop.f32.mrb[48].mxu0 }
 0x5e1   : > { %v2378_v24 = vpop.f32.mrb[49].mxu0  ;;  %v2443_v12 = vmul.f32 %v7983_v14, %v7265_v17  ;;  %v7995_v17 = vpop.eup %7994  ;;  %8026 = vrcp.f32 %v10007_v26 }
 0x5e2   : > { %v7266_v46 = vpop.f32.mrb[50].mxu0  ;;  %v2441_v60 = vmul.f32 %v7985_v19, %v2378_v24  ;;  %v7997_v19 = vpop.eup %7996  ;;  %8028 = vrcp.f32 %v9999_v63  ;;  %v12029_v63 = vld [vmem:[#allocation55_spill] sm:$0xff] }
 0x5e3   : > { %v2444_v25 = vmul.f32 %v7987_v62, %v7266_v46  ;;  %v2381_v48 = vpop.f32.mrb[51].mxu0  ;;  %v7999_v39 = vpop.eup %7998  ;;  %v6698_v34 = vcombine.low %v12030_v20, %v12029_v63 }
 0x5e4   : > { %v2442_v50 = vmul.f32 %v7989_v18, %v2381_v48  ;;  %v10013_v18 = vpop.xlane.xlu1 %2696 }
 0x5e5   : > { %v7734_v0 = vpack.i.bf16 %v2444_v25, %v2443_v12  ;;  %8030 = vrcp.f32 %v10013_v18  ;;  %7383 = vmatprep.subr.bf16.mxu1 %v6698_v34 }
 0x5e6   : > { %v7739_v57 = vpack.i.bf16 %v2442_v50, %v2441_v60  ;;  %v10016_v60 = vpop.xlane.xlu0 %2702  ;;  %7384 = vmatpush3.bf16.msra.mxu1 %v6698_v34 }
 0x5e7   : > { %7735 = vrot.lane.b32.xlu1 %v7734_v0, %s8394_s19  ;;  %v8001_v0 = vpop.eup %8000  ;;  %8032 = vrcp.f32 %v10003_v59 }
 0x5e8   : > { %7740 = vrot.lane.b32.xlu0 %v7739_v57, %s8394_s19  ;;  %v10021_v1 = vpop.xlane.xlu1 %2692 }
 0x5ea   : > { %v10025_v16 = vpop.xlane.xlu0 %2698 }
 0x5ec   : > { %v7269_v11 = vpop.f32.mrb[52].mxu0 }
 0x5ed   : > { %v2394_v14 = vpop.f32.mrb[53].mxu0  ;;  %v2447_v24 = vmul.f32 %v7991_v10, %v7269_v11  ;;  %v8003_v10 = vpop.eup %8002  ;;  %8034 = vrcp.f32 %v10021_v1 }
 0x5ee   : > { %v7270_v53 = vpop.f32.mrb[54].mxu0  ;;  %v2445_v12 = vmul.f32 %v7993_v15, %v2394_v14  ;;  %v8005_v15 = vpop.eup %8004  ;;  %8036 = vrcp.f32 %v10009_v28 }
 0x5ef   : > { %v2448_v62 = vmul.f32 %v7995_v17, %v7270_v53  ;;  %v2397_v46 = vpop.f32.mrb[55].mxu0  ;;  %v10032_v53 = vpop.xlane.xlu1 %2704 }
 0x5f0   : > { %v2446_v25 = vmul.f32 %v7997_v19, %v2397_v46  ;;  %v10041_v30 = vpop.xlane.xlu0 %3088 }
 0x5f1   : > { %v7744_v48 = vpack.i.bf16 %v2448_v62, %v2447_v24  ;;  %v8007_v62 = vpop.eup %8006  ;;  %8038 = vrcp.f32 %v10032_v53 }
 0x5f2   : > { %v7749_v50 = vpack.i.bf16 %v2446_v25, %v2445_v12  ;;  %v8009_v12 = vpop.eup %8008  ;;  %8040 = vrcp.f32 %v10016_v60 }
 0x5f3   : > { %7745 = vrot.lane.b32.xlu1 %v7744_v48, %s8394_s19  ;;  %v8011_v48 = vpop.eup %8010 }
 0x5f4   : > { %7750 = vrot.lane.b32.xlu0 %v7749_v50, %s8394_s19  ;;  %v10048_v50 = vpop.xlane.xlu1 %2700  ;;  %v8013_v38 = vpop.eup %8012 }
 0x5f5   : > { %8042 = vrcp.f32 %v10048_v50  ;;  %v12037_v50 = vld [vmem:[#allocation63_spill] sm:$0xff] }
 0x5f6   : > { %8044 = vrcp.f32 %v10025_v16 }
 0x5f8   : > { %v7273_v31 = vpop.f32.mrb[56].mxu0 }
 0x5f9   : > { %v2410_v57 = vpop.f32.mrb[57].mxu0  ;;  %v10028_v14 = vmul.f32 %v7999_v39, %v7273_v31 }
 0x5fa   : > { %v7274_v11 = vpop.f32.mrb[58].mxu0  ;;  %v10034_v29 = vmul.f32 %v8003_v10, %v2410_v57  ;;  %v10054_v10 = vpop.xlane.xlu0 %3084 }
 0x5fb   : > { %v10030_v51 = vmul.f32 %v8001_v0, %v7274_v11  ;;  %v2413_v17 = vpop.f32.mrb[59].mxu0 }
 0x5fc   : > { %v10036_v27 = vmul.f32 %v8005_v15, %v2413_v17  ;;  %v8015_v15 = vpop.eup %8014  ;;  %v10067_v17 = vpop.xlane.xlu1 %3090 }
 0x5fd   : > { %8046 = vrcp.f32 %v10067_v17 }
 0x600   : > { %v7277_v46 = vpop.f32.mrb[60].mxu0  ;;  %v10073_v26 = vpop.xlane.xlu1 %3086 }
 0x601   : > { %v2426_v25 = vpop.f32.mrb[61].mxu0  ;;  %v10050_v31 = vmul.f32 %v8009_v12, %v7277_v46  ;;  %v8017_v46 = vpop.eup %8016  ;;  %8048 = vrcp.f32 %v10041_v30  ;;  %v12043_v30 = vld [vmem:[#allocation69_spill] sm:$0xff] }
 0x602   : > { %v7278_v39 = vpop.f32.mrb[62].mxu0  ;;  %v10056_v43 = vmul.f32 %v8013_v38, %v2426_v25  ;;  %v8019_v25 = vpop.eup %8018  ;;  %8050 = vrcp.f32 %v10073_v26  ;;  %v12044_v26 = vld [vmem:[#allocation68_spill] sm:$0xff] }
 0x603   : > { %v10052_v0 = vmul.f32 %v8007_v62, %v7278_v39  ;;  %v2429_v57 = vpop.f32.mrb[63].mxu0  ;;  %v8021_v2 = vpop.eup %8020  ;;  %8052 = vrcp.f32 %v10054_v10 }
 0x604   : > { %v10058_v5 = vmul.f32 %v8011_v48, %v2429_v57  ;;  %v10070_v48 = vpop.xlane.xlu0 %3096  ;;  %v8023_v47 = vpop.eup %8022 }
 0x605   : > { %v8025_v18 = vpop.eup %8024 }
 0x606   : > { %v8027_v59 = vpop.eup %8026 }
 0x607   : > { %v8029_v20 = vpop.eup %8028 }
 0x608   : > { %v7317_v62 = vpop.f32.mrb[64].mxu0 }
 0x609   : > { %v2788_v12 = vpop.f32.mrb[65].mxu0  ;;  %v2853_v38 = vmul.f32 %v8017_v46, %v7317_v62  ;;  %v12032_v46 = vld [vmem:[#allocation56_spill] sm:$0xff] }
 0x60a   : > { %v7318_v39 = vpop.f32.mrb[66].mxu0  ;;  %v2851_v11 = vmul.f32 %v8021_v2, %v2788_v12 }
 0x60b   : > { %v2854_v57 = vmul.f32 %v8015_v15, %v7318_v39  ;;  %v2791_v23 = vpop.f32.mrb[67].mxu0  ;;  %v10080_v15 = vpop.xlane.xlu0 %3092 }
 0x60c   : > { %v2852_v49 = vmul.f32 %v8019_v25, %v2791_v23  ;;  %v12031_v23 = vld [vmem:[#allocation57_spill] sm:$0xff]  ;;  %v10085_v25 = vpop.xlane.xlu1 %3098 }
 0x60d   : > { %v7754_v24 = vpack.i.bf16 %v2854_v57, %v2853_v38  ;;  %v6699_v12 = vcombine.low %v12032_v46, %v12031_v23  ;;  %v12033_v38 = vld [vmem:[#allocation59_spill] sm:$0xff]  ;;  %v12034_v57 = vld [vmem:[#allocation58_spill] sm:$0xff] }
 0x60e   : > { %v7759_v19 = vpack.i.bf16 %v2852_v49, %v2851_v11  ;;  %v6700_v49 = vcombine.low %v12034_v57, %v12033_v38  ;;  %v12038_v38 = vld [vmem:[#allocation62_spill] sm:$0xff] }
 0x60f   : > { %7755 = vrot.lane.b32.xlu1 %v7754_v24, %s8393_s0  ;;  %v10091_v63 = vpop.xlane.xlu0 %3104  ;;  %7385 = vmatprep.subr.bf16.mxu1 %v6699_v12  ;;  %v6702_v57 = vcombine.low %v12038_v38, %v12037_v50 }
 0x610   : > { %v7321_v62 = vpop.f32.mrb[68].mxu0  ;;  %7386 = vmatpush3.bf16.msra.mxu1 %v6699_v12 }
 0x611   : > { %v2804_v11 = vpop.f32.mrb[69].mxu0  ;;  %v2857_v39 = vmul.f32 %v8025_v18, %v7321_v62  ;;  %7387 = vmatprep.subr.bf16.mxu1 %v6700_v49  ;;  %v8031_v62 = vpop.eup %8030 }
 0x612   : > { %v7322_v24 = vpop.f32.mrb[70].mxu0  ;;  %v2855_v28 = vmul.f32 %v8029_v20, %v2804_v11  ;;  %v10099_v18 = vpop.xlane.xlu1 %3094 }
 0x613   : > { %v2858_v2 = vmul.f32 %v8023_v47, %v7322_v24  ;;  %v2807_v1 = vpop.f32.mrb[71].mxu0  ;;  %1890 = vadd.xlane.f32.xlu0 %v9839_v8  ;;  %7760 = vrot.lane.b32.xlu1 %v7759_v19, %s8393_s0  ;;  %v12035_v8 = vld [vmem:[#allocation61_spill] sm:$0xff]  ;;  %v12036_v47 = vld [vmem:[#allocation60_spill] sm:$0xff]  ;;  %v10102_v12 = vpop.xlane.xlu0 %3100 }
 0x614   : > { %v2856_v23 = vmul.f32 %v8027_v59, %v2807_v1  ;;  %v6701_v19 = vcombine.low %v12036_v47, %v12035_v8  ;;  %v8033_v59 = vpop.eup %8032  ;;  %7388 = vmatpush3.bf16.msra.mxu1 %v6700_v49 }
 0x615   : > { %v7764_v46 = vpack.i.bf16 %v2858_v2, %v2857_v39  ;;  %v8035_v24 = vpop.eup %8034 }
 0x616   : > { %v7769_v34 = vpack.i.bf16 %v2856_v23, %v2855_v28  ;;  %v8037_v20 = vpop.eup %8036  ;;  %7389 = vmatprep.subr.bf16.mxu1 %v6701_v19  ;;  %v10111_v28 = vpop.xlane.xlu1 %3106 }
 0x617   : > { %7765 = vrot.lane.b32.xlu1 %v7764_v46, %s8393_s0 }
 0x618   : > { %v7325_v11 = vpop.f32.mrb[72].mxu0  ;;  %7390 = vmatpush3.bf16.msra.mxu1 %v6701_v19 }
 0x619   : > { %v2820_v53 = vpop.f32.mrb[73].mxu0  ;;  %v10104_v39 = vmul.f32 %v8033_v59, %v7325_v11  ;;  %7391 = vmatprep.subr.bf16.mxu1 %v6702_v57 }
 0x61a   : > { %v7326_v60 = vpop.f32.mrb[74].mxu0  ;;  %v10113_v16 = vmul.f32 %v8037_v20, %v2820_v53  ;;  %v12039_v53 = vld [vmem:[#allocation65_spill] sm:$0xff] }
 0x61b   : > { %v10106_v2 = vmul.f32 %v8031_v62, %v7326_v60  ;;  %v2823_v1 = vpop.f32.mrb[75].mxu0  ;;  %7770 = vrot.lane.b32.xlu1 %v7769_v34, %s8393_s0  ;;  %v8039_v34 = vpop.eup %8038  ;;  %v12040_v60 = vld [vmem:[#allocation64_spill] sm:$0xff] }
 0x61c   : > { %v10115_v23 = vmul.f32 %v8035_v24, %v2823_v1  ;;  %v8041_v11 = vpop.eup %8040  ;;  %v6703_v24 = vcombine.low %v12040_v60, %v12039_v53  ;;  %7392 = vmatpush3.bf16.msra.mxu1 %v6702_v57 }
 0x61d   : > { %v8043_v20 = vpop.eup %8042 }
 0x61e   : > { %v10121_v8 = vpop.xlane.xlu0 %3112  ;;  %v8045_v38 = vpop.eup %8044  ;;  %7393 = vmatprep.subr.bf16.mxu1 %v6703_v24 }
 0x620   : > { %v7329_v47 = vpop.f32.mrb[76].mxu0  ;;  %v10123_v62 = vpop.xlane.xlu1 %3102  ;;  %7394 = vmatpush3.bf16.msra.mxu1 %v6703_v24 }
 0x621   : > { %v2836_v59 = vpop.f32.mrb[77].mxu0  ;;  %v10130_v49 = vmul.f32 %v8041_v11, %v7329_v47  ;;  %7395 = vmatprep.subr.bf16.mxu1 %v6704_v21  ;;  %v8047_v47 = vpop.eup %8046 }
 0x622   : > { %v7330_v1 = vpop.f32.mrb[78].mxu0  ;;  %v10127_v50 = vpop.xlane.xlu0 %3108  ;;  %v10137_v53 = vmul.f32 %v8045_v38, %v2836_v59 }
 0x623   : > { %v10132_v19 = vmul.f32 %v8039_v34, %v7330_v1  ;;  %v2839_v46 = vpop.f32.mrb[79].mxu0  ;;  %v8049_v11 = vpop.eup %8048 }
 0x624   : > { %v10139_v60 = vmul.f32 %v8043_v20, %v2839_v46  ;;  %v10141_v58 = vpop.xlane.xlu1 %3114  ;;  %7396 = vmatpush3.bf16.msra.mxu1 %v6704_v21  ;;  %v6705_v46 = vcombine.low %v12044_v26, %v12043_v30 }
 0x626   : > { %v1879_v34 = vpop.xlane.xlu0 %1878  ;;  %7397 = vmatprep.subr.bf16.mxu1 %v6705_v46 }
 0x627   : > { %8054 = vrcp.f32 %v1879_v34 }
 0x628   : > { %v10149_v3 = vpop.xlane.xlu1 %3110  ;;  %8056 = vrcp.f32 %v10070_v48  ;;  %7398 = vmatpush3.bf16.msra.mxu1 %v6705_v46  ;;  %v8051_v48 = vpop.eup %8050 }
 0x629   : > { %8058 = vrcp.f32 %v10085_v25  ;;  %v8053_v21 = vpop.eup %8052 }
 0x62a   : > { %v1883_v7 = vpop.xlane.xlu0 %1882 }
 0x62b   : > { %8060 = vrcp.f32 %v1883_v7 }
 0x62c   : > { %8062 = vrcp.f32 %v10080_v15  ;;  %v1881_v10 = vpop.xlane.xlu1 %1880 }
 0x62d   : > { %8064 = vrcp.f32 %v1881_v10 }
 0x62e   : > { %8066 = vrcp.f32 %v10099_v18  ;;  %v1885_v59 = vpop.xlane.xlu0 %1884  ;;  %v7369_v24 = vpop.f32.mrb[80].mxu0 }
 0x62f   : > { %8068 = vrcp.f32 %v1885_v59  ;;  %v3198_v25 = vpop.f32.mrb[81].mxu0  ;;  %v3263_v38 = vmul.f32 %v8049_v11, %v7369_v24 }
 0x630   : > { %v7370_v20 = vpop.f32.mrb[82].mxu0  ;;  %v3261_v15 = vmul.f32 %v8053_v21, %v3198_v25 }
 0x631   : > { %v8055_v1 = vpop.eup %8054  ;;  %v3264_v34 = vmul.f32 %v8047_v47, %v7370_v20  ;;  %v3201_v7 = vpop.f32.mrb[83].mxu0 }
 0x632   : > { %v3262_v30 = vmul.f32 %v8051_v48, %v3201_v7  ;;  %v1887_v26 = vpop.xlane.xlu0 %1886  ;;  %v10158_v10 = vmul.f32 %v8055_v1, %v9975_v37  ;;  %v8057_v17 = vpop.eup %8056 }
 0x633   : > { %v7774_v18 = vpack.i.bf16 %v3264_v34, %v3263_v38  ;;  %8070 = vrcp.f32 %v1887_v26  ;;  %v8059_v57 = vpop.eup %8058 }
 0x634   : > { %v7779_v46 = vpack.i.bf16 %v3262_v30, %v3261_v15  ;;  %8072 = vrcp.f32 %v9927_v40 }
 0x635   : > { %v8061_v45 = vpop.eup %8060  ;;  %7775 = vrot.lane.b32.xlu1 %v7774_v18, %s8392_s10  ;;  %8074 = vrcp.f32 %v9934_v56 }
 0x636   : > { %v8063_v59 = vpop.eup %8062  ;;  %v7373_v55 = vpop.f32.mrb[84].mxu0  ;;  %7780 = vrot.lane.b32.xlu0 %v7779_v46, %s8392_s10  ;;  %v10163_v47 = vmul.f32 %v8061_v45, %v9973_v32  ;;  %8076 = vrcp.f32 %v10091_v63 }
 0x637   : > { %v8065_v11 = vpop.eup %8064  ;;  %v3214_v24 = vpop.f32.mrb[85].mxu0  ;;  %v3267_v20 = vmul.f32 %v8057_v17, %v7373_v55  ;;  %8078 = vrcp.f32 %v10102_v12 }
 0x638   : > { %v8067_v48 = vpop.eup %8066  ;;  %v7374_v37 = vpop.f32.mrb[86].mxu0  ;;  %v10166_v25 = vmul.f32 %v8065_v11, %v9979_v13  ;;  %v3265_v34 = vmul.f32 %v8063_v59, %v3214_v24  ;;  %8080 = vrcp.f32 %v10111_v28 }
 0x639   : > { %v8069_v21 = vpop.eup %8068  ;;  %v3268_v1 = vmul.f32 %v8059_v57, %v7374_v37  ;;  %v3217_v38 = vpop.f32.mrb[87].mxu0  ;;  %8082 = vrcp.f32 %v10123_v62 }
 0x63a   : > { %v3266_v7 = vmul.f32 %v8067_v48, %v3217_v38  ;;  %v10169_v15 = vmul.f32 %v8069_v21, %v9977_v41  ;;  %8084 = vrcp.f32 %v10121_v8 }
 0x63b   : > { %v7784_v30 = vpack.i.bf16 %v3268_v1, %v3267_v20  ;;  %8086 = vrcp.f32 %v10127_v50  ;;  %v12046_v1 = vpack.i.bf16 %v10115_v23, %v10113_v16  ;;  %v12052_v23 = vpack.i.bf16 %v10132_v19, %v10130_v49 }
 0x63c   : > { %v7789_v26 = vpack.i.bf16 %v3266_v7, %v3265_v34  ;;  %8088 = vrcp.f32 %v10141_v58  ;;  %v12045_v58 = vpack.i.bf16 %v10030_v51, %v10028_v14  ;;  %v12047_v7 = vpack.i.bf16 %v10036_v27, %v10034_v29 }
 0x63d   : > { %v8071_v45 = vpop.eup %8070  ;;  %8090 = vrcp.f32 %v10149_v3  ;;  %v12049_v29 = vpack.i.bf16 %v10058_v5, %v10056_v43  ;;  %v12050_v27 = vpack.i.bf16 %v10052_v0, %v10050_v31 }
 0x63e   : > { %7790 = vrot.lane.b32.xlu0 %v7789_v26, %s8392_s10  ;;  %v10173_v32 = vmul.f32 %v8071_v45, %v9987_v35  ;;  %v8073_v41 = vpop.eup %8072  ;;  %8092 = vrcp.f32 %v9921_v22 }
 0x63f   : > { %v8075_v13 = vpop.eup %8074  ;;  %8094 = vrcp.f32 %v9923_v54 }
 0x640   : > { %v2022_v40 = vmul.f32 %v8075_v13, %v9965_v44  ;;  %v8077_v12 = vpop.eup %8076  ;;  %8096 = vrcp.f32 %v9925_v33 }
 0x641   : > { %v8079_v62 = vpop.eup %8078  ;;  %8098 = vrcp.f32 %v9929_v4 }
 0x642   : > { %v8081_v44 = vpop.eup %8080 }
 0x643   : > { %v8083_v18 = vpop.eup %8082 }
 0x644   : > { %v8085_v37 = vpop.eup %8084 }
 0x645   : > { %v8087_v21 = vpop.eup %8086 }
 0x646   : > { %v8089_v38 = vpop.eup %8088 }
 0x659   : > { %1888 = vadd.xlane.f32.xlu1 %v9829_v61  ;;  %v10182_v55 = vpop.permute.xlu1 %7735  ;;  %v2021_v61 = vmul.f32 %v8073_v41, %v9959_v52 }
 0x65d   : > { %1892 = vadd.xlane.f32.xlu0 %v9831_v9 }
 0x665   : > { %v7746_v35 = vpop.permute.xlu1 %7745 }
 0x666   : > { %v7748_v56 = vunpack.i.h.bf16 %v7746_v35  ;;  %v7747_v17 = vunpack.i.l.bf16 %v7746_v35  ;;  %v12048_v35 = vpack.i.bf16 %v10106_v2, %v10104_v39  ;;  %v12051_v39 = vpack.i.bf16 %v10139_v60, %v10137_v53  ;;  %v7741_v60 = vpop.permute.xlu0 %7740 }
 0x667   : > { %v7743_v54 = vunpack.i.h.bf16 %v7741_v60 }
 0x668   : > { %v3476_v9 = vsel %vm1660_vm0, %v2022_v40, %v7748_v56  ;;  %v3475_v63 = vsel %vm1660_vm0, %v2021_v61, %v7747_v17  ;;  %v7738_v17 = vunpack.i.h.bf16 %v10182_v55 }
 0x669   : > { %v7377_v28 = vpop.f32.mrb[88].mxu0 }
 0x66a   : > { %v3230_v52 = vpop.f32.mrb[89].mxu0  ;;  %7785 = vrot.lane.b32.xlu1 %v7784_v30, %s8392_s10  ;;  %v3271_v8 = vmul.f32 %v8077_v12, %v7377_v28  ;;  %v8091_v30 = vpop.eup %8090  ;;  %v7742_v12 = vunpack.i.l.bf16 %v7741_v60  ;;  %v12053_v28 = vld [vmem:[#allocation148_spill] sm:$0xff] }
 0x66b   : > { %v7378_v57 = vpop.f32.mrb[90].mxu0  ;;  %v3269_v59 = vmul.f32 %v8079_v62, %v3230_v52  ;;  %v7751_v49 = vpop.permute.xlu0 %7750 }
 0x66c   : > { %v3272_v46 = vmul.f32 %v8081_v44, %v7378_v57  ;;  %v3233_v50 = vpop.f32.mrb[91].mxu0  ;;  %v8093_v40 = vpop.eup %8092  ;;  %v12054_v57 = vld [vmem:[#allocation127_spill] sm:$0xff] }
 0x66d   : > { %v3270_v11 = vmul.f32 %v8083_v18, %v3233_v50  ;;  %v8095_v56 = vpop.eup %8094  ;;  %v2017_v4 = vmul.f32 %v8093_v40, %v9945_v42 }
 0x66e   : > { %v7819_v24 = vpack.i.bf16 %v3272_v46, %v3271_v8  ;;  %7800 = vrot.lane.b32.xlu1 %v12045_v58, %s8394_s19  ;;  %v8097_v22 = vpop.eup %8096  ;;  %v2015_v18 = vmul.f32 %v8095_v56, %v12054_v57 }
 0x66f   : > { %v7814_v48 = vpack.i.bf16 %v3270_v11, %v3269_v59  ;;  %v8099_v33 = vpop.eup %8098  ;;  %v2018_v62 = vmul.f32 %v8097_v22, %v12053_v28 }
 0x670   : > { %v3469_v42 = vsel %vm1660_vm0, %v2015_v18, %v7742_v12 }
 0x671   : > { %v7381_v3 = vpop.f32.mrb[92].mxu0 }
 0x672   : > { %v3246_v20 = vpop.f32.mrb[93].mxu0  ;;  %7805 = vrot.lane.b32.xlu1 %v12046_v1, %s8393_s0  ;;  %v3275_v14 = vmul.f32 %v8085_v37, %v7381_v3 }
 0x673   : > { %v7382_v34 = vpop.f32.mrb[94].mxu0  ;;  %7795 = vrot.lane.b32.xlu0 %v12047_v7, %s8394_s19  ;;  %v3273_v45 = vmul.f32 %v8087_v21, %v3246_v20 }
 0x674   : > { %v3276_v51 = vmul.f32 %v8089_v38, %v7382_v34  ;;  %v3249_v26 = vpop.f32.mrb[95].mxu0 }
 0x675   : > { %v3274_v41 = vmul.f32 %v8091_v30, %v3249_v26 }
 0x676   : > { %v7849_v13 = vpack.i.bf16 %v3276_v51, %v3275_v14  ;;  %7810 = vrot.lane.b32.xlu1 %v12048_v35, %s8393_s0 }
 0x677   : > { %v7844_v16 = vpack.i.bf16 %v3274_v41, %v3273_v45  ;;  %7815 = vrot.lane.b32.xlu0 %v7814_v48, %s8392_s10  ;;  %v12056_v41 = vld [vmem:[#allocation132_spill] sm:$0xff] }
 0x67a   : > { %7820 = vrot.lane.b32.xlu1 %v7819_v24, %s8392_s10 }
 0x67b   : > { %7825 = vrot.lane.b32.xlu0 %v12049_v29, %s8394_s19  ;;  %v7752_v29 = vunpack.i.l.bf16 %v7751_v49 }
 0x67e   : > { %7830 = vrot.lane.b32.xlu1 %v12050_v27, %s8394_s19 }
 0x67f   : > { %7835 = vrot.lane.b32.xlu0 %v12051_v39, %s8393_s0 }
 0x681   : > { %v7756_v2 = vpop.permute.xlu1 %7755 }
 0x682   : > { %7840 = vrot.lane.b32.xlu1 %v12052_v23, %s8393_s0  ;;  %v7758_v52 = vunpack.i.h.bf16 %v7756_v2  ;;  %v7757_v44 = vunpack.i.l.bf16 %v7756_v2  ;;  %v12057_v23 = vld [vmem:[#allocation128_spill] sm:$0xff] }
 0x683   : > { %7845 = vrot.lane.b32.xlu0 %v7844_v16, %s8392_s10  ;;  %v7753_v16 = vunpack.i.h.bf16 %v7751_v49 }
 0x685   : > { %v7761_v43 = vpop.permute.xlu1 %7760 }
 0x686   : > { %7850 = vrot.lane.b32.xlu1 %v7849_v13, %s8392_s10  ;;  %v7763_v46 = vunpack.i.h.bf16 %v7761_v43  ;;  %v7762_v50 = vunpack.i.l.bf16 %v7761_v43 }
 0x688   : > { %v3486_v38 = vsel %vm3485_vm1, %v3469_v42, %v7762_v50 }
 0x689   : > { %v7766_v5 = vpop.permute.xlu1 %7765 }
 0x68a   : > { %v7768_v61 = vunpack.i.h.bf16 %v7766_v5  ;;  %v7767_v31 = vunpack.i.l.bf16 %v7766_v5  ;;  %v12058_v5 = vld [vmem:[#allocation155_spill] sm:$0xff] }
 0x68c   : > { %v10231_v0 = vsel %vm3485_vm1, %v3475_v63, %v7767_v31  ;;  %v10234_v53 = vsel %vm3485_vm1, %v3476_v9, %v7768_v61  ;;  %v7737_v9 = vunpack.i.l.bf16 %v10182_v55  ;;  %v3472_v55 = vsel %vm1660_vm0, %v2018_v62, %v7738_v17 }
 0x68d   : > { %v7771_v63 = vpop.permute.xlu1 %7770  ;;  %v3489_v3 = vsel %vm3485_vm1, %v3472_v55, %v7758_v52 }
 0x68e   : > { %v3471_v59 = vsel %vm1660_vm0, %v2017_v4, %v7737_v9  ;;  %v7773_v39 = vunpack.i.h.bf16 %v7771_v63  ;;  %v7772_v2 = vunpack.i.l.bf16 %v7771_v63 }
 0x68f   : > { %v3488_v37 = vsel %vm3485_vm1, %v3471_v59, %v7757_v44 }
 0x6a0   : > { %v1891_v19 = vpop.xlane.xlu0 %1890 }
 0x6a1   : > { %8100 = vrcp.f32 %v1891_v19 }
 0x6a2   : > { %8102 = vrcp.f32 %v9932_v6  ;;  %v12055_v6 = vld [vmem:[#allocation130_spill] sm:$0xff] }
 0x6a3   : > { %8104 = vrcp.f32 %v9940_v36  ;;  %v2016_v8 = vmul.f32 %v8099_v33, %v12055_v6 }
 0x6a5   : > { %v3470_v11 = vsel %vm1660_vm0, %v2016_v8, %v7743_v54 }
 0x6a6   : > { %v3487_v1 = vsel %vm3485_vm1, %v3470_v11, %v7763_v46 }
 0x6a7   : > { %v7776_v36 = vpop.permute.xlu1 %7775 }
 0x6a8   : > { %v7778_v24 = vunpack.i.h.bf16 %v7776_v36  ;;  %v7777_v58 = vunpack.i.l.bf16 %v7776_v36  ;;  %v7781_v48 = vpop.permute.xlu0 %7780 }
 0x6a9   : > { %v7783_v21 = vunpack.i.h.bf16 %v7781_v48  ;;  %v7782_v20 = vunpack.i.l.bf16 %v7781_v48 }
 0x6aa   : > { %v3505_v34 = vsel %vm3502_vm2, %v3488_v37, %v7777_v58  ;;  %v3506_v7 = vsel %vm3502_vm2, %v3489_v3, %v7778_v24 }
 0x6ab   : > { %v8101_v30 = vpop.eup %8100  ;;  %v3520_v14 = vpack.c.bf16 %v3506_v7, %v3505_v34  ;;  %v3503_v51 = vsel %vm3502_vm2, %v3486_v38, %v7782_v20  ;;  %v3504_v26 = vsel %vm3502_vm2, %v3487_v1, %v7783_v21 }
 0x6ac   : > { %v3519_v45 = vpack.c.bf16 %v3504_v26, %v3503_v51  ;;  %v10261_v13 = vmul.f32 %v8101_v30, %v12056_v41  ;;  %v8103_v35 = vpop.eup %8102 }
 0x6ad   : > { %v8105_v27 = vpop.eup %8104  ;;  %v2019_v43 = vmul.f32 %v8103_v35, %v12057_v23 }
 0x6ae   : > { %7399 = vmatprep.mubr.bf16.mxu1 %v3519_v45  ;;  %v2020_v61 = vmul.f32 %v8105_v27, %v12058_v5 }
 0x6af   : > { %7400 = vmatmul.mubr.bf16.vlgmr.msra.gmra.mrb[80].mxu1 %v3520_v14  ;;  %v3473_v19 = vsel %vm1660_vm0, %v2019_v43, %v7752_v29 }
 0x6b0   : > { %v7791_v31 = vpop.permute.xlu0 %7790  ;;  %v3474_v60 = vsel %vm1660_vm0, %v2020_v61, %v7753_v16  ;;  %v3490_v49 = vsel %vm3485_vm1, %v3473_v19, %v7772_v2 }
 0x6b1   : > { %v7793_v40 = vunpack.i.h.bf16 %v7791_v31  ;;  %v7792_v56 = vunpack.i.l.bf16 %v7791_v31  ;;  %v3491_v17 = vsel %vm3485_vm1, %v3474_v60, %v7773_v39  ;;  %v12059_v39 = vld [vmem:[#allocation151_spill] sm:$0xff] }
 0x6b3   : > { %v3507_v9 = vsel %vm3502_vm2, %v3490_v49, %v7792_v56  ;;  %v3508_v63 = vsel %vm3502_vm2, %v3491_v17, %v7793_v40 }
 0x6b4   : > { %v3521_v22 = vpack.c.bf16 %v3508_v63, %v3507_v9 }
 0x6b6   : > { %7403 = vmatprep.mubr.bf16.mxu1 %v3521_v22 }
 0x6e6   : > { %v1889_v54 = vpop.xlane.xlu1 %1888 }
 0x6e7   : > { %8106 = vrcp.f32 %v1889_v54 }
 0x6ea   : > { %v1893_v12 = vpop.xlane.xlu0 %1892  ;;  %v7786_v33 = vpop.permute.xlu1 %7785 }
 0x6eb   : > { %v7788_v4 = vunpack.i.h.bf16 %v7786_v33  ;;  %v7787_v28 = vunpack.i.l.bf16 %v7786_v33  ;;  %8108 = vrcp.f32 %v1893_v12 }
 0x6ed   : > { %v3509_v62 = vsel %vm3502_vm2, %v10231_v0, %v7787_v28  ;;  %v3510_v52 = vsel %vm3502_vm2, %v10234_v53, %v7788_v4  ;;  %v12060_v4 = vld [vmem:[#allocation129_spill] sm:$0xff] }
 0x6ee   : > { %v7796_v44 = vpop.permute.xlu0 %7795  ;;  %v7801_v57 = vpop.permute.xlu1 %7800  ;;  %v3522_v18 = vpack.c.bf16 %v3510_v52, %v3509_v62 }
 0x6ef   : > { %v7798_v6 = vunpack.i.h.bf16 %v7796_v44  ;;  %v7797_v8 = vunpack.i.l.bf16 %v7796_v44  ;;  %v7803_v58 = vunpack.i.h.bf16 %v7801_v57  ;;  %v7802_v48 = vunpack.i.l.bf16 %v7801_v57 }
 0x6f0   : > { %7404 = vmatmul.mubr.bf16.gmra.mrb[84].mxu1 %v3522_v18 }
 0x6f1   : > { %v3477_v42 = vsel %vm1660_vm0, %v10158_v10, %v7797_v8  ;;  %v3478_v0 = vsel %vm1660_vm0, %v10166_v25, %v7798_v6  ;;  %v8107_v10 = vpop.eup %8106  ;;  %v3480_v25 = vsel %vm1660_vm0, %v10169_v15, %v7803_v58  ;;  %v3479_v7 = vsel %vm1660_vm0, %v10163_v47, %v7802_v48  ;;  %v8238_v48 = vld [vmem:[#allocation2] sm:$0xff] }
 0x6f2   : > { %v7816_v46 = vpop.permute.xlu0 %7815  ;;  %v7806_v50 = vpop.permute.xlu1 %7805  ;;  %v2028_v2 = vmul.f32 %v8107_v10, %v12059_v39  ;;  %v8241_v10 = vld [vmem:[#allocation2 + $0x18] sm:$0xff] }
 0x6f3   : > { %v7818_v55 = vunpack.i.h.bf16 %v7816_v46  ;;  %v7817_v59 = vunpack.i.l.bf16 %v7816_v46  ;;  %v7808_v36 = vunpack.i.h.bf16 %v7806_v50  ;;  %v7807_v11 = vunpack.i.l.bf16 %v7806_v50 }
 0x6f5   : > { %v3495_v53 = vsel %vm3485_vm1, %v3478_v0, %v7808_v36  ;;  %v3494_v24 = vsel %vm3485_vm1, %v3477_v42, %v7807_v11  ;;  %v8109_v9 = vpop.eup %8108  ;;  %v12062_v36 = vld [vmem:[#allocation70_spill] sm:$0xff] }
 0x6f6   : > { %v7826_v37 = vpop.permute.xlu0 %7825  ;;  %v7811_v3 = vpop.permute.xlu1 %7810  ;;  %v3511_v21 = vsel %vm3502_vm2, %v3494_v24, %v7817_v59  ;;  %v3512_v20 = vsel %vm3502_vm2, %v3495_v53, %v7818_v55  ;;  %v2030_v28 = vmul.f32 %v8109_v9, %v12060_v4  ;;  %v12061_v59 = vld [vmem:[#allocation126_spill] sm:$0xff]  ;;  %v8247_v9 = vld [vmem:[#allocation2 + $0x48] sm:$0xff] }
 0x6f7   : > { %v7813_v1 = vunpack.i.h.bf16 %v7811_v3  ;;  %v7812_v38 = vunpack.i.l.bf16 %v7811_v3  ;;  %v3523_v34 = vpack.c.bf16 %v3512_v20, %v3511_v21  ;;  %v7828_v51 = vunpack.i.h.bf16 %v7826_v37  ;;  %v8239_v21 = vld [vmem:[#allocation2 + $0x8] sm:$0xff] }
 0x6f8   : > { %v7827_v26 = vunpack.i.l.bf16 %v7826_v37  ;;  %v10309_v11 = vrot.slane %v12062_v36, %v12061_v59 }
 0x6f9   : > { %7407 = vmatprep.mubr.bf16.mxu1 %v3523_v34  ;;  %v3496_v35 = vsel %vm3485_vm1, %v3479_v7, %v7812_v38  ;;  %v3497_v16 = vsel %vm3485_vm1, %v3480_v25, %v7813_v1  ;;  %v3482_v31 = vsel %vm1660_vm0, %v2028_v2, %v7828_v51  ;;  %v8240_v1 = vld [vmem:[#allocation2 + $0x10] sm:$0xff] }
 0x6fa   : > { %v7836_v30 = vpop.permute.xlu0 %7835  ;;  %v7821_v14 = vpop.permute.xlu1 %7820  ;;  %v3481_v61 = vsel %vm1660_vm0, %v10173_v32, %v7827_v26  ;;  %v8244_v2 = vld [vmem:[#allocation2 + $0x30] sm:$0xff] }
 0x6fb   : > { %v7823_v45 = vunpack.i.h.bf16 %v7821_v14  ;;  %v7822_v41 = vunpack.i.l.bf16 %v7821_v14  ;;  %v7838_v29 = vunpack.i.h.bf16 %v7836_v30  ;;  %v7837_v27 = vunpack.i.l.bf16 %v7836_v30 }
 0x6fd   : > { %v3513_v15 = vsel %vm3502_vm2, %v3496_v35, %v7822_v41  ;;  %v3514_v23 = vsel %vm3502_vm2, %v3497_v16, %v7823_v45  ;;  %v3498_v40 = vsel %vm3485_vm1, %v3481_v61, %v7837_v27  ;;  %v3499_v56 = vsel %vm3485_vm1, %v3482_v31, %v7838_v29  ;;  %v8242_v41 = vld [vmem:[#allocation2 + $0x20] sm:$0xff]  ;;  %v8243_v27 = vld [vmem:[#allocation2 + $0x28] sm:$0xff] }
 0x6fe   : > { %v7846_v47 = vpop.permute.xlu0 %7845  ;;  %v7831_v43 = vpop.permute.xlu1 %7830  ;;  %v3524_v5 = vpack.c.bf16 %v3514_v23, %v3513_v15  ;;  %v8245_v23 = vld [vmem:[#allocation2 + $0x38] sm:$0xff] }
 0x6ff   : > { %v7848_v60 = vunpack.i.h.bf16 %v7846_v47  ;;  %v7847_v19 = vunpack.i.l.bf16 %v7846_v47  ;;  %v7833_v54 = vunpack.i.h.bf16 %v7831_v43  ;;  %v7832_v12 = vunpack.i.l.bf16 %v7831_v43 }
 0x700   : > { %7408 = vmatmul.mubr.bf16.gmra.mrb[88].mxu1 %v3524_v5 }
 0x701   : > { %v3515_v17 = vsel %vm3502_vm2, %v3498_v40, %v7847_v19  ;;  %v3516_v49 = vsel %vm3502_vm2, %v3499_v56, %v7848_v60  ;;  %v3484_v52 = vsel %vm1660_vm0, %v2030_v28, %v7833_v54  ;;  %v3483_v44 = vsel %vm1660_vm0, %v10261_v13, %v7832_v12  ;;  %v8246_v40 = vld [vmem:[#allocation2 + $0x40] sm:$0xff]  ;;  %v8249_v12 = vld [vmem:[#allocation2 + $0x58] sm:$0xff] }
 0x702   : > { %v7841_v63 = vpop.permute.xlu1 %7840  ;;  %v3525_v22 = vpack.c.bf16 %v3516_v49, %v3515_v17 }
 0x703   : > { %v7843_v33 = vunpack.i.h.bf16 %v7841_v63  ;;  %v7842_v32 = vunpack.i.l.bf16 %v7841_v63 }
 0x704   : > { %7411 = vmatprep.mubr.bf16.mxu1 %v3525_v22  ;;  %v8248_v22 = vld [vmem:[#allocation2 + $0x50] sm:$0xff] }
 0x705   : > { %v3500_v6 = vsel %vm3485_vm1, %v3483_v44, %v7842_v32  ;;  %v3501_v8 = vsel %vm3485_vm1, %v3484_v52, %v7843_v33 }
 0x706   : > { %v7851_v62 = vpop.permute.xlu1 %7850 }
 0x707   : > { %v7853_v57 = vunpack.i.h.bf16 %v7851_v62  ;;  %v7852_v18 = vunpack.i.l.bf16 %v7851_v62 }
 0x709   : > { %v3517_v46 = vsel %vm3502_vm2, %v3500_v6, %v7852_v18  ;;  %v3518_v50 = vsel %vm3502_vm2, %v3501_v8, %v7853_v57  ;;  %v8250_v57 = vld [vmem:[#allocation2 + $0x60] sm:$0xff] }
 0x70a   : > { %v3526_v55 = vpack.c.bf16 %v3518_v50, %v3517_v46  ;;  %v8251_v46 = vld [vmem:[#allocation2 + $0x68] sm:$0xff] }
 0x70c   : > { %7412 = vmatmul.mubr.bf16.gmra.mrb[92].mxu1 %v3526_v55  ;;  %v8252_v55 = vld [vmem:[#allocation2 + $0x70] sm:$0xff] }
 0x782   : > { %v7401_v42 = vpop.f32.mrb[80].mxu1 }
 0x783   : > { %v3615_v0 = vpop.f32.mrb[81].mxu1  ;;  %v3624_v58 = vadd.f32 %v7401_v42, %v10309_v11  ;;  %v8253_v42 = vld [vmem:[#allocation2 + $0x78] sm:$0xff] }
 0x784   : > { %v3616_v13 = vadd.f32 %v3615_v0, %v10309_v11  ;;  %v7402_v53 = vpop.f32.mrb[82].mxu1 }
 0x785   : > { %v3618_v24 = vpop.f32.mrb[83].mxu1  ;;  %v10319_v38 = vadd.f32 %v8240_v1, %v3624_v58  ;;  %v3627_v34 = vadd.f32 %v7402_v53, %v10309_v11  ;;  %v12064_v53 = vld [vmem:[#allocation73_spill] sm:$0xff]  ;;  %v12065_v58 = vld [vmem:[#allocation76_spill] sm:$0xff] }
 0x786   : > { %v10313_v37 = vadd.f32 %v8238_v48, %v3616_v13  ;;  %v3619_v3 = vadd.f32 %v3618_v24, %v10309_v11  ;;  %v12063_v13 = vld [vmem:[#allocation74_spill] sm:$0xff]  ;;  %v12066_v48 = vld [vmem:[#allocation75_spill] sm:$0xff] }
 0x787   : > { %v10324_v25 = vadd.f32 %v8241_v10, %v3627_v34  ;;  %v6706_v24 = vcombine.low %v12064_v53, %v12063_v13 }
 0x788   : > { %v10316_v20 = vadd.f32 %v8239_v21, %v3619_v3  ;;  %3694 = vadd.xlane.f32.xlu0 %v10313_v37  ;;  %v6709_v3 = vcombine.high %v12066_v48, %v12065_v58  ;;  %v6708_v21 = vcombine.low %v12066_v48, %v12065_v58 }
 0x78a   : > { %3696 = vadd.xlane.f32.xlu1 %v10316_v20 }
 0x78c   : > { %3698 = vadd.xlane.f32.xlu0 %v10319_v38 }
 0x790   : > { %3700 = vadd.xlane.f32.xlu0 %v10324_v25 }
 0x7c3   : > { %v7405_v7 = vpop.f32.mrb[84].mxu1 }
 0x7c4   : > { %v3631_v30 = vpop.f32.mrb[85].mxu1  ;;  %v3640_v45 = vadd.f32 %v7405_v7, %v10309_v11 }
 0x7c5   : > { %v3632_v14 = vadd.f32 %v3631_v30, %v10309_v11  ;;  %v7406_v51 = vpop.f32.mrb[86].mxu1 }
 0x7c6   : > { %v3634_v26 = vpop.f32.mrb[87].mxu1  ;;  %v3643_v29 = vadd.f32 %v7406_v51, %v10309_v11  ;;  %v10336_v15 = vadd.f32 %v8244_v2, %v3640_v45 }
 0x7c7   : > { %v10329_v35 = vadd.f32 %v8242_v41, %v3632_v14  ;;  %v3635_v16 = vadd.f32 %v3634_v26, %v10309_v11 }
 0x7c8   : > { %v10339_v47 = vadd.f32 %v8245_v23, %v3643_v29  ;;  %v12068_v23 = vld [vmem:[#allocation77_spill] sm:$0xff] }
 0x7c9   : > { %v10333_v39 = vadd.f32 %v8243_v27, %v3635_v16  ;;  %3702 = vadd.xlane.f32.xlu0 %v10329_v35 }
 0x7cb   : > { %3704 = vadd.xlane.f32.xlu1 %v10333_v39 }
 0x7cd   : > { %3706 = vadd.xlane.f32.xlu0 %v10336_v15 }
 0x7cf   : > { %3708 = vadd.xlane.f32.xlu1 %v10339_v47 }
 0x7d3   : > { %v7409_v43 = vpop.f32.mrb[88].mxu1 }
 0x7d4   : > { %v3647_v5 = vpop.f32.mrb[89].mxu1  ;;  %v3656_v19 = vadd.f32 %v7409_v43, %v10309_v11 }
 0x7d5   : > { %v3648_v61 = vadd.f32 %v3647_v5, %v10309_v11  ;;  %v7410_v31 = vpop.f32.mrb[90].mxu1 }
 0x7d6   : > { %v3650_v60 = vpop.f32.mrb[91].mxu1  ;;  %v3659_v49 = vadd.f32 %v7410_v31, %v10309_v11  ;;  %v10352_v54 = vadd.f32 %v8248_v22, %v3656_v19  ;;  %v12070_v31 = vld [vmem:[#allocation79_spill] sm:$0xff]  ;;  %v12071_v19 = vld [vmem:[#allocation82_spill] sm:$0xff] }
 0x7d7   : > { %v10345_v56 = vadd.f32 %v8246_v40, %v3648_v61  ;;  %v3651_v17 = vadd.f32 %v3650_v60, %v10309_v11  ;;  %v12069_v61 = vld [vmem:[#allocation80_spill] sm:$0xff]  ;;  %v12072_v40 = vld [vmem:[#allocation81_spill] sm:$0xff]  ;;  %v12074_v22 = vld [vmem:[#allocation83_spill] sm:$0xff] }
 0x7d8   : > { %v10355_v33 = vadd.f32 %v8249_v12, %v3659_v49  ;;  %v6713_v60 = vcombine.high %v12070_v31, %v12069_v61  ;;  %v6714_v49 = vcombine.low %v12072_v40, %v12071_v19 }
 0x7d9   : > { %v10349_v63 = vadd.f32 %v8247_v9, %v3651_v17  ;;  %3710 = vadd.xlane.f32.xlu0 %v10345_v56  ;;  %v6715_v17 = vcombine.high %v12072_v40, %v12071_v19  ;;  %v12073_v9 = vld [vmem:[#allocation84_spill] sm:$0xff] }
 0x7da   : > { %v6717_v12 = vcombine.high %v12074_v22, %v12073_v9 }
 0x7db   : > { %3712 = vadd.xlane.f32.xlu1 %v10349_v63 }
 0x7dd   : > { %3714 = vadd.xlane.f32.xlu0 %v10352_v54 }
 0x7df   : > { %v7413_v32 = vpop.f32.mrb[92].mxu1  ;;  %3716 = vadd.xlane.f32.xlu1 %v10355_v33 }
 0x7e0   : > { %v3663_v4 = vpop.f32.mrb[93].mxu1  ;;  %v3672_v44 = vadd.f32 %v7413_v32, %v10309_v11  ;;  %v6716_v32 = vcombine.low %v12074_v22, %v12073_v9 }
 0x7e1   : > { %v3664_v28 = vadd.f32 %v3663_v4, %v10309_v11  ;;  %v7414_v62 = vpop.f32.mrb[94].mxu1  ;;  %v12075_v4 = vld [vmem:[#allocation86_spill] sm:$0xff] }
 0x7e2   : > { %v3666_v52 = vpop.f32.mrb[95].mxu1  ;;  %v3675_v8 = vadd.f32 %v7414_v62, %v10309_v11  ;;  %v10368_v36 = vadd.f32 %v8252_v55, %v3672_v44  ;;  %v12077_v44 = vld [vmem:[#allocation88_spill] sm:$0xff] }
 0x7e3   : > { %v10361_v18 = vadd.f32 %v8250_v57, %v3664_v28  ;;  %v3667_v6 = vadd.f32 %v3666_v52, %v10309_v11  ;;  %v6707_v11 = vcombine.high %v12064_v53, %v12063_v13  ;;  %v12076_v28 = vld [vmem:[#allocation85_spill] sm:$0xff]  ;;  %v12078_v57 = vld [vmem:[#allocation87_spill] sm:$0xff] }
 0x7e4   : > { %v10371_v0 = vadd.f32 %v8253_v42, %v3675_v8  ;;  %v6719_v62 = vcombine.high %v12076_v28, %v12075_v4  ;;  %v6718_v52 = vcombine.low %v12076_v28, %v12075_v4  ;;  %v6720_v8 = vcombine.low %v12078_v57, %v12077_v44 }
 0x7e5   : > { %v10365_v50 = vadd.f32 %v8251_v46, %v3667_v6  ;;  %3718 = vadd.xlane.f32.xlu0 %v10361_v18  ;;  %4014 = vmatprep.subr.bf16.mxu0 %v6707_v11  ;;  %v6721_v6 = vcombine.high %v12078_v57, %v12077_v44 }
 0x7e6   : > { %4015 = vmatpush1.bf16.msra.mxu0 %v6706_v24 }
 0x7e7   : > { %3720 = vadd.xlane.f32.xlu1 %v10365_v50  ;;  %4016 = vmatprep.subr.bf16.mxu0 %v6709_v3 }
 0x7e9   : > { %3722 = vadd.xlane.f32.xlu0 %v10368_v36 }
 0x7ea   : > { %4017 = vmatpush1.bf16.msra.mxu0 %v6708_v21 }
 0x7eb   : > { %3724 = vadd.xlane.f32.xlu1 %v10371_v0 }
 0x815   : > { %v3695_v1 = vpop.xlane.xlu0 %3694 }
 0x816   : > { %v3727_v34 = vmul.f32 0.0078125, %v3695_v1 }
 0x817   : > { %v3697_v10 = vpop.xlane.xlu1 %3696 }
 0x818   : > { %v10384_v7 = vsub.f32 %v10313_v37, %v3727_v34  ;;  %v3728_v30 = vmul.f32 0.0078125, %v3697_v10 }
 0x819   : > { %v3699_v14 = vpop.xlane.xlu0 %3698 }
 0x81a   : > { %v10387_v51 = vsub.f32 %v10316_v20, %v3728_v30  ;;  %v3729_v26 = vmul.f32 0.0078125, %v3699_v14  ;;  %v3759_v45 = vmul.f32 %v10384_v7, %v10384_v7 }
 0x81c   : > { %v10392_v41 = vsub.f32 %v10319_v38, %v3729_v26  ;;  %3775 = vadd.xlane.f32.xlu0 %v3759_v45  ;;  %v3760_v16 = vmul.f32 %v10387_v51, %v10387_v51  ;;  %v12067_v38 = vld [vmem:[#allocation78_spill] sm:$0xff] }
 0x81d   : > { %v3701_v29 = vpop.xlane.xlu0 %3700  ;;  %v6711_v43 = vcombine.high %v12068_v23, %v12067_v38  ;;  %v6710_v5 = vcombine.low %v12068_v23, %v12067_v38 }
 0x81e   : > { %v3730_v27 = vmul.f32 0.0078125, %v3701_v29  ;;  %3777 = vadd.xlane.f32.xlu1 %v3760_v16  ;;  %v3761_v37 = vmul.f32 %v10392_v41, %v10392_v41 }
 0x81f   : > { %4018 = vmatprep.subr.bf16.mxu0 %v6711_v43 }
 0x820   : > { %v10399_v20 = vsub.f32 %v10324_v25, %v3730_v27  ;;  %3779 = vadd.xlane.f32.xlu0 %v3761_v37  ;;  %4019 = vmatpush1.bf16.msra.mxu0 %v6710_v5  ;;  %v6712_v25 = vcombine.low %v12070_v31, %v12069_v61 }
 0x821   : > { %4020 = vmatprep.subr.bf16.mxu0 %v6713_v60 }
 0x822   : > { %v3762_v2 = vmul.f32 %v10399_v20, %v10399_v20 }
 0x824   : > { %3781 = vadd.xlane.f32.xlu1 %v3762_v2  ;;  %4021 = vmatpush1.bf16.msra.mxu0 %v6712_v25 }
 0x825   : > { %4022 = vmatprep.subr.bf16.mxu0 %v6715_v17 }
 0x828   : > { %4023 = vmatpush1.bf16.msra.mxu0 %v6714_v49 }
 0x829   : > { %4024 = vmatprep.subr.bf16.mxu0 %v6717_v12 }
 0x82c   : > { %4025 = vmatpush1.bf16.msra.mxu0 %v6716_v32 }
 0x82d   : > { %4026 = vmatprep.subr.bf16.mxu0 %v6719_v62 }
 0x830   : > { %4027 = vmatpush1.bf16.msra.mxu0 %v6718_v52 }
 0x831   : > { %4028 = vmatprep.subr.bf16.mxu0 %v6721_v6 }
 0x834   : > { %4029 = vmatpush1.bf16.msra.mxu0 %v6720_v8 }
 0x856   : > { %v3703_v46 = vpop.xlane.xlu0 %3702 }
 0x857   : > { %v3731_v55 = vmul.f32 0.0078125, %v3703_v46 }
 0x858   : > { %v3705_v42 = vpop.xlane.xlu1 %3704 }
 0x859   : > { %v10428_v13 = vsub.f32 %v10329_v35, %v3731_v55  ;;  %v3732_v53 = vmul.f32 0.0078125, %v3705_v42  ;;  %v12079_v55 = vld [vmem:[#allocation71_spill] sm:$0xff] }
 0x85a   : > { %v3707_v11 = vpop.xlane.xlu0 %3706  ;;  %v10489_v42 = vrot.slane %v12079_v55, %v12061_v59 }
 0x85b   : > { %v10431_v24 = vsub.f32 %v10333_v39, %v3732_v53  ;;  %v3733_v58 = vmul.f32 0.0078125, %v3707_v11  ;;  %v3763_v48 = vmul.f32 %v10428_v13, %v10428_v13 }
 0x85c   : > { %v3709_v3 = vpop.xlane.xlu1 %3708 }
 0x85d   : > { %v10436_v21 = vsub.f32 %v10336_v15, %v3733_v58  ;;  %v3734_v1 = vmul.f32 0.0078125, %v3709_v3  ;;  %3783 = vadd.xlane.f32.xlu0 %v3763_v48  ;;  %v3764_v34 = vmul.f32 %v10431_v24, %v10431_v24 }
 0x85f   : > { %v10441_v35 = vsub.f32 %v10339_v47, %v3734_v1  ;;  %3785 = vadd.xlane.f32.xlu1 %v3764_v34  ;;  %v3765_v39 = vmul.f32 %v10436_v21, %v10436_v21  ;;  %v12080_v1 = vld [vmem:[#allocation72_spill] sm:$0xff] }
 0x860   : > { %v10496_v34 = vrot.slane %v12080_v1, %v12061_v59 }
 0x861   : > { %3787 = vadd.xlane.f32.xlu0 %v3765_v39  ;;  %v3766_v10 = vmul.f32 %v10441_v35, %v10441_v35 }
 0x863   : > { %3789 = vadd.xlane.f32.xlu1 %v3766_v10 }
 0x866   : > { %v3711_v30 = vpop.xlane.xlu0 %3710 }
 0x867   : > { %v3735_v15 = vmul.f32 0.0078125, %v3711_v30 }
 0x868   : > { %v3713_v14 = vpop.xlane.xlu1 %3712 }
 0x869   : > { %v10448_v26 = vsub.f32 %v10345_v56, %v3735_v15  ;;  %v3736_v45 = vmul.f32 0.0078125, %v3713_v14 }
 0x86a   : > { %v3715_v16 = vpop.xlane.xlu0 %3714 }
 0x86b   : > { %v10451_v47 = vsub.f32 %v10349_v63, %v3736_v45  ;;  %v3737_v29 = vmul.f32 0.0078125, %v3715_v16  ;;  %v3767_v27 = vmul.f32 %v10448_v26, %v10448_v26 }
 0x86c   : > { %v3717_v37 = vpop.xlane.xlu1 %3716 }
 0x86d   : > { %v10456_v2 = vsub.f32 %v10352_v54, %v3737_v29  ;;  %v3738_v38 = vmul.f32 0.0078125, %v3717_v37  ;;  %3791 = vadd.xlane.f32.xlu0 %v3767_v27  ;;  %v3768_v23 = vmul.f32 %v10451_v47, %v10451_v47  ;;  %v12081_v27 = vmov 0  }
 0x86f   : > { %v10461_v56 = vsub.f32 %v10355_v33, %v3738_v38  ;;  %3793 = vadd.xlane.f32.xlu1 %v3768_v23  ;;  %v3769_v63 = vmul.f32 %v10456_v2, %v10456_v2 }
 0x871   : > { %3795 = vadd.xlane.f32.xlu0 %v3769_v63  ;;  %v3770_v43 = vmul.f32 %v10461_v56, %v10461_v56 }
 0x872   : > { %v3719_v5 = vpop.xlane.xlu0 %3718 }
 0x873   : > { %v3739_v61 = vmul.f32 0.0078125, %v3719_v5  ;;  %3797 = vadd.xlane.f32.xlu1 %v3770_v43 }
 0x874   : > { %v3721_v54 = vpop.xlane.xlu1 %3720 }
 0x875   : > { %v10468_v31 = vsub.f32 %v10361_v18, %v3739_v61  ;;  %v3740_v60 = vmul.f32 0.0078125, %v3721_v54 }
 0x876   : > { %v3723_v25 = vpop.xlane.xlu0 %3722 }
 0x877   : > { %v10471_v33 = vsub.f32 %v10365_v50, %v3740_v60  ;;  %v3741_v19 = vmul.f32 0.0078125, %v3723_v25  ;;  %v3771_v40 = vmul.f32 %v10468_v31, %v10468_v31 }
 0x878   : > { %v3725_v17 = vpop.xlane.xlu1 %3724 }
 0x879   : > { %v10476_v49 = vsub.f32 %v10368_v36, %v3741_v19  ;;  %v3742_v9 = vmul.f32 0.0078125, %v3725_v17  ;;  %3799 = vadd.xlane.f32.xlu0 %v3771_v40  ;;  %v3772_v22 = vmul.f32 %v10471_v33, %v10471_v33 }
 0x87b   : > { %v10481_v18 = vsub.f32 %v10371_v0, %v3742_v9  ;;  %3801 = vadd.xlane.f32.xlu1 %v3772_v22  ;;  %v3773_v50 = vmul.f32 %v10476_v49, %v10476_v49 }
 0x87d   : > { %3803 = vadd.xlane.f32.xlu0 %v3773_v50  ;;  %v3774_v12 = vmul.f32 %v10481_v18, %v10481_v18 }
 0x87f   : > { %3805 = vadd.xlane.f32.xlu1 %v3774_v12 }
 0x8a9   : > { %v3776_v32 = vpop.xlane.xlu0 %3775 }
 0x8aa   : > { %v3807_v36 = vmul.f32 0.0078125, %v3776_v32 }
 0x8ab   : > { %v3778_v4 = vpop.xlane.xlu1 %3777 }
 0x8ac   : > { %v3823_v28 = vadd.f32 1e-12, %v3807_v36  ;;  %v3808_v62 = vmul.f32 0.0078125, %v3778_v4 }
 0x8ad   : > { %v3780_v52 = vpop.xlane.xlu0 %3779 }
 0x8ae   : > { %8110 = vrsqrt.f32 %v3823_v28  ;;  %v3824_v44 = vadd.f32 1e-12, %v3808_v62  ;;  %v3809_v57 = vmul.f32 0.0078125, %v3780_v52 }
 0x8b0   : > { %8112 = vrsqrt.f32 %v3824_v44  ;;  %v3825_v0 = vadd.f32 1e-12, %v3809_v57 }
 0x8b1   : > { %v3782_v6 = vpop.xlane.xlu1 %3781 }
 0x8b2   : > { %8114 = vrsqrt.f32 %v3825_v0  ;;  %v3810_v8 = vmul.f32 0.0078125, %v3782_v6 }
 0x8b4   : > { %v3826_v46 = vadd.f32 1e-12, %v3810_v8 }
 0x8b6   : > { %8116 = vrsqrt.f32 %v3826_v46 }
 0x8b8   : > { %v8111_v53 = vpop.eup %8110 }
 0x8b9   : > { %v3855_v11 = vmul.f32 %v8111_v53, %v10384_v7 }
 0x8ba   : > { %v8113_v58 = vpop.eup %8112 }
 0x8bb   : > { %v3877_v48 = vmul.f32 %v10489_v42, %v3855_v11  ;;  %v3856_v3 = vmul.f32 %v8113_v58, %v10387_v51 }
 0x8bc   : > { %v8115_v39 = vpop.eup %8114 }
 0x8bd   : > { %v3878_v10 = vmul.f32 %v10489_v42, %v3856_v3  ;;  %v10500_v30 = vadd.f32 %v10496_v34, %v3877_v48  ;;  %v3857_v7 = vmul.f32 %v8115_v39, %v10392_v41 }
 0x8bf   : > { %v10503_v15 = vadd.f32 %v10496_v34, %v3878_v10  ;;  %v3879_v16 = vmul.f32 %v10489_v42, %v3857_v7 }
 0x8c0   : > { %v8117_v14 = vpop.eup %8116 }
 0x8c1   : > { %v3915_v45 = vpack.c.bf16 %v10503_v15, %v10500_v30  ;;  %v3858_v51 = vmul.f32 %v8117_v14, %v10399_v20  ;;  %v10516_v38 = vadd.f32 %v10496_v34, %v3879_v16 }
 0x8c3   : > { %4047 = vmatmul.mubr.bf16.vlgmr.msra.gmra.mrb[96].mxu0 %v3915_v45  ;;  %v3880_v29 = vmul.f32 %v10489_v42, %v3858_v51 }
 0x8c4   : > { %4056 = vmatprep.mubr.bf16.mxu0 %v12081_v27 }
 0x8c5   : > { %v10513_v37 = vadd.f32 %v10496_v34, %v3880_v29 }
 0x8c7   : > { %v3916_v41 = vpack.c.bf16 %v10513_v37, %v10516_v38 }
 0x8cb   : > { %4057 = vmatmul.mubr.bf16.gmra.mrb[100].mxu0 %v3916_v41 }
 0x8cc   : > { %4066 = vmatprep.mubr.bf16.mxu0 %v12081_v27 }
 0x8ea   : > { %v3784_v20 = vpop.xlane.xlu0 %3783 }
 0x8eb   : > { %v3811_v23 = vmul.f32 0.0078125, %v3784_v20 }
 0x8ec   : > { %v3786_v63 = vpop.xlane.xlu1 %3785 }
 0x8ed   : > { %v3827_v43 = vadd.f32 1e-12, %v3811_v23  ;;  %v3812_v5 = vmul.f32 0.0078125, %v3786_v63 }
 0x8ee   : > { %v3788_v61 = vpop.xlane.xlu0 %3787 }
 0x8ef   : > { %8118 = vrsqrt.f32 %v3827_v43  ;;  %v3828_v54 = vadd.f32 1e-12, %v3812_v5  ;;  %v3813_v60 = vmul.f32 0.0078125, %v3788_v61 }
 0x8f0   : > { %v3790_v25 = vpop.xlane.xlu1 %3789 }
 0x8f1   : > { %8120 = vrsqrt.f32 %v3828_v54  ;;  %v3829_v19 = vadd.f32 1e-12, %v3813_v60  ;;  %v3814_v40 = vmul.f32 0.0078125, %v3790_v25 }
 0x8f3   : > { %8122 = vrsqrt.f32 %v3829_v19  ;;  %v3830_v17 = vadd.f32 1e-12, %v3814_v40 }
 0x8f5   : > { %8124 = vrsqrt.f32 %v3830_v17 }
 0x8f9   : > { %v8119_v9 = vpop.eup %8118 }
 0x8fa   : > { %v3792_v22 = vpop.xlane.xlu0 %3791  ;;  %v3859_v50 = vmul.f32 %v8119_v9, %v10428_v13 }
 0x8fb   : > { %v8121_v12 = vpop.eup %8120  ;;  %v3815_v32 = vmul.f32 0.0078125, %v3792_v22 }
 0x8fc   : > { %v3794_v36 = vpop.xlane.xlu1 %3793  ;;  %v3860_v4 = vmul.f32 %v8121_v12, %v10431_v24  ;;  %v3881_v28 = vmul.f32 %v10489_v42, %v3859_v50 }
 0x8fd   : > { %v8123_v62 = vpop.eup %8122  ;;  %v3831_v52 = vadd.f32 1e-12, %v3815_v32  ;;  %v3816_v44 = vmul.f32 0.0078125, %v3794_v36 }
 0x8fe   : > { %v3796_v57 = vpop.xlane.xlu0 %3795  ;;  %v3882_v0 = vmul.f32 %v10489_v42, %v3860_v4  ;;  %v10526_v13 = vadd.f32 %v10496_v34, %v3881_v28  ;;  %v3861_v24 = vmul.f32 %v8123_v62, %v10436_v21 }
 0x8ff   : > { %v8125_v6 = vpop.eup %8124  ;;  %8126 = vrsqrt.f32 %v3831_v52  ;;  %v3832_v8 = vadd.f32 1e-12, %v3816_v44  ;;  %v3817_v46 = vmul.f32 0.0078125, %v3796_v57 }
 0x900   : > { %v3798_v55 = vpop.xlane.xlu1 %3797  ;;  %v10529_v53 = vadd.f32 %v10496_v34, %v3882_v0  ;;  %v3862_v11 = vmul.f32 %v8125_v6, %v10441_v35  ;;  %v3883_v10 = vmul.f32 %v10489_v42, %v3861_v24  ;;  %v12082_v6 = vld [vmem:[#allocation107_spill] sm:$0xff] }
 0x901   : > { %8128 = vrsqrt.f32 %v3832_v8  ;;  %v3833_v58 = vadd.f32 1e-12, %v3817_v46  ;;  %v3818_v48 = vmul.f32 0.0078125, %v3798_v55  ;;  %v12083_v8 = vld [vmem:[#allocation106_spill] sm:$0xff]  ;;  %v12084_v24 = vld [vmem:[#allocation91_spill] sm:$0xff] }
 0x902   : > { %v3917_v3 = vpack.c.bf16 %v10529_v53, %v10526_v13  ;;  %v3884_v1 = vmul.f32 %v10489_v42, %v3862_v11  ;;  %v10542_v45 = vadd.f32 %v10496_v34, %v3883_v10  ;;  %v6730_v46 = vcombine.low %v12083_v8, %v12082_v6  ;;  %v12085_v11 = vld [vmem:[#allocation90_spill] sm:$0xff]  ;;  %v12111_v8 = vld [vmem:[#allocation103_spill] sm:$0xff] }
 0x903   : > { %8130 = vrsqrt.f32 %v3833_v58  ;;  %v3834_v39 = vadd.f32 1e-12, %v3818_v48  ;;  %v6722_v58 = vcombine.low %v12085_v11, %v12084_v24  ;;  %v12113_v24 = vld [vmem:[#allocation121_spill] sm:$0xff]  ;;  %v12114_v11 = vld [vmem:[#allocation120_spill] sm:$0xff] }
 0x904   : > { %4067 = vmatmul.mubr.bf16.gmra.mrb[104].mxu0 %v3917_v3  ;;  %v10539_v21 = vadd.f32 %v10496_v34, %v3884_v1  ;;  %6966 = vmatprep.subr.bf16.mxu1 %v6730_v46  ;;  %v12087_v1 = vld [vmem:[#allocation109_spill] sm:$0xff]  ;;  %v12112_v46 = vld [vmem:[#allocation102_spill] sm:$0xff] }
 0x905   : > { %8132 = vrsqrt.f32 %v3834_v39  ;;  %4076 = vmatprep.mubr.bf16.mxu0 %v12081_v27  ;;  %6967 = vmatpush3.bf16.msra.mxu1 %v6722_v58  ;;  %v12088_v39 = vld [vmem:[#allocation108_spill] sm:$0xff]  ;;  %v6737_v58 = vcombine.low %v12114_v11, %v12113_v24 }
 0x906   : > { %v3800_v7 = vpop.xlane.xlu0 %3799  ;;  %v3918_v20 = vpack.c.bf16 %v10539_v21, %v10542_v45  ;;  %v6731_v10 = vcombine.low %v12088_v39, %v12087_v1  ;;  %v12117_v1 = vld [vmem:[#allocation89_spill] sm:$0xff] }
 0x907   : > { %v3819_v35 = vmul.f32 0.0078125, %v3800_v7  ;;  %v12089_v7 = vld [vmem:[#allocation93_spill] sm:$0xff]  ;;  %v10632_v39 = vrot.slane %v12117_v1, %v12061_v59 }
 0x908   : > { %v3802_v14 = vpop.xlane.xlu1 %3801  ;;  %6968 = vmatprep.subr.bf16.mxu1 %v6731_v10  ;;  %v12118_v10 = vld [vmem:[#allocation125_spill] sm:$0xff] }
 0x909   : > { %v8127_v51 = vpop.eup %8126  ;;  %v3835_v16 = vadd.f32 1e-12, %v3819_v35  ;;  %v3820_v29 = vmul.f32 0.0078125, %v3802_v14  ;;  %v12090_v35 = vld [vmem:[#allocation92_spill] sm:$0xff] }
 0x90a   : > { %v3804_v41 = vpop.xlane.xlu0 %3803  ;;  %v3863_v23 = vmul.f32 %v8127_v51, %v10448_v26  ;;  %v6723_v14 = vcombine.low %v12090_v35, %v12089_v7  ;;  %v12119_v7 = vsub.s32 1, %v12118_v10 }
 0x90b   : > { %v8129_v63 = vpop.eup %8128  ;;  %8134 = vrsqrt.f32 %v3835_v16  ;;  %v3836_v43 = vadd.f32 1e-12, %v3820_v29  ;;  %v3821_v5 = vmul.f32 0.0078125, %v3804_v41 }
 0x90c   : > { %v3806_v61 = vpop.xlane.xlu1 %3805  ;;  %4077 = vmatmul.mubr.bf16.gmra.mrb[108].mxu0 %v3918_v20  ;;  %v3864_v54 = vmul.f32 %v8129_v63, %v10451_v47  ;;  %v3885_v60 = vmul.f32 %v10489_v42, %v3863_v23  ;;  %6969 = vmatpush3.bf16.msra.mxu1 %v6723_v14  ;;  %v12091_v20 = vld [vmem:[#allocation111_spill] sm:$0xff]  ;;  %v10637_v35 = vrot.slane %v12117_v1, %v12119_v7 }
 0x90d   : > { %v8131_v25 = vpop.eup %8130  ;;  %8136 = vrsqrt.f32 %v3836_v43  ;;  %v3822_v19 = vmul.f32 0.0078125, %v3806_v61  ;;  %4086 = vmatprep.mubr.bf16.mxu0 %v12081_v27  ;;  %v3837_v9 = vadd.f32 1e-12, %v3821_v5  ;;  %v12093_v63 = vld [vmem:[#allocation95_spill] sm:$0xff]  ;;  %v12094_v43 = vld [vmem:[#allocation94_spill] sm:$0xff] }
 0x90e   : > { %v3886_v40 = vmul.f32 %v10489_v42, %v3864_v54  ;;  %v10552_v22 = vadd.f32 %v10496_v34, %v3885_v60  ;;  %v3865_v47 = vmul.f32 %v8131_v25, %v10456_v2  ;;  %v6724_v5 = vcombine.low %v12094_v43, %v12093_v63  ;;  %v12096_v54 = vld [vmem:[#allocation113_spill] sm:$0xff]  ;;  %v12097_v60 = vld [vmem:[#allocation112_spill] sm:$0xff] }
 0x90f   : > { %v8133_v17 = vpop.eup %8132  ;;  %v3838_v26 = vadd.f32 1e-12, %v3822_v19  ;;  %v6733_v25 = vcombine.low %v12097_v60, %v12096_v54  ;;  %v12098_v19 = vld [vmem:[#allocation97_spill] sm:$0xff] }
 0x910   : > { %v10555_v50 = vadd.f32 %v10496_v34, %v3886_v40  ;;  %v3866_v12 = vmul.f32 %v8133_v17, %v10461_v56  ;;  %v3887_v4 = vmul.f32 %v10489_v42, %v3865_v47  ;;  %v12099_v40 = vld [vmem:[#allocation96_spill] sm:$0xff] }
 0x911   : > { %8138 = vrsqrt.f32 %v3838_v26  ;;  %v6725_v17 = vcombine.low %v12099_v40, %v12098_v19  ;;  %v12101_v26 = vld [vmem:[#allocation115_spill] sm:$0xff] }
 0x912   : > { %v3919_v32 = vpack.c.bf16 %v10555_v50, %v10552_v22  ;;  %v3888_v36 = vmul.f32 %v10489_v42, %v3866_v12  ;;  %8140 = vrsqrt.f32 %v3837_v9  ;;  %v10568_v2 = vadd.f32 %v10496_v34, %v3887_v4  ;;  %v12103_v12 = vld [vmem:[#allocation99_spill] sm:$0xff]  ;;  %v12105_v4 = vld [vmem:[#allocation117_spill] sm:$0xff] }
 0x914   : > { %4087 = vmatmul.mubr.bf16.gmra.mrb[112].mxu0 %v3919_v32  ;;  %v10565_v62 = vadd.f32 %v10496_v34, %v3888_v36  ;;  %v12104_v32 = vld [vmem:[#allocation98_spill] sm:$0xff] }
 0x915   : > { %v8135_v28 = vpop.eup %8134  ;;  %4096 = vmatprep.mubr.bf16.mxu0 %v12081_v27  ;;  %v6726_v36 = vcombine.low %v12104_v32, %v12103_v12 }
 0x916   : > { %v3867_v56 = vmul.f32 %v8135_v28, %v10468_v31  ;;  %v3920_v57 = vpack.c.bf16 %v10565_v62, %v10568_v2  ;;  %v12106_v28 = vld [vmem:[#allocation116_spill] sm:$0xff] }
 0x917   : > { %v8137_v52 = vpop.eup %8136 }
 0x918   : > { %v3868_v44 = vmul.f32 %v8137_v52, %v10471_v33  ;;  %v3889_v48 = vmul.f32 %v10489_v42, %v3867_v56  ;;  %v6735_v52 = vcombine.low %v12106_v28, %v12105_v4  ;;  %v12107_v56 = vld [vmem:[#allocation101_spill] sm:$0xff] }
 0x91a   : > { %v3890_v0 = vmul.f32 %v10489_v42, %v3868_v44  ;;  %v10590_v51 = vadd.f32 %v10496_v34, %v3889_v48  ;;  %v12115_v48 = vld [vmem:[#allocation105_spill] sm:$0xff] }
 0x91b   : > { %v8139_v55 = vpop.eup %8138 }
 0x91c   : > { %4097 = vmatmul.mubr.bf16.gmra.mrb[116].mxu0 %v3920_v57  ;;  %v8141_v3 = vpop.eup %8140  ;;  %v10582_v31 = vadd.f32 %v10496_v34, %v3890_v0  ;;  %v3870_v33 = vmul.f32 %v8139_v55, %v10481_v18  ;;  %v12092_v18 = vld [vmem:[#allocation110_spill] sm:$0xff]  ;;  %v12109_v57 = vld [vmem:[#allocation119_spill] sm:$0xff]  ;;  %v6728_v55 = vcombine.low %v12112_v46, %v12111_v8 }
 0x91d   : > { %4106 = vmatprep.mubr.bf16.mxu0 %v12081_v27  ;;  %v3869_v16 = vmul.f32 %v8141_v3, %v10476_v49  ;;  %v6732_v23 = vcombine.low %v12092_v18, %v12091_v20  ;;  %v12110_v0 = vld [vmem:[#allocation118_spill] sm:$0xff]  ;;  %v12116_v3 = vld [vmem:[#allocation104_spill] sm:$0xff] }
 0x91e   : > { %12086 = vst [vmem:[#allocation134_spill] sm:$0xff] %v10582_v31  ;;  %v3921_v29 = vpack.c.bf16 %v10582_v31, %v10590_v51  ;;  %v3892_v41 = vmul.f32 %v10489_v42, %v3870_v33  ;;  %v6736_v6 = vcombine.low %v12110_v0, %v12109_v57  ;;  %v6729_v33 = vcombine.low %v12116_v3, %v12115_v48 }
 0x91f   : > { %v3891_v61 = vmul.f32 %v10489_v42, %v3869_v16  ;;  %6970 = vmatprep.subr.bf16.mxu1 %v6732_v23 }
 0x920   : > { %6971 = vmatpush3.bf16.msra.mxu1 %v6724_v5  ;;  %v10603_v49 = vadd.f32 %v10496_v34, %v3892_v41 }
 0x921   : > { %v10610_v9 = vadd.f32 %v10496_v34, %v3891_v61  ;;  %6972 = vmatprep.subr.bf16.mxu1 %v6733_v25  ;;  %v12108_v34 = vld [vmem:[#allocation100_spill] sm:$0xff] }
 0x922   : > { %12095 = vst [vmem:[#allocation131_spill] sm:$0xff] %v10603_v49  ;;  %v6727_v44 = vcombine.low %v12108_v34, %v12107_v56 }
 0x923   : > { %12100 = vst [vmem:[#allocation159_spill] sm:$0xff] %v10610_v9  ;;  %v3922_v42 = vpack.c.bf16 %v10603_v49, %v10610_v9 }
 0x924   : > { %4107 = vmatmul.mubr.bf16.gmra.mrb[120].mxu0 %v3921_v29  ;;  %6973 = vmatpush3.bf16.msra.mxu1 %v6725_v17 }
 0x925   : > { %4116 = vmatprep.mubr.bf16.mxu0 %v12081_v27  ;;  %v12102_v27 = vld [vmem:[#allocation114_spill] sm:$0xff] }
 0x926   : > { %v6734_v47 = vcombine.low %v12102_v27, %v12101_v26 }
 0x928   : > { %6974 = vmatprep.subr.bf16.mxu1 %v6734_v47 }
 0x929   : > { %6975 = vmatpush3.bf16.msra.mxu1 %v6726_v36 }
 0x92a   : > { %6976 = vmatprep.subr.bf16.mxu1 %v6735_v52 }
 0x92c   : > { %4117 = vmatmul.mubr.bf16.gmra.mrb[124].mxu0 %v3922_v42 }
 0x92d   : > { %6977 = vmatpush3.bf16.msra.mxu1 %v6727_v44 }
 0x92e   : > { %6978 = vmatprep.subr.bf16.mxu1 %v6736_v6 }
 0x931   : > { %6979 = vmatpush3.bf16.msra.mxu1 %v6728_v55 }
 0x932   : > { %6980 = vmatprep.subr.bf16.mxu1 %v6737_v58 }
 0x935   : > { %6981 = vmatpush3.bf16.msra.mxu1 %v6729_v33 }
 0x996   : > { %v4048_v14 = vpop.f32.mrb[96].mxu0 }
 0x997   : > { %v10640_v16 = vadd.f32 %v4048_v14, %v10632_v39  ;;  %v4050_v29 = vpop.f32.mrb[97].mxu0 }
 0x998   : > { %v10643_v41 = vadd.f32 %v4050_v29, %v10637_v35  ;;  %v4052_v20 = vpop.f32.mrb[98].mxu0 }
 0x999   : > { %v4127_v18 = vmul.f32 %v10640_v16, %v10640_v16  ;;  %v10648_v23 = vadd.f32 %v4052_v20, %v10632_v39  ;;  %v4054_v63 = vpop.f32.mrb[99].mxu0 }
 0x99a   : > { %v4128_v43 = vmul.f32 %v10643_v41, %v10643_v41  ;;  %v10653_v5 = vadd.f32 %v4054_v63, %v10637_v35 }
 0x99b   : > { %v4159_v61 = vmul.f32 %v4127_v18, %v10640_v16  ;;  %v4129_v54 = vmul.f32 %v10648_v23, %v10648_v23 }
 0x99c   : > { %v4160_v60 = vmul.f32 %v4128_v43, %v10643_v41  ;;  %v4130_v25 = vmul.f32 %v10653_v5, %v10653_v5 }
 0x99d   : > { %v4191_v19 = vmul.f32 0.044715, %v4159_v61  ;;  %v4161_v40 = vmul.f32 %v4129_v54, %v10648_v23 }
 0x99e   : > { %v4192_v17 = vmul.f32 0.044715, %v4160_v60  ;;  %v4162_v42 = vmul.f32 %v4130_v25, %v10653_v5  ;;  %v4058_v26 = vpop.f32.mrb[100].mxu0 }
 0x99f   : > { %v4223_v27 = vadd.f32 %v4191_v19, %v10640_v16  ;;  %v4193_v47 = vmul.f32 0.044715, %v4161_v40  ;;  %v10665_v12 = vadd.f32 %v4058_v26, %v10632_v39  ;;  %v4060_v32 = vpop.f32.mrb[101].mxu0 }
 0x9a0   : > { %v4224_v36 = vadd.f32 %v4192_v17, %v10643_v41  ;;  %v4194_v4 = vmul.f32 0.044715, %v4162_v42  ;;  %v10669_v28 = vadd.f32 %v4060_v32, %v10637_v35  ;;  %v4062_v52 = vpop.f32.mrb[102].mxu0 }
 0x9a1   : > { %v4255_v56 = vmul.f32 0.7978846, %v4223_v27  ;;  %v4225_v34 = vadd.f32 %v4193_v47, %v10648_v23  ;;  %v4131_v44 = vmul.f32 %v10665_v12, %v10665_v12  ;;  %v10675_v57 = vadd.f32 %v4062_v52, %v10632_v39  ;;  %v4064_v0 = vpop.f32.mrb[103].mxu0 }
 0x9a2   : > { %v4256_v6 = vmul.f32 0.7978846, %v4224_v36  ;;  %v4226_v8 = vadd.f32 %v4194_v4, %v10653_v5  ;;  %v4132_v46 = vmul.f32 %v10669_v28, %v10669_v28  ;;  %v10681_v55 = vadd.f32 %v4064_v0, %v10637_v35 }
 0x9a3   : > { %8142 = vtanh.f32 %v4255_v56  ;;  %v4257_v24 = vmul.f32 0.7978846, %v4225_v34  ;;  %v4163_v11 = vmul.f32 %v4131_v44, %v10665_v12  ;;  %v4133_v58 = vmul.f32 %v10675_v57, %v10675_v57 }
 0x9a4   : > { %8144 = vtanh.f32 %v4256_v6  ;;  %v4258_v48 = vmul.f32 0.7978846, %v4226_v8  ;;  %v4164_v3 = vmul.f32 %v4132_v46, %v10669_v28  ;;  %v4134_v33 = vmul.f32 %v10681_v55, %v10681_v55 }
 0x9a5   : > { %8146 = vtanh.f32 %v4257_v24  ;;  %v4195_v1 = vmul.f32 0.044715, %v4163_v11  ;;  %v4165_v10 = vmul.f32 %v4133_v58, %v10675_v57 }
 0x9a6   : > { %8148 = vtanh.f32 %v4258_v48  ;;  %v4196_v7 = vmul.f32 0.044715, %v4164_v3  ;;  %v4166_v14 = vmul.f32 %v4134_v33, %v10681_v55 }
 0x9a7   : > { %v4227_v29 = vadd.f32 %v4195_v1, %v10665_v12  ;;  %v4197_v20 = vmul.f32 0.044715, %v4165_v10 }
 0x9a8   : > { %v4228_v18 = vadd.f32 %v4196_v7, %v10669_v28  ;;  %v4198_v63 = vmul.f32 0.044715, %v4166_v14 }
 0x9a9   : > { %v4259_v43 = vmul.f32 0.7978846, %v4227_v29  ;;  %v4229_v61 = vadd.f32 %v4197_v20, %v10675_v57 }
 0x9aa   : > { %v4260_v54 = vmul.f32 0.7978846, %v4228_v18  ;;  %v4230_v60 = vadd.f32 %v4198_v63, %v10681_v55 }
 0x9ab   : > { %8150 = vtanh.f32 %v4259_v43  ;;  %v4261_v25 = vmul.f32 0.7978846, %v4229_v61 }
 0x9ac   : > { %8152 = vtanh.f32 %v4260_v54  ;;  %v4262_v19 = vmul.f32 0.7978846, %v4230_v60 }
 0x9ad   : > { %v8143_v40 = vpop.eup %8142  ;;  %8154 = vtanh.f32 %v4261_v25 }
 0x9ae   : > { %v8145_v17 = vpop.eup %8144  ;;  %v4319_v42 = vadd.f32 1.0, %v8143_v40  ;;  %8156 = vtanh.f32 %v4262_v19 }
 0x9af   : > { %v8147_v26 = vpop.eup %8146  ;;  %v4320_v27 = vadd.f32 1.0, %v8145_v17 }
 0x9b0   : > { %v8149_v47 = vpop.eup %8148  ;;  %v4351_v32 = vmul.f32 0.5, %v4319_v42  ;;  %v4321_v36 = vadd.f32 1.0, %v8147_v26 }
 0x9b1   : > { %v4322_v4 = vadd.f32 1.0, %v8149_v47  ;;  %v4352_v52 = vmul.f32 0.5, %v4320_v27 }
 0x9b2   : > { %v4353_v56 = vmul.f32 0.5, %v4321_v36  ;;  %v4383_v44 = vmul.f32 %v4351_v32, %v10640_v16 }
 0x9b3   : > { %v4354_v34 = vmul.f32 0.5, %v4322_v4  ;;  %v4384_v8 = vmul.f32 %v4352_v52, %v10643_v41 }
 0x9b4   : > { %v4385_v0 = vmul.f32 %v4353_v56, %v10648_v23 }
 0x9b5   : > { %v8151_v6 = vpop.eup %8150  ;;  %v4386_v46 = vmul.f32 %v4354_v34, %v10653_v5 }
 0x9b6   : > { %v8153_v24 = vpop.eup %8152  ;;  %v4415_v11 = vpack.c.bf16 %v4385_v0, %v4383_v44  ;;  %v4323_v58 = vadd.f32 1.0, %v8151_v6 }
 0x9b7   : > { %v8155_v48 = vpop.eup %8154  ;;  %v4416_v3 = vpack.c.bf16 %v4386_v46, %v4384_v8  ;;  %v4324_v33 = vadd.f32 1.0, %v8153_v24 }
 0x9b8   : > { %v8157_v1 = vpop.eup %8156  ;;  %v4325_v10 = vadd.f32 1.0, %v8155_v48  ;;  %v4355_v7 = vmul.f32 0.5, %v4323_v58 }
 0x9b9   : > { %4565 = vmatprep.mubr.bf16.mxu1 %v4416_v3  ;;  %v4326_v14 = vadd.f32 1.0, %v8157_v1  ;;  %v4356_v29 = vmul.f32 0.5, %v4324_v33 }
 0x9ba   : > { %4566 = vmatmul.mubr.bf16.vlgmr.msra.gmra.mrb[96].mxu1 %v4415_v11  ;;  %v4357_v16 = vmul.f32 0.5, %v4325_v10  ;;  %v4387_v20 = vmul.f32 %v4355_v7, %v10665_v12 }
 0x9bb   : > { %v4358_v23 = vmul.f32 0.5, %v4326_v14  ;;  %v4388_v5 = vmul.f32 %v4356_v29, %v10669_v28 }
 0x9bc   : > { %v4389_v41 = vmul.f32 %v4357_v16, %v10675_v57 }
 0x9bd   : > { %v4390_v18 = vmul.f32 %v4358_v23, %v10681_v55 }
 0x9be   : > { %v4417_v63 = vpack.c.bf16 %v4389_v41, %v4387_v20 }
 0x9bf   : > { %v4418_v43 = vpack.c.bf16 %v4390_v18, %v4388_v5 }
 0x9c1   : > { %4573 = vmatprep.mubr.bf16.mxu1 %v4418_v43 }
 0x9c2   : > { %4574 = vmatmul.mubr.bf16.gmra.mrb[100].mxu1 %v4417_v63 }
 0x9d7   : > { %v4068_v61 = vpop.f32.mrb[104].mxu0 }
 0x9d8   : > { %v10704_v54 = vadd.f32 %v4068_v61, %v10632_v39  ;;  %v4070_v60 = vpop.f32.mrb[105].mxu0 }
 0x9d9   : > { %v10707_v25 = vadd.f32 %v4070_v60, %v10637_v35  ;;  %v4072_v19 = vpop.f32.mrb[106].mxu0 }
 0x9da   : > { %v4135_v12 = vmul.f32 %v10704_v54, %v10704_v54  ;;  %v10712_v28 = vadd.f32 %v4072_v19, %v10632_v39  ;;  %v4074_v57 = vpop.f32.mrb[107].mxu0 }
 0x9db   : > { %v4136_v55 = vmul.f32 %v10707_v25, %v10707_v25  ;;  %v10717_v40 = vadd.f32 %v4074_v57, %v10637_v35 }
 0x9dc   : > { %v4167_v17 = vmul.f32 %v4135_v12, %v10704_v54  ;;  %v4137_v42 = vmul.f32 %v10712_v28, %v10712_v28 }
 0x9dd   : > { %v4168_v26 = vmul.f32 %v4136_v55, %v10707_v25  ;;  %v4138_v27 = vmul.f32 %v10717_v40, %v10717_v40 }
 0x9de   : > { %v4199_v47 = vmul.f32 0.044715, %v4167_v17  ;;  %v4169_v32 = vmul.f32 %v4137_v42, %v10712_v28 }
 0x9df   : > { %v4200_v36 = vmul.f32 0.044715, %v4168_v26  ;;  %v4170_v4 = vmul.f32 %v4138_v27, %v10717_v40  ;;  %v4078_v52 = vpop.f32.mrb[108].mxu0 }
 0x9e0   : > { %v4231_v56 = vadd.f32 %v4199_v47, %v10704_v54  ;;  %v4201_v34 = vmul.f32 0.044715, %v4169_v32  ;;  %v10729_v44 = vadd.f32 %v4078_v52, %v10632_v39  ;;  %v4080_v0 = vpop.f32.mrb[109].mxu0 }
 0x9e1   : > { %v4232_v6 = vadd.f32 %v4200_v36, %v10707_v25  ;;  %v4202_v8 = vmul.f32 0.044715, %v4170_v4  ;;  %v10733_v46 = vadd.f32 %v4080_v0, %v10637_v35  ;;  %v4082_v24 = vpop.f32.mrb[110].mxu0 }
 0x9e2   : > { %v4263_v11 = vmul.f32 0.7978846, %v4231_v56  ;;  %v4233_v58 = vadd.f32 %v4201_v34, %v10712_v28  ;;  %v4139_v48 = vmul.f32 %v10729_v44, %v10729_v44  ;;  %v10739_v3 = vadd.f32 %v4082_v24, %v10632_v39  ;;  %v4084_v33 = vpop.f32.mrb[111].mxu0 }
 0x9e3   : > { %v4264_v1 = vmul.f32 0.7978846, %v4232_v6  ;;  %v4234_v10 = vadd.f32 %v4202_v8, %v10717_v40  ;;  %v4140_v7 = vmul.f32 %v10733_v46, %v10733_v46  ;;  %v10745_v14 = vadd.f32 %v4084_v33, %v10637_v35 }
 0x9e4   : > { %8158 = vtanh.f32 %v4263_v11  ;;  %v4265_v29 = vmul.f32 0.7978846, %v4233_v58  ;;  %v4171_v16 = vmul.f32 %v4139_v48, %v10729_v44  ;;  %v4141_v23 = vmul.f32 %v10739_v3, %v10739_v3 }
 0x9e5   : > { %8160 = vtanh.f32 %v4264_v1  ;;  %v4266_v20 = vmul.f32 0.7978846, %v4234_v10  ;;  %v4172_v41 = vmul.f32 %v4140_v7, %v10733_v46  ;;  %v4142_v5 = vmul.f32 %v10745_v14, %v10745_v14 }
 0x9e6   : > { %8162 = vtanh.f32 %v4265_v29  ;;  %v4203_v18 = vmul.f32 0.044715, %v4171_v16  ;;  %v4173_v63 = vmul.f32 %v4141_v23, %v10739_v3 }
 0x9e7   : > { %v4204_v43 = vmul.f32 0.044715, %v4172_v41  ;;  %v4174_v61 = vmul.f32 %v4142_v5, %v10745_v14  ;;  %v4088_v60 = vpop.f32.mrb[112].mxu0  ;;  %8164 = vtanh.f32 %v4266_v20 }
 0x9e8   : > { %v4235_v19 = vadd.f32 %v4203_v18, %v10729_v44  ;;  %v4205_v12 = vmul.f32 0.044715, %v4173_v63  ;;  %v10757_v57 = vadd.f32 %v4088_v60, %v10632_v39  ;;  %v4090_v55 = vpop.f32.mrb[113].mxu0 }
 0x9e9   : > { %v4236_v17 = vadd.f32 %v4204_v43, %v10733_v46  ;;  %v4206_v42 = vmul.f32 0.044715, %v4174_v61  ;;  %v10761_v26 = vadd.f32 %v4090_v55, %v10637_v35  ;;  %v4092_v27 = vpop.f32.mrb[114].mxu0 }
 0x9ea   : > { %v4267_v47 = vmul.f32 0.7978846, %v4235_v19  ;;  %v4237_v32 = vadd.f32 %v4205_v12, %v10739_v3  ;;  %v4143_v36 = vmul.f32 %v10757_v57, %v10757_v57  ;;  %v10767_v4 = vadd.f32 %v4092_v27, %v10632_v39  ;;  %v4094_v52 = vpop.f32.mrb[115].mxu0 }
 0x9eb   : > { %v4268_v56 = vmul.f32 0.7978846, %v4236_v17  ;;  %v4238_v34 = vadd.f32 %v4206_v42, %v10745_v14  ;;  %v4144_v0 = vmul.f32 %v10761_v26, %v10761_v26  ;;  %v10773_v6 = vadd.f32 %v4094_v52, %v10637_v35 }
 0x9ec   : > { %8166 = vtanh.f32 %v4267_v47  ;;  %v4269_v8 = vmul.f32 0.7978846, %v4237_v32  ;;  %v4175_v24 = vmul.f32 %v4143_v36, %v10757_v57  ;;  %v4145_v11 = vmul.f32 %v10767_v4, %v10767_v4 }
 0x9ed   : > { %8168 = vtanh.f32 %v4268_v56  ;;  %v4270_v58 = vmul.f32 0.7978846, %v4238_v34  ;;  %v4176_v48 = vmul.f32 %v4144_v0, %v10761_v26  ;;  %v4146_v33 = vmul.f32 %v10773_v6, %v10773_v6 }
 0x9ee   : > { %v8159_v1 = vpop.eup %8158  ;;  %8170 = vtanh.f32 %v4269_v8  ;;  %v4207_v10 = vmul.f32 0.044715, %v4175_v24  ;;  %v4177_v7 = vmul.f32 %v4145_v11, %v10767_v4 }
 0x9ef   : > { %v8161_v29 = vpop.eup %8160  ;;  %8172 = vtanh.f32 %v4270_v58  ;;  %v4208_v16 = vmul.f32 0.044715, %v4176_v48  ;;  %v4178_v23 = vmul.f32 %v4146_v33, %v10773_v6  ;;  %v4098_v20 = vpop.f32.mrb[116].mxu0  ;;  %v10783_v41 = vadd.f32 1.0, %v8159_v1 }
 0x9f0   : > { %v8163_v5 = vpop.eup %8162  ;;  %v4239_v18 = vadd.f32 %v4207_v10, %v10757_v57  ;;  %v4209_v63 = vmul.f32 0.044715, %v4177_v7  ;;  %v10787_v43 = vadd.f32 %v4098_v20, %v10632_v39  ;;  %v4100_v61 = vpop.f32.mrb[117].mxu0  ;;  %v4328_v60 = vadd.f32 1.0, %v8161_v29 }
 0x9f1   : > { %v4240_v19 = vadd.f32 %v4208_v16, %v10761_v26  ;;  %v4210_v12 = vmul.f32 0.044715, %v4178_v23  ;;  %v10791_v55 = vadd.f32 %v4100_v61, %v10637_v35  ;;  %v4102_v17 = vpop.f32.mrb[118].mxu0  ;;  %v10793_v42 = vadd.f32 1.0, %v8163_v5  ;;  %v8165_v56 = vpop.eup %8164 }
 0x9f2   : > { %v4271_v27 = vmul.f32 0.7978846, %v4239_v18  ;;  %v4241_v47 = vadd.f32 %v4209_v63, %v10767_v4  ;;  %v4147_v32 = vmul.f32 %v10787_v43, %v10787_v43  ;;  %v10799_v36 = vadd.f32 %v4102_v17, %v10632_v39  ;;  %v4104_v52 = vpop.f32.mrb[119].mxu0 }
 0x9f3   : > { %v4272_v34 = vmul.f32 0.7978846, %v4240_v19  ;;  %v4242_v0 = vadd.f32 %v4210_v12, %v10773_v6  ;;  %v4148_v8 = vmul.f32 %v10791_v55, %v10791_v55  ;;  %v10805_v24 = vadd.f32 %v4104_v52, %v10637_v35 }
 0x9f4   : > { %8174 = vtanh.f32 %v4271_v27  ;;  %v4273_v11 = vmul.f32 0.7978846, %v4241_v47  ;;  %v4179_v58 = vmul.f32 %v4147_v32, %v10787_v43  ;;  %v4149_v48 = vmul.f32 %v10799_v36, %v10799_v36 }
 0x9f5   : > { %8176 = vtanh.f32 %v4272_v34  ;;  %v4274_v33 = vmul.f32 0.7978846, %v4242_v0  ;;  %v4180_v1 = vmul.f32 %v4148_v8, %v10791_v55  ;;  %v4150_v10 = vmul.f32 %v10805_v24, %v10805_v24 }
 0x9f6   : > { %v10813_v7 = vpop.eup %8166  ;;  %8178 = vtanh.f32 %v4273_v11  ;;  %v4211_v29 = vmul.f32 0.044715, %v4179_v58  ;;  %v4181_v16 = vmul.f32 %v4149_v48, %v10799_v36  ;;  %v4330_v23 = vadd.f32 1.0, %v8165_v56 }
 0x9f7   : > { %v10816_v20 = vpop.eup %8168  ;;  %8180 = vtanh.f32 %v4274_v33  ;;  %v4212_v5 = vmul.f32 0.044715, %v4180_v1  ;;  %v4182_v18 = vmul.f32 %v4150_v10, %v10805_v24  ;;  %v4108_v63 = vpop.f32.mrb[120].mxu0  ;;  %v4360_v61 = vmul.f32 0.5, %v4328_v60 }
 0x9f8   : > { %v10819_v19 = vpop.eup %8170  ;;  %v4243_v12 = vadd.f32 %v4211_v29, %v10787_v43  ;;  %v4213_v17 = vmul.f32 0.044715, %v4181_v16  ;;  %v10823_v27 = vadd.f32 %v4108_v63, %v10632_v39  ;;  %v4110_v47 = vpop.f32.mrb[121].mxu0  ;;  %v4362_v32 = vmul.f32 0.5, %v4330_v23 }
 0x9f9   : > { %v10825_v52 = vpop.eup %8172  ;;  %v4244_v56 = vadd.f32 %v4212_v5, %v10791_v55  ;;  %v4214_v34 = vmul.f32 0.044715, %v4182_v18  ;;  %v10829_v0 = vadd.f32 %v4110_v47, %v10637_v35  ;;  %v4112_v8 = vpop.f32.mrb[122].mxu0  ;;  %v4392_v60 = vmul.f32 %v4360_v61, %v10707_v25 }
 0x9fa   : > { %v4275_v11 = vmul.f32 0.7978846, %v4243_v12  ;;  %v4245_v58 = vadd.f32 %v4213_v17, %v10799_v36  ;;  %v4151_v48 = vmul.f32 %v10823_v27, %v10823_v27  ;;  %v10836_v33 = vadd.f32 %v4112_v8, %v10632_v39  ;;  %v4114_v1 = vpop.f32.mrb[123].mxu0 }
 0x9fb   : > { %v4276_v10 = vmul.f32 0.7978846, %v4244_v56  ;;  %v4246_v29 = vadd.f32 %v4214_v34, %v10805_v24  ;;  %v4152_v16 = vmul.f32 %v10829_v0, %v10829_v0  ;;  %v10842_v23 = vadd.f32 %v4114_v1, %v10637_v35 }
 0x9fc   : > { %8182 = vtanh.f32 %v4275_v11  ;;  %v4277_v25 = vmul.f32 0.7978846, %v4245_v58  ;;  %v4183_v5 = vmul.f32 %v4151_v48, %v10823_v27  ;;  %v4153_v18 = vmul.f32 %v10836_v33, %v10836_v33 }
 0x9fd   : > { %8184 = vtanh.f32 %v4276_v10  ;;  %v4278_v63 = vmul.f32 0.7978846, %v4246_v29  ;;  %v4184_v61 = vmul.f32 %v4152_v16, %v10829_v0  ;;  %v4154_v12 = vmul.f32 %v10842_v23, %v10842_v23 }
 0x9fe   : > { %v10850_v17 = vpop.eup %8174  ;;  %8186 = vtanh.f32 %v4277_v25  ;;  %v4215_v47 = vmul.f32 0.044715, %v4183_v5  ;;  %v4185_v56 = vmul.f32 %v4153_v18, %v10836_v33  ;;  %v4394_v34 = vmul.f32 %v4362_v32, %v10717_v40 }
 0x9ff   : > { %v10854_v8 = vpop.eup %8176  ;;  %8188 = vtanh.f32 %v4278_v63  ;;  %v4216_v11 = vmul.f32 0.044715, %v4184_v61  ;;  %v4186_v58 = vmul.f32 %v4154_v12, %v10842_v23  ;;  %v4359_v48 = vmul.f32 0.5, %v10783_v41  ;;  %v4118_v1 = vpop.f32.mrb[124].mxu0 }
 0xa00   : > { %v10858_v10 = vpop.eup %8178  ;;  %v4247_v29 = vadd.f32 %v4215_v47, %v10823_v27  ;;  %v4217_v16 = vmul.f32 0.044715, %v4185_v56  ;;  %v4420_v25 = vpack.c.bf16 %v4394_v34, %v4392_v60  ;;  %v4361_v5 = vmul.f32 0.5, %v10793_v42  ;;  %v4120_v18 = vpop.f32.mrb[125].mxu0 }
 0xa01   : > { %v10862_v49 = vpop.eup %8180  ;;  %v4248_v40 = vadd.f32 %v4216_v11, %v10829_v0  ;;  %v4218_v32 = vmul.f32 0.044715, %v4186_v58  ;;  %v4391_v63 = vmul.f32 %v4359_v48, %v10704_v54  ;;  %v10867_v61 = vadd.f32 %v4118_v1, %v10632_v39  ;;  %v4122_v41 = vpop.f32.mrb[126].mxu0 }
 0xa02   : > { %v4279_v12 = vmul.f32 0.7978846, %v4247_v29  ;;  %v4249_v9 = vadd.f32 %v4217_v16, %v10836_v33  ;;  %4581 = vmatprep.mubr.bf16.mxu1 %v4420_v25  ;;  %v4393_v60 = vmul.f32 %v4361_v5, %v10712_v28  ;;  %v10872_v42 = vadd.f32 %v4120_v18, %v10637_v35  ;;  %v4124_v47 = vpop.f32.mrb[127].mxu0 }
 0xa03   : > { %v4280_v56 = vmul.f32 0.7978846, %v4248_v40  ;;  %v4250_v34 = vadd.f32 %v4218_v32, %v10842_v23  ;;  %v4155_v54 = vmul.f32 %v10867_v61, %v10867_v61  ;;  %v10878_v11 = vadd.f32 %v4122_v41, %v10632_v39 }
 0xa04   : > { %8190 = vtanh.f32 %v4279_v12  ;;  %v4281_v58 = vmul.f32 0.7978846, %v4249_v9  ;;  %v4419_v48 = vpack.c.bf16 %v4393_v60, %v4391_v63  ;;  %v4156_v1 = vmul.f32 %v10872_v42, %v10872_v42 }
 0xa05   : > { %8192 = vtanh.f32 %v4280_v56  ;;  %v4282_v28 = vmul.f32 0.7978846, %v4250_v34  ;;  %v4187_v29 = vmul.f32 %v4155_v54, %v10867_v61  ;;  %v4157_v16 = vmul.f32 %v10878_v11, %v10878_v11 }
 0xa06   : > { %v8183_v25 = vpop.eup %8182  ;;  %8194 = vtanh.f32 %v4281_v58  ;;  %4582 = vmatmul.mubr.bf16.gmra.mrb[104].mxu1 %v4419_v48  ;;  %v4188_v5 = vmul.f32 %v4156_v1, %v10872_v42  ;;  %v10887_v39 = vadd.f32 %v4124_v47, %v10637_v35  ;;  %v4332_v9 = vadd.f32 1.0, %v10816_v20 }
 0xa07   : > { %v8185_v18 = vpop.eup %8184  ;;  %8196 = vtanh.f32 %v4282_v28  ;;  %v4219_v40 = vmul.f32 0.044715, %v4187_v29  ;;  %v4189_v32 = vmul.f32 %v4157_v16, %v10878_v11  ;;  %v4334_v63 = vadd.f32 1.0, %v10825_v52 }
 0xa08   : > { %v8187_v41 = vpop.eup %8186  ;;  %v4220_v12 = vmul.f32 0.044715, %v4188_v5  ;;  %v4158_v60 = vmul.f32 %v10887_v39, %v10887_v39  ;;  %v4364_v56 = vmul.f32 0.5, %v4332_v9  ;;  %v4331_v34 = vadd.f32 1.0, %v10813_v7 }
 0xa09   : > { %v8189_v54 = vpop.eup %8188  ;;  %v4251_v35 = vadd.f32 %v4219_v40, %v10867_v61  ;;  %v4221_v47 = vmul.f32 0.044715, %v4189_v32  ;;  %v4366_v20 = vmul.f32 0.5, %v4334_v63  ;;  %v4333_v58 = vadd.f32 1.0, %v10819_v19 }
 0xa0a   : > { %v4252_v48 = vadd.f32 %v4220_v12, %v10872_v42  ;;  %v4190_v1 = vmul.f32 %v4158_v60, %v10887_v39  ;;  %v4396_v52 = vmul.f32 %v4364_v56, %v10733_v46  ;;  %v4363_v28 = vmul.f32 0.5, %v4331_v34 }
 0xa0b   : > { %v4283_v29 = vmul.f32 0.7978846, %v4251_v35  ;;  %v4253_v16 = vadd.f32 %v4221_v47, %v10878_v11  ;;  %v4398_v5 = vmul.f32 %v4366_v20, %v10745_v14  ;;  %v4365_v7 = vmul.f32 0.5, %v4333_v58 }
 0xa0c   : > { %v4284_v9 = vmul.f32 0.7978846, %v4252_v48  ;;  %v4222_v31 = vmul.f32 0.044715, %v4190_v1  ;;  %v4395_v40 = vmul.f32 %v4363_v28, %v10729_v44  ;;  %v4336_v32 = vadd.f32 1.0, %v10854_v8 }
 0xa0d   : > { %8198 = vtanh.f32 %v4283_v29  ;;  %v4285_v19 = vmul.f32 0.7978846, %v4253_v16  ;;  %v4422_v63 = vpack.c.bf16 %v4398_v5, %v4396_v52  ;;  %v4397_v12 = vmul.f32 %v4365_v7, %v10739_v3 }
 0xa0e   : > { %v8191_v60 = vpop.eup %8190  ;;  %8200 = vtanh.f32 %v4284_v9  ;;  %v4254_v46 = vadd.f32 %v4222_v31, %v10887_v39  ;;  %v4338_v56 = vadd.f32 1.0, %v10862_v49  ;;  %v4368_v34 = vmul.f32 0.5, %v4336_v32 }
 0xa0f   : > { %v8193_v14 = vpop.eup %8192  ;;  %8202 = vtanh.f32 %v4285_v19  ;;  %4589 = vmatprep.mubr.bf16.mxu1 %v4422_v63  ;;  %v4421_v35 = vpack.c.bf16 %v4397_v12, %v4395_v40  ;;  %v4335_v44 = vadd.f32 1.0, %v10850_v17  ;;  %v4337_v8 = vadd.f32 1.0, %v10858_v10 }
 0xa10   : > { %v8195_v47 = vpop.eup %8194  ;;  %v4286_v20 = vmul.f32 0.7978846, %v4254_v46  ;;  %v4370_v58 = vmul.f32 0.5, %v4338_v56  ;;  %v4400_v3 = vmul.f32 %v4368_v34, %v10761_v26  ;;  %v4340_v48 = vadd.f32 1.0, %v8185_v18 }
 0xa11   : > { %v8197_v1 = vpop.eup %8196  ;;  %4590 = vmatmul.mubr.bf16.gmra.mrb[108].mxu1 %v4421_v35  ;;  %v4367_v31 = vmul.f32 0.5, %v4335_v44  ;;  %v4369_v52 = vmul.f32 0.5, %v4337_v8  ;;  %v4342_v49 = vadd.f32 1.0, %v8189_v54  ;;  %v4339_v28 = vadd.f32 1.0, %v8183_v25 }
 0xa12   : > { %8204 = vtanh.f32 %v4286_v20  ;;  %v4402_v29 = vmul.f32 %v4370_v58, %v10773_v6  ;;  %v4372_v16 = vmul.f32 0.5, %v4340_v48  ;;  %v4341_v5 = vadd.f32 1.0, %v8187_v41 }
 0xa13   : > { %v4399_v17 = vmul.f32 %v4367_v31, %v10757_v57  ;;  %v4401_v10 = vmul.f32 %v4369_v52, %v10767_v4  ;;  %v4374_v7 = vmul.f32 0.5, %v4342_v49  ;;  %v4371_v9 = vmul.f32 0.5, %v4339_v28 }
 0xa14   : > { %v4424_v40 = vpack.c.bf16 %v4402_v29, %v4400_v3  ;;  %v4404_v26 = vmul.f32 %v4372_v16, %v10791_v55  ;;  %v4373_v18 = vmul.f32 0.5, %v4341_v5  ;;  %v4344_v32 = vadd.f32 1.0, %v8193_v14 }
 0xa15   : > { %v4423_v19 = vpack.c.bf16 %v4401_v10, %v4399_v17  ;;  %v4406_v54 = vmul.f32 %v4374_v7, %v10805_v24  ;;  %v4403_v25 = vmul.f32 %v4371_v9, %v10787_v43  ;;  %v4346_v63 = vadd.f32 1.0, %v8197_v1  ;;  %v12120_v17 = vld [vmem:[#allocation122_spill] sm:$0xff] }
 0xa16   : > { %4597 = vmatprep.mubr.bf16.mxu1 %v4424_v40  ;;  %v4405_v6 = vmul.f32 %v4373_v18, %v10799_v36  ;;  %v4376_v41 = vmul.f32 0.5, %v4344_v32  ;;  %v4343_v57 = vadd.f32 1.0, %v8191_v60  ;;  %v4345_v12 = vadd.f32 1.0, %v8195_v47 }
 0xa17   : > { %v8199_v4 = vpop.eup %8198  ;;  %v4426_v46 = vpack.c.bf16 %v4406_v54, %v4404_v26  ;;  %v4378_v56 = vmul.f32 0.5, %v4346_v63  ;;  %v10927_v10 = vrot.slane %v12120_v17, %v12061_v59 }
 0xa18   : > { %v8201_v34 = vpop.eup %8200  ;;  %v4425_v35 = vpack.c.bf16 %v4405_v6, %v4403_v25  ;;  %v4375_v55 = vmul.f32 0.5, %v4343_v57  ;;  %v4377_v44 = vmul.f32 0.5, %v4345_v12  ;;  %v4408_v24 = vmul.f32 %v4376_v41, %v10829_v0 }
 0xa19   : > { %v8203_v14 = vpop.eup %8202  ;;  %4598 = vmatmul.mubr.bf16.gmra.mrb[112].mxu1 %v4423_v19  ;;  %v4410_v43 = vmul.f32 %v4378_v56, %v10842_v23  ;;  %v4348_v8 = vadd.f32 1.0, %v8201_v34  ;;  %v4347_v20 = vadd.f32 1.0, %v8199_v4 }
 0xa1a   : > { %4605 = vmatprep.mubr.bf16.mxu1 %v4426_v46  ;;  %v4407_v36 = vmul.f32 %v4375_v55, %v10823_v27  ;;  %v4409_v60 = vmul.f32 %v4377_v44, %v10836_v33  ;;  %v4349_v47 = vadd.f32 1.0, %v8203_v14 }
 0xa1b   : > { %v4428_v58 = vpack.c.bf16 %v4410_v43, %v4408_v24  ;;  %v4379_v3 = vmul.f32 0.5, %v4347_v20  ;;  %v4380_v49 = vmul.f32 0.5, %v4348_v8 }
 0xa1c   : > { %v8205_v48 = vpop.eup %8204  ;;  %v4427_v1 = vpack.c.bf16 %v4409_v60, %v4407_v36  ;;  %v4381_v31 = vmul.f32 0.5, %v4349_v47 }
 0xa1d   : > { %v4350_v52 = vadd.f32 1.0, %v8205_v48  ;;  %v4411_v28 = vmul.f32 %v4379_v3, %v10867_v61  ;;  %v4412_v16 = vmul.f32 %v4380_v49, %v10872_v42 }
 0xa1e   : > { %v4413_v0 = vmul.f32 %v4381_v31, %v10878_v11 }
 0xa1f   : > { %v4382_v23 = vmul.f32 0.5, %v4350_v52 }
 0xa20   : > { %v4429_v29 = vpack.c.bf16 %v4413_v0, %v4411_v28 }
 0xa21   : > { %4606 = vmatmul.mubr.bf16.gmra.mrb[116].mxu1 %v4425_v35  ;;  %v4414_v27 = vmul.f32 %v4382_v23, %v10887_v39 }
 0xa22   : > { %4613 = vmatprep.mubr.bf16.mxu1 %v4428_v58 }
 0xa23   : > { %v4430_v33 = vpack.c.bf16 %v4414_v27, %v4412_v16 }
 0xa29   : > { %4614 = vmatmul.mubr.bf16.gmra.mrb[120].mxu1 %v4427_v1 }
 0xa2a   : > { %4621 = vmatprep.mubr.bf16.mxu1 %v4430_v33 }
 0xa31   : > { %4622 = vmatmul.mubr.bf16.gmra.mrb[124].mxu1 %v4429_v29 }
 0xa8d   : > { %v6982_v5 = vpop.f32.mrb[96].mxu1 }
 0xa8e   : > { %v6983_v61 = vpop.f32.mrb[97].mxu1 }
 0xa8f   : > { %v6984_v7 = vadd.f32 %v6983_v61, %v6982_v5  ;;  %v6985_v11 = vpop.f32.mrb[98].mxu1 }
 0xa90   : > { %v6986_v9 = vpop.f32.mrb[99].mxu1 }
 0xa91   : > { %v4568_v40 = vadd.f32 %v6984_v7, %v10927_v10  ;;  %v6987_v26 = vadd.f32 %v6986_v9, %v6985_v11 }
 0xa93   : > { %v4571_v42 = vadd.f32 %v6987_v26, %v10927_v10  ;;  %v10932_v39 = vadd.f32 %v4568_v40, %v10500_v30 }
 0xa95   : > { %4646 = vadd.xlane.f32.xlu0 %v10932_v39  ;;  %v6988_v18 = vpop.f32.mrb[100].mxu1  ;;  %v10936_v32 = vadd.f32 %v4571_v42, %v10503_v15 }
 0xa96   : > { %v6989_v19 = vpop.f32.mrb[101].mxu1 }
 0xa97   : > { %v6990_v54 = vadd.f32 %v6989_v19, %v6988_v18  ;;  %4648 = vadd.xlane.f32.xlu1 %v10936_v32  ;;  %v6991_v25 = vpop.f32.mrb[102].mxu1 }
 0xa98   : > { %v6992_v63 = vpop.f32.mrb[103].mxu1 }
 0xa99   : > { %v4576_v6 = vadd.f32 %v6990_v54, %v10927_v10  ;;  %v6993_v41 = vadd.f32 %v6992_v63, %v6991_v25  ;;  %v12121_v54 = vld [vmem:[#allocation134_spill] sm:$0xff] }
 0xa9b   : > { %v4579_v57 = vadd.f32 %v6993_v41, %v10927_v10  ;;  %v10942_v30 = vadd.f32 %v4576_v6, %v10516_v38 }
 0xa9d   : > { %4650 = vadd.xlane.f32.xlu0 %v10942_v30  ;;  %v10946_v12 = vadd.f32 %v4579_v57, %v10513_v37 }
 0xa9f   : > { %4652 = vadd.xlane.f32.xlu1 %v10946_v12 }
 0xad9   : > { %v6994_v15 = vpop.f32.mrb[104].mxu1 }
 0xada   : > { %v6995_v4 = vpop.f32.mrb[105].mxu1 }
 0xadb   : > { %v6996_v46 = vadd.f32 %v6995_v4, %v6994_v15  ;;  %v6997_v56 = vpop.f32.mrb[106].mxu1 }
 0xadc   : > { %v6998_v34 = vpop.f32.mrb[107].mxu1 }
 0xadd   : > { %v4584_v35 = vadd.f32 %v6996_v46, %v10927_v10  ;;  %v6999_v55 = vadd.f32 %v6998_v34, %v6997_v56  ;;  %v12122_v46 = vld [vmem:[#allocation159_spill] sm:$0xff] }
 0xade   : > { %v12123_v56 = vld [vmem:[#allocation131_spill] sm:$0xff] }
 0xadf   : > { %v4587_v44 = vadd.f32 %v6999_v55, %v10927_v10  ;;  %v10952_v38 = vadd.f32 %v4584_v35, %v10526_v13 }
 0xae1   : > { %4654 = vadd.xlane.f32.xlu0 %v10952_v38  ;;  %v10956_v37 = vadd.f32 %v4587_v44, %v10529_v53 }
 0xae3   : > { %4656 = vadd.xlane.f32.xlu1 %v10956_v37 }
 0xae4   : > { %v7000_v14 = vpop.f32.mrb[108].mxu1 }
 0xae5   : > { %v7001_v24 = vpop.f32.mrb[109].mxu1 }
 0xae6   : > { %v7002_v43 = vadd.f32 %v7001_v24, %v7000_v14  ;;  %v7003_v8 = vpop.f32.mrb[110].mxu1 }
 0xae7   : > { %v7004_v20 = vpop.f32.mrb[111].mxu1 }
 0xae8   : > { %v4592_v36 = vadd.f32 %v7002_v43, %v10927_v10  ;;  %v7005_v60 = vadd.f32 %v7004_v20, %v7003_v8 }
 0xaea   : > { %v4595_v47 = vadd.f32 %v7005_v60, %v10927_v10  ;;  %v10962_v13 = vadd.f32 %v4592_v36, %v10542_v45 }
 0xaec   : > { %4658 = vadd.xlane.f32.xlu0 %v10962_v13  ;;  %v7006_v58 = vpop.f32.mrb[112].mxu1  ;;  %v10966_v53 = vadd.f32 %v4595_v47, %v10539_v21 }
 0xaed   : > { %v7007_v3 = vpop.f32.mrb[113].mxu1 }
 0xaee   : > { %v7008_v48 = vadd.f32 %v7007_v3, %v7006_v58  ;;  %4660 = vadd.xlane.f32.xlu1 %v10966_v53  ;;  %v7009_v1 = vpop.f32.mrb[114].mxu1 }
 0xaef   : > { %v7010_v31 = vpop.f32.mrb[115].mxu1 }
 0xaf0   : > { %v4600_v52 = vadd.f32 %v7008_v48, %v10927_v10  ;;  %v7011_v49 = vadd.f32 %v7010_v31, %v7009_v1 }
 0xaf2   : > { %v4603_v28 = vadd.f32 %v7011_v49, %v10927_v10  ;;  %v10972_v45 = vadd.f32 %v4600_v52, %v10552_v22 }
 0xaf4   : > { %4662 = vadd.xlane.f32.xlu0 %v10972_v45  ;;  %v7012_v0 = vpop.f32.mrb[116].mxu1  ;;  %v10976_v21 = vadd.f32 %v4603_v28, %v10555_v50 }
 0xaf5   : > { %v7013_v23 = vpop.f32.mrb[117].mxu1 }
 0xaf6   : > { %v7014_v29 = vadd.f32 %v7013_v23, %v7012_v0  ;;  %4664 = vadd.xlane.f32.xlu1 %v10976_v21  ;;  %v7015_v16 = vpop.f32.mrb[118].mxu1 }
 0xaf7   : > { %v7016_v27 = vpop.f32.mrb[119].mxu1 }
 0xaf8   : > { %v4608_v33 = vadd.f32 %v7014_v29, %v10927_v10  ;;  %v7017_v5 = vadd.f32 %v7016_v27, %v7015_v16 }
 0xafa   : > { %v4611_v17 = vadd.f32 %v7017_v5, %v10927_v10  ;;  %v10982_v22 = vadd.f32 %v4608_v33, %v10568_v2 }
 0xafc   : > { %4666 = vadd.xlane.f32.xlu0 %v10982_v22  ;;  %v7018_v61 = vpop.f32.mrb[120].mxu1  ;;  %v10986_v50 = vadd.f32 %v4611_v17, %v10565_v62 }
 0xafd   : > { %v7019_v7 = vpop.f32.mrb[121].mxu1 }
 0xafe   : > { %v7020_v11 = vadd.f32 %v7019_v7, %v7018_v61  ;;  %4668 = vadd.xlane.f32.xlu1 %v10986_v50  ;;  %v7021_v9 = vpop.f32.mrb[122].mxu1 }
 0xaff   : > { %v7022_v40 = vpop.f32.mrb[123].mxu1 }
 0xb00   : > { %v4616_v26 = vadd.f32 %v7020_v11, %v10927_v10  ;;  %v7023_v42 = vadd.f32 %v7022_v40, %v7021_v9 }
 0xb02   : > { %v4619_v18 = vadd.f32 %v7023_v42, %v10927_v10  ;;  %v10992_v2 = vadd.f32 %v4616_v26, %v10590_v51 }
 0xb04   : > { %4670 = vadd.xlane.f32.xlu0 %v10992_v2  ;;  %v7024_v19 = vpop.f32.mrb[124].mxu1  ;;  %v10996_v62 = vadd.f32 %v4619_v18, %v12121_v54 }
 0xb05   : > { %v7025_v25 = vpop.f32.mrb[125].mxu1 }
 0xb06   : > { %v7026_v63 = vadd.f32 %v7025_v25, %v7024_v19  ;;  %4672 = vadd.xlane.f32.xlu1 %v10996_v62  ;;  %v7027_v6 = vpop.f32.mrb[126].mxu1 }
 0xb07   : > { %v7028_v41 = vpop.f32.mrb[127].mxu1 }
 0xb08   : > { %v4624_v57 = vadd.f32 %v7026_v63, %v10927_v10  ;;  %v7029_v15 = vadd.f32 %v7028_v41, %v7027_v6 }
 0xb0a   : > { %v4627_v4 = vadd.f32 %v7029_v15, %v10927_v10  ;;  %v11002_v51 = vadd.f32 %v4624_v57, %v12122_v46 }
 0xb0c   : > { %4674 = vadd.xlane.f32.xlu0 %v11002_v51  ;;  %v11006_v34 = vadd.f32 %v4627_v4, %v12123_v56 }
 0xb0e   : > { %4676 = vadd.xlane.f32.xlu1 %v11006_v34 }
 0xb22   : > { %v4647_v35 = vpop.xlane.xlu0 %4646 }
 0xb23   : > { %v4678_v55 = vmul.f32 0.0078125, %v4647_v35 }
 0xb24   : > { %v4649_v44 = vpop.xlane.xlu1 %4648 }
 0xb25   : > { %v11010_v14 = vsub.f32 %v10932_v39, %v4678_v55  ;;  %v4679_v24 = vmul.f32 0.0078125, %v4649_v44 }
 0xb27   : > { %v11013_v43 = vsub.f32 %v10936_v32, %v4679_v24  ;;  %v4710_v10 = vmul.f32 %v11010_v14, %v11010_v14 }
 0xb29   : > { %4726 = vadd.xlane.f32.xlu0 %v4710_v10  ;;  %v4711_v8 = vmul.f32 %v11013_v43, %v11013_v43 }
 0xb2a   : > { %v4651_v20 = vpop.xlane.xlu0 %4650 }
 0xb2b   : > { %v4680_v36 = vmul.f32 0.0078125, %v4651_v20  ;;  %4728 = vadd.xlane.f32.xlu1 %v4711_v8 }
 0xb2c   : > { %v4653_v60 = vpop.xlane.xlu1 %4652 }
 0xb2d   : > { %v11020_v47 = vsub.f32 %v10942_v30, %v4680_v36  ;;  %v4681_v39 = vmul.f32 0.0078125, %v4653_v60 }
 0xb2f   : > { %v11023_v58 = vsub.f32 %v10946_v12, %v4681_v39  ;;  %v4712_v32 = vmul.f32 %v11020_v47, %v11020_v47 }
 0xb31   : > { %4730 = vadd.xlane.f32.xlu0 %v4712_v32  ;;  %v4713_v3 = vmul.f32 %v11023_v58, %v11023_v58 }
 0xb33   : > { %4732 = vadd.xlane.f32.xlu1 %v4713_v3 }
 0xb6e   : > { %v4655_v48 = vpop.xlane.xlu0 %4654 }
 0xb6f   : > { %v4682_v1 = vmul.f32 0.0078125, %v4655_v48 }
 0xb70   : > { %v4657_v31 = vpop.xlane.xlu1 %4656 }
 0xb71   : > { %v11030_v52 = vsub.f32 %v10952_v38, %v4682_v1  ;;  %v4683_v30 = vmul.f32 0.0078125, %v4657_v31  ;;  %v12124_v1 = vld [vmem:[#allocation123_spill] sm:$0xff] }
 0xb72   : > { %v11091_v31 = vrot.slane %v12124_v1, %v12061_v59 }
 0xb73   : > { %v11033_v49 = vsub.f32 %v10956_v37, %v4683_v30  ;;  %v4714_v12 = vmul.f32 %v11030_v52, %v11030_v52 }
 0xb75   : > { %4734 = vadd.xlane.f32.xlu0 %v4714_v12  ;;  %v4715_v28 = vmul.f32 %v11033_v49, %v11033_v49  ;;  %v12125_v12 = vld [vmem:[#allocation124_spill] sm:$0xff] }
 0xb77   : > { %4736 = vadd.xlane.f32.xlu1 %v4715_v28  ;;  %v11095_v28 = vrot.slane %v12125_v12, %v12061_v59 }
 0xb79   : > { %v4659_v0 = vpop.xlane.xlu0 %4658 }
 0xb7a   : > { %v4684_v23 = vmul.f32 0.0078125, %v4659_v0 }
 0xb7b   : > { %v4661_v29 = vpop.xlane.xlu1 %4660 }
 0xb7c   : > { %v11040_v16 = vsub.f32 %v10962_v13, %v4684_v23  ;;  %v4685_v38 = vmul.f32 0.0078125, %v4661_v29 }
 0xb7e   : > { %v11043_v27 = vsub.f32 %v10966_v53, %v4685_v38  ;;  %v4716_v37 = vmul.f32 %v11040_v16, %v11040_v16 }
 0xb80   : > { %4738 = vadd.xlane.f32.xlu0 %v4716_v37  ;;  %v4717_v33 = vmul.f32 %v11043_v27, %v11043_v27 }
 0xb81   : > { %v4663_v5 = vpop.xlane.xlu0 %4662 }
 0xb82   : > { %v4686_v17 = vmul.f32 0.0078125, %v4663_v5  ;;  %4740 = vadd.xlane.f32.xlu1 %v4717_v33 }
 0xb83   : > { %v4665_v61 = vpop.xlane.xlu1 %4664 }
 0xb84   : > { %v11050_v7 = vsub.f32 %v10972_v45, %v4686_v17  ;;  %v4687_v13 = vmul.f32 0.0078125, %v4665_v61 }
 0xb86   : > { %v11053_v11 = vsub.f32 %v10976_v21, %v4687_v13  ;;  %v4718_v53 = vmul.f32 %v11050_v7, %v11050_v7 }
 0xb88   : > { %4742 = vadd.xlane.f32.xlu0 %v4718_v53  ;;  %v4719_v9 = vmul.f32 %v11053_v11, %v11053_v11 }
 0xb89   : > { %v4667_v40 = vpop.xlane.xlu0 %4666 }
 0xb8a   : > { %v4688_v26 = vmul.f32 0.0078125, %v4667_v40  ;;  %4744 = vadd.xlane.f32.xlu1 %v4719_v9 }
 0xb8b   : > { %v4669_v42 = vpop.xlane.xlu1 %4668 }
 0xb8c   : > { %v11060_v18 = vsub.f32 %v10982_v22, %v4688_v26  ;;  %v4689_v45 = vmul.f32 0.0078125, %v4669_v42 }
 0xb8e   : > { %v11063_v19 = vsub.f32 %v10986_v50, %v4689_v45  ;;  %v4720_v21 = vmul.f32 %v11060_v18, %v11060_v18 }
 0xb90   : > { %4746 = vadd.xlane.f32.xlu0 %v4720_v21  ;;  %v4721_v54 = vmul.f32 %v11063_v19, %v11063_v19 }
 0xb91   : > { %v4671_v25 = vpop.xlane.xlu0 %4670 }
 0xb92   : > { %v4690_v63 = vmul.f32 0.0078125, %v4671_v25  ;;  %4748 = vadd.xlane.f32.xlu1 %v4721_v54 }
 0xb93   : > { %v4673_v6 = vpop.xlane.xlu1 %4672 }
 0xb94   : > { %v11070_v41 = vsub.f32 %v10992_v2, %v4690_v63  ;;  %v4691_v22 = vmul.f32 0.0078125, %v4673_v6 }
 0xb96   : > { %v11073_v57 = vsub.f32 %v10996_v62, %v4691_v22  ;;  %v4722_v50 = vmul.f32 %v11070_v41, %v11070_v41 }
 0xb98   : > { %4750 = vadd.xlane.f32.xlu0 %v4722_v50  ;;  %v4723_v15 = vmul.f32 %v11073_v57, %v11073_v57 }
 0xb99   : > { %v4675_v4 = vpop.xlane.xlu0 %4674 }
 0xb9a   : > { %v4692_v46 = vmul.f32 0.0078125, %v4675_v4  ;;  %4752 = vadd.xlane.f32.xlu1 %v4723_v15 }
 0xb9b   : > { %v4677_v56 = vpop.xlane.xlu1 %4676 }
 0xb9c   : > { %v11080_v35 = vsub.f32 %v11002_v51, %v4692_v46  ;;  %v4693_v2 = vmul.f32 0.0078125, %v4677_v56 }
 0xb9e   : > { %v11083_v55 = vsub.f32 %v11006_v34, %v4693_v2  ;;  %v4724_v62 = vmul.f32 %v11080_v35, %v11080_v35 }
 0xba0   : > { %4754 = vadd.xlane.f32.xlu0 %v4724_v62  ;;  %v4725_v44 = vmul.f32 %v11083_v55, %v11083_v55 }
 0xba2   : > { %4756 = vadd.xlane.f32.xlu1 %v4725_v44 }
 0xbb6   : > { %v4727_v24 = vpop.xlane.xlu0 %4726 }
 0xbb7   : > { %v4758_v10 = vmul.f32 0.0078125, %v4727_v24 }
 0xbb8   : > { %v4729_v8 = vpop.xlane.xlu1 %4728 }
 0xbb9   : > { %v4774_v20 = vadd.f32 1e-12, %v4758_v10  ;;  %v4759_v36 = vmul.f32 0.0078125, %v4729_v8 }
 0xbbb   : > { %8206 = vrsqrt.f32 %v4774_v20  ;;  %v4775_v51 = vadd.f32 1e-12, %v4759_v36 }
 0xbbd   : > { %8208 = vrsqrt.f32 %v4775_v51 }
 0xbbe   : > { %v4731_v60 = vpop.xlane.xlu0 %4730 }
 0xbbf   : > { %v4760_v39 = vmul.f32 0.0078125, %v4731_v60 }
 0xbc0   : > { %v4733_v34 = vpop.xlane.xlu1 %4732 }
 0xbc1   : > { %v4776_v32 = vadd.f32 1e-12, %v4760_v39  ;;  %v4761_v3 = vmul.f32 0.0078125, %v4733_v34 }
 0xbc3   : > { %8210 = vrsqrt.f32 %v4776_v32  ;;  %v4777_v48 = vadd.f32 1e-12, %v4761_v3 }
 0xbc5   : > { %v8207_v30 = vpop.eup %8206  ;;  %8212 = vrsqrt.f32 %v4777_v48 }
 0xbc6   : > { %v4806_v0 = vmul.f32 %v8207_v30, %v11010_v14 }
 0xbc7   : > { %v8209_v23 = vpop.eup %8208 }
 0xbc8   : > { %v4828_v29 = vmul.f32 %v11091_v31, %v4806_v0  ;;  %v4807_v38 = vmul.f32 %v8209_v23, %v11013_v43 }
 0xbca   : > { %v4850_v37 = vadd.f32 %v11095_v28, %v4828_v29  ;;  %v4829_v33 = vmul.f32 %v11091_v31, %v4807_v38 }
 0xbcc   : > { %4866 = vst [vmem:[#allocation2] sm:$0xff] %v4850_v37  ;;  %v4851_v5 = vadd.f32 %v11095_v28, %v4829_v33 }
 0xbcd   : > { %v8211_v17 = vpop.eup %8210 }
 0xbce   : > { %4867 = vst [vmem:[#allocation2 + $0x8] sm:$0xff] %v4851_v5  ;;  %v4808_v61 = vmul.f32 %v8211_v17, %v11020_v47 }
 0xbcf   : > { %v8213_v59 = vpop.eup %8212 }
 0xbd0   : > { %v4830_v13 = vmul.f32 %v11091_v31, %v4808_v61  ;;  %v4809_v14 = vmul.f32 %v8213_v59, %v11023_v58 }
 0xbd2   : > { %v4852_v53 = vadd.f32 %v11095_v28, %v4830_v13  ;;  %v4831_v43 = vmul.f32 %v11091_v31, %v4809_v14 }
 0xbd4   : > { %4868 = vst [vmem:[#allocation2 + $0x10] sm:$0xff] %v4852_v53  ;;  %v4853_v9 = vadd.f32 %v11095_v28, %v4831_v43 }
 0xbd6   : > { %4869 = vst [vmem:[#allocation2 + $0x18] sm:$0xff] %v4853_v9 }
 0xc02   : > { %v4735_v40 = vpop.xlane.xlu0 %4734 }
 0xc03   : > { %v4762_v26 = vmul.f32 0.0078125, %v4735_v40 }
 0xc04   : > { %v4737_v42 = vpop.xlane.xlu1 %4736 }
 0xc05   : > { %v4778_v45 = vadd.f32 1e-12, %v4762_v26  ;;  %v4763_v21 = vmul.f32 0.0078125, %v4737_v42 }
 0xc07   : > { %8214 = vrsqrt.f32 %v4778_v45  ;;  %v4779_v47 = vadd.f32 1e-12, %v4763_v21 }
 0xc09   : > { %8216 = vrsqrt.f32 %v4779_v47 }
 0xc0d   : > { %v4739_v54 = vpop.xlane.xlu0 %4738 }
 0xc0e   : > { %v4764_v25 = vmul.f32 0.0078125, %v4739_v54 }
 0xc0f   : > { %v4741_v63 = vpop.xlane.xlu1 %4740 }
 0xc10   : > { %v4780_v58 = vadd.f32 1e-12, %v4764_v25  ;;  %v4765_v6 = vmul.f32 0.0078125, %v4741_v63 }
 0xc11   : > { %v8215_v22 = vpop.eup %8214 }
 0xc12   : > { %v4810_v50 = vmul.f32 %v8215_v22, %v11030_v52  ;;  %8218 = vrsqrt.f32 %v4780_v58  ;;  %v4781_v15 = vadd.f32 1e-12, %v4765_v6 }
 0xc13   : > { %v8217_v4 = vpop.eup %8216 }
 0xc14   : > { %v4832_v46 = vmul.f32 %v11091_v31, %v4810_v50  ;;  %v4811_v56 = vmul.f32 %v8217_v4, %v11033_v49  ;;  %8220 = vrsqrt.f32 %v4781_v15 }
 0xc15   : > { %v4743_v2 = vpop.xlane.xlu0 %4742 }
 0xc16   : > { %v4854_v62 = vadd.f32 %v11095_v28, %v4832_v46  ;;  %v4833_v44 = vmul.f32 %v11091_v31, %v4811_v56  ;;  %v4766_v24 = vmul.f32 0.0078125, %v4743_v2 }
 0xc17   : > { %v4745_v10 = vpop.xlane.xlu1 %4744 }
 0xc18   : > { %4870 = vst [vmem:[#allocation2 + $0x20] sm:$0xff] %v4854_v62  ;;  %v4855_v8 = vadd.f32 %v11095_v28, %v4833_v44  ;;  %v4782_v20 = vadd.f32 1e-12, %v4766_v24  ;;  %v4767_v52 = vmul.f32 0.0078125, %v4745_v10 }
 0xc1a   : > { %4871 = vst [vmem:[#allocation2 + $0x28] sm:$0xff] %v4855_v8  ;;  %8222 = vrsqrt.f32 %v4782_v20  ;;  %v4783_v36 = vadd.f32 1e-12, %v4767_v52 }
 0xc1c   : > { %v8219_v51 = vpop.eup %8218  ;;  %8224 = vrsqrt.f32 %v4783_v36 }
 0xc1d   : > { %v4812_v49 = vmul.f32 %v8219_v51, %v11040_v16  ;;  %v4747_v60 = vpop.xlane.xlu0 %4746 }
 0xc1e   : > { %v8221_v39 = vpop.eup %8220  ;;  %v4768_v34 = vmul.f32 0.0078125, %v4747_v60 }
 0xc1f   : > { %v4834_v32 = vmul.f32 %v11091_v31, %v4812_v49  ;;  %v4813_v3 = vmul.f32 %v8221_v39, %v11043_v27  ;;  %v4749_v48 = vpop.xlane.xlu1 %4748 }
 0xc20   : > { %v4784_v1 = vadd.f32 1e-12, %v4768_v34  ;;  %v4769_v30 = vmul.f32 0.0078125, %v4749_v48 }
 0xc21   : > { %v4856_v12 = vadd.f32 %v11095_v28, %v4834_v32  ;;  %v4835_v0 = vmul.f32 %v11091_v31, %v4813_v3 }
 0xc22   : > { %8226 = vrsqrt.f32 %v4784_v1  ;;  %v4785_v23 = vadd.f32 1e-12, %v4769_v30 }
 0xc23   : > { %4872 = vst [vmem:[#allocation2 + $0x30] sm:$0xff] %v4856_v12  ;;  %v4857_v29 = vadd.f32 %v11095_v28, %v4835_v0 }
 0xc24   : > { %v8223_v16 = vpop.eup %8222  ;;  %8228 = vrsqrt.f32 %v4785_v23 }
 0xc25   : > { %4873 = vst [vmem:[#allocation2 + $0x38] sm:$0xff] %v4857_v29  ;;  %v4814_v38 = vmul.f32 %v8223_v16, %v11050_v7  ;;  %v4751_v37 = vpop.xlane.xlu0 %4750 }
 0xc26   : > { %v8225_v33 = vpop.eup %8224  ;;  %v4770_v27 = vmul.f32 0.0078125, %v4751_v37 }
 0xc27   : > { %v4836_v5 = vmul.f32 %v11091_v31, %v4814_v38  ;;  %v4815_v17 = vmul.f32 %v8225_v33, %v11053_v11  ;;  %v4753_v61 = vpop.xlane.xlu1 %4752 }
 0xc28   : > { %v4786_v59 = vadd.f32 1e-12, %v4770_v27  ;;  %v4771_v13 = vmul.f32 0.0078125, %v4753_v61 }
 0xc29   : > { %v4858_v14 = vadd.f32 %v11095_v28, %v4836_v5  ;;  %v4837_v53 = vmul.f32 %v11091_v31, %v4815_v17 }
 0xc2a   : > { %8230 = vrsqrt.f32 %v4786_v59  ;;  %v4787_v43 = vadd.f32 1e-12, %v4771_v13 }
 0xc2b   : > { %4874 = vst [vmem:[#allocation2 + $0x40] sm:$0xff] %v4858_v14  ;;  %v4859_v9 = vadd.f32 %v11095_v28, %v4837_v53 }
 0xc2c   : > { %v8227_v7 = vpop.eup %8226  ;;  %8232 = vrsqrt.f32 %v4787_v43 }
 0xc2d   : > { %4875 = vst [vmem:[#allocation2 + $0x48] sm:$0xff] %v4859_v9  ;;  %v4816_v40 = vmul.f32 %v8227_v7, %v11060_v18  ;;  %v4755_v26 = vpop.xlane.xlu0 %4754 }
 0xc2e   : > { %v8229_v42 = vpop.eup %8228  ;;  %v4772_v11 = vmul.f32 0.0078125, %v4755_v26 }
 0xc2f   : > { %v4838_v45 = vmul.f32 %v11091_v31, %v4816_v40  ;;  %v4817_v21 = vmul.f32 %v8229_v42, %v11063_v19  ;;  %v4757_v47 = vpop.xlane.xlu1 %4756 }
 0xc30   : > { %v4788_v54 = vadd.f32 1e-12, %v4772_v11  ;;  %v4773_v25 = vmul.f32 0.0078125, %v4757_v47 }
 0xc31   : > { %v4860_v63 = vadd.f32 %v11095_v28, %v4838_v45  ;;  %v4839_v58 = vmul.f32 %v11091_v31, %v4817_v21 }
 0xc32   : > { %8234 = vrsqrt.f32 %v4788_v54  ;;  %v4789_v6 = vadd.f32 1e-12, %v4773_v25 }
 0xc33   : > { %4876 = vst [vmem:[#allocation2 + $0x50] sm:$0xff] %v4860_v63  ;;  %v4861_v22 = vadd.f32 %v11095_v28, %v4839_v58 }
 0xc34   : > { %v8231_v18 = vpop.eup %8230  ;;  %8236 = vrsqrt.f32 %v4789_v6 }
 0xc35   : > { %4877 = vst [vmem:[#allocation2 + $0x58] sm:$0xff] %v4861_v22  ;;  %v4818_v50 = vmul.f32 %v8231_v18, %v11070_v41 }
 0xc36   : > { %v8233_v15 = vpop.eup %8232 }
 0xc37   : > { %v4840_v19 = vmul.f32 %v11091_v31, %v4818_v50  ;;  %v4819_v4 = vmul.f32 %v8233_v15, %v11073_v57 }
 0xc39   : > { %v4862_v46 = vadd.f32 %v11095_v28, %v4840_v19  ;;  %v4841_v56 = vmul.f32 %v11091_v31, %v4819_v4 }
 0xc3b   : > { %4878 = vst [vmem:[#allocation2 + $0x60] sm:$0xff] %v4862_v46  ;;  %v4863_v2 = vadd.f32 %v11095_v28, %v4841_v56 }
 0xc3c   : > { %v8235_v62 = vpop.eup %8234 }
 0xc3d   : > { %4879 = vst [vmem:[#allocation2 + $0x68] sm:$0xff] %v4863_v2  ;;  %v4820_v44 = vmul.f32 %v8235_v62, %v11080_v35 }
 0xc3e   : > { %v8237_v24 = vpop.eup %8236 }
 0xc3f   : > { %v4842_v10 = vmul.f32 %v11091_v31, %v4820_v44  ;;  %v4821_v41 = vmul.f32 %v8237_v24, %v11083_v55 }
 0xc41   : > { %v4864_v8 = vadd.f32 %v11095_v28, %v4842_v10  ;;  %v4843_v57 = vmul.f32 %v11091_v31, %v4821_v41 }
 0xc43   : > { %4880 = vst [vmem:[#allocation2 + $0x70] sm:$0xff] %v4864_v8  ;;  %v4865_v20 = vadd.f32 %v11095_v28, %v4843_v57 }
 0xc45   : > { %4881 = vst [vmem:[#allocation2 + $0x78] sm:$0xff] %v4865_v20 }
 0xc46 PF: > { %s12126_s6 = sld [smem:[#allocation8_spill]] }
 0xc4c   : > { %p6738_p2 = scmp.ne.s32.totalorder %s12126_s6, 1 }
 0xc4d   : > { %v12127_v52 = vld [vmem:[#allocation23_spill] sm:$0xff] (!%p6738_p2)  ;;  %v12128_v36 = vld [vmem:[#allocation21_spill] sm:$0xff] (!%p6738_p2)  ;;  %v8395_v1 = vmov (!%p6738_p2), 0   ;;  %v12143_v44 = vld [vmem:[#allocation24_spill] sm:$0xff] (!%p6738_p2)  ;;  %s8396_s3 = smov (!%p6738_p2), 96   ;;  %vm8398_vm3 = vmmov (!%p6738_p2), 0  }
 0xc4e   : > { %4885 = sbr.rel (%p6738_p2) target bundleno = 6431 (0x191f), region = 112  ;;  %v6740_v35 = vcombine.high (!%p6738_p2), %v12128_v36, %v12127_v52  ;;  %v6739_v51 = vcombine.low (!%p6738_p2), %v12128_v36, %v12127_v52  ;;  %v12129_v49 = vld [vmem:[#allocation27_spill] sm:$0xff] (!%p6738_p2)  ;;  %v12130_v55 = vld [vmem:[#allocation25_spill] sm:$0xff] (!%p6738_p2)  ;;  %5086 = vmatprep.mubr.bf16.mxu0 (!%p6738_p2), %v8395_v1  ;;  %v12144_v24 = vld [vmem:[#allocation22_spill] sm:$0xff] (!%p6738_p2)  ;;  %vm5298_vm4 = vcmask (!%p6738_p2), 261120   ;;  %s8399_s16 = smov (!%p6738_p2), 64  }
 0xc4f   : > { %v6743_v60 = vcombine.high (!%p6738_p2), %v12130_v55, %v12129_v49  ;;  %v4886_v39 = vld [vmem:[#allocation2] sm:$0xff] (!%p6738_p2)  ;;  %v4887_v34 = vld [vmem:[#allocation2 + $0x8] sm:$0xff] (!%p6738_p2)  ;;  %v6742_v31 = vcombine.low (!%p6738_p2), %v12130_v55, %v12129_v49  ;;  %v4888_v26 = vld [vmem:[#allocation2 + $0x10] sm:$0xff] (!%p6738_p2)  ;;  %v6741_v10 = vcombine.low (!%p6738_p2), %v12144_v24, %v12143_v44  ;;  %s8400_s1 = smov (!%p6738_p2), 32   ;;  %vm5342_vm5 = vcmask (!%p6738_p2), 1040384   ;;  %s12230_s20 = sld [smem:[#allocation173_spill]] (!%p6738_p2) }
 0xc50   : > { %5054 = vmatprep.subr.bf16.mxu0 (!%p6738_p2), %v6740_v35  ;;  %v12131_v28 = vld [vmem:[#allocation31_spill] sm:$0xff] (!%p6738_p2)  ;;  %v12132_v32 = vld [vmem:[#allocation29_spill] sm:$0xff] (!%p6738_p2)  ;;  %v4902_v48 = vpack.c.bf16 (!%p6738_p2), %v4887_v34, %v4886_v39  ;;  %v12145_v41 = vld [vmem:[#allocation28_spill] sm:$0xff] (!%p6738_p2)  ;;  %vm5780_vm6 = vcmask (!%p6738_p2), 523264   ;;  %vm5782_vm7 = vcmask (!%p6738_p2), 785408   ;;  %s12234_s19 = sld [smem:[#allocation174_spill]] (!%p6738_p2) }
 0xc51   : > { %5055 = vmatpush1.bf16.msra.mxu0 (!%p6738_p2), %v6739_v51  ;;  %v6746_v3 = vcombine.high (!%p6738_p2), %v12132_v32, %v12131_v28  ;;  %v6745_v30 = vcombine.low (!%p6738_p2), %v12132_v32, %v12131_v28  ;;  %v12133_v12 = vld [vmem:[#allocation35_spill] sm:$0xff] (!%p6738_p2)  ;;  %v12134_v0 = vld [vmem:[#allocation33_spill] sm:$0xff] (!%p6738_p2)  ;;  %7415 = vmatprep.subr.bf16.mxu1 (!%p6738_p2), %v6741_v10  ;;  %v12146_v8 = vld [vmem:[#allocation26_spill] sm:$0xff] (!%p6738_p2)  ;;  %v4911_v32 = vlaneseq (!%p6738_p2) }
 0xc52   : > { %5056 = vmatprep.subr.bf16.mxu0 (!%p6738_p2), %v6743_v60  ;;  %7431 = vmatprep.mubr.bf16.mxu1 (!%p6738_p2), %v4902_v48  ;;  %v6749_v23 = vcombine.high (!%p6738_p2), %v12134_v0, %v12133_v12  ;;  %v6748_v29 = vcombine.low (!%p6738_p2), %v12134_v0, %v12133_v12  ;;  %v12135_v16 = vld [vmem:[#allocation39_spill] sm:$0xff] (!%p6738_p2)  ;;  %v12136_v38 = vld [vmem:[#allocation37_spill] sm:$0xff] (!%p6738_p2)  ;;  %v6744_v57 = vcombine.low (!%p6738_p2), %v12146_v8, %v12145_v41  ;;  %v12147_v20 = vld [vmem:[#allocation32_spill] sm:$0xff] (!%p6738_p2) }
 0xc53   : > { %v6752_v37 = vcombine.high (!%p6738_p2), %v12136_v38, %v12135_v16  ;;  %v6751_v33 = vcombine.low (!%p6738_p2), %v12136_v38, %v12135_v16  ;;  %v12137_v27 = vld [vmem:[#allocation43_spill] sm:$0xff] (!%p6738_p2)  ;;  %v12138_v5 = vld [vmem:[#allocation41_spill] sm:$0xff] (!%p6738_p2)  ;;  %7416 = vmatpush3.bf16.msra.mxu1 (!%p6738_p2), %v6741_v10  ;;  %v12148_v52 = vld [vmem:[#allocation30_spill] sm:$0xff] (!%p6738_p2)  ;;  %v11200_v12 = vshrl.u32 (!%p6738_p2), %v4911_v32, 7 }
 0xc54   : > { %v6755_v17 = vcombine.high (!%p6738_p2), %v12138_v5, %v12137_v27  ;;  %v6754_v61 = vcombine.low (!%p6738_p2), %v12138_v5, %v12137_v27  ;;  %v12139_v59 = vld [vmem:[#allocation47_spill] sm:$0xff] (!%p6738_p2)  ;;  %v12140_v13 = vld [vmem:[#allocation45_spill] sm:$0xff] (!%p6738_p2)  ;;  %v6747_v36 = vcombine.low (!%p6738_p2), %v12148_v52, %v12147_v20  ;;  %7417 = vmatprep.subr.bf16.mxu1 (!%p6738_p2), %v6744_v57  ;;  %v12149_v35 = vld [vmem:[#allocation36_spill] sm:$0xff] (!%p6738_p2) }
 0xc55   : > { %5057 = vmatpush1.bf16.msra.mxu0 %v6742_v31  ;;  %v6758_v14 = vcombine.high %v12140_v13, %v12139_v59  ;;  %v6757_v53 = vcombine.low %v12140_v13, %v12139_v59  ;;  %v12141_v43 = vld [vmem:[#allocation51_spill] sm:$0xff]  ;;  %v12142_v9 = vld [vmem:[#allocation49_spill] sm:$0xff]  ;;  %v12150_v51 = vld [vmem:[#allocation34_spill] sm:$0xff]  ;;  %v4913_v16 = vsub.s32 0, %v11200_v12 }
 0xc56   : > { %5058 = vmatprep.subr.bf16.mxu0 %v6746_v3  ;;  %v6761_v7 = vcombine.high %v12142_v9, %v12141_v43  ;;  %v6760_v40 = vcombine.low %v12142_v9, %v12141_v43  ;;  %v4889_v42 = vld [vmem:[#allocation2 + $0x18] sm:$0xff]  ;;  %v4890_v45 = vld [vmem:[#allocation2 + $0x20] sm:$0xff]  ;;  %v4891_v21 = vld [vmem:[#allocation2 + $0x28] sm:$0xff]  ;;  %v6750_v49 = vcombine.low %v12150_v51, %v12149_v35 }
 0xc57   : > { %v4903_v11 = vpack.c.bf16 %v4889_v42, %v4888_v26  ;;  %v4904_v47 = vpack.c.bf16 %v4891_v21, %v4890_v45  ;;  %v4892_v54 = vld [vmem:[#allocation2 + $0x30] sm:$0xff]  ;;  %v4893_v25 = vld [vmem:[#allocation2 + $0x38] sm:$0xff]  ;;  %v4894_v58 = vld [vmem:[#allocation2 + $0x40] sm:$0xff]  ;;  %7418 = vmatpush3.bf16.msra.mxu1 %v6744_v57 }
 0xc58   : > { %v4905_v63 = vpack.c.bf16 %v4893_v25, %v4892_v54  ;;  %v4895_v6 = vld [vmem:[#allocation2 + $0x48] sm:$0xff]  ;;  %v4896_v18 = vld [vmem:[#allocation2 + $0x50] sm:$0xff]  ;;  %v4897_v50 = vld [vmem:[#allocation2 + $0x58] sm:$0xff]  ;;  %7419 = vmatprep.subr.bf16.mxu1 %v6747_v36 }
 0xc59   : > { %5059 = vmatpush1.bf16.msra.mxu0 %v6745_v30  ;;  %v4906_v22 = vpack.c.bf16 %v4895_v6, %v4894_v58  ;;  %v4907_v15 = vpack.c.bf16 %v4897_v50, %v4896_v18  ;;  %v4898_v19 = vld [vmem:[#allocation2 + $0x60] sm:$0xff]  ;;  %v4899_v4 = vld [vmem:[#allocation2 + $0x68] sm:$0xff]  ;;  %v4900_v56 = vld [vmem:[#allocation2 + $0x70] sm:$0xff] }
 0xc5a   : > { %5060 = vmatprep.subr.bf16.mxu0 %v6749_v23  ;;  %v4908_v46 = vpack.c.bf16 %v4899_v4, %v4898_v19  ;;  %v4901_v2 = vld [vmem:[#allocation2 + $0x78] sm:$0xff]  ;;  %v12151_v55 = vld [vmem:[#allocation40_spill] sm:$0xff]  ;;  %v12159_v38 = vld [vmem:[#allocation53_spill] sm:$0xff]  ;;  %v8397_v4 = vmov 0.0  }
 0xc5b   : > { %v4909_v62 = vpack.c.bf16 %v4901_v2, %v4900_v56  ;;  %7420 = vmatpush3.bf16.msra.mxu1 %v6747_v36  ;;  %v12152_v60 = vld [vmem:[#allocation38_spill] sm:$0xff]  ;;  %v12153_v34 = vld [vmem:[#allocation44_spill] sm:$0xff] }
 0xc5c   : > { %7421 = vmatprep.subr.bf16.mxu1 %v6750_v49  ;;  %v6753_v39 = vcombine.low %v12152_v60, %v12151_v55  ;;  %v12154_v31 = vld [vmem:[#allocation42_spill] sm:$0xff]  ;;  %v12155_v3 = vld [vmem:[#allocation48_spill] sm:$0xff] }
 0xc5d   : > { %5061 = vmatpush1.bf16.msra.mxu0 %v6748_v29  ;;  %v6756_v28 = vcombine.low %v12154_v31, %v12153_v34  ;;  %v12157_v0 = vld [vmem:[#allocation52_spill] sm:$0xff]  ;;  %v12158_v23 = vld [vmem:[#allocation50_spill] sm:$0xff] }
 0xc5e   : > { %5062 = vmatprep.subr.bf16.mxu0 %v6752_v37  ;;  %v6762_v29 = vcombine.low %v12158_v23, %v12157_v0  ;;  %v4914_v37 = vrot.slane %v12159_v38, %v4913_v16 }
 0xc5f   : > { %7422 = vmatpush3.bf16.msra.mxu1 %v6750_v49 }
 0xc60   : > { %7423 = vmatprep.subr.bf16.mxu1 %v6753_v39 }
 0xc61   : > { %5063 = vmatpush1.bf16.msra.mxu0 %v6751_v33 }
 0xc62   : > { %5064 = vmatprep.subr.bf16.mxu0 %v6755_v17 }
 0xc63   : > { %7424 = vmatpush3.bf16.msra.mxu1 %v6753_v39 }
 0xc64   : > { %7425 = vmatprep.subr.bf16.mxu1 %v6756_v28 }
 0xc65   : > { %5065 = vmatpush1.bf16.msra.mxu0 %v6754_v61 }
 0xc66   : > { %5066 = vmatprep.subr.bf16.mxu0 %v6758_v14 }
 0xc67   : > { %7426 = vmatpush3.bf16.msra.mxu1 %v6756_v28 }
 0xc69   : > { %5067 = vmatpush1.bf16.msra.mxu0 %v6757_v53 }
 0xc6a   : > { %5068 = vmatprep.subr.bf16.mxu0 %v6761_v7 }
 0xc6d   : > { %5069 = vmatpush1.bf16.msra.mxu0 %v6760_v40 }
 0xc6e   : > { %7455 = vmatprep.subr.bf16.mxu0 %v8397_v4 }
 0xc70   : > { %5087 = vmatmul.mubr.bf16.vlgmr.msra.gmra.mrb[0].mxu0 %v4902_v48  ;;  %v12156_v48 = vld [vmem:[#allocation46_spill] sm:$0xff] }
 0xc71   : > { %5095 = vmatprep.mubr.bf16.mxu0 %v8395_v1  ;;  %v6759_v30 = vcombine.low %v12156_v48, %v12155_v3 }
 0xc73   : > { %7427 = vmatprep.subr.bf16.mxu1 %v6759_v30 }
 0xc74   : > { %7428 = vmatpush3.bf16.msra.mxu1 %v6759_v30 }
 0xc75   : > { %7429 = vmatprep.subr.bf16.mxu1 %v6762_v29 }
 0xc78   : > { %5096 = vmatmul.mubr.bf16.gmra.mrb[4].mxu0 %v4903_v11  ;;  %7430 = vmatpush3.bf16.msra.mxu1 %v6762_v29 }
 0xc79   : > { %5103 = vmatprep.mubr.bf16.mxu0 %v8395_v1  ;;  %7447 = vmatprep.subr.bf16.mxu1 %v8397_v4 }
 0xc7b   : > { %7432 = vmatmul.mubr.bf16.vlgmr.msra.gmra.mrb[0].mxu1 %v4903_v11  ;;  %v4917_v11 = vsub.s32 1, %v11200_v12 }
 0xc7c   : > { %7435 = vmatprep.mubr.bf16.mxu1 %v4904_v47 }
 0xc7d   : > { %v4918_v54 = vrot.slane %v12159_v38, %v4917_v11 }
 0xc80   : > { %5104 = vmatmul.mubr.bf16.gmra.mrb[8].mxu0 %v4904_v47 }
 0xc81   : > { %5111 = vmatprep.mubr.bf16.mxu0 %v8395_v1 }
 0xc83   : > { %7436 = vmatmul.mubr.bf16.gmra.mrb[4].mxu1 %v4905_v63 }
 0xc84   : > { %7439 = vmatprep.mubr.bf16.mxu1 %v4906_v22 }
 0xc88   : > { %5112 = vmatmul.mubr.bf16.gmra.mrb[12].mxu0 %v4905_v63 }
 0xc89   : > { %5119 = vmatprep.mubr.bf16.mxu0 %v8395_v1 }
 0xc8b   : > { %7440 = vmatmul.mubr.bf16.gmra.mrb[8].mxu1 %v4907_v15 }
 0xc8c   : > { %7443 = vmatprep.mubr.bf16.mxu1 %v4908_v46 }
 0xc90   : > { %5120 = vmatmul.mubr.bf16.gmra.mrb[16].mxu0 %v4906_v22 }
 0xc91   : > { %5127 = vmatprep.mubr.bf16.mxu0 %v8395_v1 }
 0xc93   : > { %7444 = vmatmul.mubr.bf16.gmra.mrb[12].mxu1 %v4909_v62 }
 0xc94   : > { %7451 = vmatprep.mubr.msk.bf16.mxu1 %vm8398_vm3, %v8397_v4 }
 0xc98   : > { %5128 = vmatmul.mubr.bf16.gmra.mrb[20].mxu0 %v4907_v15 }
 0xc99   : > { %5135 = vmatprep.mubr.bf16.mxu0 %v8395_v1 }
 0xca0   : > { %5136 = vmatmul.mubr.bf16.gmra.mrb[24].mxu0 %v4908_v46 }
 0xca1   : > { %5143 = vmatprep.mubr.bf16.mxu0 %v8395_v1 }
 0xca8   : > { %5144 = vmatmul.mubr.bf16.gmra.mrb[28].mxu0 %v4909_v62 }
 0xca9   : > { %7471 = vmatprep.mubr.msk.bf16.mxu0 %vm8398_vm3, %v8397_v4 }
 0xd43   : > { %v5088_v33 = vpop.f32.mrb[0].mxu0 }
 0xd44   : > { %v5089_v27 = vadd.f32 %v5088_v33, %v4914_v37  ;;  %v5090_v5 = vpop.f32.mrb[1].mxu0 }
 0xd45   : > { %v5092_v17 = vpop.f32.mrb[2].mxu0  ;;  %v5091_v63 = vadd.f32 %v5090_v5, %v4918_v54 }
 0xd46   : > { %v11208_v61 = vpack.c.bf16 %v5089_v27, %v5089_v27  ;;  %v5093_v59 = vpop.f32.mrb[3].mxu0 }
 0xd47   : > { %v5094_v18 = vadd.f32 %v5093_v59, %v4918_v54 }
 0xd48   : > { %5396 = vrot.lane.b32.xlu0 %v11208_v61, %s8396_s3 }
 0xd4b   : > { %v5097_v13 = vpop.f32.mrb[4].mxu0 }
 0xd4c   : > { %v5098_v14 = vpop.f32.mrb[5].mxu0 }
 0xd4d   : > { %v5100_v53 = vpop.f32.mrb[6].mxu0  ;;  %v5099_v50 = vadd.f32 %v5098_v14, %v4918_v54  ;;  %v4921_v14 = vsub.s32 2, %v11200_v12 }
 0xd4e   : > { %v5101_v43 = vpop.f32.mrb[7].mxu0 }
 0xd4f   : > { %v5102_v2 = vadd.f32 %v5101_v43, %v4918_v54  ;;  %v4922_v53 = vrot.slane %v12159_v38, %v4921_v14  ;;  %v7433_v43 = vpop.f32.mrb[0].mxu1 }
 0xd53   : > { %v5105_v9 = vpop.f32.mrb[8].mxu0 }
 0xd54   : > { %v5106_v7 = vpop.f32.mrb[9].mxu0  ;;  %v5195_v9 = vadd.f32 %v7433_v43, %v4922_v53 }
 0xd55   : > { %v5108_v40 = vpop.f32.mrb[10].mxu0  ;;  %v5107_v62 = vadd.f32 %v5106_v7, %v4918_v54  ;;  %v5186_v7 = vpop.f32.mrb[1].mxu1 }
 0xd56   : > { %v5109_v26 = vpop.f32.mrb[11].mxu0  ;;  %v5187_v40 = vadd.f32 %v5186_v7, %v4922_v53 }
 0xd57   : > { %v5110_v8 = vadd.f32 %v5109_v26, %v4918_v54  ;;  %v7434_v26 = vpop.f32.mrb[2].mxu1 }
 0xd5b   : > { %v5113_v42 = vpop.f32.mrb[12].mxu0 }
 0xd5c   : > { %v5114_v45 = vpop.f32.mrb[13].mxu0  ;;  %v5198_v42 = vadd.f32 %v7434_v26, %v4922_v53 }
 0xd5d   : > { %v5116_v21 = vpop.f32.mrb[14].mxu0  ;;  %v5115_v57 = vadd.f32 %v5114_v45, %v4918_v54  ;;  %v5189_v45 = vpop.f32.mrb[3].mxu1 }
 0xd5e   : > { %v5117_v47 = vpop.f32.mrb[15].mxu0  ;;  %v5190_v21 = vadd.f32 %v5189_v45, %v4922_v53 }
 0xd5f   : > { %v5118_v51 = vadd.f32 %v5117_v47, %v4918_v54  ;;  %v11235_v47 = vpack.c.bf16 %v5198_v42, %v5195_v9 }
 0xd63   : > { %v5121_v25 = vpop.f32.mrb[16].mxu0 }
 0xd64   : > { %v5122_v58 = vpop.f32.mrb[17].mxu0  ;;  %v7437_v25 = vpop.f32.mrb[4].mxu1 }
 0xd65   : > { %v5124_v6 = vpop.f32.mrb[18].mxu0  ;;  %v5123_v49 = vadd.f32 %v5122_v58, %v4918_v54  ;;  %v5202_v38 = vpop.f32.mrb[5].mxu1 }
 0xd66   : > { %5249 = vxpose.xlu0.b32.start [1/16] %v5091_v63, 128  ;;  %v5125_v22 = vpop.f32.mrb[19].mxu0  ;;  %v5211_v63 = vadd.f32 %v7437_v25, %v4922_v53  ;;  %v5203_v58 = vadd.f32 %v5202_v38, %v4922_v53  ;;  %v7438_v6 = vpop.f32.mrb[6].mxu1 }
 0xd67   : > { %v5126_v55 = vadd.f32 %v5125_v22, %v4918_v54  ;;  %v5214_v22 = vadd.f32 %v7438_v6, %v4922_v53 }
 0xd6a   : > { %5250 = vxpose.xlu0.b32.cont [2/16] %v5094_v18, 128  ;;  %v5205_v18 = vpop.f32.mrb[7].mxu1 }
 0xd6b   : > { %v5129_v15 = vpop.f32.mrb[20].mxu0 }
 0xd6c   : > { %v5130_v19 = vpop.f32.mrb[21].mxu0  ;;  %v11248_v15 = vpack.c.bf16 %v5214_v22, %v5211_v63 }
 0xd6d   : > { %v5132_v46 = vpop.f32.mrb[22].mxu0  ;;  %v5131_v60 = vadd.f32 %v5130_v19, %v4918_v54 }
 0xd6e   : > { %5251 = vxpose.xlu0.b32.cont [3/16] %v5099_v50, 128  ;;  %v5133_v56 = vpop.f32.mrb[23].mxu0  ;;  %v5206_v50 = vadd.f32 %v5205_v18, %v4922_v53  ;;  %v7441_v46 = vpop.f32.mrb[8].mxu1 }
 0xd6f   : > { %v5134_v39 = vadd.f32 %v5133_v56, %v4918_v54  ;;  %v5227_v56 = vadd.f32 %v7441_v46, %v4922_v53 }
 0xd70   : > { %v11251_v19 = vpack.c.bf16 %v5206_v50, %v5203_v58 }
 0xd72   : > { %5252 = vxpose.xlu0.b32.cont [4/16] %v5102_v2, 128  ;;  %v5218_v2 = vpop.f32.mrb[9].mxu1 }
 0xd73   : > { %v5137_v44 = vpop.f32.mrb[24].mxu0 }
 0xd74   : > { %v5138_v24 = vpop.f32.mrb[25].mxu0  ;;  %v7442_v44 = vpop.f32.mrb[10].mxu1 }
 0xd75   : > { %v5140_v10 = vpop.f32.mrb[26].mxu0  ;;  %v5139_v34 = vadd.f32 %v5138_v24, %v4918_v54  ;;  %v5230_v24 = vadd.f32 %v7442_v44, %v4922_v53 }
 0xd76   : > { %5253 = vxpose.xlu0.b32.cont [5/16] %v5107_v62, 128  ;;  %v5141_v41 = vpop.f32.mrb[27].mxu0  ;;  %v5219_v62 = vadd.f32 %v5218_v2, %v4922_v53  ;;  %v5221_v10 = vpop.f32.mrb[11].mxu1 }
 0xd77   : > { %v5142_v31 = vadd.f32 %v5141_v41, %v4918_v54  ;;  %v5222_v41 = vadd.f32 %v5221_v10, %v4922_v53 }
 0xd7a   : > { %5254 = vxpose.xlu0.b32.cont [6/16] %v5110_v8, 128  ;;  %v11262_v8 = vpack.c.bf16 %v5230_v24, %v5227_v56 }
 0xd7b   : > { %v5145_v20 = vpop.f32.mrb[28].mxu0 }
 0xd7c   : > { %v5146_v52 = vpop.f32.mrb[29].mxu0  ;;  %v7445_v20 = vpop.f32.mrb[12].mxu1 }
 0xd7d   : > { %v5148_v36 = vpop.f32.mrb[30].mxu0  ;;  %v5147_v28 = vadd.f32 %v5146_v52, %v4918_v54  ;;  %v5243_v52 = vadd.f32 %v7445_v20, %v4922_v53 }
 0xd7e   : > { %5255 = vxpose.xlu0.b32.cont [7/16] %v5115_v57, 128  ;;  %v5149_v35 = vpop.f32.mrb[31].mxu0  ;;  %v11265_v57 = vpack.c.bf16 %v5222_v41, %v5219_v62  ;;  %v5234_v36 = vpop.f32.mrb[13].mxu1 }
 0xd7f   : > { %v5150_v32 = vadd.f32 %v5149_v35, %v4918_v54  ;;  %v11237_v54 = vpack.c.bf16 %v5190_v21, %v5187_v40  ;;  %v5235_v35 = vadd.f32 %v5234_v36, %v4922_v53 }
 0xd81   : > { %5460 = vrot.lane.b32.xlu1 %v11237_v54, %s8396_s3  ;;  %7456 = vmatpush3.bf16.msra.mxu0 %v11237_v54 }
 0xd82   : > { %5256 = vxpose.xlu0.b32.cont [8/16] %v5118_v51, 128  ;;  %7457 = vmatprep.subr.bf16.mxu0 %v8397_v4  ;;  %v7446_v51 = vpop.f32.mrb[14].mxu1 }
 0xd85   : > { %5462 = vrot.lane.b32.xlu1 %v11235_v47, %s8396_s3  ;;  %7458 = vmatpush3.bf16.msra.mxu0 %v11235_v47 }
 0xd86   : > { %5257 = vxpose.xlu0.b32.cont [9/16] %v5123_v49, 128  ;;  %7459 = vmatprep.subr.bf16.mxu0 %v8397_v4  ;;  %v5246_v49 = vadd.f32 %v7446_v51, %v4922_v53 }
 0xd89   : > { %5464 = vrot.lane.b32.xlu1 %v11251_v19, %s8396_s3  ;;  %7460 = vmatpush3.bf16.msra.mxu0 %v11251_v19 }
 0xd8a   : > { %5258 = vxpose.xlu0.b32.cont [10/16] %v5126_v55, 128  ;;  %7461 = vmatprep.subr.bf16.mxu0 %v8397_v4  ;;  %v5237_v55 = vpop.f32.mrb[15].mxu1 }
 0xd8d   : > { %5466 = vrot.lane.b32.xlu1 %v11248_v15, %s8396_s3  ;;  %7462 = vmatpush3.bf16.msra.mxu0 %v11248_v15 }
 0xd8e   : > { %5259 = vxpose.xlu0.b32.cont [11/16] %v5131_v60, 128  ;;  %7463 = vmatprep.subr.bf16.mxu0 %v8397_v4  ;;  %v5238_v60 = vadd.f32 %v5237_v55, %v4922_v53 }
 0xd91   : > { %5468 = vrot.lane.b32.xlu1 %v11265_v57, %s8396_s3  ;;  %7464 = vmatpush3.bf16.msra.mxu0 %v11265_v57 }
 0xd92   : > { %5260 = vxpose.xlu0.b32.cont [12/16] %v5134_v39, 128  ;;  %7465 = vmatprep.subr.bf16.mxu0 %v8397_v4  ;;  %v11276_v39 = vpack.c.bf16 %v5246_v49, %v5243_v52 }
 0xd95   : > { %5470 = vrot.lane.b32.xlu1 %v11262_v8, %s8396_s3  ;;  %7466 = vmatpush3.bf16.msra.mxu0 %v11262_v8 }
 0xd96   : > { %5261 = vxpose.xlu0.b32.cont [13/16] %v5139_v34, 128  ;;  %7467 = vmatprep.subr.bf16.mxu0 %v8397_v4  ;;  %v5295_v34 = vpack.c.bf16 %v5238_v60, %v5235_v35 }
 0xd99   : > { %5472 = vrot.lane.b32.xlu1 %v5295_v34, %s8396_s3  ;;  %7468 = vmatpush3.bf16.msra.mxu0 %v5295_v34 }
 0xd9a   : > { %5262 = vxpose.xlu0.b32.cont [14/16] %v5142_v31, 128  ;;  %7469 = vmatprep.subr.bf16.mxu0 %v8397_v4 }
 0xd9d   : > { %7470 = vmatpush3.bf16.msra.mxu0 %v11276_v39 }
 0xd9e   : > { %5263 = vxpose.xlu0.b32.cont [15/16] %v5147_v28, 128  ;;  %7511 = vmatprep.subr.bf16.mxu0 %v8397_v4 }
 0xda2   : > { %5264 = vxpose.xlu0.b32.end [16/16] %v5150_v32, 128 }
 0xdba   : > { %v5397_v3 = vpop.permute.xlu0 %5396 }
 0xdcb   : > { %5581 = vrot.lane.b32.xlu0 %v11237_v54, %s8399_s16 }
 0xdcf   : > { %5708 = vrot.lane.b32.xlu0 %v11248_v15, %s8400_s1 }
 0xdd3   : > { %5710 = vrot.lane.b32.xlu0 %v11265_v57, %s8400_s1 }
 0xdd7   : > { %5712 = vrot.lane.b32.xlu0 %v11262_v8, %s8400_s1 }
 0xddb   : > { %5714 = vrot.lane.b32.xlu0 %v5295_v34, %s8400_s1 }
 0xddf   : > { %5716 = vrot.lane.b32.xlu0 %v11276_v39, %s8400_s1 }
 0xde6   : > { %v5265_v48 = vpop.trf.xlu0 }
 0xdea   : > { %v5266_v30 = vpop.trf.xlu0 }
 0xdeb   : > { %v5281_v0 = vpack.c.bf16 %v5266_v30, %v5265_v48 }
 0xded   : > { %7448 = vmatpush3.bf16.msra.mxu1 %v5281_v0 }
 0xdee   : > { %v5267_v23 = vpop.trf.xlu0  ;;  %7449 = vmatprep.subr.bf16.mxu1 %v8397_v4 }
 0xdf2   : > { %v5268_v29 = vpop.trf.xlu0 }
 0xdf3   : > { %v5282_v37 = vpack.c.bf16 %v5268_v29, %v5267_v23  ;;  %v5461_v31 = vpop.permute.xlu1 %5460 }
 0xdf5   : > { %7450 = vmatpush3.bf16.msra.mxu1 %v5282_v37 }
 0xdf6   : > { %v5269_v33 = vpop.trf.xlu0  ;;  %7475 = vmatprep.subr.bf16.mxu1 %v8397_v4 }
 0xdf7   : > { %v5463_v28 = vpop.permute.xlu1 %5462 }
 0xdf8   : > { %7452 = vmatmul.mubr.msk.bf16.vlgmr.msra.gmra.mrb[16].mxu1 %vm5298_vm4, %v11208_v61 }
 0xdf9   : > { %7479 = vmatprep.mubr.msk.bf16.mxu1 %vm8398_vm3, %v8397_v4 }
 0xdfa   : > { %v5270_v27 = vpop.trf.xlu0 }
 0xdfb   : > { %v5283_v5 = vpack.c.bf16 %v5270_v27, %v5269_v33  ;;  %v5465_v32 = vpop.permute.xlu1 %5464 }
 0xdfd   : > { %7476 = vmatpush3.bf16.msra.mxu1 %v5283_v5  ;;  %v12160_v5 = vld [vmem:[#allocation20_spill] sm:$0xff] }
 0xdfe   : > { %v5271_v17 = vpop.trf.xlu0  ;;  %7477 = vmatprep.subr.bf16.mxu1 %v8397_v4 }
 0xe02   : > { %v5272_v59 = vpop.trf.xlu0 }
 0xe03   : > { %v5284_v13 = vpack.c.bf16 %v5272_v59, %v5271_v17 }
 0xe05   : > { %7478 = vmatpush3.bf16.msra.mxu1 %v5284_v13 }
 0xe06   : > { %7483 = vmatprep.subr.bf16.mxu1 %v8397_v4 }
 0xe08   : > { %7480 = vmatmul.mubr.msk.bf16.vlgmr.msra.gmra.mrb[20].mxu1 %vm5298_vm4, %v5397_v3  ;;  %v5467_v3 = vpop.permute.xlu1 %5466 }
 0xe09   : > { %7499 = vmatprep.mubr.msk.bf16.mxu1 %vm8398_vm3, %v8397_v4  ;;  %7484 = vmatpush3.bf16.msra.mxu1 %v5461_v31 }
 0xe0a   : > { %7485 = vmatprep.subr.bf16.mxu1 %v8397_v4 }
 0xe0c   : > { %v5469_v48 = vpop.permute.xlu1 %5468 }
 0xe0d   : > { %7486 = vmatpush3.bf16.msra.mxu1 %v5463_v28 }
 0xe0e   : > { %7487 = vmatprep.subr.bf16.mxu1 %v8397_v4 }
 0xe10   : > { %v5471_v30 = vpop.permute.xlu1 %5470 }
 0xe11   : > { %7488 = vmatpush3.bf16.msra.mxu1 %v5465_v32 }
 0xe12   : > { %7489 = vmatprep.subr.bf16.mxu1 %v8397_v4 }
 0xe14   : > { %v5473_v0 = vpop.permute.xlu1 %5472 }
 0xe15   : > { %7490 = vmatpush3.bf16.msra.mxu1 %v5467_v3 }
 0xe16   : > { %7491 = vmatprep.subr.bf16.mxu1 %v8397_v4 }
 0xe19   : > { %7492 = vmatpush3.bf16.msra.mxu1 %v5469_v48 }
 0xe1a   : > { %7493 = vmatprep.subr.bf16.mxu1 %v8397_v4 }
 0xe1d   : > { %7494 = vmatpush3.bf16.msra.mxu1 %v5471_v30 }
 0xe1e   : > { %7495 = vmatprep.subr.bf16.mxu1 %v8397_v4 }
 0xe21   : > { %7496 = vmatpush3.bf16.msra.mxu1 %v5473_v0 }
 0xe22   : > { %7497 = vmatprep.subr.bf16.mxu1 %v8397_v4 }
 0xecb   : > { %v5336_v23 = vpop.f32.mrb[16].mxu1 }
 0xecc   : > { %v7453_v29 = vpop.f32.mrb[17].mxu1  ;;  %v5337_v43 = vadd.f32 %v5336_v23, %v12160_v5 }
 0xecd   : > { %v5339_v37 = vpop.f32.mrb[18].mxu1 }
 0xece   : > { %v7454_v33 = vpop.f32.mrb[19].mxu1  ;;  %v5343_v9 = vsel %vm5342_vm5, %v5337_v43, -inf }
 0xedb   : > { %v5435_v27 = vpop.f32.mrb[20].mxu1 }
 0xedc   : > { %v5436_v17 = vadd.f32 %v5435_v27, %v12160_v5  ;;  %v7481_v59 = vpop.f32.mrb[21].mxu1 }
 0xedd   : > { %v5438_v13 = vpop.f32.mrb[22].mxu1 }
 0xede   : > { %v7482_v14 = vpop.f32.mrb[23].mxu1  ;;  %v5441_v53 = vsel %vm5342_vm5, %v5436_v17, -inf }
 0xedf   : > { %5442 = vmax.xlane.f32.xlu1 %v5441_v53 }
 0xef0   : > { %5474 = vrot.lane.b32.xlu1 %v11276_v39, %s8396_s3 }
 0xef4   : > { %5525 = vrot.lane.b32.xlu1 %v11208_v61, %s8399_s16 }
 0xef8   : > { %5646 = vrot.lane.b32.xlu1 %v11208_v61, %s8400_s1  ;;  %v5273_v61 = vpop.trf.xlu0 }
 0xefc   : > { %v5274_v7 = vpop.trf.xlu0 }
 0xefd   : > { %v5285_v58 = vpack.c.bf16 %v5274_v7, %v5273_v61 }
 0xf00   : > { %v5275_v40 = vpop.trf.xlu0 }
 0xf04   : > { %v5276_v21 = vpop.trf.xlu0 }
 0xf05   : > { %v5286_v6 = vpack.c.bf16 %v5276_v21, %v5275_v40 }
 0xf1c   : > { %5344 = vmax.xlane.f32.xlu1 %v5343_v9 }
 0xf2d   : > { %5702 = vrot.lane.b32.xlu1 %v11237_v54, %s8400_s1  ;;  %v5277_v54 = vpop.trf.xlu0 }
 0xf31   : > { %5583 = vrot.lane.b32.xlu1 %v11235_v47, %s8399_s16  ;;  %v5278_v63 = vpop.trf.xlu0 }
 0xf32   : > { %v5287_v18 = vpack.c.bf16 %v5278_v63, %v5277_v54 }
 0xf35   : > { %5704 = vrot.lane.b32.xlu1 %v11235_v47, %s8400_s1  ;;  %v5279_v22 = vpop.trf.xlu0 }
 0xf39   : > { %5585 = vrot.lane.b32.xlu1 %v11251_v19, %s8399_s16 }
 0xf3d   : > { %5706 = vrot.lane.b32.xlu1 %v11251_v19, %s8400_s1 }
 0xf41   : > { %5587 = vrot.lane.b32.xlu1 %v11248_v15, %s8399_s16  ;;  %v5280_v15 = vpop.trf.xlu0 }
 0xf42   : > { %v5288_v19 = vpack.c.bf16 %v5280_v15, %v5279_v22 }
 0xf45   : > { %5589 = vrot.lane.b32.xlu1 %v11265_v57, %s8399_s16  ;;  %v5582_v10 = vpop.permute.xlu0 %5581 }
 0xf49   : > { %5591 = vrot.lane.b32.xlu1 %v11262_v8, %s8399_s16  ;;  %v5709_v57 = vpop.permute.xlu0 %5708 }
 0xf4d   : > { %5593 = vrot.lane.b32.xlu1 %v5295_v34, %s8399_s16  ;;  %v5711_v35 = vpop.permute.xlu0 %5710 }
 0xf51   : > { %v5713_v49 = vpop.permute.xlu0 %5712 }
 0xf55   : > { %v5715_v60 = vpop.permute.xlu0 %5714 }
 0xf59   : > { %v5717_v31 = vpop.permute.xlu0 %5716 }
 0xf6c   : > { %v5443_v26 = vpop.xlane.xlu1 %5442 }
 0xf6d   : > { %v5444_v42 = vsub.f32 %v5436_v17, %v5443_v26 }
 0xf6f   : > { %v5445_v45 = vmul.f32 1.442695, %v5444_v42 }
 0xf70   : > { %v5475_v47 = vpop.permute.xlu1 %5474 }
 0xf71   : > { %8270 = vpow2.f32 %v5445_v45  ;;  %7498 = vmatpush3.bf16.msra.mxu1 %v5475_v47 }
 0xf72   : > { %7503 = vmatprep.subr.bf16.mxu1 %v8397_v4 }
 0xf74   : > { %v5526_v50 = vpop.permute.xlu1 %5525 }
 0xf78   : > { %v5647_v46 = vpop.permute.xlu1 %5646 }
 0xf7b   : > { %v11323_v25 = vpop.eup %8270 }
 0xf7c   : > { %v5451_v38 = vpack.c.bf16 %v11323_v25, %v11323_v25  ;;  %v5447_v26 = vsel %vm5342_vm5, %v11323_v25, 0.0 }
 0xf7e   : > { %7500 = vmatmul.mubr.bf16.vlgmr.msra.gmra.mrb[24].mxu1 %v5451_v38 }
 0xf7f   : > { %7504 = vmatpush3.bf16.msra.mxu1 %v5285_v58  ;;  %7507 = vmatprep.mubr.msk.bf16.mxu1 %vm8398_vm3, %v8397_v4 }
 0xf80   : > { %7505 = vmatprep.subr.bf16.mxu1 %v8397_v4 }
 0xf83   : > { %7506 = vmatpush3.bf16.msra.mxu1 %v5286_v6 }
 0xf84   : > { %7531 = vmatprep.subr.bf16.mxu1 %v8397_v4 }
 0xf86   : > { %7508 = vmatmul.mubr.msk.bf16.vlgmr.msra.gmra.mrb[28].mxu1 %vm5298_vm4, %v5526_v50 }
 0xf87   : > { %7532 = vmatpush3.bf16.msra.mxu1 %v5287_v18  ;;  %7535 = vmatprep.mubr.msk.bf16.mxu1 %vm8398_vm3, %v8397_v4 }
 0xf88   : > { %7533 = vmatprep.subr.bf16.mxu1 %v8397_v4 }
 0xf8b   : > { %7534 = vmatpush3.bf16.msra.mxu1 %v5288_v19 }
 0xf8c   : > { %7539 = vmatprep.subr.bf16.mxu1 %v8397_v4 }
 0xf8e   : > { %7536 = vmatmul.mubr.msk.bf16.vlgmr.msra.gmra.mrb[32].mxu1 %vm5298_vm4, %v5647_v46  ;;  %v12161_v46 = vld [vmem:[#allocation55_spill] sm:$0xff] }
 0xf8f   : > { %7555 = vmatprep.mubr.msk.bf16.mxu1 %vm8398_vm3, %v8397_v4 }
 0xfa9   : > { %v5345_v56 = vpop.xlane.xlu1 %5344 }
 0xfaa   : > { %v5346_v2 = vsub.f32 %v5337_v43, %v5345_v56  ;;  %v12162_v56 = vld [vmem:[#allocation54_spill] sm:$0xff] }
 0xfac   : > { %v5347_v62 = vmul.f32 1.442695, %v5346_v2  ;;  %v6767_v2 = vcombine.low %v12162_v56, %v12161_v46  ;;  %v12180_v56 = vld [vmem:[#allocation76_spill] sm:$0xff] }
 0xfad   : > { %v5703_v44 = vpop.permute.xlu1 %5702 }
 0xfae   : > { %8272 = vpow2.f32 %v5347_v62  ;;  %7540 = vmatpush3.bf16.msra.mxu1 %v5703_v44  ;;  %v12163_v62 = vld [vmem:[#allocation57_spill] sm:$0xff]  ;;  %v12164_v44 = vld [vmem:[#allocation56_spill] sm:$0xff] }
 0xfaf   : > { %7541 = vmatprep.subr.bf16.mxu1 %v8397_v4 }
 0xfb1   : > { %v5584_v24 = vpop.permute.xlu1 %5583 }
 0xfb5   : > { %v5705_v41 = vpop.permute.xlu1 %5704 }
 0xfb6   : > { %7542 = vmatpush3.bf16.msra.mxu1 %v5705_v41 }
 0xfb7   : > { %7543 = vmatprep.subr.bf16.mxu1 %v8397_v4 }
 0xfb8   : > { %v11341_v8 = vpop.eup %8272 }
 0xfb9   : > { %v5586_v20 = vpop.permute.xlu1 %5585  ;;  %v5353_v52 = vpack.c.bf16 %v11341_v8, %v11341_v8  ;;  %v5349_v18 = vsel %vm5342_vm5, %v11341_v8, 0.0  ;;  %v12167_v8 = vld [vmem:[#allocation61_spill] sm:$0xff] }
 0xfbb   : > { %7472 = vmatmul.mubr.bf16.vlgmr.msra.gmra.mrb[32].mxu0 %v5353_v52  ;;  %v12169_v52 = vld [vmem:[#allocation63_spill] sm:$0xff] }
 0xfbc   : > { %7512 = vmatpush3.bf16.msra.mxu0 %v5582_v10  ;;  %7527 = vmatprep.mubr.msk.bf16.mxu0 %vm8398_vm3, %v8397_v4  ;;  %v12166_v10 = vld [vmem:[#allocation58_spill] sm:$0xff] }
 0xfbd   : > { %v5707_v36 = vpop.permute.xlu1 %5706  ;;  %7513 = vmatprep.subr.bf16.mxu0 %v8397_v4 }
 0xfbe   : > { %7544 = vmatpush3.bf16.msra.mxu1 %v5707_v36  ;;  %v12170_v36 = vld [vmem:[#allocation62_spill] sm:$0xff] }
 0xfbf   : > { %7545 = vmatprep.subr.bf16.mxu1 %v8397_v4 }
 0xfc0   : > { %7514 = vmatpush3.bf16.msra.mxu0 %v5584_v24  ;;  %v6768_v24 = vcombine.low %v12164_v44, %v12163_v62 }
 0xfc1   : > { %v5588_v51 = vpop.permute.xlu1 %5587  ;;  %7515 = vmatprep.subr.bf16.mxu0 %v8397_v4 }
 0xfc2   : > { %7546 = vmatpush3.bf16.msra.mxu1 %v5709_v57  ;;  %v12168_v57 = vld [vmem:[#allocation60_spill] sm:$0xff] }
 0xfc3   : > { %7547 = vmatprep.subr.bf16.mxu1 %v8397_v4 }
 0xfc4   : > { %7516 = vmatpush3.bf16.msra.mxu0 %v5586_v20  ;;  %v6770_v20 = vcombine.low %v12168_v57, %v12167_v8 }
 0xfc5   : > { %7517 = vmatprep.subr.bf16.mxu0 %v8397_v4  ;;  %v5590_v55 = vpop.permute.xlu1 %5589 }
 0xfc6   : > { %7548 = vmatpush3.bf16.msra.mxu1 %v5711_v35  ;;  %v6771_v35 = vcombine.low %v12170_v36, %v12169_v52 }
 0xfc7   : > { %7549 = vmatprep.subr.bf16.mxu1 %v8397_v4 }
 0xfc8   : > { %7518 = vmatpush3.bf16.msra.mxu0 %v5588_v51 }
 0xfc9   : > { %7519 = vmatprep.subr.bf16.mxu0 %v8397_v4  ;;  %v5592_v34 = vpop.permute.xlu1 %5591 }
 0xfca   : > { %7550 = vmatpush3.bf16.msra.mxu1 %v5713_v49  ;;  %v12171_v49 = vld [vmem:[#allocation65_spill] sm:$0xff] }
 0xfcb   : > { %7551 = vmatprep.subr.bf16.mxu1 %v8397_v4 }
 0xfcc   : > { %7520 = vmatpush3.bf16.msra.mxu0 %v5590_v55  ;;  %v12172_v55 = vld [vmem:[#allocation64_spill] sm:$0xff] }
 0xfcd   : > { %7521 = vmatprep.subr.bf16.mxu0 %v8397_v4  ;;  %v5594_v28 = vpop.permute.xlu1 %5593 }
 0xfce   : > { %7552 = vmatpush3.bf16.msra.mxu1 %v5715_v60  ;;  %v6772_v60 = vcombine.low %v12172_v55, %v12171_v49 }
 0xfcf   : > { %7553 = vmatprep.subr.bf16.mxu1 %v8397_v4 }
 0xfd0   : > { %7522 = vmatpush3.bf16.msra.mxu0 %v5592_v34  ;;  %v12173_v34 = vld [vmem:[#allocation67_spill] sm:$0xff] }
 0xfd1   : > { %7523 = vmatprep.subr.bf16.mxu0 %v8397_v4 }
 0xfd2   : > { %7554 = vmatpush3.bf16.msra.mxu1 %v5717_v31  ;;  %v12174_v31 = vld [vmem:[#allocation66_spill] sm:$0xff] }
 0xfd4   : > { %7524 = vmatpush3.bf16.msra.mxu0 %v5594_v28  ;;  %v6773_v28 = vcombine.low %v12174_v31, %v12173_v34  ;;  %v12187_v34 = vld [vmem:[#allocation81_spill] sm:$0xff] }
 0xfd5   : > { %7525 = vmatprep.subr.bf16.mxu0 %v8397_v4 }
0x1051   : > { %v5518_v32 = vpop.f32.mrb[24].mxu1 }
0x1052   : > { %v7501_v3 = vpop.f32.mrb[25].mxu1 }
0x1053   : > { %v5521_v48 = vpop.f32.mrb[26].mxu1  ;;  %v12175_v3 = vld [vmem:[#allocation69_spill] sm:$0xff] }
0x1054   : > { %v7502_v30 = vpop.f32.mrb[27].mxu1  ;;  %v12176_v48 = vld [vmem:[#allocation68_spill] sm:$0xff] }
0x1055   : > { %v6774_v30 = vcombine.low %v12176_v48, %v12175_v3  ;;  %v12189_v3 = vld [vmem:[#allocation83_spill] sm:$0xff] }
0x1059   : > { %v5564_v0 = vpop.f32.mrb[28].mxu1 }
0x105a   : > { %v5565_v23 = vadd.f32 %v5564_v0, %v12160_v5  ;;  %v7509_v29 = vpop.f32.mrb[29].mxu1 }
0x105b   : > { %v5567_v37 = vpop.f32.mrb[30].mxu1 }
0x105c   : > { %v7510_v33 = vpop.f32.mrb[31].mxu1  ;;  %v5570_v27 = vsel %vm5342_vm5, %v5565_v23, -inf }
0x105d   : > { %5571 = vmax.xlane.f32.xlu1 %v5570_v27 }
0x1061   : > { %v5685_v17 = vpop.f32.mrb[32].mxu1 }
0x1062   : > { %v5686_v59 = vadd.f32 %v5685_v17, %v12160_v5  ;;  %v7537_v13 = vpop.f32.mrb[33].mxu1 }
0x1063   : > { %v5688_v14 = vpop.f32.mrb[34].mxu1 }
0x1064   : > { %v7538_v53 = vpop.f32.mrb[35].mxu1  ;;  %v5691_v43 = vsel %vm5342_vm5, %v5686_v59, -inf }
0x1065   : > { %5692 = vmax.xlane.f32.xlu1 %v5691_v43 }
0x1076   : > { %5595 = vrot.lane.b32.xlu1 %v11276_v39, %s8399_s16 }
0x108e   : > { %v11365_v9 = vpop.f32.mrb[32].mxu0 }
0x108f   : > { %v7473_v61 = vpop.f32.mrb[33].mxu0 }
0x1090   : > { %v5391_v7 = vpop.f32.mrb[34].mxu0 }
0x1091   : > { %v7474_v40 = vpop.f32.mrb[35].mxu0 }
0x109a   : > { %5448 = vadd.xlane.f32.xlu1 %v5447_v26 }
0x10ea   : > { %v5572_v42 = vpop.xlane.xlu1 %5571 }
0x10eb   : > { %v5573_v5 = vsub.f32 %v5565_v23, %v5572_v42 }
0x10ed   : > { %v5574_v45 = vmul.f32 1.442695, %v5573_v5 }
0x10ef   : > { %8274 = vpow2.f32 %v5574_v45 }
0x10f2   : > { %v5693_v21 = vpop.xlane.xlu1 %5692 }
0x10f3   : > { %v5694_v47 = vsub.f32 %v5686_v59, %v5693_v21 }
0x10f5   : > { %v5695_v54 = vmul.f32 1.442695, %v5694_v47 }
0x10f6   : > { %v5596_v63 = vpop.permute.xlu1 %5595 }
0x10f7   : > { %8276 = vpow2.f32 %v5695_v54  ;;  %7526 = vmatpush3.bf16.msra.mxu0 %v5596_v63 }
0x10f8   : > { %7559 = vmatprep.subr.bf16.mxu0 %v8397_v4 }
0x10f9   : > { %v8275_v39 = vpop.eup %8274 }
0x10fa   : > { %v5576_v38 = vsel %vm5342_vm5, %v8275_v39, 0.0  ;;  %v5580_v58 = vpack.c.bf16 %v8275_v39, %v8275_v39  ;;  %v12177_v39 = vld [vmem:[#allocation70_spill] sm:$0xff] }
0x10fb   : > { %5577 = vadd.xlane.f32.xlu0 %v5576_v38 }
0x10fc   : > { %7528 = vmatmul.mubr.bf16.vlgmr.msra.gmra.mrb[36].mxu0 %v5580_v58 }
0x10fd   : > { %7575 = vmatprep.mubr.msk.bf16.mxu0 %vm8398_vm3, %v8397_v4  ;;  %7560 = vmatpush3.bf16.msra.mxu0 %v6767_v2  ;;  %v12181_v2 = vld [vmem:[#allocation75_spill] sm:$0xff] }
0x10fe   : > { %7561 = vmatprep.subr.bf16.mxu0 %v8397_v4  ;;  %v6778_v62 = vcombine.high %v12181_v2, %v12180_v56  ;;  %v6777_v44 = vcombine.low %v12181_v2, %v12180_v56  ;;  %v12208_v2 = vld [vmem:[#allocation113_spill] sm:$0xff] }
0x1101   : > { %v8277_v25 = vpop.eup %8276  ;;  %7562 = vmatpush3.bf16.msra.mxu0 %v6768_v24  ;;  %v12182_v24 = vld [vmem:[#allocation78_spill] sm:$0xff] }
0x1102   : > { %v5697_v6 = vsel %vm5342_vm5, %v8277_v25, 0.0  ;;  %v5701_v22 = vpack.c.bf16 %v8277_v25, %v8277_v25  ;;  %7563 = vmatprep.subr.bf16.mxu0 %v8397_v4 }
0x1103   : > { %5698 = vadd.xlane.f32.xlu0 %v5697_v6 }
0x1104   : > { %7556 = vmatmul.mubr.bf16.vlgmr.msra.gmra.mrb[36].mxu1 %v5701_v22  ;;  %v8294_v22 = vld [vmem:[#allocation2] sm:$0xff] }
0x1105   : > { %6014 = vmatprep.mubr.bf16.mxu1 %v8395_v1  ;;  %v12165_v1 = vld [vmem:[#allocation59_spill] sm:$0xff] }
0x1106   : > { %v6769_v41 = vcombine.low %v12166_v10, %v12165_v1  ;;  %v12183_v1 = vld [vmem:[#allocation77_spill] sm:$0xff] }
0x1107   : > { %5350 = vadd.xlane.f32.xlu0 %v5349_v18  ;;  %v6780_v10 = vcombine.high %v12183_v1, %v12182_v24  ;;  %v6779_v36 = vcombine.low %v12183_v1, %v12182_v24  ;;  %v12210_v24 = vld [vmem:[#allocation97_spill] sm:$0xff]  ;;  %v12211_v1 = vld [vmem:[#allocation96_spill] sm:$0xff] }
0x1108   : > { %7564 = vmatpush3.bf16.msra.mxu0 %v6769_v41 }
0x1109   : > { %7565 = vmatprep.subr.bf16.mxu0 %v8397_v4 }
0x110c   : > { %7566 = vmatpush3.bf16.msra.mxu0 %v6770_v20 }
0x110d   : > { %7567 = vmatprep.subr.bf16.mxu0 %v8397_v4 }
0x1110   : > { %7568 = vmatpush3.bf16.msra.mxu0 %v6771_v35  ;;  %v12184_v35 = vld [vmem:[#allocation80_spill] sm:$0xff] }
0x1111   : > { %7569 = vmatprep.subr.bf16.mxu0 %v8397_v4 }
0x1114   : > { %7570 = vmatpush3.bf16.msra.mxu0 %v6772_v60  ;;  %v12186_v60 = vld [vmem:[#allocation82_spill] sm:$0xff] }
0x1115   : > { %7571 = vmatprep.subr.bf16.mxu0 %v8397_v4  ;;  %v6784_v31 = vcombine.high %v12187_v34, %v12186_v60 }
0x1118   : > { %7572 = vmatpush3.bf16.msra.mxu0 %v6773_v28  ;;  %v6783_v28 = vcombine.low %v12187_v34, %v12186_v60  ;;  %v12219_v60 = vld [vmem:[#allocation100_spill] sm:$0xff] }
0x1119   : > { %7573 = vmatprep.subr.bf16.mxu0 %v8397_v4 }
0x111c   : > { %7574 = vmatpush3.bf16.msra.mxu0 %v6774_v30 }
0x1127   : > { %v5449_v50 = vpop.xlane.xlu1 %5448 }
0x1128   : > { %8278 = vrcp.f32 %v5449_v50  ;;  %v12178_v50 = vld [vmem:[#allocation74_spill] sm:$0xff] }
0x1132   : > { %v8279_v15 = vpop.eup %8278 }
0x1133   : > { %v5524_v19 = vmul.f32 %v8279_v15, %v5518_v32  ;;  %v12179_v15 = vld [vmem:[#allocation73_spill] sm:$0xff] }
0x1134   : > { %v6775_v46 = vcombine.low %v12179_v15, %v12178_v50 }
0x1135   : > { %5768 = vrot.lane.b32.xlu1 %v5524_v19, %s8400_s1  ;;  %v6776_v19 = vcombine.high %v12179_v15, %v12178_v50  ;;  %v12205_v50 = vld [vmem:[#allocation110_spill] sm:$0xff]  ;;  %s12235_s1 = sld [smem:[#allocation176_spill]] }
0x1137   : > { %5982 = vmatprep.subr.bf16.mxu1 %v6776_v19  ;;  %v12206_v19 = vld [vmem:[#allocation95_spill] sm:$0xff] }
0x1138   : > { %5983 = vmatpush1.bf16.msra.mxu1 %v6775_v46  ;;  %v12207_v46 = vld [vmem:[#allocation94_spill] sm:$0xff] }
0x1139   : > { %5984 = vmatprep.subr.bf16.mxu1 %v6778_v62  ;;  %v6793_v56 = vcombine.low %v12207_v46, %v12206_v19  ;;  %v12209_v62 = vld [vmem:[#allocation112_spill] sm:$0xff] }
0x113c   : > { %5985 = vmatpush1.bf16.msra.mxu1 %v6777_v44  ;;  %v6802_v44 = vcombine.low %v12209_v62, %v12208_v2 }
0x113d   : > { %5986 = vmatprep.subr.bf16.mxu1 %v6780_v10  ;;  %v6794_v10 = vcombine.low %v12211_v1, %v12210_v24 }
0x1140   : > { %5987 = vmatpush1.bf16.msra.mxu1 %v6779_v36 }
0x1188   : > { %v5578_v51 = vpop.xlane.xlu0 %5577 }
0x1189   : > { %8280 = vrcp.f32 %v5578_v51  ;;  %v12185_v51 = vld [vmem:[#allocation79_spill] sm:$0xff] }
0x118a   : > { %v6782_v49 = vcombine.high %v12185_v51, %v12184_v35  ;;  %v6781_v55 = vcombine.low %v12185_v51, %v12184_v35  ;;  %v12216_v35 = vld [vmem:[#allocation117_spill] sm:$0xff]  ;;  %v12217_v51 = vld [vmem:[#allocation116_spill] sm:$0xff] }
0x118c   : > { %5988 = vmatprep.subr.bf16.mxu1 %v6782_v49  ;;  %v6804_v49 = vcombine.low %v12217_v51, %v12216_v35  ;;  %v8256_v35 = vld [vmem:[%s12230_s20 + $0x10] sm:$0xff]   ;;  %v8257_v51 = vld [vmem:[%s12230_s20 + $0x18] sm:$0xff]  }
0x118d   : > { %5989 = vmatpush1.bf16.msra.mxu1 %v6781_v55  ;;  %v12218_v55 = vld [vmem:[#allocation101_spill] sm:$0xff] }
0x118e   : > { %5990 = vmatprep.subr.bf16.mxu1 %v6784_v31  ;;  %v6796_v34 = vcombine.low %v12219_v60, %v12218_v55  ;;  %v12220_v31 = vld [vmem:[#allocation119_spill] sm:$0xff]  ;;  %v8259_v55 = vld [vmem:[%s12230_s20 + $0x28] sm:$0xff]   ;;  %v8260_v60 = vld [vmem:[%s12230_s20 + $0x30] sm:$0xff]  }
0x1190   : > { %v5699_v32 = vpop.xlane.xlu0 %5698 }
0x1191   : > { %8282 = vrcp.f32 %v5699_v32  ;;  %v12188_v32 = vld [vmem:[#allocation84_spill] sm:$0xff]  ;;  %5991 = vmatpush1.bf16.msra.mxu1 %v6783_v28  ;;  %v12221_v28 = vld [vmem:[#allocation118_spill] sm:$0xff] }
0x1192   : > { %v6786_v48 = vcombine.high %v12189_v3, %v12188_v32  ;;  %v6785_v30 = vcombine.low %v12189_v3, %v12188_v32  ;;  %v6805_v32 = vcombine.low %v12221_v28, %v12220_v31  ;;  %v12222_v3 = vld [vmem:[#allocation103_spill] sm:$0xff] }
0x1193   : > { %v8281_v0 = vpop.eup %8280 }
0x1194   : > { %v5351_v61 = vpop.xlane.xlu0 %5350  ;;  %5992 = vmatprep.subr.bf16.mxu1 %v6786_v48  ;;  %v12223_v48 = vld [vmem:[#allocation102_spill] sm:$0xff] }
0x1195   : > { %8284 = vrcp.f32 %v5351_v61  ;;  %5993 = vmatpush1.bf16.msra.mxu1 %v6785_v30  ;;  %v6797_v30 = vcombine.low %v12223_v48, %v12222_v3 }
0x119b   : > { %v8283_v17 = vpop.eup %8282 }
0x119f   : > { %v8285_v7 = vpop.eup %8284 }
0x11a0   : > { %v5394_v26 = vmul.f32 %v8285_v7, %v11365_v9  ;;  %v12194_v7 = vld [vmem:[#allocation71_spill] sm:$0xff] }
0x11a7   : > { %v5769_v40 = vpop.permute.xlu1 %5768 }
0x11a8   : > { %v5779_v5 = vsel %vm5298_vm4, %v5394_v26, %v5769_v40  ;;  %v12195_v26 = vld [vmem:[#allocation72_spill] sm:$0xff] }
0x11cf   : > { %v5639_v23 = vpop.f32.mrb[36].mxu0 }
0x11d0   : > { %v5645_v29 = vmul.f32 %v8281_v0, %v5639_v23  ;;  %v7529_v37 = vpop.f32.mrb[37].mxu0  ;;  %v12190_v0 = vld [vmem:[#allocation86_spill] sm:$0xff]  ;;  %v12191_v23 = vld [vmem:[#allocation85_spill] sm:$0xff] }
0x11d1   : > { %v5642_v33 = vpop.f32.mrb[38].mxu0  ;;  %v6787_v37 = vcombine.low %v12191_v23, %v12190_v0 }
0x11d2   : > { %v7530_v27 = vpop.f32.mrb[39].mxu0  ;;  %5772 = vrot.lane.b32.xlu0 %v5645_v29, %s8399_s16  ;;  %v6788_v29 = vcombine.high %v12191_v23, %v12190_v0  ;;  %v12192_v33 = vld [vmem:[#allocation88_spill] sm:$0xff]  ;;  %v12224_v0 = vld [vmem:[#allocation121_spill] sm:$0xff]  ;;  %s12231_s16 = sld [smem:[#allocation175_spill]] }
0x11d3   : > { %v12193_v27 = vld [vmem:[#allocation87_spill] sm:$0xff]  ;;  %v12225_v23 = vld [vmem:[#allocation120_spill] sm:$0xff] }
0x11d4   : > { %5994 = vmatprep.subr.bf16.mxu1 %v6788_v29  ;;  %v6806_v29 = vcombine.low %v12225_v23, %v12224_v0 }
0x11d5   : > { %5995 = vmatpush1.bf16.msra.mxu1 %v6787_v37  ;;  %v12226_v37 = vld [vmem:[#allocation105_spill] sm:$0xff] }
0x11d7   : > { %v5760_v59 = vpop.f32.mrb[36].mxu1 }
0x11d8   : > { %v5766_v13 = vmul.f32 %v8283_v17, %v5760_v59  ;;  %v7557_v14 = vpop.f32.mrb[37].mxu1  ;;  %v6790_v17 = vcombine.high %v12193_v27, %v12192_v33  ;;  %v6789_v59 = vcombine.low %v12193_v27, %v12192_v33  ;;  %v12227_v33 = vld [vmem:[#allocation104_spill] sm:$0xff]  ;;  %v8265_v3 = vld [vmem:[%s12231_s16 + $0x18] sm:$0xff]  }
0x11d9   : > { %v5763_v53 = vpop.f32.mrb[38].mxu1  ;;  %v6798_v27 = vcombine.low %v12227_v33, %v12226_v37  ;;  %v8262_v31 = vld [vmem:[%s12231_s16] sm:$0xff]   ;;  %v8263_v28 = vld [vmem:[%s12231_s16 + $0x8] sm:$0xff]  }
0x11da   : > { %v7558_v43 = vpop.f32.mrb[39].mxu1  ;;  %5776 = vrot.lane.b32.xlu1 %v5766_v13, %s8396_s3  ;;  %5996 = vmatprep.subr.bf16.mxu1 %v6790_v17  ;;  %v12228_v17 = vld [vmem:[#allocation89_spill] sm:$0xff]  ;;  %v8266_v48 = vld [vmem:[%s12231_s16 + $0x20] sm:$0xff]  }
0x11db   : > { %5997 = vmatpush1.bf16.msra.mxu1 %v6789_v59  ;;  %v5975_v59 = vrot.slane %v12228_v17, %v4913_v16 }
0x11dc   : > { %7579 = vmatprep.subr.bf16.mxu1 %v8397_v4 }
0x1244   : > { %v5773_v42 = vpop.permute.xlu0 %5772 }
0x1245   : > { %v5781_v45 = vsel %vm5780_vm6, %v5779_v5, %v5773_v42 }
0x124c   : > { %v5777_v21 = vpop.permute.xlu1 %5776 }
0x124d   : > { %v5783_v47 = vsel %vm5782_vm7, %v5781_v45, %v5777_v21  ;;  %v12196_v45 = vld [vmem:[#allocation107_spill] sm:$0xff]  ;;  %v12197_v21 = vld [vmem:[#allocation106_spill] sm:$0xff] }
0x124e   : > { %v5784_v54 = vpack.c.bf16 %v5783_v47, %v5783_v47  ;;  %v6799_v47 = vcombine.low %v12197_v21, %v12196_v45 }
0x1250   : > { %7576 = vmatmul.mubr.bf16.vlgmr.msra.gmra.mrb[40].mxu0 %v5784_v54  ;;  %v12198_v54 = vld [vmem:[#allocation91_spill] sm:$0xff]  ;;  %7103 = vmatprep.subr.bf16.mxu0 %v6799_v47 }
0x1323   : > { %v5867_v63 = vpop.f32.mrb[40].mxu0 }
0x1324   : > { %v5868_v38 = vadd.f32 %v5867_v63, %v12177_v39  ;;  %v7577_v58 = vpop.f32.mrb[41].mxu0  ;;  %v12199_v63 = vld [vmem:[#allocation90_spill] sm:$0xff] }
0x1325   : > { %v5870_v25 = vpop.f32.mrb[42].mxu0  ;;  %v6791_v39 = vcombine.low %v12199_v63, %v12198_v54  ;;  %v12201_v58 = vld [vmem:[#allocation108_spill] sm:$0xff] }
0x1326   : > { %v7578_v6 = vpop.f32.mrb[43].mxu0  ;;  %v5873_v18 = vadd.f32 %v8294_v22, %v5868_v38  ;;  %v12200_v38 = vld [vmem:[#allocation109_spill] sm:$0xff]  ;;  %v12203_v22 = vld [vmem:[#allocation92_spill] sm:$0xff] }
0x1327   : > { %7104 = vmatpush3.bf16.msra.mxu0 %v6791_v39  ;;  %v6800_v25 = vcombine.low %v12201_v58, %v12200_v38  ;;  %v12202_v6 = vld [vmem:[#allocation93_spill] sm:$0xff] }
0x1328   : > { %v5874_v9 = vsel %vm5342_vm5, %v5873_v18, 0.0 }
0x1329   : > { %5875 = vadd.xlane.f32.xlu1 %v5874_v9  ;;  %7105 = vmatprep.subr.bf16.mxu0 %v6800_v25  ;;  %v12204_v9 = vld [vmem:[#allocation111_spill] sm:$0xff] }
0x132a   : > { %v6801_v15 = vcombine.low %v12205_v50, %v12204_v9 }
0x13b6   : > { %v5876_v41 = vpop.xlane.xlu1 %5875 }
0x13b7   : > { %v5878_v8 = vmul.f32 0.0078125, %v5876_v41  ;;  %v12212_v41 = vld [vmem:[#allocation115_spill] sm:$0xff] }
0x13b9   : > { %v5879_v57 = vsub.f32 %v5873_v18, %v5878_v8  ;;  %v6792_v18 = vcombine.low %v12203_v22, %v12202_v6  ;;  %v12213_v8 = vld [vmem:[#allocation114_spill] sm:$0xff] }
0x13bb   : > { %v5880_v20 = vmul.f32 %v5879_v57, %v5879_v57  ;;  %7106 = vmatpush3.bf16.msra.mxu0 %v6792_v18 }
0x13bc   : > { %7107 = vmatprep.subr.bf16.mxu0 %v6801_v15 }
0x13bd   : > { %v5881_v52 = vsel %vm5342_vm5, %v5880_v20, 0.0  ;;  %v12214_v20 = vld [vmem:[#allocation99_spill] sm:$0xff] }
0x13be   : > { %5882 = vadd.xlane.f32.xlu0 %v5881_v52  ;;  %v12215_v52 = vld [vmem:[#allocation98_spill] sm:$0xff] }
0x13bf   : > { %7108 = vmatpush3.bf16.msra.mxu0 %v6793_v56  ;;  %v6795_v36 = vcombine.low %v12215_v52, %v12214_v20 }
0x13c0   : > { %7109 = vmatprep.subr.bf16.mxu0 %v6802_v44  ;;  %v12229_v44 = vld [vmem:[#allocation122_spill] sm:$0xff] }
0x13c3   : > { %7110 = vmatpush3.bf16.msra.mxu0 %v6794_v10 }
0x144b   : > { %v5883_v13 = vpop.xlane.xlu0 %5882 }
0x144c   : > { %v5884_v14 = vmul.f32 0.0078125, %v5883_v13  ;;  %v5979_v13 = vrot.slane %v12228_v17, %v4917_v11 }
0x144e   : > { %v5885_v53 = vadd.f32 1e-12, %v5884_v14 }
0x1450   : > { %8286 = vrsqrt.f32 %v5885_v53 }
0x145a   : > { %v8287_v43 = vpop.eup %8286 }
0x145b   : > { %v5887_v61 = vmul.f32 %v8287_v43, %v5879_v57  ;;  %v6803_v57 = vcombine.low %v12213_v8, %v12212_v41  ;;  %v8254_v41 = vld [vmem:[%s12230_s20] sm:$0xff]   ;;  %v8255_v8 = vld [vmem:[%s12230_s20 + $0x8] sm:$0xff]  }
0x145d   : > { %v5888_v40 = vmul.f32 %v5887_v61, %v12194_v7  ;;  %7111 = vmatprep.subr.bf16.mxu0 %v6803_v57 }
0x145e   : > { %7112 = vmatpush3.bf16.msra.mxu0 %v6795_v36 }
0x145f   : > { %v11443_v42 = vadd.f32 %v5888_v40, %v12195_v26  ;;  %7113 = vmatprep.subr.bf16.mxu0 %v6804_v49  ;;  %v8258_v49 = vld [vmem:[%s12230_s20 + $0x20] sm:$0xff]  }
0x1461   : > { %v5890_v5 = vpack.c.bf16 %v11443_v42, %v11443_v42 }
0x1462   : > { %7114 = vmatpush3.bf16.msra.mxu0 %v6796_v34  ;;  %v8261_v34 = vld [vmem:[%s12230_s20 + $0x38] sm:$0xff]  }
0x1463   : > { %6015 = vmatmul.mubr.bf16.vlgmr.msra.gmra.mrb[40].mxu1 %v5890_v5  ;;  %7115 = vmatprep.subr.bf16.mxu0 %v6805_v32  ;;  %v8264_v32 = vld [vmem:[%s12231_s16 + $0x10] sm:$0xff]  }
0x1464   : > { %7595 = vmatprep.mubr.msk.bf16.mxu1 %vm8398_vm3, %v8397_v4  ;;  %7580 = vmatpush3.bf16.msra.mxu1 %v8254_v41 }
0x1465   : > { %7581 = vmatprep.subr.bf16.mxu1 %v8397_v4 }
0x1466   : > { %7116 = vmatpush3.bf16.msra.mxu0 %v6797_v30  ;;  %v8267_v30 = vld [vmem:[%s12231_s16 + $0x28] sm:$0xff]  }
0x1467   : > { %7117 = vmatprep.subr.bf16.mxu0 %v6806_v29 }
0x1468   : > { %7582 = vmatpush3.bf16.msra.mxu1 %v8255_v8 }
0x1469   : > { %7583 = vmatprep.subr.bf16.mxu1 %v8397_v4 }
0x146a   : > { %7118 = vmatpush3.bf16.msra.mxu0 %v6798_v27  ;;  %v12232_v27 = vld [vmem:[#allocation123_spill] sm:$0xff] }
0x146b   : > { %7599 = vmatprep.subr.bf16.mxu0 %v8397_v4 }
0x146c   : > { %7584 = vmatpush3.bf16.msra.mxu1 %v8256_v35 }
0x146d   : > { %7585 = vmatprep.subr.bf16.mxu1 %v8397_v4 }
0x1470   : > { %7586 = vmatpush3.bf16.msra.mxu1 %v8257_v51 }
0x1471   : > { %7587 = vmatprep.subr.bf16.mxu1 %v8397_v4 }
0x1474   : > { %7588 = vmatpush3.bf16.msra.mxu1 %v8258_v49 }
0x1475   : > { %7589 = vmatprep.subr.bf16.mxu1 %v8397_v4 }
0x1478   : > { %7590 = vmatpush3.bf16.msra.mxu1 %v8259_v55 }
0x1479   : > { %7591 = vmatprep.subr.bf16.mxu1 %v8397_v4 }
0x147c   : > { %7592 = vmatpush3.bf16.msra.mxu1 %v8260_v60 }
0x147d   : > { %7593 = vmatprep.subr.bf16.mxu1 %v8397_v4 }
0x1480   : > { %7594 = vmatpush3.bf16.msra.mxu1 %v8261_v34 }
0x1536   : > { %v6016_v14 = vpop.f32.mrb[40].mxu1 }
0x1537   : > { %v6017_v53 = vadd.f32 %v6016_v14, %v5975_v59  ;;  %v6018_v43 = vpop.f32.mrb[41].mxu1  ;;  %v12233_v59 = vld [vmem:[#allocation124_spill] sm:$0xff] }
0x1538   : > { %v6019_v61 = vadd.f32 %v6018_v43, %v5979_v13  ;;  %v6020_v7 = vpop.f32.mrb[42].mxu1  ;;  %v8269_v43 = vld [vmem:[%s12231_s16 + $0x38] sm:$0xff]  }
0x1539   : > { %v6023_v40 = vmul.f32 %v6017_v53, %v6017_v53  ;;  %v6021_v26 = vpop.f32.mrb[43].mxu1 }
0x153a   : > { %v6024_v5 = vmul.f32 %v6019_v61, %v6019_v61 }
0x153b   : > { %v6025_v45 = vmul.f32 %v6023_v40, %v6017_v53 }
0x153c   : > { %v6026_v21 = vmul.f32 %v6024_v5, %v6019_v61 }
0x153d   : > { %v6027_v47 = vmul.f32 0.044715, %v6025_v45 }
0x153e   : > { %v6028_v54 = vmul.f32 0.044715, %v6026_v21 }
0x153f   : > { %v6029_v63 = vadd.f32 %v6027_v47, %v6017_v53 }
0x1540   : > { %v6030_v39 = vadd.f32 %v6028_v54, %v6019_v61 }
0x1541   : > { %v6031_v38 = vmul.f32 0.7978846, %v6029_v63 }
0x1542   : > { %v6032_v16 = vmul.f32 0.7978846, %v6030_v39 }
0x1543   : > { %8288 = vtanh.f32 %v6031_v38 }
0x1544   : > { %8290 = vtanh.f32 %v6032_v16 }
0x154d   : > { %v8289_v12 = vpop.eup %8288 }
0x154e   : > { %v8291_v11 = vpop.eup %8290  ;;  %v6035_v58 = vadd.f32 1.0, %v8289_v12 }
0x154f   : > { %v6036_v25 = vadd.f32 1.0, %v8291_v11 }
0x1550   : > { %v6037_v6 = vmul.f32 0.5, %v6035_v58 }
0x1551   : > { %v6038_v22 = vmul.f32 0.5, %v6036_v25 }
0x1552   : > { %v6039_v18 = vmul.f32 %v6037_v6, %v6017_v53  ;;  %v8268_v53 = vld [vmem:[%s12231_s16 + $0x30] sm:$0xff]  }
0x1553   : > { %v6040_v9 = vmul.f32 %v6038_v22, %v6019_v61  ;;  %v6212_v61 = vld [vmem:[%s12234_s19] sm:$0x1] }
0x1554   : > { %v6041_v15 = vpack.c.bf16 %v6039_v18, %v6039_v18 }
0x1555   : > { %v6042_v50 = vpack.c.bf16 %v6040_v9, %v6040_v9 }
0x1557   : > { %6171 = vmatprep.mubr.bf16.mxu0 %v6042_v50 }
0x1558   : > { %6172 = vmatmul.mubr.bf16.vlgmr.msra.gmra.mrb[44].mxu0 %v6041_v15 }
0x1559   : > { %7615 = vmatprep.mubr.msk.bf16.mxu0 %vm8398_vm3, %v8397_v4  ;;  %7600 = vmatpush3.bf16.msra.mxu0 %v8262_v31 }
0x155a   : > { %7601 = vmatprep.subr.bf16.mxu0 %v8397_v4 }
0x155d   : > { %7602 = vmatpush3.bf16.msra.mxu0 %v8263_v28 }
0x155e   : > { %7603 = vmatprep.subr.bf16.mxu0 %v8397_v4 }
0x1561   : > { %7604 = vmatpush3.bf16.msra.mxu0 %v8264_v32 }
0x1562   : > { %7605 = vmatprep.subr.bf16.mxu0 %v8397_v4 }
0x1565   : > { %7606 = vmatpush3.bf16.msra.mxu0 %v8265_v3 }
0x1566   : > { %7607 = vmatprep.subr.bf16.mxu0 %v8397_v4 }
0x1569   : > { %7608 = vmatpush3.bf16.msra.mxu0 %v8266_v48 }
0x156a   : > { %7609 = vmatprep.subr.bf16.mxu0 %v8397_v4 }
0x156d   : > { %7610 = vmatpush3.bf16.msra.mxu0 %v8267_v30 }
0x156e   : > { %7611 = vmatprep.subr.bf16.mxu0 %v8397_v4 }
0x1571   : > { %7612 = vmatpush3.bf16.msra.mxu0 %v8268_v53 }
0x1572   : > { %7613 = vmatprep.subr.bf16.mxu0 %v8397_v4  ;;  %v6319_v4 = vld [vmem:[%s12235_s1] sm:$0x1] }
0x1575   : > { %7614 = vmatpush3.bf16.msra.mxu0 %v8269_v43 }
0x162b   : > { %v7119_v19 = vpop.f32.mrb[44].mxu0 }
0x162c   : > { %v7120_v46 = vpop.f32.mrb[45].mxu0 }
0x162d   : > { %v7121_v56 = vadd.f32 %v7120_v46, %v7119_v19  ;;  %v7122_v2 = vpop.f32.mrb[46].mxu0 }
0x162e   : > { %v7123_v62 = vpop.f32.mrb[47].mxu0 }
0x162f   : > { %v6174_v24 = vadd.f32 %v7121_v56, %v12229_v44 }
0x1631   : > { %v6179_v1 = vadd.f32 %v6174_v24, %v11443_v42 }
0x1633   : > { %v6180_v10 = vsel %vm5342_vm5, %v6179_v1, 0.0 }
0x1634   : > { %6181 = vadd.xlane.f32.xlu0 %v6180_v10 }
0x16c1   : > { %v6182_v57 = vpop.xlane.xlu0 %6181 }
0x16c2   : > { %v6183_v20 = vmul.f32 0.0078125, %v6182_v57 }
0x16c4   : > { %v6184_v42 = vsub.f32 %v6179_v1, %v6183_v20 }
0x16c6   : > { %v6185_v52 = vmul.f32 %v6184_v42, %v6184_v42 }
0x16c8   : > { %v6186_v36 = vsel %vm5342_vm5, %v6185_v52, 0.0 }
0x16c9   : > { %6187 = vadd.xlane.f32.xlu1 %v6186_v36 }
0x1756   : > { %v6188_v0 = vpop.xlane.xlu1 %6187 }
0x1757   : > { %v6189_v23 = vmul.f32 0.0078125, %v6188_v0 }
0x1759   : > { %v6190_v29 = vadd.f32 1e-12, %v6189_v23 }
0x175b   : > { %8292 = vrsqrt.f32 %v6190_v29 }
0x1765   : > { %v8293_v37 = vpop.eup %8292 }
0x1766   : > { %v6192_v33 = vmul.f32 %v8293_v37, %v6184_v42 }
0x1768   : > { %v6193_v17 = vmul.f32 %v6192_v33, %v12232_v27 }
0x176a   : > { %v6194_v13 = vadd.f32 %v6193_v17, %v12233_v59 }
0x176c   : > { %v6195_v14 = vpack.c.bf16 %v6194_v13, %v6194_v13 }
0x176e   : > { %7596 = vmatmul.mubr.bf16.vlgmr.msra.gmra.mrb[44].mxu1 %v6195_v14 }
0x1841   : > { %v6295_v7 = vpop.f32.mrb[44].mxu1 }
0x1842   : > { %v6296_v40 = vadd.f32 %v6295_v7, %v6212_v61  ;;  %v7597_v26 = vpop.f32.mrb[45].mxu1 }
0x1843   : > { %v6298_v5 = vpop.f32.mrb[46].mxu1 }
0x1844   : > { %v6301_v45 = vmax.f32 %v6296_v40, 0.0  ;;  %v7598_v21 = vpop.f32.mrb[47].mxu1 }
0x1846   : > { %v6302_v47 = vpack.c.bf16 %v6301_v45, %v6301_v45 }
0x1848   : > { %7616 = vmatmul.mubr.bf16.vlgmr.msra.gmra.mrb[48].mxu0 %v6302_v47 }
0x191b   : > { %v6402_v54 = vpop.f32.mrb[48].mxu0 }
0x191c   : > { %v6403_v63 = vadd.f32 %v6402_v54, %v6319_v4  ;;  %v7617_v39 = vpop.f32.mrb[49].mxu0 }
0x191d   : > { %v6405_v38 = vpop.f32.mrb[50].mxu0 }
0x191e   : > { %6408 = vst [vmem:[%s8656_s2] sm:$0x1] %v6403_v63  ;;  %v7618_v16 = vpop.f32.mrb[51].mxu0 }
0x191f PF: > { %s12236_s5 = sld [smem:[#allocation9_spill]]  ;;  %s12238_s18 = sld [smem:[#allocation177_spill]] }
0x1920   : > { %s6422_s23 = sshll.u32 %s8656_s2, 4  ;;  %s12239_s21 = sand.u32 1, %s8365_s22   ;;  %s6423_s23 = int_to_ptr.vmem [resolvable:$true] %s6422_s23 }
0x1921   : > { %s6410_s29 = scalar_lea.sflag [#allocation4], %s12239_s21  ;;  %s8295_s30 = scalar_lea.vmem %s6423_s23, 16 }
0x1922   : > { %p8296_p4 = scmp.ne.s32.totalorder %s6423_s23, %s8295_s30  ;;  %s8401_s4 = smov [#allocation3]  }
0x1923   : > { %s8299_s25 = sshll.u32 %s8401_s4, 4  ;;  %s8300_s25 = int_to_ptr.vmem [resolvable:$false] %s8299_s25 }
0x1924   : > { %p8297_p5 = pnand %p8296_p4, %p8556_p3  ;;  %s8301_s10 = scalar_lea.vmem %s8300_s25, 32 }
0x1925   : > { %s6823_s24 = sshll.u32 %s12236_s5, 4  ;;  %p8302_p7 = scmp.lt.s32.totalorder %s6423_s23, %s8300_s25 }
0x1926   : > { %s11569_s28 = scalar_lea.hbm %s12238_s18, %s6823_s24  ;;  %p8298_p6 = pneg %p8297_p5 }
0x1927   : > { %p8303_p8 = scmp.lt.s32.totalorder %s8301_s10, %s8295_s30 }
0x1929   : > { %p8304_p10 = por %p8303_p8, %p8302_p7 }
0x192b   : > { %p8305_p11 = pnand %p8304_p10, %p8298_p6 }
0x192d   : > { %8308 = shalt.err (!%p8305_p11)
}
0x192e   : > { %s8309_s2 = scalar_lea.hbm %s11569_s28, 16  ;;  %s8313_s6 = scalar_lea.hbm %s12238_s18, 32 }
0x192f   : > { %p8310_p12 = scmp.ne.s32.totalorder %s11569_s28, %s8309_s2  ;;  %p8314_p1 = scmp.lt.u32.totalorder %s11569_s28, %s12238_s18 }
0x1930   : > { %p8315_p2 = scmp.lt.u32.totalorder %s8313_s6, %s8309_s2  ;;  %p8317_p5 = scmp.lt.u32.totalorder %s8309_s2, %s11569_s28 }
0x1931   : > { %p8311_p13 = pnand %p8310_p12, %p8556_p3 }
0x1932   : > { %p8316_p4 = por %p8315_p2, %p8314_p1 }
0x1933   : > { %p8312_p0 = pneg %p8311_p13 }
0x1934   : > { %p8318_p6 = por %p8317_p5, %p8316_p4 }
0x1936   : > { %p8319_p7 = pnand %p8318_p6, %p8312_p0 }
0x1938   : > { %8322 = shalt.err (!%p8319_p7)
}
0x1939   : > { %7621 = dma.vmem_to_hbm [thread:$0]  (%p8556_p3), %s6423_s23, 16, %s11569_s28, %s6410_s29  }
0x193a PF: > { %s12240_s5 = sld [smem:[#allocation12_spill]]  ;;  %s12241_s24 = sld [smem:[#allocation6_spill]] }
0x1940   : > { %p7627_p8 = scmp.ge.s32.totalorder %s12240_s5, 2  ;;  %s6434_s26 = sand.u32 1, %s12241_s24  }
0x1941   : > { %s6435_s21 = scalar_lea.sflag [#allocation4], %s6434_s26 }
0x1942   : > { %p7624_p10 = pnand %p7627_p8, %p8566_p9 }
0x1944   : > { %8356 = dma.done.wait (!%p7624_p10), %s6435_s21, 16  }
0x1945   : > { %8358 = vsyncadd (!%p7624_p10), %s6435_s21, 4294967280  ;;  %s33_s26 = sadd.s32 1, %s12240_s5   ;;  %s12243_s30 = sld [smem:[#allocation7_spill]] }
0x1946   : > { %p30_p11 = scmp.ge.s32.totalorder %s33_s26, 6   ;;  %s12244_s23 = sld [smem:[#allocation17_spill]] }
0x1947   : > { %s12245_s24 = sld [smem:[#allocation10_spill]]  ;;  %s12246_s2 = sld [smem:[#allocation11_spill]] }
0x1948   : > { %s12247_s25 = sld [smem:[#allocation13_spill]]  ;;  %s12248_s3 = sld [smem:[#allocation15_spill]] }
0x1949   : > { %s12249_s1 = smov %s8365_s22  ;;  %32 = sbr.rel (!%p30_p11) target bundleno = 19 (0x13), region = 186 }
0x194b   : > { %s12250_s22 = smov %s12243_s30 }
0x1950   :  { %6439 = vsyncpa [#allocation4], 1 }
0x1951   :  { %6441 = vsyncpa [#allocation4 + $0x1], 1 }

</bundles_post_ra>
